<compile_context>
chip_gen: v7x
topology: tpu7x:2x2x1
jax: 0.10.0
libtpu: 0.0.40
codegen_flags: <defaults>
</compile_context>

<pallas_src>
import math

import jax
import jax.numpy as jnp
from jax.experimental import pallas as pl
from jax.experimental.pallas import tpu as pltpu


# --------------------------------------------------------------------------
# Fused XConvBlock kernel (channel-major: rows = channels, lanes = (t, b, f))
# --------------------------------------------------------------------------
def _full_spec(shape):
    return pl.BlockSpec(shape, lambda i: (0,) * len(shape))


def _make_xconv_kernel(B, To, Fo, C, H):
    M = To * B * Fo          # lanes of the big tensors, ordered (t, b, f)
    TB = To * B              # GRU / FDTA columns, ordered (t, b)
    inv_m = 1.0 / float(M)
    inv_f = 1.0 / float(Fo)

    def kernel(pt_ref, wc_ref, pp_ref, gw_ref, fw_ref, o_ref):
        f32 = jnp.float32

        # ---- unpack packed per-channel parameter columns (C, 10) ----------
        pp = pp_ref[...]
        bc, bnw, bnb = pp[:, 0:1], pp[:, 1:2], pp[:, 2:3]
        gam, bet, alp = pp[:, 3:4], pp[:, 4:5], pp[:, 5:6]
        bfc, b1, b2 = pp[:, 6:7], pp[:, 7:8], pp[:, 8:9]
        prelu = pp[:, 9:10]

        # ---- Conv2d as a single matmul: (C, K) @ (K, M) + bias -------------
        y = jnp.dot(wc_ref[...], pt_ref[...], preferred_element_type=f32) + bc

        # ---- BatchNorm2d (training-mode batch stats, biased var, eps=1e-5) -
        mean = jnp.sum(y, axis=1, keepdims=True) * inv_m
        yc = y - mean
        var = jnp.sum(yc * yc, axis=1, keepdims=True) * inv_m
        ybn = yc * jax.lax.rsqrt(var + 1e-5) * bnw + bnb

        # ---- APReLU: gamma*x + beta + relu(x) + alpha*relu(-x) --------------
        yact = (gam * ybn + bet
                + jnp.maximum(ybn, 0.0) + alp * jnp.maximum(-ybn, 0.0))

        # ---- TRA: zt = mean over frequency of yact^2 -> (C, TB) -------------
        # Frequency reduction as an MXU matmul with an iota-built selection
        # matrix (folds the 1/Fo scale), avoiding lane-splitting reshapes.
        m_i = jax.lax.broadcasted_iota(jnp.int32, (M, TB), 0)
        tb_i = jax.lax.broadcasted_iota(jnp.int32, (M, TB), 1)
        d = m_i - tb_i * Fo
        S = jnp.where((d >= 0) & (d < Fo), inv_f, 0.0).astype(f32)   # (M, TB)
        zt = jnp.dot(yact * yact, S, preferred_element_type=f32)     # (C, TB)

        # ---- GRU (PyTorch gate order r,z,n), fully unrolled, h in vregs -----
        gw = gw_ref[...]
        wih = gw[:, :C]
        whh = gw[:, C:C + H]
        bih = gw[:, C + H:C + H + 1]
        bhh = gw[:, C + H + 1:C + H + 2]
        GX = jnp.dot(wih, zt, preferred_element_type=f32) + bih      # (3H, TB)

        # E_t places the (H, B) step output at columns [t*B, (t+1)*B).
        col_e = jax.lax.broadcasted_iota(jnp.int32, (B, TB), 1)
        row_e = jax.lax.broadcasted_iota(jnp.int32, (B, TB), 0)
        d_e = col_e - row_e                                           # (B, TB)

        h = jnp.zeros((H, B), f32)
        hseq = jnp.zeros((H, TB), f32)
        for t in range(To):
            gxt = GX[:, t * B:(t + 1) * B]                            # (3H, B)
            gh = jnp.dot(whh, h, preferred_element_type=f32) + bhh    # (3H, B)
            r = jax.nn.sigmoid(gxt[:H] + gh[:H])
            z = jax.nn.sigmoid(gxt[H:2 * H] + gh[H:2 * H])
            n = jnp.tanh(gxt[2 * H:] + r * gh[2 * H:])
            h = (1.0 - z) * n + z * h                                 # (H, B)
            e_t = (d_e == t * B).astype(f32)                          # (B, TB)
            hseq = hseq + jnp.dot(h, e_t, preferred_element_type=f32)

        # ---- att_fc + sigmoid -> At (C, TB) ---------------------------------
        fw = fw_ref[...]
        wfc = fw[:, :H]
        w1 = fw[:, H:H + 3 * C]
        w2 = fw[:, H + 3 * C:H + 6 * C]
        At = jax.nn.sigmoid(
            jnp.dot(wfc, hseq, preferred_element_type=f32) + bfc)

        # ---- FDTA: (3,1) conv -> PReLU -> (3,1) conv -> sigmoid -------------
        # Time shift by +-1 step (= +-B columns, zero padded) via iota-built
        # shift matrices; each conv then fuses into ONE matmul.
        i_r = jax.lax.broadcasted_iota(jnp.int32, (TB, TB), 0)
        j_r = jax.lax.broadcasted_iota(jnp.int32, (TB, TB), 1)
        dr = i_r - j_r
        Rp = (dr == -B).astype(f32)        # prv[:, j] = x[:, j - B]
        Rn = (dr == B).astype(f32)         # nxt[:, j] = x[:, j + B]

        prv = jnp.dot(At, Rp, preferred_element_type=f32)
        nxt = jnp.dot(At, Rn, preferred_element_type=f32)
        x1 = jnp.concatenate([prv, At, nxt], axis=0)                  # (3C, TB)
        v = jnp.dot(w1, x1, preferred_element_type=f32) + b1
        v = jnp.maximum(v, 0.0) + prelu * jnp.minimum(v, 0.0)         # PReLU

        prv2 = jnp.dot(v, Rp, preferred_element_type=f32)
        nxt2 = jnp.dot(v, Rn, preferred_element_type=f32)
        x2 = jnp.concatenate([prv2, v, nxt2], axis=0)                 # (3C, TB)
        v2 = jnp.dot(w2, x2, preferred_element_type=f32) + b2
        gate = At * jax.nn.sigmoid(v2)                                # (C, TB)

        # ---- broadcast gate over frequency (selection matmul) and apply -----
        tb_j = jax.lax.broadcasted_iota(jnp.int32, (TB, M), 0)
        m_j = jax.lax.broadcasted_iota(jnp.int32, (TB, M), 1)
        d2 = m_j - tb_j * Fo
        S2 = jnp.where((d2 >= 0) & (d2 < Fo), 1.0, 0.0).astype(f32)   # (TB, M)
        o_ref[...] = yact * jnp.dot(gate, S2, preferred_element_type=f32)

    return kernel


# --------------------------------------------------------------------------
# Host wrapper: im2col glue + one fused pallas_call + tiny NCHW relayout
# --------------------------------------------------------------------------
def xconv_block_forward(x, p, kernel_size, stride, padding):
    B, Cin, T, F = map(int, x.shape)
    kh, kw = kernel_size
    sh, sw = stride
    ph, pw = padding
    C = int(p['conv']['w'].shape[0])
    H = 2 * C
    K = Cin * kh * kw

    To = (T + 2 * ph - kh) // sh + 1
    Fo = (F + 2 * pw - kw) // sw + 1
    M = To * B * Fo

    # im2col, transposed for the kernel: rows = (cin, kh, kw) features,
    # lanes = (t, b, f).  (K, M) is lane-dense (512 lanes) and only ~80 KB.
    xp = jnp.pad(x, ((0, 0), (0, 0), (ph, ph), (pw, pw)))
    cols = []
    for i in range(kh):
        for j in range(kw):
            cols.append(xp[:, :, i:i + sh * To:sh, j:j + sw * Fo:sw])
    patches = jnp.stack(cols, axis=-1)               # (B, Cin, To, Fo, kh*kw)
    patches_t = patches.transpose(1, 4, 2, 0, 3).reshape(K, M)

    # Static weight repacking (tiny, once per call).
    wc = p['conv']['w'].reshape(C, K)                              # (C, K)
    prelu_c = jnp.broadcast_to(jnp.ravel(p['prelu'])[0], (C,))
    pp = jnp.stack([p['conv']['b'], p['bn']['w'], p['bn']['b'],
                    p['act']['gamma'], p['act']['beta'], p['act']['alpha'],
                    p['fc']['b'], p['c1']['b'], p['c2']['b'], prelu_c],
                   axis=1)                                         # (C, 10)
    gw = jnp.concatenate([p['gru']['w_ih'], p['gru']['w_hh'],
                          p['gru']['b_ih'][:, None],
                          p['gru']['b_hh'][:, None]], axis=1)      # (3H, C+H+2)
    w1 = jnp.transpose(p['c1']['w'][:, :, :, 0], (0, 2, 1)).reshape(C, 3 * C)
    w2 = jnp.transpose(p['c2']['w'][:, :, :, 0], (0, 2, 1)).reshape(C, 3 * C)
    fw = jnp.concatenate([p['fc']['w'], w1, w2], axis=1)           # (C, H+6C)

    kernel = _make_xconv_kernel(B, To, Fo, C, H)
    out_cm = pl.pallas_call(
        kernel,
        out_shape=jax.ShapeDtypeStruct((C, M), jnp.float32),
        grid=(1,),
        in_specs=[
            _full_spec((K, M)),
            _full_spec((C, K)),
            _full_spec((C, 10)),
            _full_spec((3 * H, C + H + 2)),
            _full_spec((C, H + 6 * C)),
        ],
        out_specs=_full_spec((C, M)),
        compiler_params=pltpu.CompilerParams(
            dimension_semantics=("arbitrary",)),
    )(patches_t, wc, pp, gw, fw)

    # rows = c, lanes = (t, b, f)  ->  NCHW  (tiny, 32 KB)
    return out_cm.reshape(C, To, B, Fo).transpose(2, 0, 1, 3)


# --------------------------------------------------------------------------
# Deterministic parameter initialisation (PyTorch-default style)
# --------------------------------------------------------------------------
def _uniform(key, shape, fan_in):
    bound = 1.0 / math.sqrt(fan_in)
    return jax.random.uniform(key, shape, jnp.float32, -bound, bound)


def init_xconv_block(key, in_channels, out_channels, kernel_size):
    kh, kw = kernel_size
    C, H = out_channels, 2 * out_channels
    ks = jax.random.split(key, 12)
    fan_conv = in_channels * kh * kw
    fan_fdta = C * 3
    return dict(
        conv=dict(w=_uniform(ks[0], (C, in_channels, kh, kw), fan_conv),
                  b=_uniform(ks[1], (C,), fan_conv)),
        bn=dict(w=jnp.ones((C,), jnp.float32), b=jnp.zeros((C,), jnp.float32)),
        act=dict(gamma=jnp.ones((C,), jnp.float32),
                 beta=jnp.zeros((C,), jnp.float32),
                 alpha=jnp.full((C,), 0.25, jnp.float32)),
        gru=dict(w_ih=_uniform(ks[2], (3 * H, C), H),
                 w_hh=_uniform(ks[3], (3 * H, H), H),
                 b_ih=_uniform(ks[4], (3 * H,), H),
                 b_hh=_uniform(ks[5], (3 * H,), H)),
        fc=dict(w=_uniform(ks[6], (C, H), H),
                b=_uniform(ks[7], (C,), H)),
        c1=dict(w=_uniform(ks[8], (C, C, 3, 1), fan_fdta),
                b=_uniform(ks[9], (C,), fan_fdta)),
        prelu=jnp.full((1, 1), 0.25, jnp.float32),
        c2=dict(w=_uniform(ks[10], (C, C, 3, 1), fan_fdta),
                b=_uniform(ks[11], (C,), fan_fdta)),
    )


# --------------------------------------------------------------------------
if __name__ == "__main__":
    key = jax.random.PRNGKey(0)
    kx, kp = jax.random.split(key)

    # XConvBlock(in_channels=4, out_channels=16, kernel_size=(3,3),
    #            stride=(1,2), padding=(1,1)) on x: (B=2, 4, T=16, F=32)
    B, Cin, T, F = 2, 4, 16, 32
    Cout = 16
    ksz, stride, padding = (3, 3), (1, 2), (1, 1)

    x = jax.random.normal(kx, (B, Cin, T, F), jnp.float32)
    params = init_xconv_block(kp, Cin, Cout, ksz)

    fwd = jax.jit(lambda xx, pp: xconv_block_forward(xx, pp, ksz, stride, padding))
    out = fwd(x, params)
    jax.block_until_ready(out)

    To = (T + 2 * padding[0] - ksz[0]) // stride[0] + 1
    Fo = (F + 2 * padding[1] - ksz[1]) // stride[1] + 1
    assert out.shape == (B, Cout, To, Fo), out.shape
    assert bool(jnp.all(jnp.isfinite(out)))
    print("KERNEL_OK")
</pallas_src>

<mosaic_0001>
module attributes {stable_mosaic.version = 11 : i64} {
  func.func @kernel(%arg0: i32, %arg1: memref<36x512xf32, #tpu.memory_space<vmem>>, %arg2: memref<16x36xf32, #tpu.memory_space<vmem>>, %arg3: memref<16x10xf32, #tpu.memory_space<vmem>>, %arg4: memref<96x50xf32, #tpu.memory_space<vmem>>, %arg5: memref<16x128xf32, #tpu.memory_space<vmem>>, %arg6: memref<16x512xf32, #tpu.memory_space<vmem>>) attributes {dimension_semantics = [#tpu.dimension_semantics<arbitrary>], iteration_bounds = array<i64: 1>, scalar_prefetch = 0 : i64, scratch_operands = 0 : i64, tpu.core_type = #tpu.core_type<tc>, window_params = [{pipeline_mode = #tpu.pipeline_mode<synchronous>, transform_indices = @transform_0, window_bounds = array<i64: 36, 512>}, {pipeline_mode = #tpu.pipeline_mode<synchronous>, transform_indices = @transform_1, window_bounds = array<i64: 16, 36>}, {pipeline_mode = #tpu.pipeline_mode<synchronous>, transform_indices = @transform_2, window_bounds = array<i64: 16, 10>}, {pipeline_mode = #tpu.pipeline_mode<synchronous>, transform_indices = @transform_3, window_bounds = array<i64: 96, 50>}, {pipeline_mode = #tpu.pipeline_mode<synchronous>, transform_indices = @transform_4, window_bounds = array<i64: 16, 128>}, {pipeline_mode = #tpu.pipeline_mode<synchronous>, transform_indices = @transform_5, window_bounds = array<i64: 16, 512>}]} {
    %c0 = arith.constant 0 : index
    %c0_0 = arith.constant 0 : index
    %0 = vector.load %arg3[%c0, %c0_0] : memref<16x10xf32, #tpu.memory_space<vmem>>, vector<16x10xf32>
    %1 = vector.extract_strided_slice %0 {offsets = [0, 0], sizes = [16, 1], strides = [1, 1]} : vector<16x10xf32> to vector<16x1xf32>
    %2 = vector.extract_strided_slice %0 {offsets = [0, 1], sizes = [16, 1], strides = [1, 1]} : vector<16x10xf32> to vector<16x1xf32>
    %3 = vector.extract_strided_slice %0 {offsets = [0, 2], sizes = [16, 1], strides = [1, 1]} : vector<16x10xf32> to vector<16x1xf32>
    %4 = vector.extract_strided_slice %0 {offsets = [0, 3], sizes = [16, 1], strides = [1, 1]} : vector<16x10xf32> to vector<16x1xf32>
    %5 = vector.extract_strided_slice %0 {offsets = [0, 4], sizes = [16, 1], strides = [1, 1]} : vector<16x10xf32> to vector<16x1xf32>
    %6 = vector.extract_strided_slice %0 {offsets = [0, 5], sizes = [16, 1], strides = [1, 1]} : vector<16x10xf32> to vector<16x1xf32>
    %7 = vector.extract_strided_slice %0 {offsets = [0, 6], sizes = [16, 1], strides = [1, 1]} : vector<16x10xf32> to vector<16x1xf32>
    %8 = vector.extract_strided_slice %0 {offsets = [0, 7], sizes = [16, 1], strides = [1, 1]} : vector<16x10xf32> to vector<16x1xf32>
    %9 = vector.extract_strided_slice %0 {offsets = [0, 8], sizes = [16, 1], strides = [1, 1]} : vector<16x10xf32> to vector<16x1xf32>
    %10 = vector.extract_strided_slice %0 {offsets = [0, 9], sizes = [16, 1], strides = [1, 1]} : vector<16x10xf32> to vector<16x1xf32>
    %c0_1 = arith.constant 0 : index
    %c0_2 = arith.constant 0 : index
    %11 = vector.load %arg2[%c0_1, %c0_2] : memref<16x36xf32, #tpu.memory_space<vmem>>, vector<16x36xf32>
    %c0_3 = arith.constant 0 : index
    %c0_4 = arith.constant 0 : index
    %12 = vector.load %arg1[%c0_3, %c0_4] : memref<36x512xf32, #tpu.memory_space<vmem>>, vector<36x512xf32>
    %cst = arith.constant dense<0.000000e+00> : vector<16x512xf32>
    %13 = tpu.matmul %11, %12, %cst {dimension_numbers = #tpu.dot_dimension_numbers<[1], [0], [0], [1], [0, 0, 1, 1], [], []>} : vector<16x36xf32>, vector<36x512xf32>, vector<16x512xf32> -> vector<16x512xf32>
    %14 = vector.broadcast %1 : vector<16x1xf32> to vector<16x512xf32>
    %15 = arith.addf %13, %14 : vector<16x512xf32>
    %cst_5 = arith.constant dense<0.000000e+00> : vector<16xf32>
    %16 = vector.multi_reduction <add>, %15, %cst_5 [1] : vector<16x512xf32> to vector<16xf32>
    %17 = vector.shape_cast %16 : vector<16xf32> to vector<16x1xf32>
    %cst_6 = arith.constant 0.001953125 : f32
    %18 = vector.broadcast %cst_6 : f32 to vector<16x1xf32>
    %19 = arith.mulf %17, %18 : vector<16x1xf32>
    %20 = vector.broadcast %19 : vector<16x1xf32> to vector<16x512xf32>
    %21 = arith.subf %15, %20 : vector<16x512xf32>
    %22 = arith.mulf %21, %21 : vector<16x512xf32>
    %cst_7 = arith.constant dense<0.000000e+00> : vector<16xf32>
    %23 = vector.multi_reduction <add>, %22, %cst_7 [1] : vector<16x512xf32> to vector<16xf32>
    %24 = vector.shape_cast %23 : vector<16xf32> to vector<16x1xf32>
    %cst_8 = arith.constant 0.001953125 : f32
    %25 = vector.broadcast %cst_8 : f32 to vector<16x1xf32>
    %26 = arith.mulf %24, %25 : vector<16x1xf32>
    %cst_9 = arith.constant 9.99999974E-6 : f32
    %27 = vector.broadcast %cst_9 : f32 to vector<16x1xf32>
    %28 = arith.addf %26, %27 : vector<16x1xf32>
    %29 = math.rsqrt %28 : vector<16x1xf32>
    %30 = vector.broadcast %29 : vector<16x1xf32> to vector<16x512xf32>
    %31 = arith.mulf %21, %30 : vector<16x512xf32>
    %32 = vector.broadcast %2 : vector<16x1xf32> to vector<16x512xf32>
    %33 = arith.mulf %31, %32 : vector<16x512xf32>
    %34 = vector.broadcast %3 : vector<16x1xf32> to vector<16x512xf32>
    %35 = arith.addf %33, %34 : vector<16x512xf32>
    %36 = vector.broadcast %4 : vector<16x1xf32> to vector<16x512xf32>
    %37 = arith.mulf %36, %35 : vector<16x512xf32>
    %38 = vector.broadcast %5 : vector<16x1xf32> to vector<16x512xf32>
    %39 = arith.addf %37, %38 : vector<16x512xf32>
    %cst_10 = arith.constant 0.000000e+00 : f32
    %40 = vector.broadcast %cst_10 : f32 to vector<16x512xf32>
    %41 = arith.maximumf %35, %40 : vector<16x512xf32>
    %42 = arith.addf %39, %41 : vector<16x512xf32>
    %cst_11 = arith.constant 0.000000e+00 : f32
    %43 = vector.broadcast %cst_11 : f32 to vector<16x512xf32>
    %44 = arith.subf %43, %35 : vector<16x512xf32>
    %cst_12 = arith.constant 0.000000e+00 : f32
    %45 = vector.broadcast %cst_12 : f32 to vector<16x512xf32>
    %46 = arith.maximumf %44, %45 : vector<16x512xf32>
    %47 = vector.broadcast %6 : vector<16x1xf32> to vector<16x512xf32>
    %48 = arith.mulf %47, %46 : vector<16x512xf32>
    %49 = arith.addf %42, %48 : vector<16x512xf32>
    %50 = tpu.iota {dimensions = array<i32: 0>} : vector<512x32xi32>
    %51 = tpu.iota {dimensions = array<i32: 1>} : vector<512x32xi32>
    %c16_i32 = arith.constant 16 : i32
    %52 = vector.broadcast %c16_i32 : i32 to vector<512x32xi32>
    %53 = arith.muli %51, %52 : vector<512x32xi32>
    %54 = arith.subi %50, %53 : vector<512x32xi32>
    %c0_i32 = arith.constant 0 : i32
    %55 = vector.broadcast %c0_i32 : i32 to vector<512x32xi32>
    %56 = arith.cmpi sge, %54, %55 : vector<512x32xi32>
    %c16_i32_13 = arith.constant 16 : i32
    %57 = vector.broadcast %c16_i32_13 : i32 to vector<512x32xi32>
    %58 = arith.cmpi slt, %54, %57 : vector<512x32xi32>
    %59 = arith.andi %56, %58 : vector<512x32xi1>
    %cst_14 = arith.constant 6.250000e-02 : f32
    %cst_15 = arith.constant 0.000000e+00 : f32
    %60 = vector.broadcast %cst_14 : f32 to vector<512x32xf32>
    %61 = vector.broadcast %cst_15 : f32 to vector<512x32xf32>
    %62 = arith.select %59, %60, %61 : vector<512x32xi1>, vector<512x32xf32>
    %63 = arith.mulf %49, %49 : vector<16x512xf32>
    %cst_16 = arith.constant dense<0.000000e+00> : vector<16x32xf32>
    %64 = tpu.matmul %63, %62, %cst_16 {dimension_numbers = #tpu.dot_dimension_numbers<[1], [0], [0], [1], [0, 0, 1, 1], [], []>} : vector<16x512xf32>, vector<512x32xf32>, vector<16x32xf32> -> vector<16x32xf32>
    %c0_17 = arith.constant 0 : index
    %c0_18 = arith.constant 0 : index
    %65 = vector.load %arg4[%c0_17, %c0_18] : memref<96x50xf32, #tpu.memory_space<vmem>>, vector<96x50xf32>
    %66 = vector.extract_strided_slice %65 {offsets = [0, 0], sizes = [96, 16], strides = [1, 1]} : vector<96x50xf32> to vector<96x16xf32>
    %67 = vector.extract_strided_slice %65 {offsets = [0, 16], sizes = [96, 32], strides = [1, 1]} : vector<96x50xf32> to vector<96x32xf32>
    %68 = vector.extract_strided_slice %65 {offsets = [0, 48], sizes = [96, 1], strides = [1, 1]} : vector<96x50xf32> to vector<96x1xf32>
    %69 = vector.extract_strided_slice %65 {offsets = [0, 49], sizes = [96, 1], strides = [1, 1]} : vector<96x50xf32> to vector<96x1xf32>
    %cst_19 = arith.constant dense<0.000000e+00> : vector<96x32xf32>
    %70 = tpu.matmul %66, %64, %cst_19 {dimension_numbers = #tpu.dot_dimension_numbers<[1], [0], [0], [1], [0, 0, 1, 1], [], []>} : vector<96x16xf32>, vector<16x32xf32>, vector<96x32xf32> -> vector<96x32xf32>
    %71 = vector.broadcast %68 : vector<96x1xf32> to vector<96x32xf32>
    %72 = arith.addf %70, %71 : vector<96x32xf32>
    %73 = tpu.iota {dimensions = array<i32: 1>} : vector<2x32xi32>
    %74 = tpu.iota {dimensions = array<i32: 0>} : vector<2x32xi32>
    %75 = arith.subi %73, %74 : vector<2x32xi32>
    %cst_20 = arith.constant 0.000000e+00 : f32
    %76 = vector.broadcast %cst_20 : f32 to vector<32x2xf32>
    %cst_21 = arith.constant 0.000000e+00 : f32
    %77 = vector.broadcast %cst_21 : f32 to vector<32x32xf32>
    %78 = vector.extract_strided_slice %72 {offsets = [0, 0], sizes = [96, 2], strides = [1, 1]} : vector<96x32xf32> to vector<96x2xf32>
    %cst_22 = arith.constant dense<0.000000e+00> : vector<96x2xf32>
    %79 = tpu.matmul %67, %76, %cst_22 {dimension_numbers = #tpu.dot_dimension_numbers<[1], [0], [0], [1], [0, 0, 1, 1], [], []>} : vector<96x32xf32>, vector<32x2xf32>, vector<96x2xf32> -> vector<96x2xf32>
    %80 = vector.broadcast %69 : vector<96x1xf32> to vector<96x2xf32>
    %81 = arith.addf %79, %80 : vector<96x2xf32>
    %82 = vector.extract_strided_slice %78 {offsets = [0, 0], sizes = [32, 2], strides = [1, 1]} : vector<96x2xf32> to vector<32x2xf32>
    %83 = vector.extract_strided_slice %81 {offsets = [0, 0], sizes = [32, 2], strides = [1, 1]} : vector<96x2xf32> to vector<32x2xf32>
    %84 = arith.addf %82, %83 : vector<32x2xf32>
    %85 = arith.negf %84 : vector<32x2xf32>
    %86 = math.exp %85 : vector<32x2xf32>
    %cst_23 = arith.constant 1.000000e+00 : f32
    %87 = vector.broadcast %cst_23 : f32 to vector<32x2xf32>
    %88 = arith.addf %87, %86 : vector<32x2xf32>
    %89 = arith.divf %87, %88 : vector<32x2xf32>
    %90 = vector.extract_strided_slice %78 {offsets = [32, 0], sizes = [32, 2], strides = [1, 1]} : vector<96x2xf32> to vector<32x2xf32>
    %91 = vector.extract_strided_slice %81 {offsets = [32, 0], sizes = [32, 2], strides = [1, 1]} : vector<96x2xf32> to vector<32x2xf32>
    %92 = arith.addf %90, %91 : vector<32x2xf32>
    %93 = arith.negf %92 : vector<32x2xf32>
    %94 = math.exp %93 : vector<32x2xf32>
    %cst_24 = arith.constant 1.000000e+00 : f32
    %95 = vector.broadcast %cst_24 : f32 to vector<32x2xf32>
    %96 = arith.addf %95, %94 : vector<32x2xf32>
    %97 = arith.divf %95, %96 : vector<32x2xf32>
    %98 = vector.extract_strided_slice %78 {offsets = [64, 0], sizes = [32, 2], strides = [1, 1]} : vector<96x2xf32> to vector<32x2xf32>
    %99 = vector.extract_strided_slice %81 {offsets = [64, 0], sizes = [32, 2], strides = [1, 1]} : vector<96x2xf32> to vector<32x2xf32>
    %100 = arith.mulf %89, %99 : vector<32x2xf32>
    %101 = arith.addf %98, %100 : vector<32x2xf32>
    %102 = math.tanh %101 : vector<32x2xf32>
    %cst_25 = arith.constant 1.000000e+00 : f32
    %103 = vector.broadcast %cst_25 : f32 to vector<32x2xf32>
    %104 = arith.subf %103, %97 : vector<32x2xf32>
    %105 = arith.mulf %104, %102 : vector<32x2xf32>
    %106 = arith.mulf %97, %76 : vector<32x2xf32>
    %107 = arith.addf %105, %106 : vector<32x2xf32>
    %c0_i32_26 = arith.constant 0 : i32
    %108 = vector.broadcast %c0_i32_26 : i32 to vector<2x32xi32>
    %109 = arith.cmpi eq, %75, %108 : vector<2x32xi32>
    %110 = arith.extui %109 : vector<2x32xi1> to vector<2x32xi32>
    %111 = arith.sitofp %110 : vector<2x32xi32> to vector<2x32xf32>
    %cst_27 = arith.constant dense<0.000000e+00> : vector<32x32xf32>
    %112 = tpu.matmul %107, %111, %cst_27 {dimension_numbers = #tpu.dot_dimension_numbers<[1], [0], [0], [1], [0, 0, 1, 1], [], []>} : vector<32x2xf32>, vector<2x32xf32>, vector<32x32xf32> -> vector<32x32xf32>
    %113 = arith.addf %77, %112 : vector<32x32xf32>
    %114 = vector.extract_strided_slice %72 {offsets = [0, 2], sizes = [96, 2], strides = [1, 1]} : vector<96x32xf32> to vector<96x2xf32>
    %cst_28 = arith.constant dense<0.000000e+00> : vector<96x2xf32>
    %115 = tpu.matmul %67, %107, %cst_28 {dimension_numbers = #tpu.dot_dimension_numbers<[1], [0], [0], [1], [0, 0, 1, 1], [], []>} : vector<96x32xf32>, vector<32x2xf32>, vector<96x2xf32> -> vector<96x2xf32>
    %116 = vector.broadcast %69 : vector<96x1xf32> to vector<96x2xf32>
    %117 = arith.addf %115, %116 : vector<96x2xf32>
    %118 = vector.extract_strided_slice %114 {offsets = [0, 0], sizes = [32, 2], strides = [1, 1]} : vector<96x2xf32> to vector<32x2xf32>
    %119 = vector.extract_strided_slice %117 {offsets = [0, 0], sizes = [32, 2], strides = [1, 1]} : vector<96x2xf32> to vector<32x2xf32>
    %120 = arith.addf %118, %119 : vector<32x2xf32>
    %121 = arith.negf %120 : vector<32x2xf32>
    %122 = math.exp %121 : vector<32x2xf32>
    %cst_29 = arith.constant 1.000000e+00 : f32
    %123 = vector.broadcast %cst_29 : f32 to vector<32x2xf32>
    %124 = arith.addf %123, %122 : vector<32x2xf32>
    %125 = arith.divf %123, %124 : vector<32x2xf32>
    %126 = vector.extract_strided_slice %114 {offsets = [32, 0], sizes = [32, 2], strides = [1, 1]} : vector<96x2xf32> to vector<32x2xf32>
    %127 = vector.extract_strided_slice %117 {offsets = [32, 0], sizes = [32, 2], strides = [1, 1]} : vector<96x2xf32> to vector<32x2xf32>
    %128 = arith.addf %126, %127 : vector<32x2xf32>
    %129 = arith.negf %128 : vector<32x2xf32>
    %130 = math.exp %129 : vector<32x2xf32>
    %cst_30 = arith.constant 1.000000e+00 : f32
    %131 = vector.broadcast %cst_30 : f32 to vector<32x2xf32>
    %132 = arith.addf %131, %130 : vector<32x2xf32>
    %133 = arith.divf %131, %132 : vector<32x2xf32>
    %134 = vector.extract_strided_slice %114 {offsets = [64, 0], sizes = [32, 2], strides = [1, 1]} : vector<96x2xf32> to vector<32x2xf32>
    %135 = vector.extract_strided_slice %117 {offsets = [64, 0], sizes = [32, 2], strides = [1, 1]} : vector<96x2xf32> to vector<32x2xf32>
    %136 = arith.mulf %125, %135 : vector<32x2xf32>
    %137 = arith.addf %134, %136 : vector<32x2xf32>
    %138 = math.tanh %137 : vector<32x2xf32>
    %cst_31 = arith.constant 1.000000e+00 : f32
    %139 = vector.broadcast %cst_31 : f32 to vector<32x2xf32>
    %140 = arith.subf %139, %133 : vector<32x2xf32>
    %141 = arith.mulf %140, %138 : vector<32x2xf32>
    %142 = arith.mulf %133, %107 : vector<32x2xf32>
    %143 = arith.addf %141, %142 : vector<32x2xf32>
    %c2_i32 = arith.constant 2 : i32
    %144 = vector.broadcast %c2_i32 : i32 to vector<2x32xi32>
    %145 = arith.cmpi eq, %75, %144 : vector<2x32xi32>
    %146 = arith.extui %145 : vector<2x32xi1> to vector<2x32xi32>
    %147 = arith.sitofp %146 : vector<2x32xi32> to vector<2x32xf32>
    %cst_32 = arith.constant dense<0.000000e+00> : vector<32x32xf32>
    %148 = tpu.matmul %143, %147, %cst_32 {dimension_numbers = #tpu.dot_dimension_numbers<[1], [0], [0], [1], [0, 0, 1, 1], [], []>} : vector<32x2xf32>, vector<2x32xf32>, vector<32x32xf32> -> vector<32x32xf32>
    %149 = arith.addf %113, %148 : vector<32x32xf32>
    %150 = vector.extract_strided_slice %72 {offsets = [0, 4], sizes = [96, 2], strides = [1, 1]} : vector<96x32xf32> to vector<96x2xf32>
    %cst_33 = arith.constant dense<0.000000e+00> : vector<96x2xf32>
    %151 = tpu.matmul %67, %143, %cst_33 {dimension_numbers = #tpu.dot_dimension_numbers<[1], [0], [0], [1], [0, 0, 1, 1], [], []>} : vector<96x32xf32>, vector<32x2xf32>, vector<96x2xf32> -> vector<96x2xf32>
    %152 = vector.broadcast %69 : vector<96x1xf32> to vector<96x2xf32>
    %153 = arith.addf %151, %152 : vector<96x2xf32>
    %154 = vector.extract_strided_slice %150 {offsets = [0, 0], sizes = [32, 2], strides = [1, 1]} : vector<96x2xf32> to vector<32x2xf32>
    %155 = vector.extract_strided_slice %153 {offsets = [0, 0], sizes = [32, 2], strides = [1, 1]} : vector<96x2xf32> to vector<32x2xf32>
    %156 = arith.addf %154, %155 : vector<32x2xf32>
    %157 = arith.negf %156 : vector<32x2xf32>
    %158 = math.exp %157 : vector<32x2xf32>
    %cst_34 = arith.constant 1.000000e+00 : f32
    %159 = vector.broadcast %cst_34 : f32 to vector<32x2xf32>
    %160 = arith.addf %159, %158 : vector<32x2xf32>
    %161 = arith.divf %159, %160 : vector<32x2xf32>
    %162 = vector.extract_strided_slice %150 {offsets = [32, 0], sizes = [32, 2], strides = [1, 1]} : vector<96x2xf32> to vector<32x2xf32>
    %163 = vector.extract_strided_slice %153 {offsets = [32, 0], sizes = [32, 2], strides = [1, 1]} : vector<96x2xf32> to vector<32x2xf32>
    %164 = arith.addf %162, %163 : vector<32x2xf32>
    %165 = arith.negf %164 : vector<32x2xf32>
    %166 = math.exp %165 : vector<32x2xf32>
    %cst_35 = arith.constant 1.000000e+00 : f32
    %167 = vector.broadcast %cst_35 : f32 to vector<32x2xf32>
    %168 = arith.addf %167, %166 : vector<32x2xf32>
    %169 = arith.divf %167, %168 : vector<32x2xf32>
    %170 = vector.extract_strided_slice %150 {offsets = [64, 0], sizes = [32, 2], strides = [1, 1]} : vector<96x2xf32> to vector<32x2xf32>
    %171 = vector.extract_strided_slice %153 {offsets = [64, 0], sizes = [32, 2], strides = [1, 1]} : vector<96x2xf32> to vector<32x2xf32>
    %172 = arith.mulf %161, %171 : vector<32x2xf32>
    %173 = arith.addf %170, %172 : vector<32x2xf32>
    %174 = math.tanh %173 : vector<32x2xf32>
    %cst_36 = arith.constant 1.000000e+00 : f32
    %175 = vector.broadcast %cst_36 : f32 to vector<32x2xf32>
    %176 = arith.subf %175, %169 : vector<32x2xf32>
    %177 = arith.mulf %176, %174 : vector<32x2xf32>
    %178 = arith.mulf %169, %143 : vector<32x2xf32>
    %179 = arith.addf %177, %178 : vector<32x2xf32>
    %c4_i32 = arith.constant 4 : i32
    %180 = vector.broadcast %c4_i32 : i32 to vector<2x32xi32>
    %181 = arith.cmpi eq, %75, %180 : vector<2x32xi32>
    %182 = arith.extui %181 : vector<2x32xi1> to vector<2x32xi32>
    %183 = arith.sitofp %182 : vector<2x32xi32> to vector<2x32xf32>
    %cst_37 = arith.constant dense<0.000000e+00> : vector<32x32xf32>
    %184 = tpu.matmul %179, %183, %cst_37 {dimension_numbers = #tpu.dot_dimension_numbers<[1], [0], [0], [1], [0, 0, 1, 1], [], []>} : vector<32x2xf32>, vector<2x32xf32>, vector<32x32xf32> -> vector<32x32xf32>
    %185 = arith.addf %149, %184 : vector<32x32xf32>
    %186 = vector.extract_strided_slice %72 {offsets = [0, 6], sizes = [96, 2], strides = [1, 1]} : vector<96x32xf32> to vector<96x2xf32>
    %cst_38 = arith.constant dense<0.000000e+00> : vector<96x2xf32>
    %187 = tpu.matmul %67, %179, %cst_38 {dimension_numbers = #tpu.dot_dimension_numbers<[1], [0], [0], [1], [0, 0, 1, 1], [], []>} : vector<96x32xf32>, vector<32x2xf32>, vector<96x2xf32> -> vector<96x2xf32>
    %188 = vector.broadcast %69 : vector<96x1xf32> to vector<96x2xf32>
    %189 = arith.addf %187, %188 : vector<96x2xf32>
    %190 = vector.extract_strided_slice %186 {offsets = [0, 0], sizes = [32, 2], strides = [1, 1]} : vector<96x2xf32> to vector<32x2xf32>
    %191 = vector.extract_strided_slice %189 {offsets = [0, 0], sizes = [32, 2], strides = [1, 1]} : vector<96x2xf32> to vector<32x2xf32>
    %192 = arith.addf %190, %191 : vector<32x2xf32>
    %193 = arith.negf %192 : vector<32x2xf32>
    %194 = math.exp %193 : vector<32x2xf32>
    %cst_39 = arith.constant 1.000000e+00 : f32
    %195 = vector.broadcast %cst_39 : f32 to vector<32x2xf32>
    %196 = arith.addf %195, %194 : vector<32x2xf32>
    %197 = arith.divf %195, %196 : vector<32x2xf32>
    %198 = vector.extract_strided_slice %186 {offsets = [32, 0], sizes = [32, 2], strides = [1, 1]} : vector<96x2xf32> to vector<32x2xf32>
    %199 = vector.extract_strided_slice %189 {offsets = [32, 0], sizes = [32, 2], strides = [1, 1]} : vector<96x2xf32> to vector<32x2xf32>
    %200 = arith.addf %198, %199 : vector<32x2xf32>
    %201 = arith.negf %200 : vector<32x2xf32>
    %202 = math.exp %201 : vector<32x2xf32>
    %cst_40 = arith.constant 1.000000e+00 : f32
    %203 = vector.broadcast %cst_40 : f32 to vector<32x2xf32>
    %204 = arith.addf %203, %202 : vector<32x2xf32>
    %205 = arith.divf %203, %204 : vector<32x2xf32>
    %206 = vector.extract_strided_slice %186 {offsets = [64, 0], sizes = [32, 2], strides = [1, 1]} : vector<96x2xf32> to vector<32x2xf32>
    %207 = vector.extract_strided_slice %189 {offsets = [64, 0], sizes = [32, 2], strides = [1, 1]} : vector<96x2xf32> to vector<32x2xf32>
    %208 = arith.mulf %197, %207 : vector<32x2xf32>
    %209 = arith.addf %206, %208 : vector<32x2xf32>
    %210 = math.tanh %209 : vector<32x2xf32>
    %cst_41 = arith.constant 1.000000e+00 : f32
    %211 = vector.broadcast %cst_41 : f32 to vector<32x2xf32>
    %212 = arith.subf %211, %205 : vector<32x2xf32>
    %213 = arith.mulf %212, %210 : vector<32x2xf32>
    %214 = arith.mulf %205, %179 : vector<32x2xf32>
    %215 = arith.addf %213, %214 : vector<32x2xf32>
    %c6_i32 = arith.constant 6 : i32
    %216 = vector.broadcast %c6_i32 : i32 to vector<2x32xi32>
    %217 = arith.cmpi eq, %75, %216 : vector<2x32xi32>
    %218 = arith.extui %217 : vector<2x32xi1> to vector<2x32xi32>
    %219 = arith.sitofp %218 : vector<2x32xi32> to vector<2x32xf32>
    %cst_42 = arith.constant dense<0.000000e+00> : vector<32x32xf32>
    %220 = tpu.matmul %215, %219, %cst_42 {dimension_numbers = #tpu.dot_dimension_numbers<[1], [0], [0], [1], [0, 0, 1, 1], [], []>} : vector<32x2xf32>, vector<2x32xf32>, vector<32x32xf32> -> vector<32x32xf32>
    %221 = arith.addf %185, %220 : vector<32x32xf32>
    %222 = vector.extract_strided_slice %72 {offsets = [0, 8], sizes = [96, 2], strides = [1, 1]} : vector<96x32xf32> to vector<96x2xf32>
    %cst_43 = arith.constant dense<0.000000e+00> : vector<96x2xf32>
    %223 = tpu.matmul %67, %215, %cst_43 {dimension_numbers = #tpu.dot_dimension_numbers<[1], [0], [0], [1], [0, 0, 1, 1], [], []>} : vector<96x32xf32>, vector<32x2xf32>, vector<96x2xf32> -> vector<96x2xf32>
    %224 = vector.broadcast %69 : vector<96x1xf32> to vector<96x2xf32>
    %225 = arith.addf %223, %224 : vector<96x2xf32>
    %226 = vector.extract_strided_slice %222 {offsets = [0, 0], sizes = [32, 2], strides = [1, 1]} : vector<96x2xf32> to vector<32x2xf32>
    %227 = vector.extract_strided_slice %225 {offsets = [0, 0], sizes = [32, 2], strides = [1, 1]} : vector<96x2xf32> to vector<32x2xf32>
    %228 = arith.addf %226, %227 : vector<32x2xf32>
    %229 = arith.negf %228 : vector<32x2xf32>
    %230 = math.exp %229 : vector<32x2xf32>
    %cst_44 = arith.constant 1.000000e+00 : f32
    %231 = vector.broadcast %cst_44 : f32 to vector<32x2xf32>
    %232 = arith.addf %231, %230 : vector<32x2xf32>
    %233 = arith.divf %231, %232 : vector<32x2xf32>
    %234 = vector.extract_strided_slice %222 {offsets = [32, 0], sizes = [32, 2], strides = [1, 1]} : vector<96x2xf32> to vector<32x2xf32>
    %235 = vector.extract_strided_slice %225 {offsets = [32, 0], sizes = [32, 2], strides = [1, 1]} : vector<96x2xf32> to vector<32x2xf32>
    %236 = arith.addf %234, %235 : vector<32x2xf32>
    %237 = arith.negf %236 : vector<32x2xf32>
    %238 = math.exp %237 : vector<32x2xf32>
    %cst_45 = arith.constant 1.000000e+00 : f32
    %239 = vector.broadcast %cst_45 : f32 to vector<32x2xf32>
    %240 = arith.addf %239, %238 : vector<32x2xf32>
    %241 = arith.divf %239, %240 : vector<32x2xf32>
    %242 = vector.extract_strided_slice %222 {offsets = [64, 0], sizes = [32, 2], strides = [1, 1]} : vector<96x2xf32> to vector<32x2xf32>
    %243 = vector.extract_strided_slice %225 {offsets = [64, 0], sizes = [32, 2], strides = [1, 1]} : vector<96x2xf32> to vector<32x2xf32>
    %244 = arith.mulf %233, %243 : vector<32x2xf32>
    %245 = arith.addf %242, %244 : vector<32x2xf32>
    %246 = math.tanh %245 : vector<32x2xf32>
    %cst_46 = arith.constant 1.000000e+00 : f32
    %247 = vector.broadcast %cst_46 : f32 to vector<32x2xf32>
    %248 = arith.subf %247, %241 : vector<32x2xf32>
    %249 = arith.mulf %248, %246 : vector<32x2xf32>
    %250 = arith.mulf %241, %215 : vector<32x2xf32>
    %251 = arith.addf %249, %250 : vector<32x2xf32>
    %c8_i32 = arith.constant 8 : i32
    %252 = vector.broadcast %c8_i32 : i32 to vector<2x32xi32>
    %253 = arith.cmpi eq, %75, %252 : vector<2x32xi32>
    %254 = arith.extui %253 : vector<2x32xi1> to vector<2x32xi32>
    %255 = arith.sitofp %254 : vector<2x32xi32> to vector<2x32xf32>
    %cst_47 = arith.constant dense<0.000000e+00> : vector<32x32xf32>
    %256 = tpu.matmul %251, %255, %cst_47 {dimension_numbers = #tpu.dot_dimension_numbers<[1], [0], [0], [1], [0, 0, 1, 1], [], []>} : vector<32x2xf32>, vector<2x32xf32>, vector<32x32xf32> -> vector<32x32xf32>
    %257 = arith.addf %221, %256 : vector<32x32xf32>
    %258 = vector.extract_strided_slice %72 {offsets = [0, 10], sizes = [96, 2], strides = [1, 1]} : vector<96x32xf32> to vector<96x2xf32>
    %cst_48 = arith.constant dense<0.000000e+00> : vector<96x2xf32>
    %259 = tpu.matmul %67, %251, %cst_48 {dimension_numbers = #tpu.dot_dimension_numbers<[1], [0], [0], [1], [0, 0, 1, 1], [], []>} : vector<96x32xf32>, vector<32x2xf32>, vector<96x2xf32> -> vector<96x2xf32>
    %260 = vector.broadcast %69 : vector<96x1xf32> to vector<96x2xf32>
    %261 = arith.addf %259, %260 : vector<96x2xf32>
    %262 = vector.extract_strided_slice %258 {offsets = [0, 0], sizes = [32, 2], strides = [1, 1]} : vector<96x2xf32> to vector<32x2xf32>
    %263 = vector.extract_strided_slice %261 {offsets = [0, 0], sizes = [32, 2], strides = [1, 1]} : vector<96x2xf32> to vector<32x2xf32>
    %264 = arith.addf %262, %263 : vector<32x2xf32>
    %265 = arith.negf %264 : vector<32x2xf32>
    %266 = math.exp %265 : vector<32x2xf32>
    %cst_49 = arith.constant 1.000000e+00 : f32
    %267 = vector.broadcast %cst_49 : f32 to vector<32x2xf32>
    %268 = arith.addf %267, %266 : vector<32x2xf32>
    %269 = arith.divf %267, %268 : vector<32x2xf32>
    %270 = vector.extract_strided_slice %258 {offsets = [32, 0], sizes = [32, 2], strides = [1, 1]} : vector<96x2xf32> to vector<32x2xf32>
    %271 = vector.extract_strided_slice %261 {offsets = [32, 0], sizes = [32, 2], strides = [1, 1]} : vector<96x2xf32> to vector<32x2xf32>
    %272 = arith.addf %270, %271 : vector<32x2xf32>
    %273 = arith.negf %272 : vector<32x2xf32>
    %274 = math.exp %273 : vector<32x2xf32>
    %cst_50 = arith.constant 1.000000e+00 : f32
    %275 = vector.broadcast %cst_50 : f32 to vector<32x2xf32>
    %276 = arith.addf %275, %274 : vector<32x2xf32>
    %277 = arith.divf %275, %276 : vector<32x2xf32>
    %278 = vector.extract_strided_slice %258 {offsets = [64, 0], sizes = [32, 2], strides = [1, 1]} : vector<96x2xf32> to vector<32x2xf32>
    %279 = vector.extract_strided_slice %261 {offsets = [64, 0], sizes = [32, 2], strides = [1, 1]} : vector<96x2xf32> to vector<32x2xf32>
    %280 = arith.mulf %269, %279 : vector<32x2xf32>
    %281 = arith.addf %278, %280 : vector<32x2xf32>
    %282 = math.tanh %281 : vector<32x2xf32>
    %cst_51 = arith.constant 1.000000e+00 : f32
    %283 = vector.broadcast %cst_51 : f32 to vector<32x2xf32>
    %284 = arith.subf %283, %277 : vector<32x2xf32>
    %285 = arith.mulf %284, %282 : vector<32x2xf32>
    %286 = arith.mulf %277, %251 : vector<32x2xf32>
    %287 = arith.addf %285, %286 : vector<32x2xf32>
    %c10_i32 = arith.constant 10 : i32
    %288 = vector.broadcast %c10_i32 : i32 to vector<2x32xi32>
    %289 = arith.cmpi eq, %75, %288 : vector<2x32xi32>
    %290 = arith.extui %289 : vector<2x32xi1> to vector<2x32xi32>
    %291 = arith.sitofp %290 : vector<2x32xi32> to vector<2x32xf32>
    %cst_52 = arith.constant dense<0.000000e+00> : vector<32x32xf32>
    %292 = tpu.matmul %287, %291, %cst_52 {dimension_numbers = #tpu.dot_dimension_numbers<[1], [0], [0], [1], [0, 0, 1, 1], [], []>} : vector<32x2xf32>, vector<2x32xf32>, vector<32x32xf32> -> vector<32x32xf32>
    %293 = arith.addf %257, %292 : vector<32x32xf32>
    %294 = vector.extract_strided_slice %72 {offsets = [0, 12], sizes = [96, 2], strides = [1, 1]} : vector<96x32xf32> to vector<96x2xf32>
    %cst_53 = arith.constant dense<0.000000e+00> : vector<96x2xf32>
    %295 = tpu.matmul %67, %287, %cst_53 {dimension_numbers = #tpu.dot_dimension_numbers<[1], [0], [0], [1], [0, 0, 1, 1], [], []>} : vector<96x32xf32>, vector<32x2xf32>, vector<96x2xf32> -> vector<96x2xf32>
    %296 = vector.broadcast %69 : vector<96x1xf32> to vector<96x2xf32>
    %297 = arith.addf %295, %296 : vector<96x2xf32>
    %298 = vector.extract_strided_slice %294 {offsets = [0, 0], sizes = [32, 2], strides = [1, 1]} : vector<96x2xf32> to vector<32x2xf32>
    %299 = vector.extract_strided_slice %297 {offsets = [0, 0], sizes = [32, 2], strides = [1, 1]} : vector<96x2xf32> to vector<32x2xf32>
    %300 = arith.addf %298, %299 : vector<32x2xf32>
    %301 = arith.negf %300 : vector<32x2xf32>
    %302 = math.exp %301 : vector<32x2xf32>
    %cst_54 = arith.constant 1.000000e+00 : f32
    %303 = vector.broadcast %cst_54 : f32 to vector<32x2xf32>
    %304 = arith.addf %303, %302 : vector<32x2xf32>
    %305 = arith.divf %303, %304 : vector<32x2xf32>
    %306 = vector.extract_strided_slice %294 {offsets = [32, 0], sizes = [32, 2], strides = [1, 1]} : vector<96x2xf32> to vector<32x2xf32>
    %307 = vector.extract_strided_slice %297 {offsets = [32, 0], sizes = [32, 2], strides = [1, 1]} : vector<96x2xf32> to vector<32x2xf32>
    %308 = arith.addf %306, %307 : vector<32x2xf32>
    %309 = arith.negf %308 : vector<32x2xf32>
    %310 = math.exp %309 : vector<32x2xf32>
    %cst_55 = arith.constant 1.000000e+00 : f32
    %311 = vector.broadcast %cst_55 : f32 to vector<32x2xf32>
    %312 = arith.addf %311, %310 : vector<32x2xf32>
    %313 = arith.divf %311, %312 : vector<32x2xf32>
    %314 = vector.extract_strided_slice %294 {offsets = [64, 0], sizes = [32, 2], strides = [1, 1]} : vector<96x2xf32> to vector<32x2xf32>
    %315 = vector.extract_strided_slice %297 {offsets = [64, 0], sizes = [32, 2], strides = [1, 1]} : vector<96x2xf32> to vector<32x2xf32>
    %316 = arith.mulf %305, %315 : vector<32x2xf32>
    %317 = arith.addf %314, %316 : vector<32x2xf32>
    %318 = math.tanh %317 : vector<32x2xf32>
    %cst_56 = arith.constant 1.000000e+00 : f32
    %319 = vector.broadcast %cst_56 : f32 to vector<32x2xf32>
    %320 = arith.subf %319, %313 : vector<32x2xf32>
    %321 = arith.mulf %320, %318 : vector<32x2xf32>
    %322 = arith.mulf %313, %287 : vector<32x2xf32>
    %323 = arith.addf %321, %322 : vector<32x2xf32>
    %c12_i32 = arith.constant 12 : i32
    %324 = vector.broadcast %c12_i32 : i32 to vector<2x32xi32>
    %325 = arith.cmpi eq, %75, %324 : vector<2x32xi32>
    %326 = arith.extui %325 : vector<2x32xi1> to vector<2x32xi32>
    %327 = arith.sitofp %326 : vector<2x32xi32> to vector<2x32xf32>
    %cst_57 = arith.constant dense<0.000000e+00> : vector<32x32xf32>
    %328 = tpu.matmul %323, %327, %cst_57 {dimension_numbers = #tpu.dot_dimension_numbers<[1], [0], [0], [1], [0, 0, 1, 1], [], []>} : vector<32x2xf32>, vector<2x32xf32>, vector<32x32xf32> -> vector<32x32xf32>
    %329 = arith.addf %293, %328 : vector<32x32xf32>
    %330 = vector.extract_strided_slice %72 {offsets = [0, 14], sizes = [96, 2], strides = [1, 1]} : vector<96x32xf32> to vector<96x2xf32>
    %cst_58 = arith.constant dense<0.000000e+00> : vector<96x2xf32>
    %331 = tpu.matmul %67, %323, %cst_58 {dimension_numbers = #tpu.dot_dimension_numbers<[1], [0], [0], [1], [0, 0, 1, 1], [], []>} : vector<96x32xf32>, vector<32x2xf32>, vector<96x2xf32> -> vector<96x2xf32>
    %332 = vector.broadcast %69 : vector<96x1xf32> to vector<96x2xf32>
    %333 = arith.addf %331, %332 : vector<96x2xf32>
    %334 = vector.extract_strided_slice %330 {offsets = [0, 0], sizes = [32, 2], strides = [1, 1]} : vector<96x2xf32> to vector<32x2xf32>
    %335 = vector.extract_strided_slice %333 {offsets = [0, 0], sizes = [32, 2], strides = [1, 1]} : vector<96x2xf32> to vector<32x2xf32>
    %336 = arith.addf %334, %335 : vector<32x2xf32>
    %337 = arith.negf %336 : vector<32x2xf32>
    %338 = math.exp %337 : vector<32x2xf32>
    %cst_59 = arith.constant 1.000000e+00 : f32
    %339 = vector.broadcast %cst_59 : f32 to vector<32x2xf32>
    %340 = arith.addf %339, %338 : vector<32x2xf32>
    %341 = arith.divf %339, %340 : vector<32x2xf32>
    %342 = vector.extract_strided_slice %330 {offsets = [32, 0], sizes = [32, 2], strides = [1, 1]} : vector<96x2xf32> to vector<32x2xf32>
    %343 = vector.extract_strided_slice %333 {offsets = [32, 0], sizes = [32, 2], strides = [1, 1]} : vector<96x2xf32> to vector<32x2xf32>
    %344 = arith.addf %342, %343 : vector<32x2xf32>
    %345 = arith.negf %344 : vector<32x2xf32>
    %346 = math.exp %345 : vector<32x2xf32>
    %cst_60 = arith.constant 1.000000e+00 : f32
    %347 = vector.broadcast %cst_60 : f32 to vector<32x2xf32>
    %348 = arith.addf %347, %346 : vector<32x2xf32>
    %349 = arith.divf %347, %348 : vector<32x2xf32>
    %350 = vector.extract_strided_slice %330 {offsets = [64, 0], sizes = [32, 2], strides = [1, 1]} : vector<96x2xf32> to vector<32x2xf32>
    %351 = vector.extract_strided_slice %333 {offsets = [64, 0], sizes = [32, 2], strides = [1, 1]} : vector<96x2xf32> to vector<32x2xf32>
    %352 = arith.mulf %341, %351 : vector<32x2xf32>
    %353 = arith.addf %350, %352 : vector<32x2xf32>
    %354 = math.tanh %353 : vector<32x2xf32>
    %cst_61 = arith.constant 1.000000e+00 : f32
    %355 = vector.broadcast %cst_61 : f32 to vector<32x2xf32>
    %356 = arith.subf %355, %349 : vector<32x2xf32>
    %357 = arith.mulf %356, %354 : vector<32x2xf32>
    %358 = arith.mulf %349, %323 : vector<32x2xf32>
    %359 = arith.addf %357, %358 : vector<32x2xf32>
    %c14_i32 = arith.constant 14 : i32
    %360 = vector.broadcast %c14_i32 : i32 to vector<2x32xi32>
    %361 = arith.cmpi eq, %75, %360 : vector<2x32xi32>
    %362 = arith.extui %361 : vector<2x32xi1> to vector<2x32xi32>
    %363 = arith.sitofp %362 : vector<2x32xi32> to vector<2x32xf32>
    %cst_62 = arith.constant dense<0.000000e+00> : vector<32x32xf32>
    %364 = tpu.matmul %359, %363, %cst_62 {dimension_numbers = #tpu.dot_dimension_numbers<[1], [0], [0], [1], [0, 0, 1, 1], [], []>} : vector<32x2xf32>, vector<2x32xf32>, vector<32x32xf32> -> vector<32x32xf32>
    %365 = arith.addf %329, %364 : vector<32x32xf32>
    %366 = vector.extract_strided_slice %72 {offsets = [0, 16], sizes = [96, 2], strides = [1, 1]} : vector<96x32xf32> to vector<96x2xf32>
    %cst_63 = arith.constant dense<0.000000e+00> : vector<96x2xf32>
    %367 = tpu.matmul %67, %359, %cst_63 {dimension_numbers = #tpu.dot_dimension_numbers<[1], [0], [0], [1], [0, 0, 1, 1], [], []>} : vector<96x32xf32>, vector<32x2xf32>, vector<96x2xf32> -> vector<96x2xf32>
    %368 = vector.broadcast %69 : vector<96x1xf32> to vector<96x2xf32>
    %369 = arith.addf %367, %368 : vector<96x2xf32>
    %370 = vector.extract_strided_slice %366 {offsets = [0, 0], sizes = [32, 2], strides = [1, 1]} : vector<96x2xf32> to vector<32x2xf32>
    %371 = vector.extract_strided_slice %369 {offsets = [0, 0], sizes = [32, 2], strides = [1, 1]} : vector<96x2xf32> to vector<32x2xf32>
    %372 = arith.addf %370, %371 : vector<32x2xf32>
    %373 = arith.negf %372 : vector<32x2xf32>
    %374 = math.exp %373 : vector<32x2xf32>
    %cst_64 = arith.constant 1.000000e+00 : f32
    %375 = vector.broadcast %cst_64 : f32 to vector<32x2xf32>
    %376 = arith.addf %375, %374 : vector<32x2xf32>
    %377 = arith.divf %375, %376 : vector<32x2xf32>
    %378 = vector.extract_strided_slice %366 {offsets = [32, 0], sizes = [32, 2], strides = [1, 1]} : vector<96x2xf32> to vector<32x2xf32>
    %379 = vector.extract_strided_slice %369 {offsets = [32, 0], sizes = [32, 2], strides = [1, 1]} : vector<96x2xf32> to vector<32x2xf32>
    %380 = arith.addf %378, %379 : vector<32x2xf32>
    %381 = arith.negf %380 : vector<32x2xf32>
    %382 = math.exp %381 : vector<32x2xf32>
    %cst_65 = arith.constant 1.000000e+00 : f32
    %383 = vector.broadcast %cst_65 : f32 to vector<32x2xf32>
    %384 = arith.addf %383, %382 : vector<32x2xf32>
    %385 = arith.divf %383, %384 : vector<32x2xf32>
    %386 = vector.extract_strided_slice %366 {offsets = [64, 0], sizes = [32, 2], strides = [1, 1]} : vector<96x2xf32> to vector<32x2xf32>
    %387 = vector.extract_strided_slice %369 {offsets = [64, 0], sizes = [32, 2], strides = [1, 1]} : vector<96x2xf32> to vector<32x2xf32>
    %388 = arith.mulf %377, %387 : vector<32x2xf32>
    %389 = arith.addf %386, %388 : vector<32x2xf32>
    %390 = math.tanh %389 : vector<32x2xf32>
    %cst_66 = arith.constant 1.000000e+00 : f32
    %391 = vector.broadcast %cst_66 : f32 to vector<32x2xf32>
    %392 = arith.subf %391, %385 : vector<32x2xf32>
    %393 = arith.mulf %392, %390 : vector<32x2xf32>
    %394 = arith.mulf %385, %359 : vector<32x2xf32>
    %395 = arith.addf %393, %394 : vector<32x2xf32>
    %c16_i32_67 = arith.constant 16 : i32
    %396 = vector.broadcast %c16_i32_67 : i32 to vector<2x32xi32>
    %397 = arith.cmpi eq, %75, %396 : vector<2x32xi32>
    %398 = arith.extui %397 : vector<2x32xi1> to vector<2x32xi32>
    %399 = arith.sitofp %398 : vector<2x32xi32> to vector<2x32xf32>
    %cst_68 = arith.constant dense<0.000000e+00> : vector<32x32xf32>
    %400 = tpu.matmul %395, %399, %cst_68 {dimension_numbers = #tpu.dot_dimension_numbers<[1], [0], [0], [1], [0, 0, 1, 1], [], []>} : vector<32x2xf32>, vector<2x32xf32>, vector<32x32xf32> -> vector<32x32xf32>
    %401 = arith.addf %365, %400 : vector<32x32xf32>
    %402 = vector.extract_strided_slice %72 {offsets = [0, 18], sizes = [96, 2], strides = [1, 1]} : vector<96x32xf32> to vector<96x2xf32>
    %cst_69 = arith.constant dense<0.000000e+00> : vector<96x2xf32>
    %403 = tpu.matmul %67, %395, %cst_69 {dimension_numbers = #tpu.dot_dimension_numbers<[1], [0], [0], [1], [0, 0, 1, 1], [], []>} : vector<96x32xf32>, vector<32x2xf32>, vector<96x2xf32> -> vector<96x2xf32>
    %404 = vector.broadcast %69 : vector<96x1xf32> to vector<96x2xf32>
    %405 = arith.addf %403, %404 : vector<96x2xf32>
    %406 = vector.extract_strided_slice %402 {offsets = [0, 0], sizes = [32, 2], strides = [1, 1]} : vector<96x2xf32> to vector<32x2xf32>
    %407 = vector.extract_strided_slice %405 {offsets = [0, 0], sizes = [32, 2], strides = [1, 1]} : vector<96x2xf32> to vector<32x2xf32>
    %408 = arith.addf %406, %407 : vector<32x2xf32>
    %409 = arith.negf %408 : vector<32x2xf32>
    %410 = math.exp %409 : vector<32x2xf32>
    %cst_70 = arith.constant 1.000000e+00 : f32
    %411 = vector.broadcast %cst_70 : f32 to vector<32x2xf32>
    %412 = arith.addf %411, %410 : vector<32x2xf32>
    %413 = arith.divf %411, %412 : vector<32x2xf32>
    %414 = vector.extract_strided_slice %402 {offsets = [32, 0], sizes = [32, 2], strides = [1, 1]} : vector<96x2xf32> to vector<32x2xf32>
    %415 = vector.extract_strided_slice %405 {offsets = [32, 0], sizes = [32, 2], strides = [1, 1]} : vector<96x2xf32> to vector<32x2xf32>
    %416 = arith.addf %414, %415 : vector<32x2xf32>
    %417 = arith.negf %416 : vector<32x2xf32>
    %418 = math.exp %417 : vector<32x2xf32>
    %cst_71 = arith.constant 1.000000e+00 : f32
    %419 = vector.broadcast %cst_71 : f32 to vector<32x2xf32>
    %420 = arith.addf %419, %418 : vector<32x2xf32>
    %421 = arith.divf %419, %420 : vector<32x2xf32>
    %422 = vector.extract_strided_slice %402 {offsets = [64, 0], sizes = [32, 2], strides = [1, 1]} : vector<96x2xf32> to vector<32x2xf32>
    %423 = vector.extract_strided_slice %405 {offsets = [64, 0], sizes = [32, 2], strides = [1, 1]} : vector<96x2xf32> to vector<32x2xf32>
    %424 = arith.mulf %413, %423 : vector<32x2xf32>
    %425 = arith.addf %422, %424 : vector<32x2xf32>
    %426 = math.tanh %425 : vector<32x2xf32>
    %cst_72 = arith.constant 1.000000e+00 : f32
    %427 = vector.broadcast %cst_72 : f32 to vector<32x2xf32>
    %428 = arith.subf %427, %421 : vector<32x2xf32>
    %429 = arith.mulf %428, %426 : vector<32x2xf32>
    %430 = arith.mulf %421, %395 : vector<32x2xf32>
    %431 = arith.addf %429, %430 : vector<32x2xf32>
    %c18_i32 = arith.constant 18 : i32
    %432 = vector.broadcast %c18_i32 : i32 to vector<2x32xi32>
    %433 = arith.cmpi eq, %75, %432 : vector<2x32xi32>
    %434 = arith.extui %433 : vector<2x32xi1> to vector<2x32xi32>
    %435 = arith.sitofp %434 : vector<2x32xi32> to vector<2x32xf32>
    %cst_73 = arith.constant dense<0.000000e+00> : vector<32x32xf32>
    %436 = tpu.matmul %431, %435, %cst_73 {dimension_numbers = #tpu.dot_dimension_numbers<[1], [0], [0], [1], [0, 0, 1, 1], [], []>} : vector<32x2xf32>, vector<2x32xf32>, vector<32x32xf32> -> vector<32x32xf32>
    %437 = arith.addf %401, %436 : vector<32x32xf32>
    %438 = vector.extract_strided_slice %72 {offsets = [0, 20], sizes = [96, 2], strides = [1, 1]} : vector<96x32xf32> to vector<96x2xf32>
    %cst_74 = arith.constant dense<0.000000e+00> : vector<96x2xf32>
    %439 = tpu.matmul %67, %431, %cst_74 {dimension_numbers = #tpu.dot_dimension_numbers<[1], [0], [0], [1], [0, 0, 1, 1], [], []>} : vector<96x32xf32>, vector<32x2xf32>, vector<96x2xf32> -> vector<96x2xf32>
    %440 = vector.broadcast %69 : vector<96x1xf32> to vector<96x2xf32>
    %441 = arith.addf %439, %440 : vector<96x2xf32>
    %442 = vector.extract_strided_slice %438 {offsets = [0, 0], sizes = [32, 2], strides = [1, 1]} : vector<96x2xf32> to vector<32x2xf32>
    %443 = vector.extract_strided_slice %441 {offsets = [0, 0], sizes = [32, 2], strides = [1, 1]} : vector<96x2xf32> to vector<32x2xf32>
    %444 = arith.addf %442, %443 : vector<32x2xf32>
    %445 = arith.negf %444 : vector<32x2xf32>
    %446 = math.exp %445 : vector<32x2xf32>
    %cst_75 = arith.constant 1.000000e+00 : f32
    %447 = vector.broadcast %cst_75 : f32 to vector<32x2xf32>
    %448 = arith.addf %447, %446 : vector<32x2xf32>
    %449 = arith.divf %447, %448 : vector<32x2xf32>
    %450 = vector.extract_strided_slice %438 {offsets = [32, 0], sizes = [32, 2], strides = [1, 1]} : vector<96x2xf32> to vector<32x2xf32>
    %451 = vector.extract_strided_slice %441 {offsets = [32, 0], sizes = [32, 2], strides = [1, 1]} : vector<96x2xf32> to vector<32x2xf32>
    %452 = arith.addf %450, %451 : vector<32x2xf32>
    %453 = arith.negf %452 : vector<32x2xf32>
    %454 = math.exp %453 : vector<32x2xf32>
    %cst_76 = arith.constant 1.000000e+00 : f32
    %455 = vector.broadcast %cst_76 : f32 to vector<32x2xf32>
    %456 = arith.addf %455, %454 : vector<32x2xf32>
    %457 = arith.divf %455, %456 : vector<32x2xf32>
    %458 = vector.extract_strided_slice %438 {offsets = [64, 0], sizes = [32, 2], strides = [1, 1]} : vector<96x2xf32> to vector<32x2xf32>
    %459 = vector.extract_strided_slice %441 {offsets = [64, 0], sizes = [32, 2], strides = [1, 1]} : vector<96x2xf32> to vector<32x2xf32>
    %460 = arith.mulf %449, %459 : vector<32x2xf32>
    %461 = arith.addf %458, %460 : vector<32x2xf32>
    %462 = math.tanh %461 : vector<32x2xf32>
    %cst_77 = arith.constant 1.000000e+00 : f32
    %463 = vector.broadcast %cst_77 : f32 to vector<32x2xf32>
    %464 = arith.subf %463, %457 : vector<32x2xf32>
    %465 = arith.mulf %464, %462 : vector<32x2xf32>
    %466 = arith.mulf %457, %431 : vector<32x2xf32>
    %467 = arith.addf %465, %466 : vector<32x2xf32>
    %c20_i32 = arith.constant 20 : i32
    %468 = vector.broadcast %c20_i32 : i32 to vector<2x32xi32>
    %469 = arith.cmpi eq, %75, %468 : vector<2x32xi32>
    %470 = arith.extui %469 : vector<2x32xi1> to vector<2x32xi32>
    %471 = arith.sitofp %470 : vector<2x32xi32> to vector<2x32xf32>
    %cst_78 = arith.constant dense<0.000000e+00> : vector<32x32xf32>
    %472 = tpu.matmul %467, %471, %cst_78 {dimension_numbers = #tpu.dot_dimension_numbers<[1], [0], [0], [1], [0, 0, 1, 1], [], []>} : vector<32x2xf32>, vector<2x32xf32>, vector<32x32xf32> -> vector<32x32xf32>
    %473 = arith.addf %437, %472 : vector<32x32xf32>
    %474 = vector.extract_strided_slice %72 {offsets = [0, 22], sizes = [96, 2], strides = [1, 1]} : vector<96x32xf32> to vector<96x2xf32>
    %cst_79 = arith.constant dense<0.000000e+00> : vector<96x2xf32>
    %475 = tpu.matmul %67, %467, %cst_79 {dimension_numbers = #tpu.dot_dimension_numbers<[1], [0], [0], [1], [0, 0, 1, 1], [], []>} : vector<96x32xf32>, vector<32x2xf32>, vector<96x2xf32> -> vector<96x2xf32>
    %476 = vector.broadcast %69 : vector<96x1xf32> to vector<96x2xf32>
    %477 = arith.addf %475, %476 : vector<96x2xf32>
    %478 = vector.extract_strided_slice %474 {offsets = [0, 0], sizes = [32, 2], strides = [1, 1]} : vector<96x2xf32> to vector<32x2xf32>
    %479 = vector.extract_strided_slice %477 {offsets = [0, 0], sizes = [32, 2], strides = [1, 1]} : vector<96x2xf32> to vector<32x2xf32>
    %480 = arith.addf %478, %479 : vector<32x2xf32>
    %481 = arith.negf %480 : vector<32x2xf32>
    %482 = math.exp %481 : vector<32x2xf32>
    %cst_80 = arith.constant 1.000000e+00 : f32
    %483 = vector.broadcast %cst_80 : f32 to vector<32x2xf32>
    %484 = arith.addf %483, %482 : vector<32x2xf32>
    %485 = arith.divf %483, %484 : vector<32x2xf32>
    %486 = vector.extract_strided_slice %474 {offsets = [32, 0], sizes = [32, 2], strides = [1, 1]} : vector<96x2xf32> to vector<32x2xf32>
    %487 = vector.extract_strided_slice %477 {offsets = [32, 0], sizes = [32, 2], strides = [1, 1]} : vector<96x2xf32> to vector<32x2xf32>
    %488 = arith.addf %486, %487 : vector<32x2xf32>
    %489 = arith.negf %488 : vector<32x2xf32>
    %490 = math.exp %489 : vector<32x2xf32>
    %cst_81 = arith.constant 1.000000e+00 : f32
    %491 = vector.broadcast %cst_81 : f32 to vector<32x2xf32>
    %492 = arith.addf %491, %490 : vector<32x2xf32>
    %493 = arith.divf %491, %492 : vector<32x2xf32>
    %494 = vector.extract_strided_slice %474 {offsets = [64, 0], sizes = [32, 2], strides = [1, 1]} : vector<96x2xf32> to vector<32x2xf32>
    %495 = vector.extract_strided_slice %477 {offsets = [64, 0], sizes = [32, 2], strides = [1, 1]} : vector<96x2xf32> to vector<32x2xf32>
    %496 = arith.mulf %485, %495 : vector<32x2xf32>
    %497 = arith.addf %494, %496 : vector<32x2xf32>
    %498 = math.tanh %497 : vector<32x2xf32>
    %cst_82 = arith.constant 1.000000e+00 : f32
    %499 = vector.broadcast %cst_82 : f32 to vector<32x2xf32>
    %500 = arith.subf %499, %493 : vector<32x2xf32>
    %501 = arith.mulf %500, %498 : vector<32x2xf32>
    %502 = arith.mulf %493, %467 : vector<32x2xf32>
    %503 = arith.addf %501, %502 : vector<32x2xf32>
    %c22_i32 = arith.constant 22 : i32
    %504 = vector.broadcast %c22_i32 : i32 to vector<2x32xi32>
    %505 = arith.cmpi eq, %75, %504 : vector<2x32xi32>
    %506 = arith.extui %505 : vector<2x32xi1> to vector<2x32xi32>
    %507 = arith.sitofp %506 : vector<2x32xi32> to vector<2x32xf32>
    %cst_83 = arith.constant dense<0.000000e+00> : vector<32x32xf32>
    %508 = tpu.matmul %503, %507, %cst_83 {dimension_numbers = #tpu.dot_dimension_numbers<[1], [0], [0], [1], [0, 0, 1, 1], [], []>} : vector<32x2xf32>, vector<2x32xf32>, vector<32x32xf32> -> vector<32x32xf32>
    %509 = arith.addf %473, %508 : vector<32x32xf32>
    %510 = vector.extract_strided_slice %72 {offsets = [0, 24], sizes = [96, 2], strides = [1, 1]} : vector<96x32xf32> to vector<96x2xf32>
    %cst_84 = arith.constant dense<0.000000e+00> : vector<96x2xf32>
    %511 = tpu.matmul %67, %503, %cst_84 {dimension_numbers = #tpu.dot_dimension_numbers<[1], [0], [0], [1], [0, 0, 1, 1], [], []>} : vector<96x32xf32>, vector<32x2xf32>, vector<96x2xf32> -> vector<96x2xf32>
    %512 = vector.broadcast %69 : vector<96x1xf32> to vector<96x2xf32>
    %513 = arith.addf %511, %512 : vector<96x2xf32>
    %514 = vector.extract_strided_slice %510 {offsets = [0, 0], sizes = [32, 2], strides = [1, 1]} : vector<96x2xf32> to vector<32x2xf32>
    %515 = vector.extract_strided_slice %513 {offsets = [0, 0], sizes = [32, 2], strides = [1, 1]} : vector<96x2xf32> to vector<32x2xf32>
    %516 = arith.addf %514, %515 : vector<32x2xf32>
    %517 = arith.negf %516 : vector<32x2xf32>
    %518 = math.exp %517 : vector<32x2xf32>
    %cst_85 = arith.constant 1.000000e+00 : f32
    %519 = vector.broadcast %cst_85 : f32 to vector<32x2xf32>
    %520 = arith.addf %519, %518 : vector<32x2xf32>
    %521 = arith.divf %519, %520 : vector<32x2xf32>
    %522 = vector.extract_strided_slice %510 {offsets = [32, 0], sizes = [32, 2], strides = [1, 1]} : vector<96x2xf32> to vector<32x2xf32>
    %523 = vector.extract_strided_slice %513 {offsets = [32, 0], sizes = [32, 2], strides = [1, 1]} : vector<96x2xf32> to vector<32x2xf32>
    %524 = arith.addf %522, %523 : vector<32x2xf32>
    %525 = arith.negf %524 : vector<32x2xf32>
    %526 = math.exp %525 : vector<32x2xf32>
    %cst_86 = arith.constant 1.000000e+00 : f32
    %527 = vector.broadcast %cst_86 : f32 to vector<32x2xf32>
    %528 = arith.addf %527, %526 : vector<32x2xf32>
    %529 = arith.divf %527, %528 : vector<32x2xf32>
    %530 = vector.extract_strided_slice %510 {offsets = [64, 0], sizes = [32, 2], strides = [1, 1]} : vector<96x2xf32> to vector<32x2xf32>
    %531 = vector.extract_strided_slice %513 {offsets = [64, 0], sizes = [32, 2], strides = [1, 1]} : vector<96x2xf32> to vector<32x2xf32>
    %532 = arith.mulf %521, %531 : vector<32x2xf32>
    %533 = arith.addf %530, %532 : vector<32x2xf32>
    %534 = math.tanh %533 : vector<32x2xf32>
    %cst_87 = arith.constant 1.000000e+00 : f32
    %535 = vector.broadcast %cst_87 : f32 to vector<32x2xf32>
    %536 = arith.subf %535, %529 : vector<32x2xf32>
    %537 = arith.mulf %536, %534 : vector<32x2xf32>
    %538 = arith.mulf %529, %503 : vector<32x2xf32>
    %539 = arith.addf %537, %538 : vector<32x2xf32>
    %c24_i32 = arith.constant 24 : i32
    %540 = vector.broadcast %c24_i32 : i32 to vector<2x32xi32>
    %541 = arith.cmpi eq, %75, %540 : vector<2x32xi32>
    %542 = arith.extui %541 : vector<2x32xi1> to vector<2x32xi32>
    %543 = arith.sitofp %542 : vector<2x32xi32> to vector<2x32xf32>
    %cst_88 = arith.constant dense<0.000000e+00> : vector<32x32xf32>
    %544 = tpu.matmul %539, %543, %cst_88 {dimension_numbers = #tpu.dot_dimension_numbers<[1], [0], [0], [1], [0, 0, 1, 1], [], []>} : vector<32x2xf32>, vector<2x32xf32>, vector<32x32xf32> -> vector<32x32xf32>
    %545 = arith.addf %509, %544 : vector<32x32xf32>
    %546 = vector.extract_strided_slice %72 {offsets = [0, 26], sizes = [96, 2], strides = [1, 1]} : vector<96x32xf32> to vector<96x2xf32>
    %cst_89 = arith.constant dense<0.000000e+00> : vector<96x2xf32>
    %547 = tpu.matmul %67, %539, %cst_89 {dimension_numbers = #tpu.dot_dimension_numbers<[1], [0], [0], [1], [0, 0, 1, 1], [], []>} : vector<96x32xf32>, vector<32x2xf32>, vector<96x2xf32> -> vector<96x2xf32>
    %548 = vector.broadcast %69 : vector<96x1xf32> to vector<96x2xf32>
    %549 = arith.addf %547, %548 : vector<96x2xf32>
    %550 = vector.extract_strided_slice %546 {offsets = [0, 0], sizes = [32, 2], strides = [1, 1]} : vector<96x2xf32> to vector<32x2xf32>
    %551 = vector.extract_strided_slice %549 {offsets = [0, 0], sizes = [32, 2], strides = [1, 1]} : vector<96x2xf32> to vector<32x2xf32>
    %552 = arith.addf %550, %551 : vector<32x2xf32>
    %553 = arith.negf %552 : vector<32x2xf32>
    %554 = math.exp %553 : vector<32x2xf32>
    %cst_90 = arith.constant 1.000000e+00 : f32
    %555 = vector.broadcast %cst_90 : f32 to vector<32x2xf32>
    %556 = arith.addf %555, %554 : vector<32x2xf32>
    %557 = arith.divf %555, %556 : vector<32x2xf32>
    %558 = vector.extract_strided_slice %546 {offsets = [32, 0], sizes = [32, 2], strides = [1, 1]} : vector<96x2xf32> to vector<32x2xf32>
    %559 = vector.extract_strided_slice %549 {offsets = [32, 0], sizes = [32, 2], strides = [1, 1]} : vector<96x2xf32> to vector<32x2xf32>
    %560 = arith.addf %558, %559 : vector<32x2xf32>
    %561 = arith.negf %560 : vector<32x2xf32>
    %562 = math.exp %561 : vector<32x2xf32>
    %cst_91 = arith.constant 1.000000e+00 : f32
    %563 = vector.broadcast %cst_91 : f32 to vector<32x2xf32>
    %564 = arith.addf %563, %562 : vector<32x2xf32>
    %565 = arith.divf %563, %564 : vector<32x2xf32>
    %566 = vector.extract_strided_slice %546 {offsets = [64, 0], sizes = [32, 2], strides = [1, 1]} : vector<96x2xf32> to vector<32x2xf32>
    %567 = vector.extract_strided_slice %549 {offsets = [64, 0], sizes = [32, 2], strides = [1, 1]} : vector<96x2xf32> to vector<32x2xf32>
    %568 = arith.mulf %557, %567 : vector<32x2xf32>
    %569 = arith.addf %566, %568 : vector<32x2xf32>
    %570 = math.tanh %569 : vector<32x2xf32>
    %cst_92 = arith.constant 1.000000e+00 : f32
    %571 = vector.broadcast %cst_92 : f32 to vector<32x2xf32>
    %572 = arith.subf %571, %565 : vector<32x2xf32>
    %573 = arith.mulf %572, %570 : vector<32x2xf32>
    %574 = arith.mulf %565, %539 : vector<32x2xf32>
    %575 = arith.addf %573, %574 : vector<32x2xf32>
    %c26_i32 = arith.constant 26 : i32
    %576 = vector.broadcast %c26_i32 : i32 to vector<2x32xi32>
    %577 = arith.cmpi eq, %75, %576 : vector<2x32xi32>
    %578 = arith.extui %577 : vector<2x32xi1> to vector<2x32xi32>
    %579 = arith.sitofp %578 : vector<2x32xi32> to vector<2x32xf32>
    %cst_93 = arith.constant dense<0.000000e+00> : vector<32x32xf32>
    %580 = tpu.matmul %575, %579, %cst_93 {dimension_numbers = #tpu.dot_dimension_numbers<[1], [0], [0], [1], [0, 0, 1, 1], [], []>} : vector<32x2xf32>, vector<2x32xf32>, vector<32x32xf32> -> vector<32x32xf32>
    %581 = arith.addf %545, %580 : vector<32x32xf32>
    %582 = vector.extract_strided_slice %72 {offsets = [0, 28], sizes = [96, 2], strides = [1, 1]} : vector<96x32xf32> to vector<96x2xf32>
    %cst_94 = arith.constant dense<0.000000e+00> : vector<96x2xf32>
    %583 = tpu.matmul %67, %575, %cst_94 {dimension_numbers = #tpu.dot_dimension_numbers<[1], [0], [0], [1], [0, 0, 1, 1], [], []>} : vector<96x32xf32>, vector<32x2xf32>, vector<96x2xf32> -> vector<96x2xf32>
    %584 = vector.broadcast %69 : vector<96x1xf32> to vector<96x2xf32>
    %585 = arith.addf %583, %584 : vector<96x2xf32>
    %586 = vector.extract_strided_slice %582 {offsets = [0, 0], sizes = [32, 2], strides = [1, 1]} : vector<96x2xf32> to vector<32x2xf32>
    %587 = vector.extract_strided_slice %585 {offsets = [0, 0], sizes = [32, 2], strides = [1, 1]} : vector<96x2xf32> to vector<32x2xf32>
    %588 = arith.addf %586, %587 : vector<32x2xf32>
    %589 = arith.negf %588 : vector<32x2xf32>
    %590 = math.exp %589 : vector<32x2xf32>
    %cst_95 = arith.constant 1.000000e+00 : f32
    %591 = vector.broadcast %cst_95 : f32 to vector<32x2xf32>
    %592 = arith.addf %591, %590 : vector<32x2xf32>
    %593 = arith.divf %591, %592 : vector<32x2xf32>
    %594 = vector.extract_strided_slice %582 {offsets = [32, 0], sizes = [32, 2], strides = [1, 1]} : vector<96x2xf32> to vector<32x2xf32>
    %595 = vector.extract_strided_slice %585 {offsets = [32, 0], sizes = [32, 2], strides = [1, 1]} : vector<96x2xf32> to vector<32x2xf32>
    %596 = arith.addf %594, %595 : vector<32x2xf32>
    %597 = arith.negf %596 : vector<32x2xf32>
    %598 = math.exp %597 : vector<32x2xf32>
    %cst_96 = arith.constant 1.000000e+00 : f32
    %599 = vector.broadcast %cst_96 : f32 to vector<32x2xf32>
    %600 = arith.addf %599, %598 : vector<32x2xf32>
    %601 = arith.divf %599, %600 : vector<32x2xf32>
    %602 = vector.extract_strided_slice %582 {offsets = [64, 0], sizes = [32, 2], strides = [1, 1]} : vector<96x2xf32> to vector<32x2xf32>
    %603 = vector.extract_strided_slice %585 {offsets = [64, 0], sizes = [32, 2], strides = [1, 1]} : vector<96x2xf32> to vector<32x2xf32>
    %604 = arith.mulf %593, %603 : vector<32x2xf32>
    %605 = arith.addf %602, %604 : vector<32x2xf32>
    %606 = math.tanh %605 : vector<32x2xf32>
    %cst_97 = arith.constant 1.000000e+00 : f32
    %607 = vector.broadcast %cst_97 : f32 to vector<32x2xf32>
    %608 = arith.subf %607, %601 : vector<32x2xf32>
    %609 = arith.mulf %608, %606 : vector<32x2xf32>
    %610 = arith.mulf %601, %575 : vector<32x2xf32>
    %611 = arith.addf %609, %610 : vector<32x2xf32>
    %c28_i32 = arith.constant 28 : i32
    %612 = vector.broadcast %c28_i32 : i32 to vector<2x32xi32>
    %613 = arith.cmpi eq, %75, %612 : vector<2x32xi32>
    %614 = arith.extui %613 : vector<2x32xi1> to vector<2x32xi32>
    %615 = arith.sitofp %614 : vector<2x32xi32> to vector<2x32xf32>
    %cst_98 = arith.constant dense<0.000000e+00> : vector<32x32xf32>
    %616 = tpu.matmul %611, %615, %cst_98 {dimension_numbers = #tpu.dot_dimension_numbers<[1], [0], [0], [1], [0, 0, 1, 1], [], []>} : vector<32x2xf32>, vector<2x32xf32>, vector<32x32xf32> -> vector<32x32xf32>
    %617 = arith.addf %581, %616 : vector<32x32xf32>
    %618 = vector.extract_strided_slice %72 {offsets = [0, 30], sizes = [96, 2], strides = [1, 1]} : vector<96x32xf32> to vector<96x2xf32>
    %cst_99 = arith.constant dense<0.000000e+00> : vector<96x2xf32>
    %619 = tpu.matmul %67, %611, %cst_99 {dimension_numbers = #tpu.dot_dimension_numbers<[1], [0], [0], [1], [0, 0, 1, 1], [], []>} : vector<96x32xf32>, vector<32x2xf32>, vector<96x2xf32> -> vector<96x2xf32>
    %620 = vector.broadcast %69 : vector<96x1xf32> to vector<96x2xf32>
    %621 = arith.addf %619, %620 : vector<96x2xf32>
    %622 = vector.extract_strided_slice %618 {offsets = [0, 0], sizes = [32, 2], strides = [1, 1]} : vector<96x2xf32> to vector<32x2xf32>
    %623 = vector.extract_strided_slice %621 {offsets = [0, 0], sizes = [32, 2], strides = [1, 1]} : vector<96x2xf32> to vector<32x2xf32>
    %624 = arith.addf %622, %623 : vector<32x2xf32>
    %625 = arith.negf %624 : vector<32x2xf32>
    %626 = math.exp %625 : vector<32x2xf32>
    %cst_100 = arith.constant 1.000000e+00 : f32
    %627 = vector.broadcast %cst_100 : f32 to vector<32x2xf32>
    %628 = arith.addf %627, %626 : vector<32x2xf32>
    %629 = arith.divf %627, %628 : vector<32x2xf32>
    %630 = vector.extract_strided_slice %618 {offsets = [32, 0], sizes = [32, 2], strides = [1, 1]} : vector<96x2xf32> to vector<32x2xf32>
    %631 = vector.extract_strided_slice %621 {offsets = [32, 0], sizes = [32, 2], strides = [1, 1]} : vector<96x2xf32> to vector<32x2xf32>
    %632 = arith.addf %630, %631 : vector<32x2xf32>
    %633 = arith.negf %632 : vector<32x2xf32>
    %634 = math.exp %633 : vector<32x2xf32>
    %cst_101 = arith.constant 1.000000e+00 : f32
    %635 = vector.broadcast %cst_101 : f32 to vector<32x2xf32>
    %636 = arith.addf %635, %634 : vector<32x2xf32>
    %637 = arith.divf %635, %636 : vector<32x2xf32>
    %638 = vector.extract_strided_slice %618 {offsets = [64, 0], sizes = [32, 2], strides = [1, 1]} : vector<96x2xf32> to vector<32x2xf32>
    %639 = vector.extract_strided_slice %621 {offsets = [64, 0], sizes = [32, 2], strides = [1, 1]} : vector<96x2xf32> to vector<32x2xf32>
    %640 = arith.mulf %629, %639 : vector<32x2xf32>
    %641 = arith.addf %638, %640 : vector<32x2xf32>
    %642 = math.tanh %641 : vector<32x2xf32>
    %cst_102 = arith.constant 1.000000e+00 : f32
    %643 = vector.broadcast %cst_102 : f32 to vector<32x2xf32>
    %644 = arith.subf %643, %637 : vector<32x2xf32>
    %645 = arith.mulf %644, %642 : vector<32x2xf32>
    %646 = arith.mulf %637, %611 : vector<32x2xf32>
    %647 = arith.addf %645, %646 : vector<32x2xf32>
    %c30_i32 = arith.constant 30 : i32
    %648 = vector.broadcast %c30_i32 : i32 to vector<2x32xi32>
    %649 = arith.cmpi eq, %75, %648 : vector<2x32xi32>
    %650 = arith.extui %649 : vector<2x32xi1> to vector<2x32xi32>
    %651 = arith.sitofp %650 : vector<2x32xi32> to vector<2x32xf32>
    %cst_103 = arith.constant dense<0.000000e+00> : vector<32x32xf32>
    %652 = tpu.matmul %647, %651, %cst_103 {dimension_numbers = #tpu.dot_dimension_numbers<[1], [0], [0], [1], [0, 0, 1, 1], [], []>} : vector<32x2xf32>, vector<2x32xf32>, vector<32x32xf32> -> vector<32x32xf32>
    %653 = arith.addf %617, %652 : vector<32x32xf32>
    %c0_104 = arith.constant 0 : index
    %c0_105 = arith.constant 0 : index
    %654 = vector.load %arg5[%c0_104, %c0_105] : memref<16x128xf32, #tpu.memory_space<vmem>>, vector<16x128xf32>
    %655 = vector.extract_strided_slice %654 {offsets = [0, 0], sizes = [16, 32], strides = [1, 1]} : vector<16x128xf32> to vector<16x32xf32>
    %656 = vector.extract_strided_slice %654 {offsets = [0, 32], sizes = [16, 48], strides = [1, 1]} : vector<16x128xf32> to vector<16x48xf32>
    %657 = vector.extract_strided_slice %654 {offsets = [0, 80], sizes = [16, 48], strides = [1, 1]} : vector<16x128xf32> to vector<16x48xf32>
    %cst_106 = arith.constant dense<0.000000e+00> : vector<16x32xf32>
    %658 = tpu.matmul %655, %653, %cst_106 {dimension_numbers = #tpu.dot_dimension_numbers<[1], [0], [0], [1], [0, 0, 1, 1], [], []>} : vector<16x32xf32>, vector<32x32xf32>, vector<16x32xf32> -> vector<16x32xf32>
    %659 = vector.broadcast %7 : vector<16x1xf32> to vector<16x32xf32>
    %660 = arith.addf %658, %659 : vector<16x32xf32>
    %661 = arith.negf %660 : vector<16x32xf32>
    %662 = math.exp %661 : vector<16x32xf32>
    %cst_107 = arith.constant 1.000000e+00 : f32
    %663 = vector.broadcast %cst_107 : f32 to vector<16x32xf32>
    %664 = arith.addf %663, %662 : vector<16x32xf32>
    %665 = arith.divf %663, %664 : vector<16x32xf32>
    %666 = tpu.iota {dimensions = array<i32: 0>} : vector<32x32xi32>
    %667 = tpu.iota {dimensions = array<i32: 1>} : vector<32x32xi32>
    %668 = arith.subi %666, %667 : vector<32x32xi32>
    %c-2_i32 = arith.constant -2 : i32
    %669 = vector.broadcast %c-2_i32 : i32 to vector<32x32xi32>
    %670 = arith.cmpi eq, %668, %669 : vector<32x32xi32>
    %671 = arith.extui %670 : vector<32x32xi1> to vector<32x32xi32>
    %672 = arith.sitofp %671 : vector<32x32xi32> to vector<32x32xf32>
    %c2_i32_108 = arith.constant 2 : i32
    %673 = vector.broadcast %c2_i32_108 : i32 to vector<32x32xi32>
    %674 = arith.cmpi eq, %668, %673 : vector<32x32xi32>
    %675 = arith.extui %674 : vector<32x32xi1> to vector<32x32xi32>
    %676 = arith.sitofp %675 : vector<32x32xi32> to vector<32x32xf32>
    %cst_109 = arith.constant dense<0.000000e+00> : vector<16x32xf32>
    %677 = tpu.matmul %665, %672, %cst_109 {dimension_numbers = #tpu.dot_dimension_numbers<[1], [0], [0], [1], [0, 0, 1, 1], [], []>} : vector<16x32xf32>, vector<32x32xf32>, vector<16x32xf32> -> vector<16x32xf32>
    %cst_110 = arith.constant dense<0.000000e+00> : vector<16x32xf32>
    %678 = tpu.matmul %665, %676, %cst_110 {dimension_numbers = #tpu.dot_dimension_numbers<[1], [0], [0], [1], [0, 0, 1, 1], [], []>} : vector<16x32xf32>, vector<32x32xf32>, vector<16x32xf32> -> vector<16x32xf32>
    %679 = tpu.concatenate %677, %665, %678 in 0 : vector<16x32xf32>, vector<16x32xf32>, vector<16x32xf32> -> vector<48x32xf32>
    %cst_111 = arith.constant dense<0.000000e+00> : vector<16x32xf32>
    %680 = tpu.matmul %656, %679, %cst_111 {dimension_numbers = #tpu.dot_dimension_numbers<[1], [0], [0], [1], [0, 0, 1, 1], [], []>} : vector<16x48xf32>, vector<48x32xf32>, vector<16x32xf32> -> vector<16x32xf32>
    %681 = vector.broadcast %8 : vector<16x1xf32> to vector<16x32xf32>
    %682 = arith.addf %680, %681 : vector<16x32xf32>
    %cst_112 = arith.constant 0.000000e+00 : f32
    %683 = vector.broadcast %cst_112 : f32 to vector<16x32xf32>
    %684 = arith.maximumf %682, %683 : vector<16x32xf32>
    %cst_113 = arith.constant 0.000000e+00 : f32
    %685 = vector.broadcast %cst_113 : f32 to vector<16x32xf32>
    %686 = arith.minimumf %682, %685 : vector<16x32xf32>
    %687 = vector.broadcast %10 : vector<16x1xf32> to vector<16x32xf32>
    %688 = arith.mulf %687, %686 : vector<16x32xf32>
    %689 = arith.addf %684, %688 : vector<16x32xf32>
    %cst_114 = arith.constant dense<0.000000e+00> : vector<16x32xf32>
    %690 = tpu.matmul %689, %672, %cst_114 {dimension_numbers = #tpu.dot_dimension_numbers<[1], [0], [0], [1], [0, 0, 1, 1], [], []>} : vector<16x32xf32>, vector<32x32xf32>, vector<16x32xf32> -> vector<16x32xf32>
    %cst_115 = arith.constant dense<0.000000e+00> : vector<16x32xf32>
    %691 = tpu.matmul %689, %676, %cst_115 {dimension_numbers = #tpu.dot_dimension_numbers<[1], [0], [0], [1], [0, 0, 1, 1], [], []>} : vector<16x32xf32>, vector<32x32xf32>, vector<16x32xf32> -> vector<16x32xf32>
    %692 = tpu.concatenate %690, %689, %691 in 0 : vector<16x32xf32>, vector<16x32xf32>, vector<16x32xf32> -> vector<48x32xf32>
    %cst_116 = arith.constant dense<0.000000e+00> : vector<16x32xf32>
    %693 = tpu.matmul %657, %692, %cst_116 {dimension_numbers = #tpu.dot_dimension_numbers<[1], [0], [0], [1], [0, 0, 1, 1], [], []>} : vector<16x48xf32>, vector<48x32xf32>, vector<16x32xf32> -> vector<16x32xf32>
    %694 = vector.broadcast %9 : vector<16x1xf32> to vector<16x32xf32>
    %695 = arith.addf %693, %694 : vector<16x32xf32>
    %696 = arith.negf %695 : vector<16x32xf32>
    %697 = math.exp %696 : vector<16x32xf32>
    %cst_117 = arith.constant 1.000000e+00 : f32
    %698 = vector.broadcast %cst_117 : f32 to vector<16x32xf32>
    %699 = arith.addf %698, %697 : vector<16x32xf32>
    %700 = arith.divf %698, %699 : vector<16x32xf32>
    %701 = arith.mulf %665, %700 : vector<16x32xf32>
    %702 = tpu.iota {dimensions = array<i32: 0>} : vector<32x512xi32>
    %703 = tpu.iota {dimensions = array<i32: 1>} : vector<32x512xi32>
    %c16_i32_118 = arith.constant 16 : i32
    %704 = vector.broadcast %c16_i32_118 : i32 to vector<32x512xi32>
    %705 = arith.muli %702, %704 : vector<32x512xi32>
    %706 = arith.subi %703, %705 : vector<32x512xi32>
    %c0_i32_119 = arith.constant 0 : i32
    %707 = vector.broadcast %c0_i32_119 : i32 to vector<32x512xi32>
    %708 = arith.cmpi sge, %706, %707 : vector<32x512xi32>
    %c16_i32_120 = arith.constant 16 : i32
    %709 = vector.broadcast %c16_i32_120 : i32 to vector<32x512xi32>
    %710 = arith.cmpi slt, %706, %709 : vector<32x512xi32>
    %711 = arith.andi %708, %710 : vector<32x512xi1>
    %cst_121 = arith.constant 1.000000e+00 : f32
    %cst_122 = arith.constant 0.000000e+00 : f32
    %712 = vector.broadcast %cst_121 : f32 to vector<32x512xf32>
    %713 = vector.broadcast %cst_122 : f32 to vector<32x512xf32>
    %714 = arith.select %711, %712, %713 : vector<32x512xi1>, vector<32x512xf32>
    %cst_123 = arith.constant dense<0.000000e+00> : vector<16x512xf32>
    %715 = tpu.matmul %701, %714, %cst_123 {dimension_numbers = #tpu.dot_dimension_numbers<[1], [0], [0], [1], [0, 0, 1, 1], [], []>} : vector<16x32xf32>, vector<32x512xf32>, vector<16x512xf32> -> vector<16x512xf32>
    %716 = arith.mulf %49, %715 : vector<16x512xf32>
    %c0_124 = arith.constant 0 : index
    %c0_125 = arith.constant 0 : index
    %717 = vector.load %arg6[%c0_124, %c0_125] : memref<16x512xf32, #tpu.memory_space<vmem>>, vector<16x512xf32>
    tpu.vector_store %arg6[%c0_124, %c0_125], %716 {strides = array<i32>} : memref<16x512xf32, #tpu.memory_space<vmem>>, vector<16x512xf32>,
    return
  }
  func.func @transform_0(%arg0: i32) -> (i32, i32) {
    %c0_i32 = arith.constant 0 : i32
    %c0_i32_0 = arith.constant 0 : i32
    %c0_i32_1 = arith.constant 0 : i32
    return %c0_i32, %c0_i32_0 : i32, i32
  }
  func.func @transform_1(%arg0: i32) -> (i32, i32) {
    %c0_i32 = arith.constant 0 : i32
    %c0_i32_0 = arith.constant 0 : i32
    %c0_i32_1 = arith.constant 0 : i32
    return %c0_i32, %c0_i32_0 : i32, i32
  }
  func.func @transform_2(%arg0: i32) -> (i32, i32) {
    %c0_i32 = arith.constant 0 : i32
    %c0_i32_0 = arith.constant 0 : i32
    %c0_i32_1 = arith.constant 0 : i32
    return %c0_i32, %c0_i32_0 : i32, i32
  }
  func.func @transform_3(%arg0: i32) -> (i32, i32) {
    %c0_i32 = arith.constant 0 : i32
    %c0_i32_0 = arith.constant 0 : i32
    %c0_i32_1 = arith.constant 0 : i32
    return %c0_i32, %c0_i32_0 : i32, i32
  }
  func.func @transform_4(%arg0: i32) -> (i32, i32) {
    %c0_i32 = arith.constant 0 : i32
    %c0_i32_0 = arith.constant 0 : i32
    %c0_i32_1 = arith.constant 0 : i32
    return %c0_i32, %c0_i32_0 : i32, i32
  }
  func.func @transform_5(%arg0: i32) -> (i32, i32) {
    %c0_i32 = arith.constant 0 : i32
    %c0_i32_0 = arith.constant 0 : i32
    %c0_i32_1 = arith.constant 0 : i32
    return %c0_i32, %c0_i32_0 : i32, i32
  }
}

</mosaic_0001>

<bundles_post_ra>
// kernel: _lambda_.1
= control target key start
LH: loop header
LB: loop body
LE: loop exit
PB: predicated region body
PF: predicated region fallthrough
CT: control target
= control target key end

     0   :  { %v13342_v3 = vmov 0.0   ;;  %v11080_v8 = vmov 0   ;;  %vm61_vm0 = vcmask 1043456   ;;  %vm54_vm1 = vcmask 293888   ;;  %s11087_s16 = smov 112   ;;  %s11091_s14 = smov 126   ;;  %s13336_s0 = inlined_call_operand.vmem [shape: f32[36,512], index: 0, kind: input, shape index: {}]   ;;  %s13337_s2 = inlined_call_operand.vmem [shape: f32[16,10], index: 2, kind: input, shape index: {}]   ;;  %s13338_s1 = inlined_call_operand.vmem [shape: f32[16,36], index: 1, kind: input, shape index: {}]   ;;  %s13339_s3 = inlined_call_operand.vmem [shape: f32[96,50], index: 3, kind: input, shape index: {}]   ;;  %s13340_s4 = inlined_call_operand.vmem [shape: f32[16,128], index: 4, kind: input, shape index: {}]   ;;  %s13341_s5 = inlined_call_operand.vmem [shape: f32[16,512], index: 5, kind: output, shape index: {}]  }
   0x1   :  { %v25_v0 = vld [vmem:[%s13336_s0 + $0x8] sm:$0xff]  ;;  %v27_v2 = vld [vmem:[%s13336_s0 + $0x18] sm:$0xff]  ;;  %138 = vmatprep.mubr.f32.mxu0 %v13342_v3  ;;  %215 = vmatprep.mubr.f32.mxu1 %v13342_v3  ;;  %v24_v6 = vld [vmem:[%s13336_s0] sm:$0xff]  ;;  %v11081_v34 = vmov 1   ;;  %v11082_v35 = vmov 2   ;;  %v11083_v60 = vmov 3  }
   0x2   :  { %v29_v1 = vld [vmem:[%s13336_s0 + $0x28] sm:$0xff]  ;;  %v31_v5 = vld [vmem:[%s13336_s0 + $0x38] sm:$0xff]  ;;  %v28_v7 = vld [vmem:[%s13336_s0 + $0x20] sm:$0xff]  ;;  %10384 = vset.pattern.permute.xlu0 %v11080_v8  ;;  %10385 = vset.pattern.permute.xlu1 %v11081_v34  ;;  %v11084_v61 = vmov 4   ;;  %v11085_v62 = vmov 5   ;;  %s11092_s15 = smov 4  }
   0x3   :  { %v9991_v4 = vpack.c.bf16 %v29_v1, %v25_v0  ;;  %v9999_v9 = vpack.c.bf16 %v31_v5, %v27_v2  ;;  %v9993_v10 = vpack.c.bf16 %v28_v7, %v24_v6  ;;  %v26_v11 = vld [vmem:[%s13336_s0 + $0x10] sm:$0xff]  ;;  %v33_v13 = vld [vmem:[%s13336_s0 + $0x48] sm:$0xff]  ;;  %v35_v16 = vld [vmem:[%s13336_s0 + $0x58] sm:$0xff]  ;;  %s11095_s17 = smov 122   ;;  %s11096_s18 = smov 8  }
   0x4   :  { %v30_v12 = vld [vmem:[%s13336_s0 + $0x30] sm:$0xff]  ;;  %v37_v15 = vld [vmem:[%s13336_s0 + $0x68] sm:$0xff]  ;;  %v39_v17 = vld [vmem:[%s13336_s0 + $0x78] sm:$0xff]  ;;  %s11097_s19 = smov 120   ;;  %s11098_s20 = smov 10  }
   0x5   :  { %9992 = vmatprep.subr.bf16.mxu0 %v9991_v4  ;;  %v10001_v14 = vpack.c.bf16 %v30_v12, %v26_v11  ;;  %10000 = vmatprep.subr.bf16.mxu1 %v9999_v9  ;;  %v9995_v18 = vpack.c.bf16 %v37_v15, %v33_v13  ;;  %v10003_v19 = vpack.c.bf16 %v39_v17, %v35_v16  ;;  %v32_v20 = vld [vmem:[%s13336_s0 + $0x40] sm:$0xff]  ;;  %v34_v22 = vld [vmem:[%s13336_s0 + $0x50] sm:$0xff]  ;;  %v41_v26 = vld [vmem:[%s13336_s0 + $0x88] sm:$0xf]  ;;  %s11099_s21 = smov 118   ;;  %s11100_s22 = smov 12  }
   0x6   :  { %9994 = vmatpush1.bf16.msra.mxu0 %v9993_v10  ;;  %v36_v21 = vld [vmem:[%s13336_s0 + $0x60] sm:$0xff]  ;;  %v38_v24 = vld [vmem:[%s13336_s0 + $0x70] sm:$0xff]  ;;  %v43_v27 = vld [vmem:[%s13336_s0 + $0x98] sm:$0xf]  ;;  %s11101_s23 = smov 116   ;;  %s11102_s24 = smov 14  }
   0x7   :  { %10002 = vmatpush1.bf16.msra.mxu1 %v10001_v14  ;;  %v9997_v23 = vpack.c.bf16 %v36_v21, %v32_v20  ;;  %9996 = vmatprep.subr.bf16.mxu0 %v9995_v18  ;;  %v10005_v25 = vpack.c.bf16 %v38_v24, %v34_v22  ;;  %v11215_v28 = vld [vmem:[%s13337_s2] sm:$0xff]  ;;  %v11225_v30 = vld [vmem:[%s13337_s2 + $0x8] sm:$0xff]  ;;  %v42_v31 = vld [vmem:[%s13336_s0 + $0x90] sm:$0xf]  ;;  %s11103_s25 = smov 114   ;;  %s11104_s26 = smov 16  }
   0x8   :  { %10004 = vmatprep.subr.bf16.mxu1 %v10003_v19  ;;  %46 = vperm.xlu0 %10384, %v11215_v28   ;;  %v40_v29 = vld [vmem:[%s13336_s0 + $0x80] sm:$0xf]  ;;  %v23_v33 = vld [vmem:[%s13338_s1 + $0x8] sm:$0xff]  ;;  %s11093_s0 = smov 124   ;;  %s11106_s27 = smov 110  }
   0x9   :  { %v22_v32 = vld [vmem:[%s13338_s1] sm:$0xff]  ;;  %s11094_s1 = smov 6   ;;  %s11107_s28 = smov 20  }
   0xa   :  { %9998 = vmatpush1.bf16.msra.mxu0 %v9997_v23  ;;  %s11108_s29 = smov 108   ;;  %s11109_s30 = smov 22  }
   0xb   :  { %10006 = vmatpush1.bf16.msra.mxu1 %v10005_v25  ;;  %8315 = vmatprep.subr.msk.mxu0 %vm61_vm0, %v41_v26  ;;  %v400_v26 = vlaneseq  ;;  %s11110_s6 = smov 106   ;;  %s11111_s7 = smov 24  }
   0xc   :  { %8319 = vmatprep.subr.msk.mxu1 %vm61_vm0, %v43_v27  ;;  %51 = vperm.xlu0 %10384, %v11225_v30   ;;  %s11112_s8 = smov 104   ;;  %s11113_s9 = smov 26  }
   0xd   :  { %v11282_v27 = vshrl.u32 %v400_v26, 7  ;;  %s11114_s10 = smov 102   ;;  %s11115_s11 = smov 28  }
   0xe   :  { %8316 = vmatpush1.msk.msra.mxu0 %vm61_vm0, %v40_v29  ;;  %s11116_s12 = smov 100   ;;  %s11117_s13 = smov 30  }
   0xf   :  { %8320 = vmatpush1.msk.msra.mxu1 %vm61_vm0, %v42_v31  ;;  %8317 = vmatmul.mubr.msk.f32.vlgmr.msra.gmra.mrb[0].mxu0 %vm54_vm1, %v22_v32  ;;  %13372 = vst [vmem:[#allocation2_spill] sm:$0xff] %v11282_v27  ;;  %v417_v29 = vadd.s32 128, %v11282_v27  ;;  %v418_v31 = vadd.s32 136, %v11282_v27 }
  0x10   :  { %8321 = vmatmul.mubr.msk.f32.vlgmr.msra.gmra.mrb[0].mxu1 %vm54_vm1, %v22_v32  ;;  %144 = vmatprep.mubr.f32.mxu0 %v13342_v3 }
  0x11   :  { %221 = vmatprep.mubr.f32.mxu1 %v13342_v3  ;;  %10389 = vset.pattern.permute.xlu0 %v11082_v35 }
  0x13   :  { %8318 = vmatmul.mubr.msk.f32.gmra.mrb[2].mxu0 %vm54_vm1, %v23_v33 }
  0x14   :  { %8322 = vmatmul.mubr.msk.f32.gmra.mrb[2].mxu1 %vm54_vm1, %v23_v33  ;;  %v449_v33 = vadd.s32 384, %v11282_v27 }
  0x87   :  { %v47_v36 = vpop.permute.xlu0 %46 }
  0x8b   :  { %v52_v44 = vpop.permute.xlu0 %51 }
  0xe2   :  { %v140_v37 = vpop.f32.mrb[0].mxu0 }
  0xe3   :  { %v141_v38 = vadd.f32 %v140_v37, %v47_v36  ;;  %v217_v39 = vpop.f32.mrb[0].mxu1  ;;  %v142_v40 = vpop.f32.mrb[1].mxu0 }
  0xe4   :  { %v143_v41 = vadd.f32 %v142_v40, %v47_v36  ;;  %v219_v42 = vpop.f32.mrb[1].mxu1  ;;  %v218_v43 = vadd.f32 %v217_v39, %v47_v36 }
  0xe5   :  { %v220_v50 = vadd.f32 %v219_v42, %v47_v36  ;;  %v434_v42 = vadd.s32 264, %v11282_v27 }
  0xe6   :  { %v228_v45 = vadd.f32 %v143_v41, %v141_v38  ;;  %v146_v46 = vpop.f32.mrb[2].mxu0 }
  0xe7   :  { %v147_v47 = vadd.f32 %v146_v46, %v52_v44  ;;  %v223_v48 = vpop.f32.mrb[2].mxu1  ;;  %v148_v49 = vpop.f32.mrb[3].mxu0 }
  0xe8   :  { %v149_v51 = vadd.f32 %v148_v49, %v52_v44  ;;  %v225_v52 = vpop.f32.mrb[3].mxu1  ;;  %v229_v53 = vadd.f32 %v228_v45, %v218_v43  ;;  %v224_v54 = vadd.f32 %v223_v48, %v52_v44  ;;  %v11086_v45 = vmov 0.0625|0.0625  }
  0xe9   :  { %v226_v57 = vadd.f32 %v225_v52, %v52_v44  ;;  %v420_v48 = vadd.s32 152, %v11282_v27  ;;  %v451_v49 = vadd.s32 400, %v11282_v27 }
  0xea   :  { %v233_v55 = vadd.f32 %v149_v51, %v147_v47  ;;  %v230_v56 = vadd.f32 %v229_v53, %v220_v50  ;;  %v11318_v53 = vadd.s32 16, %v11282_v27 }
  0xec   :  { %231 = vadd.xlane.f32.xlu1 %v230_v56  ;;  %v234_v58 = vadd.f32 %v233_v55, %v224_v54  ;;  %13375 = vst [vmem:[#allocation5_spill] sm:$0xff] %v11318_v53  ;;  %v11323_v55 = vadd.s32 24, %v11282_v27 }
  0xee   :  { %v235_v59 = vadd.f32 %v234_v58, %v226_v57  ;;  %13376 = vst [vmem:[#allocation6_spill] sm:$0xff] %v11323_v55 }
  0xf0   :  { %236 = vadd.xlane.f32.xlu1 %v235_v59  ;;  %v436_v59 = vadd.s32 280, %v11282_v27 }
 0x101   :  { %281 = vperm.xlu1 %10385, %v11215_v28  }
 0x105   :  { %10386 = vset.pattern.permute.xlu1 %v11082_v35  ;;  %v11294_v35 = vadd.s32 8, %v11282_v27 }
 0x106   :  { %297 = vperm.xlu1 %10386, %v11215_v28  }
 0x107   :  { %13374 = vst [vmem:[#allocation4_spill] sm:$0xff] %v11294_v35 }
 0x10a   :  { %10387 = vset.pattern.permute.xlu1 %v11081_v34  ;;  %v450_v34 = vadd.s32 392, %v11282_v27 }
 0x10b   :  { %285 = vperm.xlu1 %10387, %v11225_v30  }
 0x10f   :  { %10388 = vset.pattern.permute.xlu1 %v11083_v60 }
 0x110   :  { %313 = vperm.xlu1 %10388, %v11215_v28  }
 0x114   :  { %10390 = vset.pattern.permute.xlu1 %v11084_v61 }
 0x115   :  { %329 = vperm.xlu1 %10390, %v11215_v28  }
 0x119   :  { %10391 = vset.pattern.permute.xlu1 %v11083_v60  ;;  %v421_v60 = vadd.s32 160, %v11282_v27 }
 0x11a   :  { %317 = vperm.xlu1 %10391, %v11225_v30  }
 0x11e   :  { %10392 = vset.pattern.permute.xlu1 %v11085_v62 }
 0x11f   :  { %377 = vperm.xlu1 %10392, %v11215_v28   ;;  %v11284_v28 = vand.u32 127, %v400_v26 }
 0x121   :  { %13373 = vst [vmem:[#allocation3_spill] sm:$0xff] %v11284_v28  ;;  %v11289_v32 = vmul.u32 16, %v11284_v28 }
 0x123   :  { %10393 = vset.pattern.permute.xlu1 %v11084_v61  ;;  %v484_v36 = vsub.s32 %v417_v29, %v11289_v32  ;;  %v485_v37 = vsub.s32 %v418_v31, %v11289_v32  ;;  %v517_v39 = vsub.s32 %v450_v34, %v11289_v32  ;;  %v468_v40 = vsub.s32 %v11282_v27, %v11289_v32 }
 0x124   :  { %333 = vperm.xlu1 %10393, %v11225_v30   ;;  %v501_v46 = vsub.s32 %v434_v42, %v11289_v32  ;;  %v487_v52 = vsub.s32 %v420_v48, %v11289_v32  ;;  %v470_v58 = vsub.s32 %v11318_v53, %v11289_v32  ;;  %v456_v29 = vadd.s32 440, %v11282_v27 }
 0x125   :  { %vm548_vm2 = vcmp.ge.s32.totalorder %v484_v36, 0  ;;  %vm549_vm3 = vcmp.ge.s32.totalorder %v485_v37, 0  ;;  %vm612_vm4 = vcmp.lt.s32.totalorder %v484_v36, 16  ;;  %vm613_vm5 = vcmp.lt.s32.totalorder %v485_v37, 16 }
 0x126   :  { %vm676_vm6 = vmand %vm548_vm2, %vm612_vm4  ;;  %vm581_vm10 = vcmp.ge.s32.totalorder %v517_v39, 0  ;;  %vm645_vm11 = vcmp.lt.s32.totalorder %v517_v39, 16  ;;  %vm532_vm13 = vcmp.ge.s32.totalorder %v468_v40, 0  ;;  %vm596_vm15 = vcmp.lt.s32.totalorder %v468_v40, 16 }
 0x127   :  { %vm677_vm9 = vmand %vm549_vm3, %vm613_vm5  ;;  %v408_v36 = vadd.s32 56, %v11282_v27  ;;  %v523_v37 = vsub.s32 %v456_v29, %v11289_v32  ;;  %v440_v40 = vadd.s32 312, %v11282_v27  ;;  %v425_v42 = vadd.s32 192, %v11282_v27 }
 0x128   :  { %10394 = vset.pattern.permute.xlu1 %v11085_v62  ;;  %vm10007_vm12 = vmpackc.low %vm677_vm9, %vm676_vm6  ;;  %vm629_vm9 = vcmp.lt.s32.totalorder %v501_v46, 16  ;;  %v422_v62 = vadd.s32 168, %v11282_v27  ;;  %v444_v29 = vadd.s32 344, %v11282_v27 }
 0x129   :  { %10008 = vmatprep.subr.msk.bf16.mxu0 %vm10007_vm12, %v11086_v45  ;;  %vm709_vm0 = vmand %vm581_vm10, %vm645_vm11  ;;  %v492_v48 = vsub.s32 %v425_v42, %v11289_v32  ;;  %v462_v42 = vadd.s32 488, %v11282_v27 }
 0x12a   :  { %vm660_vm4 = vmand %vm532_vm13, %vm596_vm15  ;;  %vm551_vm15 = vcmp.ge.s32.totalorder %v487_v52, 0 }
 0x179   :  { %v232_v63 = vpop.xlane.xlu1 %231 }
 0x17a   :  { %v238_v0 = vmul.f32 0.001953125, %v232_v63  ;;  %v503_v63 = vsub.s32 %v436_v59, %v11289_v32  ;;  %v442_v59 = vadd.s32 328, %v11282_v27 }
 0x17c   :  { %v11250_v1 = vsub.f32 %v141_v38, %v238_v0  ;;  %v11252_v2 = vsub.f32 %v143_v41, %v238_v0  ;;  %v11254_v4 = vsub.f32 %v218_v43, %v238_v0  ;;  %v11256_v6 = vsub.f32 %v220_v50, %v238_v0 }
 0x17d   :  { %v237_v5 = vpop.xlane.xlu1 %236  ;;  %v516_v38 = vsub.s32 %v449_v33, %v11289_v32  ;;  %v433_v41 = vadd.s32 256, %v11282_v27  ;;  %v469_v43 = vsub.s32 %v11294_v35, %v11289_v32  ;;  %v453_v0 = vadd.s32 416, %v11282_v27 }
 0x17e   :  { %v239_v7 = vmul.f32 0.001953125, %v237_v5  ;;  %v248_v8 = vmul.f32 %v11250_v1, %v11250_v1  ;;  %v249_v9 = vmul.f32 %v11252_v2, %v11252_v2  ;;  %v250_v10 = vmul.f32 %v11254_v4, %v11254_v4 }
 0x17f   :  { %v251_v15 = vmul.f32 %v11256_v6, %v11256_v6  ;;  %vm580_vm7 = vcmp.ge.s32.totalorder %v516_v38, 0  ;;  %vm644_vm8 = vcmp.lt.s32.totalorder %v516_v38, 16  ;;  %v500_v44 = vsub.s32 %v433_v41, %v11289_v32 }
 0x180   :  { %v256_v11 = vadd.f32 %v249_v9, %v248_v8  ;;  %v11264_v12 = vsub.f32 %v147_v47, %v239_v7  ;;  %v11266_v13 = vsub.f32 %v149_v51, %v239_v7  ;;  %v11268_v14 = vsub.f32 %v224_v54, %v239_v7  ;;  %vm708_vm14 = vmand %vm580_vm7, %vm644_vm8 }
 0x181   :  { %v11272_v17 = vsub.f32 %v226_v57, %v239_v7  ;;  %v419_v47 = vadd.s32 144, %v11282_v27  ;;  %vm533_vm1 = vcmp.ge.s32.totalorder %v469_v43, 0  ;;  %vm597_vm2 = vcmp.lt.s32.totalorder %v469_v43, 16  ;;  %vm10039_vm3 = vmpackc.low %vm709_vm0, %vm708_vm14 }
 0x182   :  { %v257_v16 = vadd.f32 %v256_v11, %v250_v10  ;;  %v252_v18 = vmul.f32 %v11264_v12, %v11264_v12  ;;  %v253_v19 = vmul.f32 %v11266_v13, %v11266_v13  ;;  %v254_v21 = vmul.f32 %v11268_v14, %v11268_v14  ;;  %10040 = vmatprep.subr.msk.bf16.mxu1 %vm10039_vm3, %v11086_v45  ;;  %vm661_vm7 = vmand %vm533_vm1, %vm597_vm2 }
 0x183   :  { %v255_v23 = vmul.f32 %v11272_v17, %v11272_v17  ;;  %v486_v50 = vsub.s32 %v419_v47, %v11289_v32  ;;  %v452_v51 = vadd.s32 408, %v11282_v27  ;;  %vm564_vm5 = vcmp.ge.s32.totalorder %v500_v44, 0  ;;  %vm10009_vm10 = vmpackc.low %vm661_vm7, %vm660_vm4 }
 0x184   :  { %v258_v20 = vadd.f32 %v257_v16, %v251_v15  ;;  %v261_v22 = vadd.f32 %v253_v19, %v252_v18  ;;  %vm628_vm6 = vcmp.lt.s32.totalorder %v500_v44, 16  ;;  %vm565_vm8 = vcmp.ge.s32.totalorder %v501_v46, 0  ;;  %10010 = vmatpush3.bf16.msk.msra.mxu0 %vm10009_vm10, %v11086_v45 }
 0x185   :  { %v518_v54 = vsub.s32 %v451_v49, %v11289_v32  ;;  %vm692_vm11 = vmand %vm564_vm5, %vm628_vm6  ;;  %vm550_vm12 = vcmp.ge.s32.totalorder %v486_v50, 0  ;;  %vm614_vm13 = vcmp.lt.s32.totalorder %v486_v50, 16  ;;  %v519_v56 = vsub.s32 %v452_v51, %v11289_v32 }
 0x186   :  { %259 = vadd.xlane.f32.xlu0 %v258_v20  ;;  %v262_v24 = vadd.f32 %v261_v22, %v254_v21  ;;  %vm693_vm14 = vmand %vm565_vm8, %vm629_vm9  ;;  %vm615_vm0 = vcmp.lt.s32.totalorder %v487_v52, 16  ;;  %v435_v57 = vadd.s32 272, %v11282_v27  ;;  %vm534_vm10 = vcmp.ge.s32.totalorder %v470_v58, 0 }
 0x187   :  { %vm10041_vm1 = vmpackc.low %vm693_vm14, %vm692_vm11  ;;  %vm582_vm3 = vcmp.ge.s32.totalorder %v518_v54, 0  ;;  %vm646_vm4 = vcmp.lt.s32.totalorder %v518_v54, 16  ;;  %vm583_vm6 = vcmp.ge.s32.totalorder %v519_v56, 0  ;;  %vm647_vm7 = vcmp.lt.s32.totalorder %v519_v56, 16 }
 0x188   :  { %v263_v25 = vadd.f32 %v262_v24, %v255_v23  ;;  %10042 = vmatpush3.bf16.msk.msra.mxu1 %vm10041_vm1, %v11086_v45  ;;  %vm678_vm2 = vmand %vm550_vm12, %vm614_vm13  ;;  %v502_v61 = vsub.s32 %v435_v57, %v11289_v32  ;;  %vm598_vm11 = vcmp.lt.s32.totalorder %v470_v58, 16  ;;  %v488_v5 = vsub.s32 %v421_v60, %v11289_v32 }
 0x189   :  { %vm679_vm5 = vmand %vm551_vm15, %vm615_vm0  ;;  %v454_v7 = vadd.s32 424, %v11282_v27  ;;  %v489_v8 = vsub.s32 %v422_v62, %v11289_v32  ;;  %v405_v9 = vadd.s32 32, %v11282_v27  ;;  %v520_v10 = vsub.s32 %v453_v0, %v11289_v32  ;;  %v11403_v62 = vld [vmem:[%s13339_s3] sm:$0xff] }
 0x18a   :  { %264 = vadd.xlane.f32.xlu1 %v263_v25  ;;  %vm10011_vm8 = vmpackc.low %vm679_vm5, %vm678_vm2  ;;  %vm566_vm1 = vcmp.ge.s32.totalorder %v502_v61, 0  ;;  %vm630_vm2 = vcmp.lt.s32.totalorder %v502_v61, 16  ;;  %vm631_vm5 = vcmp.lt.s32.totalorder %v503_v63, 16  ;;  %v406_v11 = vadd.s32 40, %v11282_v27 }
 0x18b   :  { %10012 = vmatprep.subr.msk.bf16.mxu0 %vm10011_vm8, %v11086_v45  ;;  %vm710_vm9 = vmand %vm582_vm3, %vm646_vm4  ;;  %vm567_vm4 = vcmp.ge.s32.totalorder %v503_v63, 0  ;;  %vm552_vm8 = vcmp.ge.s32.totalorder %v488_v5, 0  ;;  %v521_v15 = vsub.s32 %v454_v7, %v11289_v32  ;;  %v437_v16 = vadd.s32 288, %v11282_v27  ;;  %v11417_v7 = vld [vmem:[%s13339_s3 + $0x8] sm:$0xff] }
 0x18c   :  { %vm711_vm12 = vmand %vm583_vm6, %vm647_vm7  ;;  %v472_v18 = vsub.s32 %v405_v9, %v11289_v32  ;;  %v438_v19 = vadd.s32 296, %v11282_v27  ;;  %v473_v20 = vsub.s32 %v406_v11, %v11289_v32  ;;  %v423_v21 = vadd.s32 176, %v11282_v27  ;;  %v11424_v9 = vld [vmem:[%s13339_s3 + $0x30] sm:$0xff] }
 0x18d   :  { %vm10043_vm15 = vmpackc.low %vm711_vm12, %vm710_vm9  ;;  %vm616_vm9 = vcmp.lt.s32.totalorder %v488_v5, 16  ;;  %vm617_vm12 = vcmp.lt.s32.totalorder %v489_v8, 16  ;;  %v504_v22 = vsub.s32 %v437_v16, %v11289_v32  ;;  %v424_v23 = vadd.s32 184, %v11282_v27  ;;  %v11437_v16 = vld [vmem:[%s13339_s3 + $0x40] sm:$0xff] }
 0x18e   :  { %10044 = vmatprep.subr.msk.bf16.mxu1 %vm10043_vm15, %v11086_v45  ;;  %vm662_vm0 = vmand %vm534_vm10, %vm598_vm11  ;;  %vm553_vm11 = vcmp.ge.s32.totalorder %v489_v8, 0  ;;  %vm584_vm15 = vcmp.ge.s32.totalorder %v520_v10, 0  ;;  %v505_v24 = vsub.s32 %v438_v19, %v11289_v32  ;;  %v455_v25 = vadd.s32 432, %v11282_v27  ;;  %v11444_v19 = vld [vmem:[%s13339_s3 + $0x10] sm:$0xff] }
 0x18f   :  { %vm694_vm7 = vmand %vm566_vm1, %vm630_vm2  ;;  %vm585_vm2 = vcmp.ge.s32.totalorder %v521_v15, 0  ;;  %v490_v26 = vsub.s32 %v423_v21, %v11289_v32  ;;  %v491_v31 = vsub.s32 %v424_v23, %v11289_v32  ;;  %v407_v33 = vadd.s32 48, %v11282_v27 }
 0x190   :  { %vm695_vm10 = vmand %vm567_vm4, %vm631_vm5  ;;  %v522_v34 = vsub.s32 %v455_v25, %v11289_v32  ;;  %v439_v38 = vadd.s32 304, %v11282_v27  ;;  %v475_v41 = vsub.s32 %v408_v36, %v11289_v32  ;;  %v426_v44 = vadd.s32 200, %v11282_v27  ;;  %v11462_v25 = vld [vmem:[%s13339_s3 + $0x50] sm:$0xff] }
 0x191   :  { %vm681_vm1 = vmand %vm553_vm11, %vm617_vm12  ;;  %v474_v39 = vsub.s32 %v407_v33, %v11289_v32  ;;  %v507_v46 = vsub.s32 %v440_v40, %v11289_v32  ;;  %v457_v47 = vadd.s32 448, %v11282_v27  ;;  %v458_v49 = vadd.s32 456, %v11282_v27 }
 0x192   :  { %v506_v43 = vsub.s32 %v439_v38, %v11289_v32  ;;  %v493_v50 = vsub.s32 %v426_v44, %v11289_v32  ;;  %v409_v51 = vadd.s32 64, %v11282_v27  ;;  %v410_v54 = vadd.s32 72, %v11282_v27 }
 0x193   :  { %v524_v52 = vsub.s32 %v457_v47, %v11289_v32  ;;  %v525_v56 = vsub.s32 %v458_v49, %v11289_v32  ;;  %v441_v57 = vadd.s32 320, %v11282_v27  ;;  %v427_v61 = vadd.s32 208, %v11282_v27 }
 0x194   :  { %v476_v58 = vsub.s32 %v409_v51, %v11289_v32  ;;  %v477_v60 = vsub.s32 %v410_v54, %v11289_v32  ;;  %v428_v0 = vadd.s32 216, %v11282_v27  ;;  %v509_v5 = vsub.s32 %v442_v59, %v11289_v32  ;;  %v11515_v54 = vld [vmem:[%s13339_s3 + $0x38] sm:$0xff] }
 0x195   :  { %v508_v63 = vsub.s32 %v441_v57, %v11289_v32  ;;  %v459_v8 = vadd.s32 464, %v11282_v27  ;;  %v460_v11 = vadd.s32 472, %v11282_v27  ;;  %v412_v21 = vadd.s32 88, %v11282_v27 }
 0x196   :  { %v511_v38 = vsub.s32 %v444_v29, %v11289_v32  ;;  %v461_v40 = vadd.s32 480, %v11282_v27  ;;  %v413_v44 = vadd.s32 96, %v11282_v27  ;;  %v529_v49 = vsub.s32 %v462_v42, %v11289_v32 }
 0x197   :  { %v527_v23 = vsub.s32 %v460_v11, %v11289_v32  ;;  %v479_v33 = vsub.s32 %v412_v21, %v11289_v32  ;;  %v431_v57 = vadd.s32 240, %v11282_v27  ;;  %v432_v59 = vadd.s32 248, %v11282_v27 }
 0x198   :  { %v528_v47 = vsub.s32 %v461_v40, %v11289_v32  ;;  %v480_v51 = vsub.s32 %v413_v44, %v11289_v32 }
 0x19b   :  { %381 = vperm.xlu1 %10394, %v11225_v30  }
 0x19c   :  { %301 = vperm.xlu0 %10389, %v11225_v30   ;;  %v471_v30 = vsub.s32 %v11323_v55, %v11289_v32 }
 0x19e   :  { %vm535_vm13 = vcmp.ge.s32.totalorder %v471_v30, 0  ;;  %vm599_vm14 = vcmp.lt.s32.totalorder %v471_v30, 16 }
 0x19f   :  { %vm663_vm3 = vmand %vm535_vm13, %vm599_vm14  ;;  %1217 = vrot.lane.b32.xlu1 %v11403_v62, %s11087_s16 }
 0x1a0   :  { %vm10013_vm6 = vmpackc.low %vm663_vm3, %vm662_vm0  ;;  %vm648_vm0 = vcmp.lt.s32.totalorder %v520_v10, 16  ;;  %vm649_vm3 = vcmp.lt.s32.totalorder %v521_v15, 16  ;;  %v494_v10 = vsub.s32 %v427_v61, %v11289_v32  ;;  %1229 = vrot.lane.b32.xlu0 %v11424_v9, %s11087_s16  ;;  %v495_v15 = vsub.s32 %v428_v0, %v11289_v32 }
 0x1a1   :  { %10014 = vmatpush3.bf16.msk.msra.mxu0 %vm10013_vm6, %v11086_v45  ;;  %vm10045_vm13 = vmpackc.low %vm695_vm10, %vm694_vm7  ;;  %vm536_vm6 = vcmp.ge.s32.totalorder %v472_v18, 0  ;;  %vm600_vm7 = vcmp.lt.s32.totalorder %v472_v18, 16  ;;  %vm601_vm10 = vcmp.lt.s32.totalorder %v473_v20, 16  ;;  %v411_v18 = vadd.s32 80, %v11282_v27 }
 0x1a2   :  { %10046 = vmatpush3.bf16.msk.msra.mxu1 %vm10045_vm13, %v11086_v45  ;;  %vm680_vm14 = vmand %vm552_vm8, %vm616_vm9  ;;  %vm537_vm9 = vcmp.ge.s32.totalorder %v473_v20, 0  ;;  %vm568_vm13 = vcmp.ge.s32.totalorder %v504_v22, 0  ;;  %v526_v20 = vsub.s32 %v459_v8, %v11289_v32  ;;  %v463_v61 = vadd.s32 496, %v11282_v27 }
 0x1a3   :  { %vm10015_vm4 = vmpackc.low %vm681_vm1, %vm680_vm14  ;;  %vm632_vm14 = vcmp.lt.s32.totalorder %v504_v22, 16  ;;  %vm633_vm1 = vcmp.lt.s32.totalorder %v505_v24, 16  ;;  %1219 = vrot.lane.b32.xlu1 %v11417_v7, %s11087_s16  ;;  %v464_v0 = vadd.s32 504, %v11282_v27  ;;  %v415_v8 = vadd.s32 112, %v11282_v27 }
 0x1a4   :  { %10016 = vmatprep.subr.msk.bf16.mxu0 %vm10015_vm4, %v11086_v45  ;;  %vm712_vm5 = vmand %vm584_vm15, %vm648_vm0  ;;  %vm569_vm0 = vcmp.ge.s32.totalorder %v505_v24, 0  ;;  %vm554_vm4 = vcmp.ge.s32.totalorder %v490_v26, 0  ;;  %1233 = vrot.lane.b32.xlu0 %v11437_v16, %s11087_s16  ;;  %v443_v24 = vadd.s32 336, %v11282_v27  ;;  %v530_v11 = vsub.s32 %v463_v61, %v11289_v32 }
 0x1a5   :  { %vm713_vm8 = vmand %vm585_vm2, %vm649_vm3  ;;  %v482_v21 = vsub.s32 %v415_v8, %v11289_v32  ;;  %v448_v22 = vadd.s32 376, %v11282_v27 }
 0x1a6   :  { %vm10047_vm11 = vmpackc.low %vm713_vm8, %vm712_vm5  ;;  %vm618_vm5 = vcmp.lt.s32.totalorder %v490_v26, 16  ;;  %vm619_vm8 = vcmp.lt.s32.totalorder %v491_v31, 16  ;;  %v478_v26 = vsub.s32 %v411_v18, %v11289_v32  ;;  %v510_v36 = vsub.s32 %v443_v24, %v11289_v32  ;;  %v282_v24 = vpop.permute.xlu1 %281 }
 0x1a7   :  { %10048 = vmatprep.subr.msk.bf16.mxu1 %vm10047_vm11, %v11086_v45  ;;  %vm664_vm12 = vmand %vm536_vm6, %vm600_vm7  ;;  %vm555_vm7 = vcmp.ge.s32.totalorder %v491_v31, 0  ;;  %vm586_vm11 = vcmp.ge.s32.totalorder %v522_v34, 0  ;;  %1221 = vrot.lane.b32.xlu1 %v11444_v19, %s11087_s16  ;;  %v11471_v31 = vld [vmem:[%s13339_s3 + $0x18] sm:$0xff]  ;;  %v531_v18 = vsub.s32 %v464_v0, %v11289_v32  ;;  %v515_v29 = vsub.s32 %v448_v22, %v11289_v32 }
 0x1a8   :  { %vm665_vm15 = vmand %vm537_vm9, %vm601_vm10  ;;  %1237 = vrot.lane.b32.xlu0 %v11462_v25, %s11087_s16 }
 0x1a9   :  { %vm10017_vm2 = vmpackc.low %vm665_vm15, %vm664_vm12  ;;  %vm650_vm12 = vcmp.lt.s32.totalorder %v522_v34, 16  ;;  %vm651_vm15 = vcmp.lt.s32.totalorder %v523_v37, 16  ;;  %v429_v34 = vadd.s32 224, %v11282_v27 }
 0x1aa   :  { %10018 = vmatpush3.bf16.msk.msra.mxu0 %vm10017_vm2, %v11086_v45  ;;  %vm696_vm3 = vmand %vm568_vm13, %vm632_vm14  ;;  %vm587_vm14 = vcmp.ge.s32.totalorder %v523_v37, 0  ;;  %vm538_vm2 = vcmp.ge.s32.totalorder %v474_v39, 0  ;;  %v430_v37 = vadd.s32 232, %v11282_v27 }
 0x1ab   :  { %vm697_vm6 = vmand %vm569_vm0, %vm633_vm1  ;;  %1223 = vrot.lane.b32.xlu1 %v11471_v31, %s11087_s16 }
 0x1ac   :  { %vm10049_vm9 = vmpackc.low %vm697_vm6, %vm696_vm3  ;;  %vm602_vm3 = vcmp.lt.s32.totalorder %v474_v39, 16  ;;  %vm603_vm6 = vcmp.lt.s32.totalorder %v475_v41, 16  ;;  %v11488_v39 = vld [vmem:[%s13339_s3 + $0x20] sm:$0xff] }
 0x1ad   :  { %10050 = vmatpush3.bf16.msk.msra.mxu1 %vm10049_vm9, %v11086_v45  ;;  %vm682_vm10 = vmand %vm554_vm4, %vm618_vm5  ;;  %vm539_vm5 = vcmp.ge.s32.totalorder %v475_v41, 0  ;;  %vm570_vm9 = vcmp.ge.s32.totalorder %v506_v43, 0  ;;  %v496_v41 = vsub.s32 %v429_v34, %v11289_v32 }
 0x1ae   :  { %vm683_vm13 = vmand %vm555_vm7, %vm619_vm8 }
 0x1af   :  { %vm10019_vm0 = vmpackc.low %vm683_vm13, %vm682_vm10  ;;  %vm634_vm10 = vcmp.lt.s32.totalorder %v506_v43, 16  ;;  %vm635_vm13 = vcmp.lt.s32.totalorder %v507_v46, 16  ;;  %v497_v43 = vsub.s32 %v430_v37, %v11289_v32  ;;  %1225 = vrot.lane.b32.xlu1 %v11488_v39, %s11087_s16 }
 0x1b0   :  { %10020 = vmatprep.subr.msk.bf16.mxu0 %vm10019_vm0, %v11086_v45  ;;  %vm714_vm1 = vmand %vm586_vm11, %vm650_vm12  ;;  %vm571_vm12 = vcmp.ge.s32.totalorder %v507_v46, 0  ;;  %vm556_vm0 = vcmp.ge.s32.totalorder %v492_v48, 0  ;;  %v11501_v46 = vld [vmem:[%s13339_s3 + $0x28] sm:$0xff] }
 0x1b1   :  { %vm715_vm4 = vmand %vm587_vm14, %vm651_vm15 }
 0x1b2   :  { %vm10051_vm7 = vmpackc.low %vm715_vm4, %vm714_vm1  ;;  %vm620_vm1 = vcmp.lt.s32.totalorder %v492_v48, 16  ;;  %vm621_vm4 = vcmp.lt.s32.totalorder %v493_v50, 16  ;;  %v414_v48 = vadd.s32 104, %v11282_v27 }
 0x1b3   :  { %10052 = vmatprep.subr.msk.bf16.mxu1 %vm10051_vm7, %v11086_v45  ;;  %vm666_vm8 = vmand %vm538_vm2, %vm602_vm3  ;;  %vm557_vm3 = vcmp.ge.s32.totalorder %v493_v50, 0  ;;  %vm588_vm7 = vcmp.ge.s32.totalorder %v524_v52, 0  ;;  %v445_v50 = vadd.s32 352, %v11282_v27  ;;  %1227 = vrot.lane.b32.xlu1 %v11501_v46, %s11087_s16 }
 0x1b4   :  { %vm667_vm11 = vmand %vm539_vm5, %vm603_vm6 }
 0x1b5   :  { %vm10021_vm14 = vmpackc.low %vm667_vm11, %vm666_vm8  ;;  %vm652_vm8 = vcmp.lt.s32.totalorder %v524_v52, 16  ;;  %vm653_vm11 = vcmp.lt.s32.totalorder %v525_v56, 16  ;;  %v446_v52 = vadd.s32 360, %v11282_v27 }
 0x1b6   :  { %10022 = vmatpush3.bf16.msk.msra.mxu0 %vm10021_vm14, %v11086_v45  ;;  %vm698_vm15 = vmand %vm570_vm9, %vm634_vm10  ;;  %vm589_vm10 = vcmp.ge.s32.totalorder %v525_v56, 0  ;;  %vm540_vm14 = vcmp.ge.s32.totalorder %v476_v58, 0  ;;  %v481_v56 = vsub.s32 %v414_v48, %v11289_v32 }
 0x1b7   :  { %vm699_vm2 = vmand %vm571_vm12, %vm635_vm13  ;;  %1231 = vrot.lane.b32.xlu1 %v11515_v54, %s11087_s16  ;;  %v513_v30 = vsub.s32 %v446_v52, %v11289_v32 }
 0x1b8   :  { %vm10053_vm5 = vmpackc.low %vm699_vm2, %vm698_vm15  ;;  %vm604_vm15 = vcmp.lt.s32.totalorder %v476_v58, 16  ;;  %vm605_vm2 = vcmp.lt.s32.totalorder %v477_v60, 16  ;;  %v512_v58 = vsub.s32 %v445_v50, %v11289_v32 }
 0x1b9   :  { %10054 = vmatpush3.bf16.msk.msra.mxu1 %vm10053_vm5, %v11086_v45  ;;  %vm11394_vm6 = vmand %vm556_vm0, %vm620_vm1  ;;  %vm541_vm1 = vcmp.ge.s32.totalorder %v477_v60, 0  ;;  %vm572_vm5 = vcmp.ge.s32.totalorder %v508_v63, 0  ;;  %v11529_v60 = vld [vmem:[%s13339_s3 + $0x48] sm:$0xff] }
 0x1ba   :  { %vm685_vm9 = vmand %vm557_vm3, %vm621_vm4 }
 0x1bb   :  { %vm10023_vm12 = vmpackc.low %vm685_vm9, %vm11394_vm6  ;;  %vm636_vm6 = vcmp.lt.s32.totalorder %v508_v63, 16  ;;  %vm637_vm9 = vcmp.lt.s32.totalorder %v509_v5, 16  ;;  %v498_v63 = vsub.s32 %v431_v57, %v11289_v32  ;;  %1235 = vrot.lane.b32.xlu1 %v11529_v60, %s11087_s16 }
 0x1bc   :  { %10024 = vmatprep.subr.msk.bf16.mxu0 %vm10023_vm12, %v11086_v45  ;;  %vm716_vm13 = vmand %vm588_vm7, %vm652_vm8  ;;  %vm573_vm8 = vcmp.ge.s32.totalorder %v509_v5, 0  ;;  %vm558_vm12 = vcmp.ge.s32.totalorder %v494_v10, 0  ;;  %v499_v5 = vsub.s32 %v432_v59, %v11289_v32 }
 0x1bd   :  { %vm717_vm0 = vmand %vm589_vm10, %vm653_vm11 }
 0x1be   :  { %vm10055_vm3 = vmpackc.low %vm717_vm0, %vm716_vm13  ;;  %vm622_vm13 = vcmp.lt.s32.totalorder %v494_v10, 16  ;;  %vm623_vm0 = vcmp.lt.s32.totalorder %v495_v15, 16  ;;  %v11542_v10 = vld [vmem:[%s13339_s3 + $0x58] sm:$0xff]  ;;  %s11090_s3 = smov 2  }
 0x1bf   :  { %10056 = vmatprep.subr.msk.bf16.mxu1 %vm10055_vm3, %v11086_v45  ;;  %vm668_vm4 = vmand %vm540_vm14, %vm604_vm15  ;;  %vm559_vm15 = vcmp.ge.s32.totalorder %v495_v15, 0  ;;  %vm590_vm3 = vcmp.ge.s32.totalorder %v526_v20, 0  ;;  %v416_v15 = vadd.s32 120, %v11282_v27  ;;  %1239 = vrot.lane.b32.xlu1 %v11542_v10, %s11087_s16 }
 0x1c0   :  { %vm669_vm7 = vmand %vm541_vm1, %vm605_vm2 }
 0x1c1   :  { %vm10025_vm10 = vmpackc.low %vm669_vm7, %vm668_vm4  ;;  %vm654_vm4 = vcmp.lt.s32.totalorder %v526_v20, 16  ;;  %vm655_vm7 = vcmp.lt.s32.totalorder %v527_v23, 16  ;;  %v447_v20 = vadd.s32 368, %v11282_v27 }
 0x1c2   :  { %10026 = vmatpush3.bf16.msk.msra.mxu0 %vm10025_vm10, %v11086_v45  ;;  %vm11449_vm11 = vmand %vm572_vm5, %vm636_vm6  ;;  %vm591_vm6 = vcmp.ge.s32.totalorder %v527_v23, 0  ;;  %vm542_vm10 = vcmp.ge.s32.totalorder %v478_v26, 0  ;;  %v483_v23 = vsub.s32 %v416_v15, %v11289_v32 }
 0x1c3   :  { %vm701_vm14 = vmand %vm573_vm8, %vm637_vm9 }
 0x1c4   :  { %vm10057_vm1 = vmpackc.low %vm701_vm14, %vm11449_vm11  ;;  %vm606_vm11 = vcmp.lt.s32.totalorder %v478_v26, 16  ;;  %vm607_vm14 = vcmp.lt.s32.totalorder %v479_v33, 16  ;;  %v514_v26 = vsub.s32 %v447_v20, %v11289_v32 }
 0x1c5   :  { %10058 = vmatpush3.bf16.msk.msra.mxu1 %vm10057_vm1, %v11086_v45  ;;  %vm686_vm2 = vmand %vm558_vm12, %vm622_vm13  ;;  %vm543_vm13 = vcmp.ge.s32.totalorder %v479_v33, 0  ;;  %vm574_vm1 = vcmp.ge.s32.totalorder %v510_v36, 0  ;;  %v298_v33 = vpop.permute.xlu1 %297 }
 0x1c6   :  { %vm687_vm5 = vmand %vm559_vm15, %vm623_vm0 }
 0x1c7   :  { %vm10027_vm8 = vmpackc.low %vm687_vm5, %vm686_vm2  ;;  %vm638_vm2 = vcmp.lt.s32.totalorder %v510_v36, 16  ;;  %vm639_vm5 = vcmp.lt.s32.totalorder %v511_v38, 16 }
 0x1c8   :  { %10028 = vmatprep.subr.msk.bf16.mxu0 %vm10027_vm8, %v11086_v45  ;;  %vm718_vm9 = vmand %vm590_vm3, %vm654_vm4  ;;  %vm575_vm4 = vcmp.ge.s32.totalorder %v511_v38, 0  ;;  %vm560_vm8 = vcmp.ge.s32.totalorder %v496_v41, 0 }
 0x1c9   :  { %vm719_vm12 = vmand %vm591_vm6, %vm655_vm7  ;;  %v286_v32 = vpop.permute.xlu1 %285 }
 0x1ca   :  { %vm10059_vm15 = vmpackc.low %vm719_vm12, %vm718_vm9  ;;  %vm624_vm9 = vcmp.lt.s32.totalorder %v496_v41, 16  ;;  %vm625_vm12 = vcmp.lt.s32.totalorder %v497_v43, 16 }
 0x1cb   :  { %10060 = vmatprep.subr.msk.bf16.mxu1 %vm10059_vm15, %v11086_v45  ;;  %vm670_vm0 = vmand %vm542_vm10, %vm606_vm11  ;;  %vm561_vm11 = vcmp.ge.s32.totalorder %v497_v43, 0  ;;  %vm592_vm15 = vcmp.ge.s32.totalorder %v528_v47, 0 }
 0x1cc   :  { %vm671_vm3 = vmand %vm543_vm13, %vm607_vm14 }
 0x1cd   :  { %vm10029_vm6 = vmpackc.low %vm671_vm3, %vm670_vm0  ;;  %vm656_vm0 = vcmp.lt.s32.totalorder %v528_v47, 16  ;;  %vm657_vm3 = vcmp.lt.s32.totalorder %v529_v49, 16  ;;  %v314_v34 = vpop.permute.xlu1 %313 }
 0x1ce   :  { %10030 = vmatpush3.bf16.msk.msra.mxu0 %vm10029_vm6, %v11086_v45  ;;  %vm702_vm7 = vmand %vm574_vm1, %vm638_vm2  ;;  %vm593_vm2 = vcmp.ge.s32.totalorder %v529_v49, 0  ;;  %vm544_vm6 = vcmp.ge.s32.totalorder %v480_v51, 0 }
 0x1cf   :  { %vm703_vm10 = vmand %vm575_vm4, %vm639_vm5 }
 0x1d0   :  { %vm10061_vm13 = vmpackc.low %vm703_vm10, %vm702_vm7  ;;  %vm608_vm7 = vcmp.lt.s32.totalorder %v480_v51, 16  ;;  %vm609_vm10 = vcmp.lt.s32.totalorder %v481_v56, 16 }
 0x1d1   :  { %10062 = vmatpush3.bf16.msk.msra.mxu1 %vm10061_vm13, %v11086_v45  ;;  %vm688_vm14 = vmand %vm560_vm8, %vm624_vm9  ;;  %vm545_vm9 = vcmp.ge.s32.totalorder %v481_v56, 0  ;;  %vm576_vm13 = vcmp.ge.s32.totalorder %v512_v58, 0  ;;  %v330_v36 = vpop.permute.xlu1 %329 }
 0x1d2   :  { %vm689_vm1 = vmand %vm561_vm11, %vm625_vm12 }
 0x1d3   :  { %vm10031_vm4 = vmpackc.low %vm689_vm1, %vm688_vm14  ;;  %vm640_vm14 = vcmp.lt.s32.totalorder %v512_v58, 16  ;;  %vm641_vm1 = vcmp.lt.s32.totalorder %v513_v30, 16 }
 0x1d4   :  { %10032 = vmatprep.subr.msk.bf16.mxu0 %vm10031_vm4, %v11086_v45  ;;  %vm720_vm5 = vmand %vm592_vm15, %vm656_vm0  ;;  %vm577_vm0 = vcmp.ge.s32.totalorder %v513_v30, 0  ;;  %vm562_vm4 = vcmp.ge.s32.totalorder %v498_v63, 0 }
 0x1d5   :  { %vm721_vm8 = vmand %vm593_vm2, %vm657_vm3  ;;  %v11561_v37 = vpop.permute.xlu1 %317 }
 0x1d6   :  { %vm10063_vm11 = vmpackc.low %vm721_vm8, %vm720_vm5  ;;  %vm626_vm5 = vcmp.lt.s32.totalorder %v498_v63, 16  ;;  %vm627_vm8 = vcmp.lt.s32.totalorder %v499_v5, 16 }
 0x1d7   :  { %10064 = vmatprep.subr.msk.bf16.mxu1 %vm10063_vm11, %v11086_v45  ;;  %vm672_vm12 = vmand %vm544_vm6, %vm608_vm7  ;;  %vm563_vm7 = vcmp.ge.s32.totalorder %v499_v5, 0  ;;  %vm594_vm11 = vcmp.ge.s32.totalorder %v530_v11, 0 }
 0x1d8   :  { %vm673_vm15 = vmand %vm545_vm9, %vm609_vm10 }
 0x1d9   :  { %vm10033_vm2 = vmpackc.low %vm673_vm15, %vm672_vm12  ;;  %vm658_vm12 = vcmp.lt.s32.totalorder %v530_v11, 16  ;;  %vm659_vm15 = vcmp.lt.s32.totalorder %v531_v18, 16  ;;  %v11563_v38 = vpop.permute.xlu1 %377 }
 0x1da   :  { %10034 = vmatpush3.bf16.msk.msra.mxu0 %vm10033_vm2, %v11086_v45  ;;  %vm704_vm3 = vmand %vm576_vm13, %vm640_vm14  ;;  %vm595_vm14 = vcmp.ge.s32.totalorder %v531_v18, 0  ;;  %vm546_vm2 = vcmp.ge.s32.totalorder %v482_v21, 0 }
 0x1db   :  { %vm705_vm6 = vmand %vm577_vm0, %vm641_vm1 }
 0x1dc   :  { %vm10065_vm9 = vmpackc.low %vm705_vm6, %vm704_vm3  ;;  %vm610_vm3 = vcmp.lt.s32.totalorder %v482_v21, 16 }
 0x1dd   :  { %10066 = vmatpush3.bf16.msk.msra.mxu1 %vm10065_vm9, %v11086_v45  ;;  %vm690_vm10 = vmand %vm562_vm4, %vm626_vm5  ;;  %vm547_vm4 = vcmp.ge.s32.totalorder %v483_v23, 0  ;;  %vm611_vm5 = vcmp.lt.s32.totalorder %v483_v23, 16  ;;  %v11565_v40 = vpop.permute.xlu1 %333 }
 0x1de   :  { %vm691_vm13 = vmand %vm563_vm7, %vm627_vm8  ;;  %vm578_vm8 = vcmp.ge.s32.totalorder %v514_v26, 0 }
 0x1df   :  { %vm10035_vm0 = vmpackc.low %vm691_vm13, %vm690_vm10  ;;  %vm642_vm10 = vcmp.lt.s32.totalorder %v514_v26, 16 }
 0x1e0   :  { %10036 = vmatprep.subr.msk.bf16.mxu0 %vm10035_vm0, %v11086_v45  ;;  %vm722_vm1 = vmand %vm594_vm11, %vm658_vm12  ;;  %vm579_vm0 = vcmp.ge.s32.totalorder %v515_v29, 0  ;;  %vm643_vm11 = vcmp.lt.s32.totalorder %v515_v29, 16 }
 0x1e1   :  { %vm723_vm6 = vmand %vm595_vm14, %vm659_vm15 }
 0x1e2   :  { %vm10067_vm9 = vmpackc.low %vm723_vm6, %vm722_vm1  ;;  %vm1775_vm6 = vcmask 1041408  }
 0x1e3   :  { %10068 = vmatprep.subr.msk.bf16.mxu1 %vm10067_vm9, %v11086_v45  ;;  %vm674_vm7 = vmand %vm546_vm2, %vm610_vm3  ;;  %vm1018_vm2 = vcmask 130048   ;;  %vm13371_vm3 = vcmask 261120   ;;  %vm1766_vm9 = vcmask 15360  }
 0x1e4   :  { %vm675_vm13 = vmand %vm547_vm4, %vm611_vm5 }
 0x1e5   :  { %vm10037_vm12 = vmpackc.low %vm675_vm13, %vm674_vm7 }
 0x1e6   :  { %10038 = vmatpush3.bf16.msk.msra.mxu0 %vm10037_vm12, %v11086_v45  ;;  %vm706_vm14 = vmand %vm578_vm8, %vm642_vm10 }
 0x1e7   :  { %vm707_vm15 = vmand %vm579_vm0, %vm643_vm11 }
 0x1e8   :  { %vm10069_vm1 = vmpackc.low %vm707_vm15, %vm706_vm14 }
 0x1e9   :  { %10070 = vmatpush3.bf16.msk.msra.mxu1 %vm10069_vm1, %v11086_v45 }
 0x213   :  { %v260_v41 = vpop.xlane.xlu0 %259 }
 0x214   :  { %v266_v42 = vmul.f32 0.001953125, %v260_v41 }
 0x216   :  { %v268_v43 = vadd.f32 1e-05, %v266_v42 }
 0x217   :  { %v265_v44 = vpop.xlane.xlu1 %264 }
 0x218   :  { %10417 = vrsqrt.f32 %v268_v43  ;;  %v267_v47 = vmul.f32 0.001953125, %v265_v44 }
 0x21a   :  { %v269_v48 = vadd.f32 1e-05, %v267_v47 }
 0x21c   :  { %10419 = vrsqrt.f32 %v269_v48 }
 0x222   :  { %v10418_v49 = vpop.eup %10417 }
 0x223   :  { %v273_v45 = vmul.f32 %v10418_v49, %v11252_v2  ;;  %v275_v50 = vmul.f32 %v10418_v49, %v11256_v6  ;;  %v272_v51 = vmul.f32 %v10418_v49, %v11250_v1  ;;  %v274_v52 = vmul.f32 %v10418_v49, %v11254_v4  ;;  %v302_v2 = vpop.permute.xlu0 %301 }
 0x225   :  { %v289_v56 = vmul.f32 %v282_v24, %v273_v45  ;;  %v291_v57 = vmul.f32 %v282_v24, %v275_v50  ;;  %v288_v58 = vmul.f32 %v282_v24, %v272_v51  ;;  %v290_v59 = vmul.f32 %v282_v24, %v274_v52 }
 0x226   :  { %v10420_v30 = vpop.eup %10419 }
 0x227   :  { %v276_v61 = vmul.f32 %v10420_v30, %v11264_v12  ;;  %v277_v63 = vmul.f32 %v10420_v30, %v11266_v13  ;;  %v278_v0 = vmul.f32 %v10420_v30, %v11268_v14  ;;  %v279_v5 = vmul.f32 %v10420_v30, %v11272_v17 }
 0x228   :  { %v305_v8 = vadd.f32 %v298_v33, %v289_v56  ;;  %v307_v6 = vadd.f32 %v298_v33, %v291_v57  ;;  %v304_v11 = vadd.f32 %v298_v33, %v288_v58  ;;  %v306_v1 = vadd.f32 %v298_v33, %v290_v59 }
 0x229   :  { %v292_v15 = vmul.f32 %v286_v32, %v276_v61  ;;  %v293_v4 = vmul.f32 %v286_v32, %v277_v63  ;;  %v294_v18 = vmul.f32 %v286_v32, %v278_v0  ;;  %v295_v20 = vmul.f32 %v286_v32, %v279_v5 }
 0x22a   :  { %v321_v21 = vmul.f32 %v314_v34, %v305_v8  ;;  %v345_v22 = vmax.f32 %v305_v8, 0.0  ;;  %v361_v23 = vsub.f32 0.0, %v305_v8  ;;  %v323_v24 = vmul.f32 %v314_v34, %v307_v6 }
 0x22b   :  { %v11575_v12 = vadd.f32 %v302_v2, %v292_v15  ;;  %v309_v13 = vadd.f32 %v302_v2, %v293_v4  ;;  %v11577_v26 = vadd.f32 %v302_v2, %v294_v18  ;;  %v311_v14 = vadd.f32 %v302_v2, %v295_v20  ;;  %v382_v4 = vpop.permute.xlu1 %381 }
 0x22c   :  { %v337_v17 = vadd.f32 %v330_v36, %v321_v21  ;;  %v369_v29 = vmax.f32 %v361_v23, 0.0  ;;  %v339_v41 = vadd.f32 %v330_v36, %v323_v24  ;;  %v347_v42 = vmax.f32 %v307_v6, 0.0 }
 0x22d   :  { %v363_v43 = vsub.f32 0.0, %v307_v6  ;;  %v320_v33 = vmul.f32 %v314_v34, %v304_v11  ;;  %v344_v44 = vmax.f32 %v304_v11, 0.0  ;;  %v360_v47 = vsub.f32 0.0, %v304_v11 }
 0x22e   :  { %v353_v48 = vadd.f32 %v345_v22, %v337_v17  ;;  %v385_v32 = vmul.f32 %v11563_v38, %v369_v29  ;;  %v355_v49 = vadd.f32 %v347_v42, %v339_v41  ;;  %v322_v45 = vmul.f32 %v314_v34, %v306_v1 }
 0x22f   :  { %v371_v50 = vmax.f32 %v363_v43, 0.0  ;;  %v336_v51 = vadd.f32 %v330_v36, %v320_v33  ;;  %v368_v52 = vmax.f32 %v360_v47, 0.0  ;;  %v346_v56 = vmax.f32 %v306_v1, 0.0 }
 0x230   :  { %v11580_v57 = vadd.f32 %v385_v32, %v353_v48  ;;  %v338_v58 = vadd.f32 %v330_v36, %v322_v45  ;;  %v362_v59 = vsub.f32 0.0, %v306_v1  ;;  %v325_v30 = vmul.f32 %v11561_v37, %v309_v13 }
 0x231   :  { %v387_v61 = vmul.f32 %v11563_v38, %v371_v50  ;;  %v352_v63 = vadd.f32 %v344_v44, %v336_v51  ;;  %v384_v0 = vmul.f32 %v11563_v38, %v368_v52  ;;  %v349_v5 = vmax.f32 %v309_v13, 0.0 }
 0x232   :  { %13381 = vst [vmem:[#allocation7_spill] sm:$0xff] %v11580_v57  ;;  %v789_v2 = vmul.f32 %v11580_v57, %v11580_v57  ;;  %v354_v34 = vadd.f32 %v346_v56, %v338_v58  ;;  %v370_v8 = vmax.f32 %v362_v59, 0.0  ;;  %v341_v6 = vadd.f32 %v11565_v40, %v325_v30 }
 0x233   :  { %v11588_v11 = vadd.f32 %v387_v61, %v355_v49  ;;  %v11590_v15 = vadd.f32 %v384_v0, %v352_v63  ;;  %v365_v36 = vsub.f32 0.0, %v309_v13  ;;  %v327_v1 = vmul.f32 %v11561_v37, %v311_v14 }
 0x234   :  { %860 = vmatprep.mubr.f32.mxu0 %v789_v2  ;;  %v386_v18 = vmul.f32 %v11563_v38, %v370_v8  ;;  %v357_v20 = vadd.f32 %v349_v5, %v341_v6  ;;  %v351_v21 = vmax.f32 %v311_v14, 0.0  ;;  %v367_v22 = vsub.f32 0.0, %v311_v14 }
 0x235   :  { %13382 = vst [vmem:[#allocation8_spill] sm:$0xff] %v11588_v11  ;;  %13383 = vst [vmem:[#allocation9_spill] sm:$0xff] %v11590_v15  ;;  %v791_v23 = vmul.f32 %v11588_v11, %v11588_v11  ;;  %v788_v24 = vmul.f32 %v11590_v15, %v11590_v15  ;;  %v373_v17 = vmax.f32 %v365_v36, 0.0  ;;  %v343_v29 = vadd.f32 %v11565_v40, %v327_v1 }
 0x236   :  { %v11599_v41 = vadd.f32 %v386_v18, %v354_v34  ;;  %v375_v13 = vmax.f32 %v367_v22, 0.0  ;;  %v324_v42 = vmul.f32 %v11561_v37, %v11575_v12  ;;  %v348_v38 = vmax.f32 %v11575_v12, 0.0 }
 0x237   :  { %935 = vmatprep.mubr.f32.mxu1 %v791_v23  ;;  %861 = vmatmul.mubr.f32.vlgmr.msra.gmra.mrb[4].mxu0 %v788_v24  ;;  %v389_v14 = vmul.f32 %v382_v4, %v373_v17  ;;  %v359_v43 = vadd.f32 %v351_v21, %v343_v29  ;;  %v364_v33 = vsub.f32 0.0, %v11575_v12  ;;  %v326_v44 = vmul.f32 %v11561_v37, %v11577_v26 }
 0x238   :  { %13384 = vst [vmem:[#allocation10_spill] sm:$0xff] %v11599_v41  ;;  %v790_v47 = vmul.f32 %v11599_v41, %v11599_v41  ;;  %v391_v48 = vmul.f32 %v382_v4, %v375_v13  ;;  %v340_v32 = vadd.f32 %v11565_v40, %v324_v42  ;;  %v350_v49 = vmax.f32 %v11577_v26, 0.0 }
 0x239   :  { %v11611_v45 = vadd.f32 %v389_v14, %v357_v20  ;;  %v372_v50 = vmax.f32 %v364_v33, 0.0  ;;  %v342_v51 = vadd.f32 %v11565_v40, %v326_v44  ;;  %v366_v52 = vsub.f32 0.0, %v11577_v26 }
 0x23a   :  { %936 = vmatmul.mubr.f32.vlgmr.msra.gmra.mrb[4].mxu1 %v790_v47  ;;  %v11615_v12 = vadd.f32 %v391_v48, %v359_v43  ;;  %v356_v56 = vadd.f32 %v348_v38, %v340_v32  ;;  %v11088_v2 = vmov 48   ;;  %v11089_v34 = vmov 49  }
 0x23b   :  { %13385 = vst [vmem:[#allocation11_spill] sm:$0xff] %v11611_v45  ;;  %v793_v37 = vmul.f32 %v11611_v45, %v11611_v45  ;;  %v388_v58 = vmul.f32 %v382_v4, %v372_v50  ;;  %v358_v59 = vadd.f32 %v350_v49, %v342_v51  ;;  %v374_v30 = vmax.f32 %v366_v52, 0.0  ;;  %10396 = vset.pattern.permute.xlu1 %v11088_v2 }
 0x23c   :  { %13386 = vst [vmem:[#allocation12_spill] sm:$0xff] %v11615_v12  ;;  %v795_v61 = vmul.f32 %v11615_v12, %v11615_v12  ;;  %10395 = vset.pattern.permute.xlu0 %v11088_v2  ;;  %965 = vperm.xlu1 %10396, %v11417_v7  }
 0x23d   :  { %865 = vmatprep.mubr.f32.mxu0 %v793_v37  ;;  %v11621_v63 = vadd.f32 %v388_v58, %v356_v56  ;;  %v390_v0 = vmul.f32 %v382_v4, %v374_v30  ;;  %960 = vperm.xlu0 %10395, %v11403_v62  }
 0x23e   :  { %940 = vmatprep.mubr.f32.mxu1 %v795_v61 }
 0x23f   :  { %13387 = vst [vmem:[#allocation13_spill] sm:$0xff] %v11621_v63  ;;  %v792_v40 = vmul.f32 %v11621_v63, %v11621_v63  ;;  %v11625_v26 = vadd.f32 %v390_v0, %v358_v59 }
 0x240   :  { %10397 = vset.pattern.permute.xlu1 %v11089_v34 }
 0x241   :  { %13388 = vst [vmem:[#allocation14_spill] sm:$0xff] %v11625_v26  ;;  %866 = vmatmul.mubr.f32.gmra.mrb[6].mxu0 %v792_v40  ;;  %v794_v5 = vmul.f32 %v11625_v26, %v11625_v26  ;;  %980 = vperm.xlu0 %10395, %v11488_v39  }
 0x242   :  { %9350 = vmatprep.mubr.msk.f32.mxu0 %vm1018_vm2, %v11403_v62  ;;  %1170 = vperm.xlu1 %10397, %v11403_v62   ;;  %v11657_v62 = vpop.permute.xlu1 %1217 }
 0x243   :  { %941 = vmatmul.mubr.f32.gmra.mrb[6].mxu1 %v794_v5 }
 0x244   :  { %9365 = vmatprep.mubr.msk.f32.mxu1 %vm1018_vm2, %v11462_v25 }
 0x245   :  { %10400 = vset.pattern.permute.xlu0 %v11089_v34 }
 0x246   :  { %10398 = vset.pattern.permute.xlu1 %v11088_v2  ;;  %1174 = vperm.xlu0 %10400, %v11417_v7   ;;  %v11659_v20 = vpop.permute.xlu1 %1219 }
 0x247   :  { %970 = vperm.xlu1 %10398, %v11444_v19  }
 0x24a   :  { %1178 = vperm.xlu0 %10400, %v11444_v19   ;;  %v11661_v24 = vpop.permute.xlu1 %1221 }
 0x24b   :  { %975 = vperm.xlu1 %10398, %v11471_v31  }
 0x24e   :  { %1190 = vperm.xlu0 %10400, %v11501_v46   ;;  %v11663_v38 = vpop.permute.xlu1 %1223 }
 0x24f   :  { %10399 = vset.pattern.permute.xlu1 %v11089_v34 }
 0x250   :  { %1182 = vperm.xlu1 %10399, %v11471_v31  }
 0x252   :  { %1194 = vperm.xlu0 %10400, %v11424_v9   ;;  %v11666_v43 = vpop.permute.xlu1 %1225 }
 0x254   :  { %10401 = vset.pattern.permute.xlu1 %v11088_v2 }
 0x255   :  { %985 = vperm.xlu1 %10401, %v11501_v46  }
 0x256   :  { %10405 = vset.pattern.permute.xlu0 %v11088_v2 }
 0x257   :  { %1000 = vperm.xlu0 %10405, %v11437_v16  }
 0x259   :  { %10402 = vset.pattern.permute.xlu1 %v11089_v34 }
 0x25a   :  { %1186 = vperm.xlu1 %10402, %v11488_v39  }
 0x25b   :  { %10406 = vset.pattern.permute.xlu0 %v11089_v34 }
 0x25c   :  { %1202 = vperm.xlu0 %10406, %v11437_v16  }
 0x25e   :  { %10403 = vset.pattern.permute.xlu1 %v11088_v2 }
 0x25f   :  { %990 = vperm.xlu1 %10403, %v11424_v9  }
 0x260   :  { %1214 = vperm.xlu0 %10406, %v11542_v10  }
 0x263   :  { %995 = vperm.xlu1 %10403, %v11515_v54  }
 0x267   :  { %10404 = vset.pattern.permute.xlu1 %v11089_v34 }
 0x268   :  { %1198 = vperm.xlu1 %10404, %v11515_v54  }
 0x26c   :  { %1206 = vperm.xlu1 %10404, %v11529_v60  }
 0x270   :  { %10407 = vset.pattern.permute.xlu1 %v11088_v2 }
 0x271   :  { %1005 = vperm.xlu1 %10407, %v11529_v60  }
 0x275   :  { %10408 = vset.pattern.permute.xlu1 %v11089_v34 }
 0x276   :  { %1210 = vperm.xlu1 %10408, %v11462_v25  }
 0x27a   :  { %10409 = vset.pattern.permute.xlu1 %v11088_v2 }
 0x27b   :  { %1010 = vperm.xlu1 %10409, %v11462_v25  }
 0x27f   :  { %1015 = vperm.xlu1 %10409, %v11542_v10  }
 0x30a   :  { %v8909_v8 = vpop.f32.mrb[4].mxu0 }
 0x30b   :  { %v8910_v6 = vpop.f32.mrb[5].mxu0 }
 0x30c   :  { %v8911_v36 = vadd.f32 %v8910_v6, %v8909_v8 }
 0x30d   :  { %v8947_v1 = vpop.f32.mrb[4].mxu1 }
 0x30e   :  { %v8948_v4 = vpop.f32.mrb[5].mxu1 }
 0x30f   :  { %v8949_v18 = vadd.f32 %v8948_v4, %v8947_v1 }
 0x311   :  { %v938_v21 = vadd.f32 %v8949_v18, %v8911_v36 }
 0x314   :  { %v8912_v22 = vpop.f32.mrb[6].mxu0 }
 0x315   :  { %v8913_v23 = vpop.f32.mrb[7].mxu0 }
 0x316   :  { %v8950_v17 = vpop.f32.mrb[6].mxu1  ;;  %v8914_v29 = vadd.f32 %v8913_v23, %v8912_v22 }
 0x317   :  { %v8951_v25 = vpop.f32.mrb[7].mxu1 }
 0x318   :  { %v8952_v13 = vadd.f32 %v8951_v25, %v8950_v17 }
 0x31a   :  { %v943_v42 = vadd.f32 %v8952_v13, %v8914_v29 }
 0x31c   :  { %v10071_v14 = vpack.c.bf16 %v943_v42, %v938_v21 }
 0x31e   :  { %10072 = vmatprep.subr.bf16.mxu0 %v10071_v14  ;;  %10275 = vmatprep.subr.bf16.mxu1 %v10071_v14 }
 0x31f   :  { %10074 = vmatpush3.bf16.msra.mxu0 %v10071_v14  ;;  %10276 = vmatpush3.bf16.msra.mxu1 %v10071_v14 }
 0x320   :  { %9368 = vmatprep.subr.mxu1 %v13342_v3 }
 0x322   :  { %9351 = vmatmul.mubr.msk.f32.vlgmr.msra.gmra.mrb[8].mxu0 %vm1018_vm2, %v11417_v7  ;;  %9366 = vmatmul.mubr.msk.f32.vlgmr.msra.gmra.mrb[8].mxu1 %vm1018_vm2, %v11542_v10  ;;  %v11685_v7 = vpop.permute.xlu1 %1227 }
 0x323   :  { %9370 = vmatprep.mubr.msk.f32.mxu1 %vm13371_vm3, %v11657_v62  ;;  %9353 = vmatprep.mubr.msk.f32.mxu0 %vm1018_vm2, %v11444_v19  ;;  %v11691_v19 = vpop.permute.xlu0 %1229 }
 0x324   :  { %9369 = vmatpush3.msra.mxu1 %v13342_v3 }
 0x326   :  { %9354 = vmatmul.mubr.msk.f32.gmra.mrb[10].mxu0 %vm1018_vm2, %v11471_v31  ;;  %9371 = vmatmul.mubr.msk.f32.vlgmr.msra.gmra.mrb[10].mxu1 %vm13371_vm3, %v11659_v20  ;;  %v11697_v31 = vpop.permute.xlu1 %1231 }
 0x327   :  { %9373 = vmatprep.mubr.msk.f32.mxu1 %vm13371_vm3, %v11661_v24  ;;  %9356 = vmatprep.mubr.msk.f32.mxu0 %vm1018_vm2, %v11488_v39  ;;  %v11707_v39 = vpop.permute.xlu0 %1233 }
 0x32a   :  { %9357 = vmatmul.mubr.msk.f32.gmra.mrb[12].mxu0 %vm1018_vm2, %v11501_v46  ;;  %9374 = vmatmul.mubr.msk.f32.gmra.mrb[12].mxu1 %vm13371_vm3, %v11663_v38 }
 0x32b   :  { %9359 = vmatprep.mubr.msk.f32.mxu0 %vm1018_vm2, %v11424_v9  ;;  %9376 = vmatprep.mubr.msk.f32.mxu1 %vm13371_vm3, %v11666_v43  ;;  %v11717_v9 = vpop.permute.xlu1 %1235 }
 0x32e   :  { %9360 = vmatmul.mubr.msk.f32.gmra.mrb[14].mxu0 %vm1018_vm2, %v11515_v54  ;;  %9377 = vmatmul.mubr.msk.f32.gmra.mrb[14].mxu1 %vm13371_vm3, %v11685_v7 }
 0x32f   :  { %9362 = vmatprep.mubr.msk.f32.mxu0 %vm1018_vm2, %v11437_v16  ;;  %9379 = vmatprep.mubr.msk.f32.mxu1 %vm13371_vm3, %v11691_v19  ;;  %v11719_v16 = vpop.permute.xlu0 %1237  ;;  %v11725_v46 = vpop.permute.xlu1 %1239 }
 0x332   :  { %9363 = vmatmul.mubr.msk.f32.gmra.mrb[16].mxu0 %vm1018_vm2, %v11529_v60  ;;  %9380 = vmatmul.mubr.msk.f32.gmra.mrb[16].mxu1 %vm13371_vm3, %v11697_v31 }
 0x333   :  { %9396 = vmatprep.mubr.msk.f32.mxu0 %vm13371_vm3, %v11657_v62  ;;  %9382 = vmatprep.mubr.msk.f32.mxu1 %vm13371_vm3, %v11707_v39  ;;  %v966_v54 = vpop.permute.xlu1 %965  ;;  %v961_v48 = vpop.permute.xlu0 %960 }
 0x336   :  { %9383 = vmatmul.mubr.msk.f32.gmra.mrb[18].mxu1 %vm13371_vm3, %v11717_v9 }
 0x337   :  { %9385 = vmatprep.mubr.msk.f32.mxu1 %vm13371_vm3, %v11719_v16  ;;  %v11729_v60 = vpop.permute.xlu1 %1170  ;;  %v981_v49 = vpop.permute.xlu0 %980 }
 0x33a   :  { %9386 = vmatmul.mubr.msk.f32.gmra.mrb[20].mxu1 %vm13371_vm3, %v11725_v46 }
 0x33b   :  { %v971_v10 = vpop.permute.xlu1 %970  ;;  %v11735_v51 = vpop.permute.xlu0 %1174 }
 0x33f   :  { %v976_v33 = vpop.permute.xlu1 %975  ;;  %v11737_v56 = vpop.permute.xlu0 %1178 }
 0x343   :  { %v11731_v44 = vpop.permute.xlu1 %1182  ;;  %v11751_v1 = vpop.permute.xlu0 %1190 }
 0x347   :  { %v986_v47 = vpop.permute.xlu1 %985 }
 0x34b   :  { %v11733_v32 = vpop.permute.xlu1 %1186 }
 0x34f   :  { %v991_v50 = vpop.permute.xlu1 %990 }
 0x353   :  { %v996_v52 = vpop.permute.xlu1 %995 }
 0x357   :  { %v11743_v61 = vpop.permute.xlu1 %1198 }
 0x3f5   :  { %v9352_v37 = vpop.f32.mrb[8].mxu0  ;;  %v11739_v58 = vpop.f32.mrb[8].mxu1 }
 0x3f6   :  { %v1109_v59 = vpop.f32.mrb[9].mxu0  ;;  %v11741_v30 = vpop.f32.mrb[9].mxu1  ;;  %v11745_v5 = vadd.f32 %v9352_v37, %v966_v54 }
 0x3f7   :  { %v11748_v6 = vadd.f32 %v1109_v59, %v961_v48  ;;  %v11761_v48 = vpop.permute.xlu1 %1206 }
 0x3f9   :  { %v9355_v0 = vpop.f32.mrb[10].mxu0  ;;  %v9372_v40 = vpop.f32.mrb[10].mxu1 }
 0x3fa   :  { %v1338_v2 = vadd.f32 %v9372_v40, %v11735_v51  ;;  %v1119_v34 = vpop.f32.mrb[11].mxu0  ;;  %v1332_v8 = vpop.f32.mrb[11].mxu1  ;;  %v11755_v23 = vadd.f32 %v9355_v0, %v976_v33 }
 0x3fb   :  { %v1333_v36 = vadd.f32 %v1332_v8, %v11729_v60  ;;  %v11758_v42 = vadd.f32 %v1119_v34, %v971_v10 }
 0x3fc   :  { %v1392_v4 = vadd.f32 %v1338_v2, %v11745_v5 }
 0x3fd   :  { %v1391_v18 = vadd.f32 %v1333_v36, %v11748_v6  ;;  %v9358_v21 = vpop.f32.mrb[12].mxu0  ;;  %v9375_v22 = vpop.f32.mrb[12].mxu1 }
 0x3fe   :  { %v8412_v17 = vmul.f32 -1.442695, %v1392_v4  ;;  %v1348_v29 = vadd.f32 %v9375_v22, %v11731_v44  ;;  %v1129_v25 = vpop.f32.mrb[13].mxu0  ;;  %v1342_v13 = vpop.f32.mrb[13].mxu1  ;;  %v11765_v40 = vadd.f32 %v9358_v21, %v986_v47 }
 0x3ff   :  { %v8411_v14 = vmul.f32 -1.442695, %v1391_v18  ;;  %v1343_v54 = vadd.f32 %v1342_v13, %v11737_v56  ;;  %v11768_v36 = vadd.f32 %v1129_v25, %v981_v49  ;;  %v11771_v22 = vpop.permute.xlu0 %1194 }
 0x400   :  { %10421 = vpow2.f32 %v8412_v17  ;;  %v1394_v37 = vadd.f32 %v1348_v29, %v11755_v23 }
 0x401   :  { %10423 = vpow2.f32 %v8411_v14  ;;  %v1393_v59 = vadd.f32 %v1343_v54, %v11758_v42  ;;  %v9361_v33 = vpop.f32.mrb[14].mxu0  ;;  %v9378_v0 = vpop.f32.mrb[14].mxu1 }
 0x402   :  { %v8414_v2 = vmul.f32 -1.442695, %v1394_v37  ;;  %v1358_v8 = vadd.f32 %v9378_v0, %v11751_v1  ;;  %v1139_v10 = vpop.f32.mrb[15].mxu0  ;;  %v1352_v34 = vpop.f32.mrb[15].mxu1  ;;  %v11775_v13 = vadd.f32 %v9361_v33, %v996_v52 }
 0x403   :  { %v8413_v4 = vmul.f32 -1.442695, %v1393_v59  ;;  %v1353_v18 = vadd.f32 %v1352_v34, %v11733_v32  ;;  %v1006_v37 = vpop.permute.xlu1 %1005  ;;  %v11778_v59 = vadd.f32 %v1139_v10, %v991_v50  ;;  %v1001_v12 = vpop.permute.xlu0 %1000 }
 0x404   :  { %10425 = vpow2.f32 %v8414_v2  ;;  %v1420_v17 = vadd.f32 %v1358_v8, %v11765_v40 }
 0x405   :  { %10427 = vpow2.f32 %v8413_v4  ;;  %v1419_v29 = vadd.f32 %v1353_v18, %v11768_v36  ;;  %v9381_v47 = vpop.f32.mrb[16].mxu1  ;;  %v9364_v21 = vpop.f32.mrb[16].mxu0 }
 0x406   :  { %v8416_v14 = vmul.f32 -1.442695, %v1420_v17  ;;  %v1368_v54 = vadd.f32 %v9381_v47, %v11743_v61  ;;  %v1362_v49 = vpop.f32.mrb[17].mxu1  ;;  %v1149_v25 = vpop.f32.mrb[17].mxu0 }
 0x407   :  { %v8415_v0 = vmul.f32 -1.442695, %v1419_v29  ;;  %v1363_v2 = vadd.f32 %v1362_v49, %v11771_v22  ;;  %v11783_v50 = vpop.permute.xlu1 %1210 }
 0x408   :  { %10429 = vpow2.f32 %v8416_v14  ;;  %v1422_v8 = vadd.f32 %v1368_v54, %v11775_v13 }
 0x409   :  { %10431 = vpow2.f32 %v8415_v0  ;;  %v1421_v34 = vadd.f32 %v1363_v2, %v11778_v59  ;;  %v9384_v4 = vpop.f32.mrb[18].mxu1  ;;  %v11785_v2 = vpop.permute.xlu0 %1202 }
 0x40a   :  { %v10422_v52 = vpop.eup %10421  ;;  %v8418_v33 = vmul.f32 -1.442695, %v1422_v8  ;;  %v1372_v18 = vpop.f32.mrb[19].mxu1  ;;  %v1378_v63 = vadd.f32 %v9384_v4, %v11761_v48 }
 0x40b   :  { %v10424_v17 = vpop.eup %10423  ;;  %v1408_v47 = vadd.f32 1.0, %v10422_v52  ;;  %v8417_v3 = vmul.f32 -1.442695, %v1421_v34  ;;  %v1011_v52 = vpop.permute.xlu1 %1010 }
 0x40c   :  { %v1407_v45 = vadd.f32 1.0, %v10424_v17  ;;  %10433 = vpow2.f32 %v8418_v33  ;;  %v1373_v33 = vadd.f32 %v1372_v18, %v11785_v2 }
 0x40d   :  { %10435 = vrcp.f32 %v1408_v47  ;;  %v9387_v10 = vpop.f32.mrb[20].mxu1  ;;  %v11789_v57 = vpop.permute.xlu0 %1214 }
 0x40e   :  { %v10426_v29 = vpop.eup %10425  ;;  %10437 = vrcp.f32 %v1407_v45  ;;  %v1382_v14 = vpop.f32.mrb[21].mxu1  ;;  %v1388_v4 = vadd.f32 %v9387_v10, %v11789_v57 }
 0x40f   :  { %v10428_v54 = vpop.eup %10427  ;;  %v1410_v49 = vadd.f32 1.0, %v10426_v29  ;;  %10439 = vpow2.f32 %v8417_v3  ;;  %v1016_v41 = vpop.permute.xlu1 %1015 }
 0x410   :  { %v1409_v0 = vadd.f32 1.0, %v10428_v54  ;;  %v11791_v54 = vadd.f32 %v9364_v21, %v1006_v37  ;;  %v11800_v37 = vadd.f32 %v11739_v58, %v1016_v41 }
 0x411   :  { %10441 = vrcp.f32 %v1410_v49 }
 0x412   :  { %v10430_v8 = vpop.eup %10429  ;;  %10443 = vrcp.f32 %v1409_v0  ;;  %v11793_v0 = vadd.f32 %v1149_v25, %v1001_v12  ;;  %13390 = vst [vmem:[#allocation16_spill] sm:$0xff] %v11800_v37  ;;  %v11803_v25 = vadd.f32 %v11741_v30, %v1011_v52 }
 0x413   :  { %v10432_v34 = vpop.eup %10431  ;;  %v1436_v47 = vadd.f32 1.0, %v10430_v8 }
 0x414   :  { %v1435_v17 = vadd.f32 1.0, %v10432_v34  ;;  %13389 = vst [vmem:[#allocation15_spill] sm:$0xff] %v11793_v0  ;;  %13391 = vst [vmem:[#allocation17_spill] sm:$0xff] %v11803_v25 }
 0x416   :  { %v10434_v26 = vpop.eup %10433  ;;  %10445 = vrcp.f32 %v1435_v17 }
 0x417   :  { %v10436_v45 = vpop.eup %10435  ;;  %v1438_v11 = vadd.f32 1.0, %v10434_v26  ;;  %10447 = vrcp.f32 %v1436_v47  ;;  %v1383_v26 = vadd.f32 %v1382_v14, %v11783_v50 }
 0x418   :  { %v10438_v3 = vpop.eup %10437  ;;  %v1448_v29 = vmul.f32 %v10436_v45, %v1378_v63 }
 0x419   :  { %v10440_v49 = vpop.eup %10439  ;;  %v1447_v34 = vmul.f32 %v10438_v3, %v1373_v33  ;;  %10449 = vrcp.f32 %v1438_v11 }
 0x41a   :  { %v1437_v18 = vadd.f32 1.0, %v10440_v49  ;;  %v1452_v8 = vadd.f32 %v1448_v29, %v11791_v54 }
 0x41b   :  { %v10442_v15 = vpop.eup %10441  ;;  %v1451_v63 = vadd.f32 %v1447_v34, %v11793_v0 }
 0x41c   :  { %v10444_v21 = vpop.eup %10443  ;;  %10451 = vrcp.f32 %v1437_v18  ;;  %v1450_v12 = vmul.f32 %v10442_v15, %v1388_v4 }
 0x41d   :  { %v1449_v17 = vmul.f32 %v10444_v21, %v1383_v26  ;;  %10453 = vtanh.f32 %v1451_v63 }
 0x41e   :  { %10455 = vtanh.f32 %v1452_v8  ;;  %v1454_v10 = vadd.f32 %v1450_v12, %v11800_v37 }
 0x41f   :  { %v1453_v11 = vadd.f32 %v1449_v17, %v11803_v25 }
 0x420   :  { %10457 = vtanh.f32 %v1454_v10  ;;  %v10446_v14 = vpop.eup %10445 }
 0x421   :  { %10459 = vtanh.f32 %v1453_v11  ;;  %v10448_v33 = vpop.eup %10447  ;;  %v1459_v41 = vsub.f32 1.0, %v10446_v14  ;;  %v1467_v30 = vmul.f32 0.0, %v10446_v14 }
 0x422   :  { %v1460_v3 = vsub.f32 1.0, %v10448_v33  ;;  %v1468_v49 = vmul.f32 0.0, %v10448_v33 }
 0x423   :  { %v10450_v47 = vpop.eup %10449 }
 0x424   :  { %v1462_v34 = vsub.f32 1.0, %v10450_v47  ;;  %v1470_v12 = vmul.f32 0.0, %v10450_v47 }
 0x426   :  { %v10452_v45 = vpop.eup %10451 }
 0x427   :  { %v10454_v58 = vpop.eup %10453  ;;  %v1461_v4 = vsub.f32 1.0, %v10452_v45  ;;  %v1469_v10 = vmul.f32 0.0, %v10452_v45 }
 0x428   :  { %v10456_v15 = vpop.eup %10455  ;;  %v1463_v29 = vmul.f32 %v10454_v58, %v1459_v41 }
 0x429   :  { %v1464_v52 = vmul.f32 %v10456_v15, %v1460_v3 }
 0x42a   :  { %v10458_v18 = vpop.eup %10457  ;;  %v11807_v8 = vadd.f32 %v1467_v30, %v1463_v29 }
 0x42b   :  { %v10460_v26 = vpop.eup %10459  ;;  %v11809_v63 = vadd.f32 %v1468_v49, %v1464_v52  ;;  %v1466_v21 = vmul.f32 %v10458_v18, %v1462_v34 }
 0x42c   :  { %v1465_v17 = vmul.f32 %v10460_v26, %v1461_v4 }
 0x42d   :  { %v10075_v11 = vpack.c.bf16 %v11809_v63, %v11807_v8  ;;  %v11813_v55 = vadd.f32 %v1470_v12, %v1466_v21 }
 0x42e   :  { %v11815_v14 = vadd.f32 %v1469_v10, %v1465_v17 }
 0x42f   :  { %10076 = vmatprep.subr.bf16.mxu0 %v10075_v11 }
 0x430   :  { %10078 = vmatpush3.bf16.msra.mxu0 %v10075_v11  ;;  %v10079_v33 = vpack.c.bf16 %v11813_v55, %v11815_v14 }
 0x432   :  { %10080 = vmatprep.subr.bf16.mxu0 %v10079_v33 }
 0x434   :  { %10082 = vmatpush3.bf16.msra.mxu0 %v10079_v33 }
 0x437   :  { %9397 = vmatmul.mubr.msk.f32.vlgmr.msra.gmra.mrb[18].mxu0 %vm13371_vm3, %v11659_v20 }
 0x438   :  { %9399 = vmatprep.mubr.msk.f32.mxu0 %vm13371_vm3, %v11661_v24 }
 0x43b   :  { %9400 = vmatmul.mubr.msk.f32.gmra.mrb[20].mxu0 %vm13371_vm3, %v11663_v38 }
 0x43c   :  { %9402 = vmatprep.mubr.msk.f32.mxu0 %vm13371_vm3, %v11666_v43 }
 0x43f   :  { %9403 = vmatmul.mubr.msk.f32.gmra.mrb[22].mxu0 %vm13371_vm3, %v11685_v7 }
 0x440   :  { %9405 = vmatprep.mubr.msk.f32.mxu0 %vm13371_vm3, %v11691_v19 }
 0x443   :  { %9406 = vmatmul.mubr.msk.f32.gmra.mrb[24].mxu0 %vm13371_vm3, %v11697_v31 }
 0x444   :  { %9408 = vmatprep.mubr.msk.f32.mxu0 %vm13371_vm3, %v11707_v39 }
 0x447   :  { %9409 = vmatmul.mubr.msk.f32.gmra.mrb[26].mxu0 %vm13371_vm3, %v11717_v9 }
 0x448   :  { %9411 = vmatprep.mubr.msk.f32.mxu0 %vm13371_vm3, %v11719_v16 }
 0x44b   :  { %9412 = vmatmul.mubr.msk.f32.gmra.mrb[28].mxu0 %vm13371_vm3, %v11725_v46 }
 0x44c   :  { %9472 = vmatprep.mubr.msk.f32.mxu0 %vm13371_vm3, %v11657_v62 }
 0x50a   :  { %v9398_v47 = vpop.f32.mrb[18].mxu0 }
 0x50b   :  { %v1550_v45 = vadd.f32 %v9398_v47, %v11735_v51  ;;  %v1544_v41 = vpop.f32.mrb[19].mxu0 }
 0x50c   :  { %v1545_v58 = vadd.f32 %v1544_v41, %v11729_v60 }
 0x50d   :  { %1609 = vrot.lane.b32.xlu1 %v1550_v45, %s11090_s3 }
 0x50e   :  { %v9401_v3 = vpop.f32.mrb[20].mxu0  ;;  %1607 = vrot.lane.b32.xlu0 %v1545_v58, %s11090_s3 }
 0x50f   :  { %v1560_v15 = vadd.f32 %v9401_v3, %v11731_v44  ;;  %v1554_v29 = vpop.f32.mrb[21].mxu0  ;;  %v11877_v3 = vsub.s32 %v11284_v28, %v11282_v27 }
 0x510   :  { %v1555_v30 = vadd.f32 %v1554_v29, %v11737_v56 }
 0x511   :  { %1613 = vrot.lane.b32.xlu1 %v1560_v15, %s11090_s3  ;;  %13392 = vst [vmem:[#allocation18_spill] sm:$0xff] %v11877_v3  ;;  %vm1751_vm4 = vcmp.eq.s32.totalorder %v11877_v3, 2  ;;  %v13393_v15 = vmov 0.0   ;;  %vm1475_vm5 = vcmp.eq.s32.totalorder %v11877_v3, 0 }
 0x512   :  { %v9404_v52 = vpop.f32.mrb[22].mxu0  ;;  %1611 = vrot.lane.b32.xlu0 %v1555_v30, %s11090_s3  ;;  %v8440_v29 = vsel %vm1751_vm4, 1.0, %v13393_v15 }
 0x513   :  { %v1570_v49 = vadd.f32 %v9404_v52, %v11751_v1  ;;  %v1564_v34 = vpop.f32.mrb[23].mxu0  ;;  %9414 = vmatprep.subr.msk.mxu1 %vm1775_vm6, %v8440_v29 }
 0x514   :  { %v1565_v18 = vadd.f32 %v1564_v34, %v11733_v32  ;;  %9415 = vmatpush3.msk.msra.mxu1 %vm1775_vm6, %v8440_v29 }
 0x515   :  { %1653 = vrot.lane.b32.xlu1 %v1570_v49, %s11090_s3 }
 0x516   :  { %v9407_v4 = vpop.f32.mrb[24].mxu0  ;;  %1651 = vrot.lane.b32.xlu0 %v1565_v18, %s11090_s3 }
 0x517   :  { %v1580_v26 = vadd.f32 %v9407_v4, %v11743_v61  ;;  %v1574_v21 = vpop.f32.mrb[25].mxu0 }
 0x518   :  { %v1575_v12 = vadd.f32 %v1574_v21, %v11771_v22 }
 0x519   :  { %1657 = vrot.lane.b32.xlu1 %v1580_v26, %s11090_s3 }
 0x51a   :  { %v9410_v17 = vpop.f32.mrb[26].mxu0  ;;  %1655 = vrot.lane.b32.xlu0 %v1575_v12, %s11090_s3 }
 0x51b   :  { %v1590_v10 = vadd.f32 %v9410_v17, %v11761_v48  ;;  %v1584_v11 = vpop.f32.mrb[27].mxu0 }
 0x51c   :  { %v1585_v33 = vadd.f32 %v1584_v11, %v11785_v2 }
 0x51d   :  { %1697 = vrot.lane.b32.xlu1 %v1590_v10, %s11090_s3 }
 0x51e   :  { %v9413_v47 = vpop.f32.mrb[28].mxu0  ;;  %1695 = vrot.lane.b32.xlu0 %v1585_v33, %s11090_s3 }
 0x51f   :  { %v1600_v45 = vadd.f32 %v9413_v47, %v11789_v57  ;;  %v1594_v41 = vpop.f32.mrb[29].mxu0 }
 0x520   :  { %v1595_v58 = vadd.f32 %v1594_v41, %v11783_v50 }
 0x521   :  { %1701 = vrot.lane.b32.xlu1 %v1600_v45, %s11090_s3 }
 0x522   :  { %1699 = vrot.lane.b32.xlu0 %v1595_v58, %s11090_s3 }
 0x525   :  { %1733 = vrot.lane.b32.xlu1 %v11809_v63, %s11090_s3 }
 0x526   :  { %1731 = vrot.lane.b32.xlu0 %v11807_v8, %s11090_s3 }
 0x529   :  { %1737 = vrot.lane.b32.xlu1 %v11813_v55, %s11090_s3 }
 0x52a   :  { %1735 = vrot.lane.b32.xlu0 %v11815_v14, %s11090_s3 }
 0x57f   :  { %v1610_v30 = vpop.permute.xlu1 %1609 }
 0x580   :  { %v1620_v52 = vadd.f32 %v1610_v30, %v11745_v5  ;;  %v1608_v49 = vpop.permute.xlu0 %1607 }
 0x581   :  { %v1619_v34 = vadd.f32 %v1608_v49, %v11748_v6 }
 0x582   :  { %v8433_v18 = vmul.f32 -1.442695, %v1620_v52 }
 0x583   :  { %v8432_v4 = vmul.f32 -1.442695, %v1619_v34  ;;  %v1614_v26 = vpop.permute.xlu1 %1613 }
 0x584   :  { %10461 = vpow2.f32 %v8433_v18  ;;  %v1622_v21 = vadd.f32 %v1614_v26, %v11755_v23  ;;  %v1612_v12 = vpop.permute.xlu0 %1611 }
 0x585   :  { %10463 = vpow2.f32 %v8432_v4  ;;  %v1621_v17 = vadd.f32 %v1612_v12, %v11758_v42 }
 0x586   :  { %v8435_v10 = vmul.f32 -1.442695, %v1622_v21 }
 0x587   :  { %v8434_v11 = vmul.f32 -1.442695, %v1621_v17  ;;  %v1654_v33 = vpop.permute.xlu1 %1653 }
 0x588   :  { %10465 = vpow2.f32 %v8435_v10  ;;  %v1664_v47 = vadd.f32 %v1654_v33, %v11765_v40  ;;  %v1652_v45 = vpop.permute.xlu0 %1651 }
 0x589   :  { %10467 = vpow2.f32 %v8434_v11  ;;  %v1663_v41 = vadd.f32 %v1652_v45, %v11768_v36 }
 0x58a   :  { %v8437_v58 = vmul.f32 -1.442695, %v1664_v47 }
 0x58b   :  { %v8436_v29 = vmul.f32 -1.442695, %v1663_v41  ;;  %v1658_v30 = vpop.permute.xlu1 %1657 }
 0x58c   :  { %10469 = vpow2.f32 %v8437_v58  ;;  %v1666_v52 = vadd.f32 %v1658_v30, %v11775_v13  ;;  %v1656_v49 = vpop.permute.xlu0 %1655 }
 0x58d   :  { %10471 = vpow2.f32 %v8436_v29  ;;  %v1665_v34 = vadd.f32 %v1656_v49, %v11778_v59 }
 0x58e   :  { %v10462_v18 = vpop.eup %10461  ;;  %v8439_v4 = vmul.f32 -1.442695, %v1666_v52 }
 0x58f   :  { %v10464_v26 = vpop.eup %10463  ;;  %v1636_v21 = vadd.f32 1.0, %v10462_v18  ;;  %v8438_v12 = vmul.f32 -1.442695, %v1665_v34  ;;  %v1698_v29 = vpop.permute.xlu1 %1697 }
 0x590   :  { %v1635_v17 = vadd.f32 1.0, %v10464_v26  ;;  %10473 = vpow2.f32 %v8439_v4  ;;  %v1696_v49 = vpop.permute.xlu0 %1695 }
 0x591   :  { %10475 = vrcp.f32 %v1636_v21 }
 0x592   :  { %v10466_v10 = vpop.eup %10465  ;;  %10477 = vrcp.f32 %v1635_v17 }
 0x593   :  { %v10468_v11 = vpop.eup %10467  ;;  %v1638_v33 = vadd.f32 1.0, %v10466_v10  ;;  %10479 = vpow2.f32 %v8438_v12 }
 0x594   :  { %v1637_v47 = vadd.f32 1.0, %v10468_v11  ;;  %v1700_v53 = vpop.permute.xlu0 %1699 }
 0x595   :  { %10481 = vrcp.f32 %v1638_v33 }
 0x596   :  { %v10470_v45 = vpop.eup %10469  ;;  %10483 = vrcp.f32 %v1637_v47  ;;  %v1702_v47 = vpop.permute.xlu1 %1701 }
 0x597   :  { %v10472_v41 = vpop.eup %10471  ;;  %v1680_v58 = vadd.f32 1.0, %v10470_v45 }
 0x598   :  { %v1679_v52 = vadd.f32 1.0, %v10472_v41 }
 0x599   :  { %10485 = vrcp.f32 %v1680_v58 }
 0x59a   :  { %v10474_v30 = vpop.eup %10473  ;;  %10487 = vrcp.f32 %v1679_v52  ;;  %v8419_v52 = vsel %vm1475_vm5, 1.0, %v13393_v15 }
 0x59b   :  { %v10476_v18 = vpop.eup %10475  ;;  %v1682_v34 = vadd.f32 1.0, %v10474_v30  ;;  %9422 = vmatprep.subr.msk.mxu1 %vm1775_vm6, %v8419_v52 }
 0x59c   :  { %v10478_v26 = vpop.eup %10477  ;;  %v1708_v4 = vmul.f32 %v10476_v18, %v1698_v29 }
 0x59d   :  { %v10480_v21 = vpop.eup %10479  ;;  %v1707_v17 = vmul.f32 %v10478_v26, %v1696_v49  ;;  %10489 = vrcp.f32 %v1682_v34  ;;  %v1734_v34 = vpop.permute.xlu1 %1733 }
 0x59e   :  { %v1681_v10 = vadd.f32 1.0, %v10480_v21  ;;  %v1712_v12 = vadd.f32 %v1708_v4, %v11791_v54  ;;  %v1732_v4 = vpop.permute.xlu0 %1731 }
 0x59f   :  { %v10482_v11 = vpop.eup %10481  ;;  %v1711_v33 = vadd.f32 %v1707_v17, %v11793_v0 }
 0x5a0   :  { %v10484_v45 = vpop.eup %10483  ;;  %10491 = vrcp.f32 %v1681_v10  ;;  %v1710_v41 = vmul.f32 %v10482_v11, %v1702_v47 }
 0x5a1   :  { %10493 = vtanh.f32 %v1712_v12  ;;  %v1709_v30 = vmul.f32 %v10484_v45, %v1700_v53 }
 0x5a2   :  { %10495 = vtanh.f32 %v1711_v33  ;;  %v1714_v29 = vadd.f32 %v1710_v41, %v11800_v37  ;;  %v1736_v3 = vpop.permute.xlu0 %1735 }
 0x5a3   :  { %v1713_v58 = vadd.f32 %v1709_v30, %v11803_v25  ;;  %v10486_v49 = vpop.eup %10485 }
 0x5a4   :  { %10497 = vtanh.f32 %v1714_v29  ;;  %v10488_v18 = vpop.eup %10487  ;;  %v1720_v53 = vsub.f32 1.0, %v10486_v49  ;;  %v1744_v33 = vmul.f32 %v10486_v49, %v1734_v34 }
 0x5a5   :  { %10499 = vtanh.f32 %v1713_v58  ;;  %v1719_v10 = vsub.f32 1.0, %v10488_v18  ;;  %v1743_v45 = vmul.f32 %v10488_v18, %v1732_v4  ;;  %v1738_v58 = vpop.permute.xlu1 %1737 }
 0x5a7   :  { %v10490_v26 = vpop.eup %10489 }
 0x5a8   :  { %v1722_v41 = vsub.f32 1.0, %v10490_v26  ;;  %v1746_v25 = vmul.f32 %v10490_v26, %v1738_v58 }
 0x5aa   :  { %v10492_v21 = vpop.eup %10491 }
 0x5ab   :  { %v10494_v17 = vpop.eup %10493  ;;  %v1721_v35 = vsub.f32 1.0, %v10492_v21  ;;  %v1745_v0 = vmul.f32 %v10492_v21, %v1736_v3 }
 0x5ac   :  { %v10496_v12 = vpop.eup %10495  ;;  %v1724_v11 = vmul.f32 %v10494_v17, %v1720_v53 }
 0x5ad   :  { %v1723_v47 = vmul.f32 %v10496_v12, %v1719_v10 }
 0x5ae   :  { %v10498_v30 = vpop.eup %10497  ;;  %v11898_v29 = vadd.f32 %v1744_v33, %v1724_v11 }
 0x5af   :  { %v10500_v27 = vpop.eup %10499  ;;  %v11900_v28 = vadd.f32 %v1743_v45, %v1723_v47  ;;  %v1726_v15 = vmul.f32 %v10498_v30, %v1722_v41 }
 0x5b0   :  { %v1725_v37 = vmul.f32 %v10500_v27, %v1721_v35  ;;  %1760 = vrot.lane.b32.xlu1 %v11898_v29, %s11091_s14 }
 0x5b1   :  { %v11903_v49 = vadd.f32 %v1746_v25, %v1726_v15  ;;  %1758 = vrot.lane.b32.xlu0 %v11900_v28, %s11091_s14 }
 0x5b2   :  { %v11906_v18 = vadd.f32 %v1745_v0, %v1725_v37 }
 0x5b4   :  { %1764 = vrot.lane.b32.xlu1 %v11903_v49, %s11091_s14 }
 0x5b5   :  { %1762 = vrot.lane.b32.xlu0 %v11906_v18, %s11091_s14 }
 0x622   :  { %v1761_v34 = vpop.permute.xlu1 %1760 }
 0x623   :  { %v1759_v4 = vpop.permute.xlu0 %1758 }
 0x624   :  { %v10083_v26 = vpack.c.bf16 %v1761_v34, %v1759_v4  ;;  %9416 = vmatprep.mubr.msk.f32.mxu1 %vm1766_vm9, %v1759_v4 }
 0x625   :  { %9417 = vmatmul.mubr.msk.f32.vlgmr.msra.gmra.mrb[22].mxu1 %vm1766_vm9, %v1761_v34 }
 0x626   :  { %9423 = vmatpush3.msk.msra.mxu1 %vm1775_vm6, %v8419_v52  ;;  %v1765_v35 = vpop.permute.xlu1 %1764 }
 0x627   :  { %10084 = vmatprep.subr.bf16.mxu1 %v10083_v26  ;;  %v1763_v27 = vpop.permute.xlu0 %1762 }
 0x628   :  { %9419 = vmatprep.mubr.msk.f32.mxu1 %vm1766_vm9, %v1763_v27  ;;  %v10087_v0 = vpack.c.bf16 %v1765_v35, %v1763_v27 }
 0x629   :  { %9420 = vmatmul.mubr.msk.f32.gmra.mrb[24].mxu1 %vm1766_vm9, %v1765_v35 }
 0x62a   :  { %9424 = vmatprep.mubr.msk.f32.mxu1 %vm1766_vm9, %v11807_v8 }
 0x62d   :  { %9425 = vmatmul.mubr.msk.f32.vlgmr.msra.gmra.mrb[22].mxu1 %vm1766_vm9, %v11809_v63 }
 0x62e   :  { %10086 = vmatpush3.bf16.msra.mxu1 %v10083_v26  ;;  %9427 = vmatprep.mubr.msk.f32.mxu1 %vm1766_vm9, %v11815_v14 }
 0x62f   :  { %10088 = vmatprep.subr.bf16.mxu1 %v10087_v0 }
 0x631   :  { %9428 = vmatmul.mubr.msk.f32.gmra.mrb[24].mxu1 %vm1766_vm9, %v11813_v55 }
 0x632   :  { %10090 = vmatpush3.bf16.msra.mxu1 %v10087_v0  ;;  %9438 = vmatprep.mubr.msk.f32.mxu1 %vm13371_vm3, %v11657_v62 }
 0x635   :  { %9439 = vmatmul.mubr.msk.f32.vlgmr.msra.gmra.mrb[26].mxu1 %vm13371_vm3, %v11659_v20 }
 0x636   :  { %9441 = vmatprep.mubr.msk.f32.mxu1 %vm13371_vm3, %v11661_v24 }
 0x639   :  { %9442 = vmatmul.mubr.msk.f32.gmra.mrb[28].mxu1 %vm13371_vm3, %v11663_v38 }
 0x63a   :  { %9444 = vmatprep.mubr.msk.f32.mxu1 %vm13371_vm3, %v11666_v43 }
 0x63d   :  { %9445 = vmatmul.mubr.msk.f32.gmra.mrb[30].mxu1 %vm13371_vm3, %v11685_v7 }
 0x63e   :  { %9447 = vmatprep.mubr.msk.f32.mxu1 %vm13371_vm3, %v11691_v19 }
 0x641   :  { %9448 = vmatmul.mubr.msk.f32.gmra.mrb[32].mxu1 %vm13371_vm3, %v11697_v31 }
 0x642   :  { %9450 = vmatprep.mubr.msk.f32.mxu1 %vm13371_vm3, %v11707_v39 }
 0x645   :  { %9451 = vmatmul.mubr.msk.f32.gmra.mrb[34].mxu1 %vm13371_vm3, %v11717_v9 }
 0x646   :  { %9453 = vmatprep.mubr.msk.f32.mxu1 %vm13371_vm3, %v11719_v16 }
 0x649   :  { %9454 = vmatmul.mubr.msk.f32.gmra.mrb[36].mxu1 %vm13371_vm3, %v11725_v46 }
 0x708   :  { %v9440_v55 = vpop.f32.mrb[26].mxu1 }
 0x709   :  { %v2036_v37 = vadd.f32 %v9440_v55, %v11735_v51  ;;  %v2030_v25 = vpop.f32.mrb[27].mxu1 }
 0x70a   :  { %v2031_v8 = vadd.f32 %v2030_v25, %v11729_v60 }
 0x70b   :  { %2095 = vrot.lane.b32.xlu1 %v2036_v37, %s11092_s15 }
 0x70c   :  { %v9443_v63 = vpop.f32.mrb[28].mxu1  ;;  %2093 = vrot.lane.b32.xlu0 %v2031_v8, %s11092_s15 }
 0x70d   :  { %v2046_v14 = vadd.f32 %v9443_v63, %v11731_v44  ;;  %v2040_v3 = vpop.f32.mrb[29].mxu1 }
 0x70e   :  { %v2041_v15 = vadd.f32 %v2040_v3, %v11737_v56 }
 0x70f   :  { %2099 = vrot.lane.b32.xlu1 %v2046_v14, %s11092_s15 }
 0x710   :  { %v9446_v52 = vpop.f32.mrb[30].mxu1  ;;  %2097 = vrot.lane.b32.xlu0 %v2041_v15, %s11092_s15 }
 0x711   :  { %v2056_v21 = vadd.f32 %v9446_v52, %v11751_v1  ;;  %v2050_v53 = vpop.f32.mrb[31].mxu1 }
 0x712   :  { %v2051_v17 = vadd.f32 %v2050_v53, %v11733_v32 }
 0x713   :  { %2139 = vrot.lane.b32.xlu1 %v2056_v21, %s11092_s15 }
 0x714   :  { %v9449_v10 = vpop.f32.mrb[32].mxu1  ;;  %2137 = vrot.lane.b32.xlu0 %v2051_v17, %s11092_s15 }
 0x715   :  { %v2066_v12 = vadd.f32 %v9449_v10, %v11743_v61  ;;  %v2060_v11 = vpop.f32.mrb[33].mxu1 }
 0x716   :  { %v2061_v33 = vadd.f32 %v2060_v11, %v11771_v22 }
 0x717   :  { %2143 = vrot.lane.b32.xlu1 %v2066_v12, %s11092_s15 }
 0x718   :  { %v9452_v47 = vpop.f32.mrb[34].mxu1  ;;  %2141 = vrot.lane.b32.xlu0 %v2061_v33, %s11092_s15 }
 0x719   :  { %v2076_v45 = vadd.f32 %v9452_v47, %v11761_v48  ;;  %v2070_v41 = vpop.f32.mrb[35].mxu1 }
 0x71a   :  { %v2071_v30 = vadd.f32 %v2070_v41, %v11785_v2 }
 0x71b   :  { %2183 = vrot.lane.b32.xlu1 %v2076_v45, %s11092_s15 }
 0x71c   :  { %v9455_v58 = vpop.f32.mrb[36].mxu1  ;;  %2181 = vrot.lane.b32.xlu0 %v2071_v30, %s11092_s15 }
 0x71d   :  { %v2086_v34 = vadd.f32 %v9455_v58, %v11789_v57  ;;  %v2080_v4 = vpop.f32.mrb[37].mxu1 }
 0x71e   :  { %v2081_v26 = vadd.f32 %v2080_v4, %v11783_v50 }
 0x71f   :  { %2187 = vrot.lane.b32.xlu1 %v2086_v34, %s11092_s15 }
 0x720   :  { %2185 = vrot.lane.b32.xlu0 %v2081_v26, %s11092_s15 }
 0x723   :  { %2215 = vrot.lane.b32.xlu1 %v11898_v29, %s11090_s3 }
 0x724   :  { %2213 = vrot.lane.b32.xlu0 %v11900_v28, %s11090_s3 }
 0x727   :  { %2219 = vrot.lane.b32.xlu1 %v11903_v49, %s11090_s3 }
 0x728   :  { %2217 = vrot.lane.b32.xlu0 %v11906_v18, %s11090_s3 }
 0x77d   :  { %v2096_v27 = vpop.permute.xlu1 %2095 }
 0x77e   :  { %v2106_v35 = vadd.f32 %v2096_v27, %v11745_v5  ;;  %v2094_v0 = vpop.permute.xlu0 %2093 }
 0x77f   :  { %v2105_v55 = vadd.f32 %v2094_v0, %v11748_v6 }
 0x780   :  { %v8464_v37 = vmul.f32 -1.442695, %v2106_v35 }
 0x781   :  { %v8463_v25 = vmul.f32 -1.442695, %v2105_v55  ;;  %v2100_v8 = vpop.permute.xlu1 %2099 }
 0x782   :  { %10501 = vpow2.f32 %v8464_v37  ;;  %v2108_v29 = vadd.f32 %v2100_v8, %v11755_v23  ;;  %v2098_v63 = vpop.permute.xlu0 %2097 }
 0x783   :  { %10503 = vpow2.f32 %v8463_v25  ;;  %v2107_v28 = vadd.f32 %v2098_v63, %v11758_v42 }
 0x784   :  { %v8466_v49 = vmul.f32 -1.442695, %v2108_v29 }
 0x785   :  { %v8465_v14 = vmul.f32 -1.442695, %v2107_v28  ;;  %v2140_v3 = vpop.permute.xlu1 %2139 }
 0x786   :  { %10505 = vpow2.f32 %v8466_v49  ;;  %v2150_v18 = vadd.f32 %v2140_v3, %v11765_v40  ;;  %v2138_v15 = vpop.permute.xlu0 %2137 }
 0x787   :  { %10507 = vpow2.f32 %v8465_v14  ;;  %v2149_v52 = vadd.f32 %v2138_v15, %v11768_v36 }
 0x788   :  { %v8468_v21 = vmul.f32 -1.442695, %v2150_v18 }
 0x789   :  { %v8467_v53 = vmul.f32 -1.442695, %v2149_v52  ;;  %v2144_v17 = vpop.permute.xlu1 %2143 }
 0x78a   :  { %10509 = vpow2.f32 %v8468_v21  ;;  %v2152_v10 = vadd.f32 %v2144_v17, %v11775_v13  ;;  %v2142_v12 = vpop.permute.xlu0 %2141 }
 0x78b   :  { %10511 = vpow2.f32 %v8467_v53  ;;  %v2151_v11 = vadd.f32 %v2142_v12, %v11778_v59  ;;  %v13394_v53 = vld [vmem:[#allocation15_spill] sm:$0xff] }
 0x78c   :  { %v10502_v33 = vpop.eup %10501  ;;  %v8470_v47 = vmul.f32 -1.442695, %v2152_v10 }
 0x78d   :  { %v10504_v45 = vpop.eup %10503  ;;  %v2122_v41 = vadd.f32 1.0, %v10502_v33  ;;  %v8469_v30 = vmul.f32 -1.442695, %v2151_v11  ;;  %v2184_v37 = vpop.permute.xlu1 %2183 }
 0x78e   :  { %v2121_v58 = vadd.f32 1.0, %v10504_v45  ;;  %10513 = vpow2.f32 %v8470_v47  ;;  %v2182_v29 = vpop.permute.xlu0 %2181  ;;  %v13395_v45 = vld [vmem:[#allocation16_spill] sm:$0xff] }
 0x78f   :  { %10515 = vrcp.f32 %v2122_v41 }
 0x790   :  { %v10506_v34 = vpop.eup %10505  ;;  %10517 = vrcp.f32 %v2121_v58  ;;  %v13397_v58 = vld [vmem:[#allocation17_spill] sm:$0xff] }
 0x791   :  { %v10508_v4 = vpop.eup %10507  ;;  %v2124_v26 = vadd.f32 1.0, %v10506_v34  ;;  %10519 = vpow2.f32 %v8469_v30  ;;  %v2188_v10 = vpop.permute.xlu1 %2187  ;;  %v13396_v30 = vld [vmem:[#allocation18_spill] sm:$0xff] }
 0x792   :  { %v2123_v27 = vadd.f32 1.0, %v10508_v4  ;;  %v2186_v33 = vpop.permute.xlu0 %2185  ;;  %vm2233_vm7 = vcmp.eq.s32.totalorder %v13396_v30, 4  ;;  %v13398_v4 = vmov 0.0   ;;  %vm2621_vm8 = vcmp.eq.s32.totalorder %v13396_v30, 6 }
 0x793   :  { %10521 = vrcp.f32 %v2124_v26  ;;  %v8471_v26 = vsel %vm2233_vm7, 1.0, %v13398_v4  ;;  %vm3009_vm10 = vcmp.eq.s32.totalorder %v13396_v30, 8  ;;  %vm3397_vm13 = vcmp.eq.s32.totalorder %v13396_v30, 10 }
 0x794   :  { %v10510_v35 = vpop.eup %10509  ;;  %10523 = vrcp.f32 %v2123_v27  ;;  %9456 = vmatprep.subr.msk.mxu1 %vm1775_vm6, %v8471_v26  ;;  %vm3785_vm0 = vcmp.eq.s32.totalorder %v13396_v30, 12  ;;  %vm4173_vm11 = vcmp.eq.s32.totalorder %v13396_v30, 14  ;;  %vm4561_vm12 = vcmp.eq.s32.totalorder %v13396_v30, 16 }
 0x795   :  { %v10512_v0 = vpop.eup %10511  ;;  %v2166_v55 = vadd.f32 1.0, %v10510_v35  ;;  %9457 = vmatpush3.msk.msra.mxu1 %vm1775_vm6, %v8471_v26  ;;  %vm4949_vm14 = vcmp.eq.s32.totalorder %v13396_v30, 18  ;;  %vm5337_vm15 = vcmp.eq.s32.totalorder %v13396_v30, 20  ;;  %vm5725_vm1 = vcmp.eq.s32.totalorder %v13396_v30, 22 }
 0x796   :  { %v2165_v8 = vadd.f32 1.0, %v10512_v0  ;;  %v2216_v0 = vpop.permute.xlu1 %2215  ;;  %vm6113_vm2 = vcmp.eq.s32.totalorder %v13396_v30, 24  ;;  %vm6501_vm4 = vcmp.eq.s32.totalorder %v13396_v30, 26  ;;  %vm6889_vm5 = vcmp.eq.s32.totalorder %v13396_v30, 28 }
 0x797   :  { %10525 = vrcp.f32 %v2166_v55  ;;  %vm7277_vm7 = vcmp.eq.s32.totalorder %v13396_v30, 30 }
 0x798   :  { %v10514_v25 = vpop.eup %10513  ;;  %10527 = vrcp.f32 %v2165_v8 }
 0x799   :  { %v10516_v63 = vpop.eup %10515  ;;  %v2168_v28 = vadd.f32 1.0, %v10514_v25 }
 0x79a   :  { %v10518_v49 = vpop.eup %10517  ;;  %v2194_v14 = vmul.f32 %v10516_v63, %v2184_v37  ;;  %v2214_v37 = vpop.permute.xlu0 %2213 }
 0x79b   :  { %v10520_v3 = vpop.eup %10519  ;;  %v2193_v18 = vmul.f32 %v10518_v49, %v2182_v29  ;;  %10529 = vrcp.f32 %v2168_v28 }
 0x79c   :  { %v2167_v15 = vadd.f32 1.0, %v10520_v3  ;;  %v2198_v52 = vadd.f32 %v2194_v14, %v11791_v54 }
 0x79d   :  { %v10522_v21 = vpop.eup %10521  ;;  %v2197_v17 = vadd.f32 %v2193_v18, %v13394_v53 }
 0x79e   :  { %v10524_v12 = vpop.eup %10523  ;;  %10531 = vrcp.f32 %v2167_v15  ;;  %v2196_v11 = vmul.f32 %v10522_v21, %v2188_v10 }
 0x79f   :  { %10533 = vtanh.f32 %v2198_v52  ;;  %v2195_v47 = vmul.f32 %v10524_v12, %v2186_v33 }
 0x7a0   :  { %10535 = vtanh.f32 %v2197_v17  ;;  %v2200_v41 = vadd.f32 %v2196_v11, %v13395_v45  ;;  %v2220_v17 = vpop.permute.xlu1 %2219 }
 0x7a1   :  { %v2199_v34 = vadd.f32 %v2195_v47, %v13397_v58  ;;  %v10526_v27 = vpop.eup %10525 }
 0x7a2   :  { %10537 = vtanh.f32 %v2200_v41  ;;  %v10528_v35 = vpop.eup %10527  ;;  %v2206_v8 = vsub.f32 1.0, %v10526_v27  ;;  %v2226_v14 = vmul.f32 %v10526_v27, %v2216_v0  ;;  %v2218_v41 = vpop.permute.xlu0 %2217 }
 0x7a3   :  { %10539 = vtanh.f32 %v2199_v34  ;;  %v2205_v63 = vsub.f32 1.0, %v10528_v35  ;;  %v2225_v18 = vmul.f32 %v10528_v35, %v2214_v37 }
 0x7a5   :  { %v10530_v55 = vpop.eup %10529 }
 0x7a6   :  { %v2208_v15 = vsub.f32 1.0, %v10530_v55  ;;  %v2228_v47 = vmul.f32 %v10530_v55, %v2220_v17 }
 0x7a8   :  { %v10532_v25 = vpop.eup %10531 }
 0x7a9   :  { %v10534_v29 = vpop.eup %10533  ;;  %v2207_v10 = vsub.f32 1.0, %v10532_v25  ;;  %v2227_v26 = vmul.f32 %v10532_v25, %v2218_v41 }
 0x7aa   :  { %v10536_v28 = vpop.eup %10535  ;;  %v2210_v49 = vmul.f32 %v10534_v29, %v2206_v8 }
 0x7ab   :  { %v2209_v3 = vmul.f32 %v10536_v28, %v2205_v63 }
 0x7ac   :  { %v10538_v52 = vpop.eup %10537  ;;  %v11995_v21 = vadd.f32 %v2226_v14, %v2210_v49 }
 0x7ad   :  { %v10540_v12 = vpop.eup %10539  ;;  %v11997_v11 = vadd.f32 %v2225_v18, %v2209_v3  ;;  %v2212_v33 = vmul.f32 %v10538_v52, %v2208_v15 }
 0x7ae   :  { %v2211_v34 = vmul.f32 %v10540_v12, %v2207_v10  ;;  %2242 = vrot.lane.b32.xlu1 %v11995_v21, %s11093_s0 }
 0x7af   :  { %v12000_v27 = vadd.f32 %v2228_v47, %v2212_v33  ;;  %2240 = vrot.lane.b32.xlu0 %v11997_v11, %s11093_s0 }
 0x7b0   :  { %v12003_v35 = vadd.f32 %v2227_v26, %v2211_v34 }
 0x7b2   :  { %2246 = vrot.lane.b32.xlu1 %v12000_v27, %s11093_s0 }
 0x7b3   :  { %2244 = vrot.lane.b32.xlu0 %v12003_v35, %s11093_s0 }
 0x820   :  { %v2243_v0 = vpop.permute.xlu1 %2242 }
 0x821   :  { %v2241_v37 = vpop.permute.xlu0 %2240 }
 0x822   :  { %v10091_v8 = vpack.c.bf16 %v2243_v0, %v2241_v37  ;;  %9458 = vmatprep.mubr.msk.f32.mxu1 %vm1766_vm9, %v2241_v37 }
 0x823   :  { %9459 = vmatmul.mubr.msk.f32.vlgmr.msra.gmra.mrb[22].mxu1 %vm1766_vm9, %v2243_v0 }
 0x824   :  { %v2247_v55 = vpop.permute.xlu1 %2246  ;;  %10092 = vmatprep.subr.bf16.mxu0 %v10091_v8 }
 0x825   :  { %10094 = vmatpush3.bf16.msra.mxu0 %v10091_v8  ;;  %v2245_v25 = vpop.permute.xlu0 %2244 }
 0x826   :  { %v10095_v29 = vpack.c.bf16 %v2247_v55, %v2245_v25  ;;  %9461 = vmatprep.mubr.msk.f32.mxu1 %vm1766_vm9, %v2245_v25 }
 0x827   :  { %9462 = vmatmul.mubr.msk.f32.gmra.mrb[24].mxu1 %vm1766_vm9, %v2247_v55 }
 0x828   :  { %10096 = vmatprep.subr.bf16.mxu0 %v10095_v29 }
 0x829   :  { %10098 = vmatpush3.bf16.msra.mxu0 %v10095_v29 }
 0x82c   :  { %9473 = vmatmul.mubr.msk.f32.vlgmr.msra.gmra.mrb[30].mxu0 %vm13371_vm3, %v11659_v20 }
 0x82d   :  { %9475 = vmatprep.mubr.msk.f32.mxu0 %vm13371_vm3, %v11661_v24 }
 0x830   :  { %9476 = vmatmul.mubr.msk.f32.gmra.mrb[32].mxu0 %vm13371_vm3, %v11663_v38 }
 0x831   :  { %9478 = vmatprep.mubr.msk.f32.mxu0 %vm13371_vm3, %v11666_v43 }
 0x834   :  { %9479 = vmatmul.mubr.msk.f32.gmra.mrb[34].mxu0 %vm13371_vm3, %v11685_v7 }
 0x835   :  { %9481 = vmatprep.mubr.msk.f32.mxu0 %vm13371_vm3, %v11691_v19 }
 0x838   :  { %9482 = vmatmul.mubr.msk.f32.gmra.mrb[36].mxu0 %vm13371_vm3, %v11697_v31 }
 0x839   :  { %9484 = vmatprep.mubr.msk.f32.mxu0 %vm13371_vm3, %v11707_v39 }
 0x83c   :  { %9485 = vmatmul.mubr.msk.f32.gmra.mrb[38].mxu0 %vm13371_vm3, %v11717_v9 }
 0x83d   :  { %9487 = vmatprep.mubr.msk.f32.mxu0 %vm13371_vm3, %v11719_v16 }
 0x840   :  { %9488 = vmatmul.mubr.msk.f32.gmra.mrb[40].mxu0 %vm13371_vm3, %v11725_v46 }
 0x841   :  { %9506 = vmatprep.mubr.msk.f32.mxu0 %vm13371_vm3, %v11657_v62 }
 0x8ff   :  { %v9474_v63 = vpop.f32.mrb[30].mxu0 }
 0x900   :  { %v2424_v28 = vadd.f32 %v9474_v63, %v11735_v51  ;;  %v2418_v49 = vpop.f32.mrb[31].mxu0 }
 0x901   :  { %v2419_v14 = vadd.f32 %v2418_v49, %v11729_v60 }
 0x902   :  { %2483 = vrot.lane.b32.xlu1 %v2424_v28, %s11094_s1 }
 0x903   :  { %v9477_v3 = vpop.f32.mrb[32].mxu0  ;;  %2481 = vrot.lane.b32.xlu0 %v2419_v14, %s11094_s1 }
 0x904   :  { %v2434_v18 = vadd.f32 %v9477_v3, %v11731_v44  ;;  %v2428_v15 = vpop.f32.mrb[33].mxu0 }
 0x905   :  { %v2429_v52 = vadd.f32 %v2428_v15, %v11737_v56 }
 0x906   :  { %2487 = vrot.lane.b32.xlu1 %v2434_v18, %s11094_s1 }
 0x907   :  { %v9480_v17 = vpop.f32.mrb[34].mxu0  ;;  %2485 = vrot.lane.b32.xlu0 %v2429_v52, %s11094_s1 }
 0x908   :  { %v2444_v10 = vadd.f32 %v9480_v17, %v11751_v1  ;;  %v2438_v12 = vpop.f32.mrb[35].mxu0 }
 0x909   :  { %v2439_v33 = vadd.f32 %v2438_v12, %v11733_v32 }
 0x90a   :  { %2527 = vrot.lane.b32.xlu1 %v2444_v10, %s11094_s1 }
 0x90b   :  { %v9483_v47 = vpop.f32.mrb[36].mxu0  ;;  %2525 = vrot.lane.b32.xlu0 %v2439_v33, %s11094_s1 }
 0x90c   :  { %v2454_v41 = vadd.f32 %v9483_v47, %v11743_v61  ;;  %v2448_v34 = vpop.f32.mrb[37].mxu0 }
 0x90d   :  { %v2449_v26 = vadd.f32 %v2448_v34, %v11771_v22 }
 0x90e   :  { %2531 = vrot.lane.b32.xlu1 %v2454_v41, %s11094_s1 }
 0x90f   :  { %v9486_v0 = vpop.f32.mrb[38].mxu0  ;;  %2529 = vrot.lane.b32.xlu0 %v2449_v26, %s11094_s1 }
 0x910   :  { %v2464_v37 = vadd.f32 %v9486_v0, %v11761_v48  ;;  %v2458_v8 = vpop.f32.mrb[39].mxu0 }
 0x911   :  { %v2459_v55 = vadd.f32 %v2458_v8, %v11785_v2 }
 0x912   :  { %2571 = vrot.lane.b32.xlu1 %v2464_v37, %s11094_s1 }
 0x913   :  { %v9489_v25 = vpop.f32.mrb[40].mxu0  ;;  %2569 = vrot.lane.b32.xlu0 %v2459_v55, %s11094_s1 }
 0x914   :  { %v2474_v29 = vadd.f32 %v9489_v25, %v11789_v57  ;;  %v2468_v63 = vpop.f32.mrb[41].mxu0 }
 0x915   :  { %v2469_v28 = vadd.f32 %v2468_v63, %v11783_v50 }
 0x916   :  { %2575 = vrot.lane.b32.xlu1 %v2474_v29, %s11094_s1 }
 0x917   :  { %2573 = vrot.lane.b32.xlu0 %v2469_v28, %s11094_s1 }
 0x91a   :  { %2603 = vrot.lane.b32.xlu1 %v11995_v21, %s11090_s3 }
 0x91b   :  { %2601 = vrot.lane.b32.xlu0 %v11997_v11, %s11090_s3 }
 0x91e   :  { %2607 = vrot.lane.b32.xlu1 %v12000_v27, %s11090_s3 }
 0x91f   :  { %2605 = vrot.lane.b32.xlu0 %v12003_v35, %s11090_s3 }
 0x974   :  { %v2484_v49 = vpop.permute.xlu1 %2483 }
 0x975   :  { %v2494_v14 = vadd.f32 %v2484_v49, %v11745_v5  ;;  %v2482_v3 = vpop.permute.xlu0 %2481 }
 0x976   :  { %v2493_v18 = vadd.f32 %v2482_v3, %v11748_v6 }
 0x977   :  { %v8490_v15 = vmul.f32 -1.442695, %v2494_v14 }
 0x978   :  { %v8489_v52 = vmul.f32 -1.442695, %v2493_v18  ;;  %v2488_v17 = vpop.permute.xlu1 %2487 }
 0x979   :  { %10541 = vpow2.f32 %v8490_v15  ;;  %v2496_v21 = vadd.f32 %v2488_v17, %v11755_v23  ;;  %v2486_v10 = vpop.permute.xlu0 %2485 }
 0x97a   :  { %10543 = vpow2.f32 %v8489_v52  ;;  %v2495_v11 = vadd.f32 %v2486_v10, %v11758_v42 }
 0x97b   :  { %v8492_v27 = vmul.f32 -1.442695, %v2496_v21 }
 0x97c   :  { %v8491_v12 = vmul.f32 -1.442695, %v2495_v11  ;;  %v2528_v33 = vpop.permute.xlu1 %2527 }
 0x97d   :  { %10545 = vpow2.f32 %v8492_v27  ;;  %v2538_v35 = vadd.f32 %v2528_v33, %v11765_v40  ;;  %v2526_v47 = vpop.permute.xlu0 %2525 }
 0x97e   :  { %10547 = vpow2.f32 %v8491_v12  ;;  %v2537_v41 = vadd.f32 %v2526_v47, %v11768_v36 }
 0x97f   :  { %v8494_v34 = vmul.f32 -1.442695, %v2538_v35 }
 0x980   :  { %v8493_v26 = vmul.f32 -1.442695, %v2537_v41  ;;  %v2532_v0 = vpop.permute.xlu1 %2531 }
 0x981   :  { %10549 = vpow2.f32 %v8494_v34  ;;  %v2540_v37 = vadd.f32 %v2532_v0, %v11775_v13  ;;  %v2530_v8 = vpop.permute.xlu0 %2529 }
 0x982   :  { %10551 = vpow2.f32 %v8493_v26  ;;  %v2539_v55 = vadd.f32 %v2530_v8, %v11778_v59 }
 0x983   :  { %v10542_v25 = vpop.eup %10541  ;;  %v8496_v29 = vmul.f32 -1.442695, %v2540_v37 }
 0x984   :  { %v10544_v63 = vpop.eup %10543  ;;  %v2510_v28 = vadd.f32 1.0, %v10542_v25  ;;  %v8495_v49 = vmul.f32 -1.442695, %v2539_v55  ;;  %v2572_v11 = vpop.permute.xlu1 %2571 }
 0x985   :  { %v2509_v14 = vadd.f32 1.0, %v10544_v63  ;;  %10553 = vpow2.f32 %v8496_v29  ;;  %v2570_v33 = vpop.permute.xlu0 %2569 }
 0x986   :  { %10555 = vrcp.f32 %v2510_v28 }
 0x987   :  { %v10546_v3 = vpop.eup %10545  ;;  %10557 = vrcp.f32 %v2509_v14 }
 0x988   :  { %v10548_v18 = vpop.eup %10547  ;;  %v2512_v15 = vadd.f32 1.0, %v10546_v3  ;;  %10559 = vpow2.f32 %v8495_v49  ;;  %v2576_v29 = vpop.permute.xlu1 %2575 }
 0x989   :  { %v2511_v52 = vadd.f32 1.0, %v10548_v18  ;;  %v2574_v49 = vpop.permute.xlu0 %2573 }
 0x98a   :  { %10561 = vrcp.f32 %v2512_v15  ;;  %v8497_v15 = vsel %vm2621_vm8, 1.0, %v13398_v4 }
 0x98b   :  { %v10550_v17 = vpop.eup %10549  ;;  %10563 = vrcp.f32 %v2511_v52  ;;  %9490 = vmatprep.subr.msk.mxu1 %vm1775_vm6, %v8497_v15 }
 0x98c   :  { %v10552_v21 = vpop.eup %10551  ;;  %v2554_v10 = vadd.f32 1.0, %v10550_v17  ;;  %9491 = vmatpush3.msk.msra.mxu1 %vm1775_vm6, %v8497_v15 }
 0x98d   :  { %v2553_v12 = vadd.f32 1.0, %v10552_v21  ;;  %v2604_v21 = vpop.permute.xlu1 %2603 }
 0x98e   :  { %10565 = vrcp.f32 %v2554_v10 }
 0x98f   :  { %v10554_v27 = vpop.eup %10553  ;;  %10567 = vrcp.f32 %v2553_v12 }
 0x990   :  { %v10556_v35 = vpop.eup %10555  ;;  %v2556_v47 = vadd.f32 1.0, %v10554_v27 }
 0x991   :  { %v10558_v41 = vpop.eup %10557  ;;  %v2582_v34 = vmul.f32 %v10556_v35, %v2572_v11  ;;  %v2602_v11 = vpop.permute.xlu0 %2601 }
 0x992   :  { %v10560_v26 = vpop.eup %10559  ;;  %v2581_v0 = vmul.f32 %v10558_v41, %v2570_v33  ;;  %10569 = vrcp.f32 %v2556_v47 }
 0x993   :  { %v2555_v37 = vadd.f32 1.0, %v10560_v26  ;;  %v2586_v8 = vadd.f32 %v2582_v34, %v11791_v54 }
 0x994   :  { %v10562_v55 = vpop.eup %10561  ;;  %v2585_v25 = vadd.f32 %v2581_v0, %v13394_v53 }
 0x995   :  { %v10564_v63 = vpop.eup %10563  ;;  %10571 = vrcp.f32 %v2555_v37  ;;  %v2584_v28 = vmul.f32 %v10562_v55, %v2576_v29 }
 0x996   :  { %10573 = vtanh.f32 %v2586_v8  ;;  %v2583_v14 = vmul.f32 %v10564_v63, %v2574_v49 }
 0x997   :  { %10575 = vtanh.f32 %v2585_v25  ;;  %v2588_v3 = vadd.f32 %v2584_v28, %v13395_v45  ;;  %v2608_v25 = vpop.permute.xlu1 %2607 }
 0x998   :  { %v2587_v18 = vadd.f32 %v2583_v14, %v13397_v58  ;;  %v10566_v52 = vpop.eup %10565 }
 0x999   :  { %10577 = vtanh.f32 %v2588_v3  ;;  %v10568_v17 = vpop.eup %10567  ;;  %v2594_v12 = vsub.f32 1.0, %v10566_v52  ;;  %v2614_v34 = vmul.f32 %v10566_v52, %v2604_v21  ;;  %v2606_v3 = vpop.permute.xlu0 %2605 }
 0x99a   :  { %10579 = vtanh.f32 %v2587_v18  ;;  %v2593_v35 = vsub.f32 1.0, %v10568_v17  ;;  %v2613_v0 = vmul.f32 %v10568_v17, %v2602_v11 }
 0x99c   :  { %v10570_v10 = vpop.eup %10569 }
 0x99d   :  { %v2596_v37 = vsub.f32 1.0, %v10570_v10  ;;  %v2616_v14 = vmul.f32 %v10570_v10, %v2608_v25 }
 0x99f   :  { %v10572_v27 = vpop.eup %10571 }
 0x9a0   :  { %v10574_v33 = vpop.eup %10573  ;;  %v2595_v29 = vsub.f32 1.0, %v10572_v27  ;;  %v2615_v15 = vmul.f32 %v10572_v27, %v2606_v3 }
 0x9a1   :  { %v10576_v47 = vpop.eup %10575  ;;  %v2598_v41 = vmul.f32 %v10574_v33, %v2594_v12 }
 0x9a2   :  { %v2597_v26 = vmul.f32 %v10576_v47, %v2593_v35 }
 0x9a3   :  { %v10578_v8 = vpop.eup %10577  ;;  %v12083_v55 = vadd.f32 %v2614_v34, %v2598_v41 }
 0x9a4   :  { %v10580_v63 = vpop.eup %10579  ;;  %v12085_v28 = vadd.f32 %v2613_v0, %v2597_v26  ;;  %v2600_v49 = vmul.f32 %v10578_v8, %v2596_v37 }
 0x9a5   :  { %v2599_v18 = vmul.f32 %v10580_v63, %v2595_v29  ;;  %2630 = vrot.lane.b32.xlu1 %v12083_v55, %s11095_s17 }
 0x9a6   :  { %v12088_v52 = vadd.f32 %v2616_v14, %v2600_v49  ;;  %2628 = vrot.lane.b32.xlu0 %v12085_v28, %s11095_s17 }
 0x9a7   :  { %v12091_v17 = vadd.f32 %v2615_v15, %v2599_v18 }
 0x9a9   :  { %2634 = vrot.lane.b32.xlu1 %v12088_v52, %s11095_s17 }
 0x9aa   :  { %2632 = vrot.lane.b32.xlu0 %v12091_v17, %s11095_s17 }
 0xa17   :  { %v2631_v21 = vpop.permute.xlu1 %2630 }
 0xa18   :  { %v2629_v11 = vpop.permute.xlu0 %2628 }
 0xa19   :  { %v10099_v12 = vpack.c.bf16 %v2631_v21, %v2629_v11  ;;  %9492 = vmatprep.mubr.msk.f32.mxu1 %vm1766_vm9, %v2629_v11 }
 0xa1a   :  { %9493 = vmatmul.mubr.msk.f32.vlgmr.msra.gmra.mrb[22].mxu1 %vm1766_vm9, %v2631_v21 }
 0xa1b   :  { %v2635_v10 = vpop.permute.xlu1 %2634  ;;  %10100 = vmatprep.subr.bf16.mxu0 %v10099_v12 }
 0xa1c   :  { %10102 = vmatpush3.bf16.msra.mxu0 %v10099_v12  ;;  %v2633_v27 = vpop.permute.xlu0 %2632 }
 0xa1d   :  { %v10103_v33 = vpack.c.bf16 %v2635_v10, %v2633_v27  ;;  %9495 = vmatprep.mubr.msk.f32.mxu1 %vm1766_vm9, %v2633_v27 }
 0xa1e   :  { %9496 = vmatmul.mubr.msk.f32.gmra.mrb[24].mxu1 %vm1766_vm9, %v2635_v10 }
 0xa1f   :  { %10104 = vmatprep.subr.bf16.mxu0 %v10103_v33 }
 0xa20   :  { %10106 = vmatpush3.bf16.msra.mxu0 %v10103_v33 }
 0xa23   :  { %9507 = vmatmul.mubr.msk.f32.vlgmr.msra.gmra.mrb[42].mxu0 %vm13371_vm3, %v11659_v20 }
 0xa24   :  { %9509 = vmatprep.mubr.msk.f32.mxu0 %vm13371_vm3, %v11661_v24 }
 0xa27   :  { %9510 = vmatmul.mubr.msk.f32.gmra.mrb[44].mxu0 %vm13371_vm3, %v11663_v38 }
 0xa28   :  { %9512 = vmatprep.mubr.msk.f32.mxu0 %vm13371_vm3, %v11666_v43 }
 0xa2b   :  { %9513 = vmatmul.mubr.msk.f32.gmra.mrb[46].mxu0 %vm13371_vm3, %v11685_v7 }
 0xa2c   :  { %9515 = vmatprep.mubr.msk.f32.mxu0 %vm13371_vm3, %v11691_v19 }
 0xa2f   :  { %9516 = vmatmul.mubr.msk.f32.gmra.mrb[48].mxu0 %vm13371_vm3, %v11697_v31 }
 0xa30   :  { %9518 = vmatprep.mubr.msk.f32.mxu0 %vm13371_vm3, %v11707_v39 }
 0xa33   :  { %9519 = vmatmul.mubr.msk.f32.gmra.mrb[50].mxu0 %vm13371_vm3, %v11717_v9 }
 0xa34   :  { %9521 = vmatprep.mubr.msk.f32.mxu0 %vm13371_vm3, %v11719_v16 }
 0xa37   :  { %9522 = vmatmul.mubr.msk.f32.gmra.mrb[52].mxu0 %vm13371_vm3, %v11725_v46 }
 0xa38   :  { %9574 = vmatprep.mubr.msk.f32.mxu0 %vm13371_vm3, %v11657_v62 }
 0xaf6   :  { %v9508_v35 = vpop.f32.mrb[42].mxu0 }
 0xaf7   :  { %v2812_v47 = vadd.f32 %v9508_v35, %v11735_v51  ;;  %v2806_v41 = vpop.f32.mrb[43].mxu0 }
 0xaf8   :  { %v2807_v34 = vadd.f32 %v2806_v41, %v11729_v60 }
 0xaf9   :  { %2871 = vrot.lane.b32.xlu1 %v2812_v47, %s11096_s18 }
 0xafa   :  { %v9511_v26 = vpop.f32.mrb[44].mxu0  ;;  %2869 = vrot.lane.b32.xlu0 %v2807_v34, %s11096_s18 }
 0xafb   :  { %v2822_v0 = vadd.f32 %v9511_v26, %v11731_v44  ;;  %v2816_v37 = vpop.f32.mrb[45].mxu0 }
 0xafc   :  { %v2817_v8 = vadd.f32 %v2816_v37, %v11737_v56 }
 0xafd   :  { %2875 = vrot.lane.b32.xlu1 %v2822_v0, %s11096_s18 }
 0xafe   :  { %v9514_v25 = vpop.f32.mrb[46].mxu0  ;;  %2873 = vrot.lane.b32.xlu0 %v2817_v8, %s11096_s18 }
 0xaff   :  { %v2832_v29 = vadd.f32 %v9514_v25, %v11751_v1  ;;  %v2826_v63 = vpop.f32.mrb[47].mxu0 }
 0xb00   :  { %v2827_v49 = vadd.f32 %v2826_v63, %v11733_v32 }
 0xb01   :  { %2915 = vrot.lane.b32.xlu1 %v2832_v29, %s11096_s18 }
 0xb02   :  { %v9517_v14 = vpop.f32.mrb[48].mxu0  ;;  %2913 = vrot.lane.b32.xlu0 %v2827_v49, %s11096_s18 }
 0xb03   :  { %v2842_v3 = vadd.f32 %v9517_v14, %v11743_v61  ;;  %v2836_v18 = vpop.f32.mrb[49].mxu0 }
 0xb04   :  { %v2837_v15 = vadd.f32 %v2836_v18, %v11771_v22 }
 0xb05   :  { %2919 = vrot.lane.b32.xlu1 %v2842_v3, %s11096_s18 }
 0xb06   :  { %v9520_v21 = vpop.f32.mrb[50].mxu0  ;;  %2917 = vrot.lane.b32.xlu0 %v2837_v15, %s11096_s18 }
 0xb07   :  { %v2852_v11 = vadd.f32 %v9520_v21, %v11761_v48  ;;  %v2846_v12 = vpop.f32.mrb[51].mxu0 }
 0xb08   :  { %v2847_v10 = vadd.f32 %v2846_v12, %v11785_v2 }
 0xb09   :  { %2959 = vrot.lane.b32.xlu1 %v2852_v11, %s11096_s18 }
 0xb0a   :  { %v9523_v27 = vpop.f32.mrb[52].mxu0  ;;  %2957 = vrot.lane.b32.xlu0 %v2847_v10, %s11096_s18 }
 0xb0b   :  { %v2862_v33 = vadd.f32 %v9523_v27, %v11789_v57  ;;  %v2856_v35 = vpop.f32.mrb[53].mxu0 }
 0xb0c   :  { %v2857_v47 = vadd.f32 %v2856_v35, %v11783_v50 }
 0xb0d   :  { %2963 = vrot.lane.b32.xlu1 %v2862_v33, %s11096_s18 }
 0xb0e   :  { %2961 = vrot.lane.b32.xlu0 %v2857_v47, %s11096_s18 }
 0xb11   :  { %2991 = vrot.lane.b32.xlu1 %v12083_v55, %s11090_s3 }
 0xb12   :  { %2989 = vrot.lane.b32.xlu0 %v12085_v28, %s11090_s3 }
 0xb15   :  { %2995 = vrot.lane.b32.xlu1 %v12088_v52, %s11090_s3 }
 0xb16   :  { %2993 = vrot.lane.b32.xlu0 %v12091_v17, %s11090_s3 }
 0xb6b   :  { %v2872_v41 = vpop.permute.xlu1 %2871 }
 0xb6c   :  { %v2882_v34 = vadd.f32 %v2872_v41, %v11745_v5  ;;  %v2870_v26 = vpop.permute.xlu0 %2869 }
 0xb6d   :  { %v2881_v0 = vadd.f32 %v2870_v26, %v11748_v6 }
 0xb6e   :  { %v8516_v37 = vmul.f32 -1.442695, %v2882_v34 }
 0xb6f   :  { %v8515_v8 = vmul.f32 -1.442695, %v2881_v0  ;;  %v2876_v25 = vpop.permute.xlu1 %2875 }
 0xb70   :  { %10581 = vpow2.f32 %v8516_v37  ;;  %v2884_v55 = vadd.f32 %v2876_v25, %v11755_v23  ;;  %v2874_v29 = vpop.permute.xlu0 %2873 }
 0xb71   :  { %10583 = vpow2.f32 %v8515_v8  ;;  %v2883_v28 = vadd.f32 %v2874_v29, %v11758_v42 }
 0xb72   :  { %v8518_v52 = vmul.f32 -1.442695, %v2884_v55 }
 0xb73   :  { %v8517_v63 = vmul.f32 -1.442695, %v2883_v28  ;;  %v2916_v49 = vpop.permute.xlu1 %2915 }
 0xb74   :  { %10585 = vpow2.f32 %v8518_v52  ;;  %v2926_v17 = vadd.f32 %v2916_v49, %v11765_v40  ;;  %v2914_v14 = vpop.permute.xlu0 %2913 }
 0xb75   :  { %10587 = vpow2.f32 %v8517_v63  ;;  %v2925_v3 = vadd.f32 %v2914_v14, %v11768_v36 }
 0xb76   :  { %v8520_v18 = vmul.f32 -1.442695, %v2926_v17 }
 0xb77   :  { %v8519_v15 = vmul.f32 -1.442695, %v2925_v3  ;;  %v2920_v21 = vpop.permute.xlu1 %2919 }
 0xb78   :  { %10589 = vpow2.f32 %v8520_v18  ;;  %v2928_v11 = vadd.f32 %v2920_v21, %v11775_v13  ;;  %v2918_v12 = vpop.permute.xlu0 %2917 }
 0xb79   :  { %10591 = vpow2.f32 %v8519_v15  ;;  %v2927_v10 = vadd.f32 %v2918_v12, %v11778_v59 }
 0xb7a   :  { %v10582_v27 = vpop.eup %10581  ;;  %v8522_v33 = vmul.f32 -1.442695, %v2928_v11 }
 0xb7b   :  { %v10584_v35 = vpop.eup %10583  ;;  %v2898_v47 = vadd.f32 1.0, %v10582_v27  ;;  %v8521_v41 = vmul.f32 -1.442695, %v2927_v10  ;;  %v2960_v28 = vpop.permute.xlu1 %2959 }
 0xb7c   :  { %v2897_v34 = vadd.f32 1.0, %v10584_v35  ;;  %10593 = vpow2.f32 %v8522_v33  ;;  %v2958_v49 = vpop.permute.xlu0 %2957 }
 0xb7d   :  { %10595 = vrcp.f32 %v2898_v47 }
 0xb7e   :  { %v10586_v26 = vpop.eup %10585  ;;  %10597 = vrcp.f32 %v2897_v34 }
 0xb7f   :  { %v10588_v0 = vpop.eup %10587  ;;  %v2900_v37 = vadd.f32 1.0, %v10586_v26  ;;  %10599 = vpow2.f32 %v8521_v41  ;;  %v2964_v33 = vpop.permute.xlu1 %2963 }
 0xb80   :  { %v2899_v8 = vadd.f32 1.0, %v10588_v0  ;;  %v2962_v41 = vpop.permute.xlu0 %2961 }
 0xb81   :  { %10601 = vrcp.f32 %v2900_v37  ;;  %v8523_v37 = vsel %vm3009_vm10, 1.0, %v13398_v4 }
 0xb82   :  { %v10590_v25 = vpop.eup %10589  ;;  %10603 = vrcp.f32 %v2899_v8  ;;  %9524 = vmatprep.subr.msk.mxu1 %vm1775_vm6, %v8523_v37 }
 0xb83   :  { %v10592_v55 = vpop.eup %10591  ;;  %v2942_v29 = vadd.f32 1.0, %v10590_v25  ;;  %9525 = vmatpush3.msk.msra.mxu1 %vm1775_vm6, %v8523_v37 }
 0xb84   :  { %v2941_v63 = vadd.f32 1.0, %v10592_v55  ;;  %v2992_v55 = vpop.permute.xlu1 %2991 }
 0xb85   :  { %10605 = vrcp.f32 %v2942_v29 }
 0xb86   :  { %v10594_v52 = vpop.eup %10593  ;;  %10607 = vrcp.f32 %v2941_v63 }
 0xb87   :  { %v10596_v17 = vpop.eup %10595  ;;  %v2944_v14 = vadd.f32 1.0, %v10594_v52 }
 0xb88   :  { %v10598_v3 = vpop.eup %10597  ;;  %v2970_v18 = vmul.f32 %v10596_v17, %v2960_v28  ;;  %v2990_v28 = vpop.permute.xlu0 %2989 }
 0xb89   :  { %v10600_v15 = vpop.eup %10599  ;;  %v2969_v21 = vmul.f32 %v10598_v3, %v2958_v49  ;;  %10609 = vrcp.f32 %v2944_v14 }
 0xb8a   :  { %v2943_v11 = vadd.f32 1.0, %v10600_v15  ;;  %v2974_v12 = vadd.f32 %v2970_v18, %v11791_v54 }
 0xb8b   :  { %v10602_v10 = vpop.eup %10601  ;;  %v2973_v27 = vadd.f32 %v2969_v21, %v13394_v53 }
 0xb8c   :  { %v10604_v35 = vpop.eup %10603  ;;  %10611 = vrcp.f32 %v2943_v11  ;;  %v2972_v47 = vmul.f32 %v10602_v10, %v2964_v33 }
 0xb8d   :  { %10613 = vtanh.f32 %v2974_v12  ;;  %v2971_v34 = vmul.f32 %v10604_v35, %v2962_v41 }
 0xb8e   :  { %10615 = vtanh.f32 %v2973_v27  ;;  %v2976_v26 = vadd.f32 %v2972_v47, %v13395_v45  ;;  %v2996_v27 = vpop.permute.xlu1 %2995 }
 0xb8f   :  { %v2975_v0 = vadd.f32 %v2971_v34, %v13397_v58  ;;  %v10606_v8 = vpop.eup %10605 }
 0xb90   :  { %10617 = vtanh.f32 %v2976_v26  ;;  %v10608_v25 = vpop.eup %10607  ;;  %v2982_v63 = vsub.f32 1.0, %v10606_v8  ;;  %v3002_v18 = vmul.f32 %v10606_v8, %v2992_v55  ;;  %v2994_v26 = vpop.permute.xlu0 %2993 }
 0xb91   :  { %10619 = vtanh.f32 %v2975_v0  ;;  %v2981_v17 = vsub.f32 1.0, %v10608_v25  ;;  %v3001_v21 = vmul.f32 %v10608_v25, %v2990_v28 }
 0xb93   :  { %v10610_v29 = vpop.eup %10609 }
 0xb94   :  { %v2984_v11 = vsub.f32 1.0, %v10610_v29  ;;  %v3004_v34 = vmul.f32 %v10610_v29, %v2996_v27 }
 0xb96   :  { %v10612_v52 = vpop.eup %10611 }
 0xb97   :  { %v10614_v49 = vpop.eup %10613  ;;  %v2983_v33 = vsub.f32 1.0, %v10612_v52  ;;  %v3003_v37 = vmul.f32 %v10612_v52, %v2994_v26 }
 0xb98   :  { %v10616_v14 = vpop.eup %10615  ;;  %v2986_v3 = vmul.f32 %v10614_v49, %v2982_v63 }
 0xb99   :  { %v2985_v15 = vmul.f32 %v10616_v14, %v2981_v17 }
 0xb9a   :  { %v10618_v12 = vpop.eup %10617  ;;  %v12171_v10 = vadd.f32 %v3002_v18, %v2986_v3 }
 0xb9b   :  { %v10620_v35 = vpop.eup %10619  ;;  %v12173_v47 = vadd.f32 %v3001_v21, %v2985_v15  ;;  %v2988_v41 = vmul.f32 %v10618_v12, %v2984_v11 }
 0xb9c   :  { %v2987_v0 = vmul.f32 %v10620_v35, %v2983_v33  ;;  %3018 = vrot.lane.b32.xlu1 %v12171_v10, %s11097_s19 }
 0xb9d   :  { %v12176_v8 = vadd.f32 %v3004_v34, %v2988_v41  ;;  %3016 = vrot.lane.b32.xlu0 %v12173_v47, %s11097_s19 }
 0xb9e   :  { %v12179_v25 = vadd.f32 %v3003_v37, %v2987_v0 }
 0xba0   :  { %3022 = vrot.lane.b32.xlu1 %v12176_v8, %s11097_s19 }
 0xba1   :  { %3020 = vrot.lane.b32.xlu0 %v12179_v25, %s11097_s19 }
 0xc0e   :  { %v3019_v55 = vpop.permute.xlu1 %3018 }
 0xc0f   :  { %v3017_v28 = vpop.permute.xlu0 %3016 }
 0xc10   :  { %v10107_v63 = vpack.c.bf16 %v3019_v55, %v3017_v28  ;;  %9526 = vmatprep.mubr.msk.f32.mxu1 %vm1766_vm9, %v3017_v28 }
 0xc11   :  { %9527 = vmatmul.mubr.msk.f32.vlgmr.msra.gmra.mrb[22].mxu1 %vm1766_vm9, %v3019_v55 }
 0xc12   :  { %v3023_v29 = vpop.permute.xlu1 %3022  ;;  %10108 = vmatprep.subr.bf16.mxu1 %v10107_v63 }
 0xc13   :  { %v3021_v52 = vpop.permute.xlu0 %3020  ;;  %10110 = vmatpush3.bf16.msra.mxu1 %v10107_v63 }
 0xc14   :  { %v10111_v49 = vpack.c.bf16 %v3023_v29, %v3021_v52  ;;  %9529 = vmatprep.mubr.msk.f32.mxu1 %vm1766_vm9, %v3021_v52 }
 0xc15   :  { %9530 = vmatmul.mubr.msk.f32.gmra.mrb[24].mxu1 %vm1766_vm9, %v3023_v29 }
 0xc16   :  { %10112 = vmatprep.subr.bf16.mxu1 %v10111_v49  ;;  %9540 = vmatprep.mubr.msk.f32.mxu1 %vm13371_vm3, %v11657_v62 }
 0xc17   :  { %10114 = vmatpush3.bf16.msra.mxu1 %v10111_v49 }
 0xc1a   :  { %9541 = vmatmul.mubr.msk.f32.vlgmr.msra.gmra.mrb[38].mxu1 %vm13371_vm3, %v11659_v20 }
 0xc1b   :  { %9543 = vmatprep.mubr.msk.f32.mxu1 %vm13371_vm3, %v11661_v24 }
 0xc1e   :  { %9544 = vmatmul.mubr.msk.f32.gmra.mrb[40].mxu1 %vm13371_vm3, %v11663_v38 }
 0xc1f   :  { %9546 = vmatprep.mubr.msk.f32.mxu1 %vm13371_vm3, %v11666_v43 }
 0xc22   :  { %9547 = vmatmul.mubr.msk.f32.gmra.mrb[42].mxu1 %vm13371_vm3, %v11685_v7 }
 0xc23   :  { %9549 = vmatprep.mubr.msk.f32.mxu1 %vm13371_vm3, %v11691_v19 }
 0xc26   :  { %9550 = vmatmul.mubr.msk.f32.gmra.mrb[44].mxu1 %vm13371_vm3, %v11697_v31 }
 0xc27   :  { %9552 = vmatprep.mubr.msk.f32.mxu1 %vm13371_vm3, %v11707_v39 }
 0xc2a   :  { %9553 = vmatmul.mubr.msk.f32.gmra.mrb[46].mxu1 %vm13371_vm3, %v11717_v9 }
 0xc2b   :  { %9555 = vmatprep.mubr.msk.f32.mxu1 %vm13371_vm3, %v11719_v16 }
 0xc2e   :  { %9556 = vmatmul.mubr.msk.f32.gmra.mrb[48].mxu1 %vm13371_vm3, %v11725_v46 }
 0xced   :  { %v9542_v17 = vpop.f32.mrb[38].mxu1 }
 0xcee   :  { %v3200_v14 = vadd.f32 %v9542_v17, %v11735_v51  ;;  %v3194_v3 = vpop.f32.mrb[39].mxu1 }
 0xcef   :  { %v3195_v18 = vadd.f32 %v3194_v3, %v11729_v60 }
 0xcf0   :  { %3259 = vrot.lane.b32.xlu1 %v3200_v14, %s11098_s20 }
 0xcf1   :  { %v9545_v15 = vpop.f32.mrb[40].mxu1  ;;  %3257 = vrot.lane.b32.xlu0 %v3195_v18, %s11098_s20 }
 0xcf2   :  { %v3210_v21 = vadd.f32 %v9545_v15, %v11731_v44  ;;  %v3204_v11 = vpop.f32.mrb[41].mxu1 }
 0xcf3   :  { %v3205_v12 = vadd.f32 %v3204_v11, %v11737_v56 }
 0xcf4   :  { %3263 = vrot.lane.b32.xlu1 %v3210_v21, %s11098_s20 }
 0xcf5   :  { %v9548_v27 = vpop.f32.mrb[42].mxu1  ;;  %3261 = vrot.lane.b32.xlu0 %v3205_v12, %s11098_s20 }
 0xcf6   :  { %v3220_v33 = vadd.f32 %v9548_v27, %v11751_v1  ;;  %v3214_v35 = vpop.f32.mrb[43].mxu1 }
 0xcf7   :  { %v3215_v41 = vadd.f32 %v3214_v35, %v11733_v32 }
 0xcf8   :  { %3303 = vrot.lane.b32.xlu1 %v3220_v33, %s11098_s20 }
 0xcf9   :  { %v9551_v34 = vpop.f32.mrb[44].mxu1  ;;  %3301 = vrot.lane.b32.xlu0 %v3215_v41, %s11098_s20 }
 0xcfa   :  { %v3230_v26 = vadd.f32 %v9551_v34, %v11743_v61  ;;  %v3224_v0 = vpop.f32.mrb[45].mxu1 }
 0xcfb   :  { %v3225_v37 = vadd.f32 %v3224_v0, %v11771_v22 }
 0xcfc   :  { %3307 = vrot.lane.b32.xlu1 %v3230_v26, %s11098_s20 }
 0xcfd   :  { %v9554_v55 = vpop.f32.mrb[46].mxu1  ;;  %3305 = vrot.lane.b32.xlu0 %v3225_v37, %s11098_s20 }
 0xcfe   :  { %v3240_v28 = vadd.f32 %v9554_v55, %v11761_v48  ;;  %v3234_v63 = vpop.f32.mrb[47].mxu1 }
 0xcff   :  { %v3235_v29 = vadd.f32 %v3234_v63, %v11785_v2 }
 0xd00   :  { %3347 = vrot.lane.b32.xlu1 %v3240_v28, %s11098_s20 }
 0xd01   :  { %v9557_v52 = vpop.f32.mrb[48].mxu1  ;;  %3345 = vrot.lane.b32.xlu0 %v3235_v29, %s11098_s20 }
 0xd02   :  { %v3250_v49 = vadd.f32 %v9557_v52, %v11789_v57  ;;  %v3244_v17 = vpop.f32.mrb[49].mxu1 }
 0xd03   :  { %v3245_v14 = vadd.f32 %v3244_v17, %v11783_v50 }
 0xd04   :  { %3351 = vrot.lane.b32.xlu1 %v3250_v49, %s11098_s20 }
 0xd05   :  { %3349 = vrot.lane.b32.xlu0 %v3245_v14, %s11098_s20 }
 0xd08   :  { %3379 = vrot.lane.b32.xlu1 %v12171_v10, %s11090_s3 }
 0xd09   :  { %3377 = vrot.lane.b32.xlu0 %v12173_v47, %s11090_s3 }
 0xd0c   :  { %3383 = vrot.lane.b32.xlu1 %v12176_v8, %s11090_s3 }
 0xd0d   :  { %3381 = vrot.lane.b32.xlu0 %v12179_v25, %s11090_s3 }
 0xd62   :  { %v3260_v3 = vpop.permute.xlu1 %3259 }
 0xd63   :  { %v3270_v18 = vadd.f32 %v3260_v3, %v11745_v5  ;;  %v3258_v15 = vpop.permute.xlu0 %3257 }
 0xd64   :  { %v3269_v21 = vadd.f32 %v3258_v15, %v11748_v6 }
 0xd65   :  { %v8542_v11 = vmul.f32 -1.442695, %v3270_v18 }
 0xd66   :  { %v8541_v12 = vmul.f32 -1.442695, %v3269_v21  ;;  %v3264_v27 = vpop.permute.xlu1 %3263 }
 0xd67   :  { %10621 = vpow2.f32 %v8542_v11  ;;  %v3272_v10 = vadd.f32 %v3264_v27, %v11755_v23  ;;  %v3262_v33 = vpop.permute.xlu0 %3261 }
 0xd68   :  { %10623 = vpow2.f32 %v8541_v12  ;;  %v3271_v47 = vadd.f32 %v3262_v33, %v11758_v42 }
 0xd69   :  { %v8544_v8 = vmul.f32 -1.442695, %v3272_v10 }
 0xd6a   :  { %v8543_v35 = vmul.f32 -1.442695, %v3271_v47  ;;  %v3304_v41 = vpop.permute.xlu1 %3303 }
 0xd6b   :  { %10625 = vpow2.f32 %v8544_v8  ;;  %v3314_v25 = vadd.f32 %v3304_v41, %v11765_v40  ;;  %v3302_v34 = vpop.permute.xlu0 %3301 }
 0xd6c   :  { %10627 = vpow2.f32 %v8543_v35  ;;  %v3313_v26 = vadd.f32 %v3302_v34, %v11768_v36 }
 0xd6d   :  { %v8546_v0 = vmul.f32 -1.442695, %v3314_v25 }
 0xd6e   :  { %v8545_v37 = vmul.f32 -1.442695, %v3313_v26  ;;  %v3308_v55 = vpop.permute.xlu1 %3307 }
 0xd6f   :  { %10629 = vpow2.f32 %v8546_v0  ;;  %v3316_v28 = vadd.f32 %v3308_v55, %v11775_v13  ;;  %v3306_v63 = vpop.permute.xlu0 %3305 }
 0xd70   :  { %10631 = vpow2.f32 %v8545_v37  ;;  %v3315_v29 = vadd.f32 %v3306_v63, %v11778_v59 }
 0xd71   :  { %v10622_v52 = vpop.eup %10621  ;;  %v8548_v49 = vmul.f32 -1.442695, %v3316_v28 }
 0xd72   :  { %v10624_v17 = vpop.eup %10623  ;;  %v3286_v14 = vadd.f32 1.0, %v10622_v52  ;;  %v8547_v3 = vmul.f32 -1.442695, %v3315_v29  ;;  %v3348_v47 = vpop.permute.xlu1 %3347 }
 0xd73   :  { %v3285_v18 = vadd.f32 1.0, %v10624_v17  ;;  %10633 = vpow2.f32 %v8548_v49  ;;  %v3346_v41 = vpop.permute.xlu0 %3345 }
 0xd74   :  { %10635 = vrcp.f32 %v3286_v14 }
 0xd75   :  { %v10626_v15 = vpop.eup %10625  ;;  %10637 = vrcp.f32 %v3285_v18 }
 0xd76   :  { %v10628_v21 = vpop.eup %10627  ;;  %v3288_v11 = vadd.f32 1.0, %v10626_v15  ;;  %10639 = vpow2.f32 %v8547_v3  ;;  %v3352_v49 = vpop.permute.xlu1 %3351 }
 0xd77   :  { %v3287_v12 = vadd.f32 1.0, %v10628_v21  ;;  %v3350_v3 = vpop.permute.xlu0 %3349 }
 0xd78   :  { %10641 = vrcp.f32 %v3288_v11  ;;  %v8549_v11 = vsel %vm3397_vm13, 1.0, %v13398_v4 }
 0xd79   :  { %v10630_v27 = vpop.eup %10629  ;;  %10643 = vrcp.f32 %v3287_v12  ;;  %9558 = vmatprep.subr.msk.mxu1 %vm1775_vm6, %v8549_v11 }
 0xd7a   :  { %v10632_v10 = vpop.eup %10631  ;;  %v3330_v33 = vadd.f32 1.0, %v10630_v27  ;;  %9559 = vmatpush3.msk.msra.mxu1 %vm1775_vm6, %v8549_v11 }
 0xd7b   :  { %v3329_v35 = vadd.f32 1.0, %v10632_v10  ;;  %v3380_v10 = vpop.permute.xlu1 %3379 }
 0xd7c   :  { %10645 = vrcp.f32 %v3330_v33 }
 0xd7d   :  { %v10634_v8 = vpop.eup %10633  ;;  %10647 = vrcp.f32 %v3329_v35 }
 0xd7e   :  { %v10636_v25 = vpop.eup %10635  ;;  %v3332_v34 = vadd.f32 1.0, %v10634_v8 }
 0xd7f   :  { %v10638_v26 = vpop.eup %10637  ;;  %v3358_v0 = vmul.f32 %v10636_v25, %v3348_v47  ;;  %v3378_v47 = vpop.permute.xlu0 %3377 }
 0xd80   :  { %v10640_v37 = vpop.eup %10639  ;;  %v3357_v55 = vmul.f32 %v10638_v26, %v3346_v41  ;;  %10649 = vrcp.f32 %v3332_v34 }
 0xd81   :  { %v3331_v28 = vadd.f32 1.0, %v10640_v37  ;;  %v3362_v63 = vadd.f32 %v3358_v0, %v11791_v54 }
 0xd82   :  { %v10642_v29 = vpop.eup %10641  ;;  %v3361_v52 = vadd.f32 %v3357_v55, %v13394_v53 }
 0xd83   :  { %v10644_v17 = vpop.eup %10643  ;;  %10651 = vrcp.f32 %v3331_v28  ;;  %v3360_v14 = vmul.f32 %v10642_v29, %v3352_v49 }
 0xd84   :  { %10653 = vtanh.f32 %v3362_v63  ;;  %v3359_v18 = vmul.f32 %v10644_v17, %v3350_v3 }
 0xd85   :  { %10655 = vtanh.f32 %v3361_v52  ;;  %v3364_v15 = vadd.f32 %v3360_v14, %v13395_v45  ;;  %v3384_v52 = vpop.permute.xlu1 %3383 }
 0xd86   :  { %v3363_v21 = vadd.f32 %v3359_v18, %v13397_v58  ;;  %v10646_v12 = vpop.eup %10645 }
 0xd87   :  { %10657 = vtanh.f32 %v3364_v15  ;;  %v10648_v27 = vpop.eup %10647  ;;  %v3370_v35 = vsub.f32 1.0, %v10646_v12  ;;  %v3390_v0 = vmul.f32 %v10646_v12, %v3380_v10  ;;  %v3382_v15 = vpop.permute.xlu0 %3381 }
 0xd88   :  { %10659 = vtanh.f32 %v3363_v21  ;;  %v3369_v25 = vsub.f32 1.0, %v10648_v27  ;;  %v3389_v55 = vmul.f32 %v10648_v27, %v3378_v47 }
 0xd8a   :  { %v10650_v33 = vpop.eup %10649 }
 0xd8b   :  { %v3372_v28 = vsub.f32 1.0, %v10650_v33  ;;  %v3392_v18 = vmul.f32 %v10650_v33, %v3384_v52 }
 0xd8d   :  { %v10652_v8 = vpop.eup %10651 }
 0xd8e   :  { %v10654_v41 = vpop.eup %10653  ;;  %v3371_v49 = vsub.f32 1.0, %v10652_v8  ;;  %v3391_v11 = vmul.f32 %v10652_v8, %v3382_v15 }
 0xd8f   :  { %v10656_v34 = vpop.eup %10655  ;;  %v3374_v26 = vmul.f32 %v10654_v41, %v3370_v35 }
 0xd90   :  { %v3373_v37 = vmul.f32 %v10656_v34, %v3369_v25 }
 0xd91   :  { %v10658_v63 = vpop.eup %10657  ;;  %v12259_v29 = vadd.f32 %v3390_v0, %v3374_v26 }
 0xd92   :  { %v10660_v17 = vpop.eup %10659  ;;  %v12261_v14 = vadd.f32 %v3389_v55, %v3373_v37  ;;  %v3376_v3 = vmul.f32 %v10658_v63, %v3372_v28 }
 0xd93   :  { %v3375_v21 = vmul.f32 %v10660_v17, %v3371_v49  ;;  %3406 = vrot.lane.b32.xlu1 %v12259_v29, %s11099_s21 }
 0xd94   :  { %v12264_v12 = vadd.f32 %v3392_v18, %v3376_v3  ;;  %3404 = vrot.lane.b32.xlu0 %v12261_v14, %s11099_s21 }
 0xd95   :  { %v12267_v27 = vadd.f32 %v3391_v11, %v3375_v21 }
 0xd97   :  { %3410 = vrot.lane.b32.xlu1 %v12264_v12, %s11099_s21 }
 0xd98   :  { %3408 = vrot.lane.b32.xlu0 %v12267_v27, %s11099_s21 }
 0xe05   :  { %v3407_v10 = vpop.permute.xlu1 %3406 }
 0xe06   :  { %v3405_v47 = vpop.permute.xlu0 %3404 }
 0xe07   :  { %v10115_v35 = vpack.c.bf16 %v3407_v10, %v3405_v47  ;;  %9560 = vmatprep.mubr.msk.f32.mxu1 %vm1766_vm9, %v3405_v47 }
 0xe08   :  { %9561 = vmatmul.mubr.msk.f32.vlgmr.msra.gmra.mrb[22].mxu1 %vm1766_vm9, %v3407_v10 }
 0xe09   :  { %v3411_v33 = vpop.permute.xlu1 %3410  ;;  %10116 = vmatprep.subr.bf16.mxu0 %v10115_v35 }
 0xe0a   :  { %10118 = vmatpush3.bf16.msra.mxu0 %v10115_v35  ;;  %v3409_v8 = vpop.permute.xlu0 %3408 }
 0xe0b   :  { %v10119_v41 = vpack.c.bf16 %v3411_v33, %v3409_v8  ;;  %9563 = vmatprep.mubr.msk.f32.mxu1 %vm1766_vm9, %v3409_v8 }
 0xe0c   :  { %9564 = vmatmul.mubr.msk.f32.gmra.mrb[24].mxu1 %vm1766_vm9, %v3411_v33 }
 0xe0d   :  { %10120 = vmatprep.subr.bf16.mxu0 %v10119_v41 }
 0xe0e   :  { %10122 = vmatpush3.bf16.msra.mxu0 %v10119_v41 }
 0xe11   :  { %9575 = vmatmul.mubr.msk.f32.vlgmr.msra.gmra.mrb[54].mxu0 %vm13371_vm3, %v11659_v20 }
 0xe12   :  { %9577 = vmatprep.mubr.msk.f32.mxu0 %vm13371_vm3, %v11661_v24 }
 0xe15   :  { %9578 = vmatmul.mubr.msk.f32.gmra.mrb[56].mxu0 %vm13371_vm3, %v11663_v38 }
 0xe16   :  { %9580 = vmatprep.mubr.msk.f32.mxu0 %vm13371_vm3, %v11666_v43 }
 0xe19   :  { %9581 = vmatmul.mubr.msk.f32.gmra.mrb[58].mxu0 %vm13371_vm3, %v11685_v7 }
 0xe1a   :  { %9583 = vmatprep.mubr.msk.f32.mxu0 %vm13371_vm3, %v11691_v19 }
 0xe1d   :  { %9584 = vmatmul.mubr.msk.f32.gmra.mrb[60].mxu0 %vm13371_vm3, %v11697_v31 }
 0xe1e   :  { %9586 = vmatprep.mubr.msk.f32.mxu0 %vm13371_vm3, %v11707_v39 }
 0xe21   :  { %9587 = vmatmul.mubr.msk.f32.gmra.mrb[62].mxu0 %vm13371_vm3, %v11717_v9 }
 0xe22   :  { %9589 = vmatprep.mubr.msk.f32.mxu0 %vm13371_vm3, %v11719_v16 }
 0xe25   :  { %9590 = vmatmul.mubr.msk.f32.gmra.mrb[64].mxu0 %vm13371_vm3, %v11725_v46 }
 0xe26   :  { %9608 = vmatprep.mubr.msk.f32.mxu0 %vm13371_vm3, %v11657_v62 }
 0xee4   :  { %v9576_v25 = vpop.f32.mrb[54].mxu0 }
 0xee5   :  { %v3588_v34 = vadd.f32 %v9576_v25, %v11735_v51  ;;  %v3582_v26 = vpop.f32.mrb[55].mxu0 }
 0xee6   :  { %v3583_v0 = vadd.f32 %v3582_v26, %v11729_v60 }
 0xee7   :  { %3647 = vrot.lane.b32.xlu1 %v3588_v34, %s11100_s22 }
 0xee8   :  { %v9579_v37 = vpop.f32.mrb[56].mxu0  ;;  %3645 = vrot.lane.b32.xlu0 %v3583_v0, %s11100_s22 }
 0xee9   :  { %v3598_v55 = vadd.f32 %v9579_v37, %v11731_v44  ;;  %v3592_v28 = vpop.f32.mrb[57].mxu0 }
 0xeea   :  { %v3593_v63 = vadd.f32 %v3592_v28, %v11737_v56 }
 0xeeb   :  { %3651 = vrot.lane.b32.xlu1 %v3598_v55, %s11100_s22 }
 0xeec   :  { %v9582_v52 = vpop.f32.mrb[58].mxu0  ;;  %3649 = vrot.lane.b32.xlu0 %v3593_v63, %s11100_s22 }
 0xeed   :  { %v3608_v49 = vadd.f32 %v9582_v52, %v11751_v1  ;;  %v3602_v17 = vpop.f32.mrb[59].mxu0 }
 0xeee   :  { %v3603_v3 = vadd.f32 %v3602_v17, %v11733_v32 }
 0xeef   :  { %3691 = vrot.lane.b32.xlu1 %v3608_v49, %s11100_s22 }
 0xef0   :  { %v9585_v18 = vpop.f32.mrb[60].mxu0  ;;  %3689 = vrot.lane.b32.xlu0 %v3603_v3, %s11100_s22 }
 0xef1   :  { %v3618_v15 = vadd.f32 %v9585_v18, %v11743_v61  ;;  %v3612_v21 = vpop.f32.mrb[61].mxu0 }
 0xef2   :  { %v3613_v11 = vadd.f32 %v3612_v21, %v11771_v22 }
 0xef3   :  { %3695 = vrot.lane.b32.xlu1 %v3618_v15, %s11100_s22 }
 0xef4   :  { %v9588_v10 = vpop.f32.mrb[62].mxu0  ;;  %3693 = vrot.lane.b32.xlu0 %v3613_v11, %s11100_s22 }
 0xef5   :  { %v3628_v47 = vadd.f32 %v9588_v10, %v11761_v48  ;;  %v3622_v35 = vpop.f32.mrb[63].mxu0 }
 0xef6   :  { %v3623_v33 = vadd.f32 %v3622_v35, %v11785_v2 }
 0xef7   :  { %3735 = vrot.lane.b32.xlu1 %v3628_v47, %s11100_s22 }
 0xef8   :  { %v9591_v8 = vpop.f32.mrb[64].mxu0  ;;  %3733 = vrot.lane.b32.xlu0 %v3623_v33, %s11100_s22 }
 0xef9   :  { %v3638_v41 = vadd.f32 %v9591_v8, %v11789_v57  ;;  %v3632_v25 = vpop.f32.mrb[65].mxu0 }
 0xefa   :  { %v3633_v34 = vadd.f32 %v3632_v25, %v11783_v50 }
 0xefb   :  { %3739 = vrot.lane.b32.xlu1 %v3638_v41, %s11100_s22 }
 0xefc   :  { %3737 = vrot.lane.b32.xlu0 %v3633_v34, %s11100_s22 }
 0xeff   :  { %3767 = vrot.lane.b32.xlu1 %v12259_v29, %s11090_s3 }
 0xf00   :  { %3765 = vrot.lane.b32.xlu0 %v12261_v14, %s11090_s3 }
 0xf03   :  { %3771 = vrot.lane.b32.xlu1 %v12264_v12, %s11090_s3 }
 0xf04   :  { %3769 = vrot.lane.b32.xlu0 %v12267_v27, %s11090_s3 }
 0xf59   :  { %v3648_v26 = vpop.permute.xlu1 %3647 }
 0xf5a   :  { %v3658_v0 = vadd.f32 %v3648_v26, %v11745_v5  ;;  %v3646_v37 = vpop.permute.xlu0 %3645 }
 0xf5b   :  { %v3657_v55 = vadd.f32 %v3646_v37, %v11748_v6 }
 0xf5c   :  { %v8568_v28 = vmul.f32 -1.442695, %v3658_v0 }
 0xf5d   :  { %v8567_v63 = vmul.f32 -1.442695, %v3657_v55  ;;  %v3652_v52 = vpop.permute.xlu1 %3651 }
 0xf5e   :  { %10661 = vpow2.f32 %v8568_v28  ;;  %v3660_v29 = vadd.f32 %v3652_v52, %v11755_v23  ;;  %v3650_v49 = vpop.permute.xlu0 %3649 }
 0xf5f   :  { %10663 = vpow2.f32 %v8567_v63  ;;  %v3659_v14 = vadd.f32 %v3650_v49, %v11758_v42 }
 0xf60   :  { %v8570_v12 = vmul.f32 -1.442695, %v3660_v29 }
 0xf61   :  { %v8569_v17 = vmul.f32 -1.442695, %v3659_v14  ;;  %v3692_v3 = vpop.permute.xlu1 %3691 }
 0xf62   :  { %10665 = vpow2.f32 %v8570_v12  ;;  %v3702_v27 = vadd.f32 %v3692_v3, %v11765_v40  ;;  %v3690_v18 = vpop.permute.xlu0 %3689 }
 0xf63   :  { %10667 = vpow2.f32 %v8569_v17  ;;  %v3701_v15 = vadd.f32 %v3690_v18, %v11768_v36 }
 0xf64   :  { %v8572_v21 = vmul.f32 -1.442695, %v3702_v27 }
 0xf65   :  { %v8571_v11 = vmul.f32 -1.442695, %v3701_v15  ;;  %v3696_v10 = vpop.permute.xlu1 %3695 }
 0xf66   :  { %10669 = vpow2.f32 %v8572_v21  ;;  %v3704_v47 = vadd.f32 %v3696_v10, %v11775_v13  ;;  %v3694_v35 = vpop.permute.xlu0 %3693 }
 0xf67   :  { %10671 = vpow2.f32 %v8571_v11  ;;  %v3703_v33 = vadd.f32 %v3694_v35, %v11778_v59 }
 0xf68   :  { %v10662_v8 = vpop.eup %10661  ;;  %v8574_v41 = vmul.f32 -1.442695, %v3704_v47 }
 0xf69   :  { %v10664_v25 = vpop.eup %10663  ;;  %v3674_v34 = vadd.f32 1.0, %v10662_v8  ;;  %v8573_v26 = vmul.f32 -1.442695, %v3703_v33  ;;  %v3736_v14 = vpop.permute.xlu1 %3735 }
 0xf6a   :  { %v3673_v0 = vadd.f32 1.0, %v10664_v25  ;;  %10673 = vpow2.f32 %v8574_v41  ;;  %v3734_v3 = vpop.permute.xlu0 %3733 }
 0xf6b   :  { %10675 = vrcp.f32 %v3674_v34 }
 0xf6c   :  { %v10666_v37 = vpop.eup %10665  ;;  %10677 = vrcp.f32 %v3673_v0 }
 0xf6d   :  { %v10668_v55 = vpop.eup %10667  ;;  %v3676_v28 = vadd.f32 1.0, %v10666_v37  ;;  %10679 = vpow2.f32 %v8573_v26  ;;  %v3740_v41 = vpop.permute.xlu1 %3739 }
 0xf6e   :  { %v3675_v63 = vadd.f32 1.0, %v10668_v55  ;;  %v3738_v26 = vpop.permute.xlu0 %3737 }
 0xf6f   :  { %10681 = vrcp.f32 %v3676_v28  ;;  %v8575_v28 = vsel %vm3785_vm0, 1.0, %v13398_v4 }
 0xf70   :  { %v10670_v52 = vpop.eup %10669  ;;  %10683 = vrcp.f32 %v3675_v63  ;;  %9592 = vmatprep.subr.msk.mxu1 %vm1775_vm6, %v8575_v28 }
 0xf71   :  { %v10672_v29 = vpop.eup %10671  ;;  %v3718_v49 = vadd.f32 1.0, %v10670_v52  ;;  %9593 = vmatpush3.msk.msra.mxu1 %vm1775_vm6, %v8575_v28 }
 0xf72   :  { %v3717_v17 = vadd.f32 1.0, %v10672_v29  ;;  %v3768_v29 = vpop.permute.xlu1 %3767 }
 0xf73   :  { %10685 = vrcp.f32 %v3718_v49 }
 0xf74   :  { %v10674_v12 = vpop.eup %10673  ;;  %10687 = vrcp.f32 %v3717_v17 }
 0xf75   :  { %v10676_v27 = vpop.eup %10675  ;;  %v3720_v18 = vadd.f32 1.0, %v10674_v12 }
 0xf76   :  { %v10678_v15 = vpop.eup %10677  ;;  %v3746_v21 = vmul.f32 %v10676_v27, %v3736_v14  ;;  %v3766_v14 = vpop.permute.xlu0 %3765 }
 0xf77   :  { %v10680_v11 = vpop.eup %10679  ;;  %v3745_v10 = vmul.f32 %v10678_v15, %v3734_v3  ;;  %10689 = vrcp.f32 %v3720_v18 }
 0xf78   :  { %v3719_v47 = vadd.f32 1.0, %v10680_v11  ;;  %v3750_v35 = vadd.f32 %v3746_v21, %v11791_v54 }
 0xf79   :  { %v10682_v33 = vpop.eup %10681  ;;  %v3749_v8 = vadd.f32 %v3745_v10, %v13394_v53 }
 0xf7a   :  { %v10684_v25 = vpop.eup %10683  ;;  %10691 = vrcp.f32 %v3719_v47  ;;  %v3748_v34 = vmul.f32 %v10682_v33, %v3740_v41 }
 0xf7b   :  { %10693 = vtanh.f32 %v3750_v35  ;;  %v3747_v0 = vmul.f32 %v10684_v25, %v3738_v26 }
 0xf7c   :  { %10695 = vtanh.f32 %v3749_v8  ;;  %v3752_v37 = vadd.f32 %v3748_v34, %v13395_v45  ;;  %v3772_v8 = vpop.permute.xlu1 %3771 }
 0xf7d   :  { %v3751_v55 = vadd.f32 %v3747_v0, %v13397_v58  ;;  %v10686_v63 = vpop.eup %10685 }
 0xf7e   :  { %10697 = vtanh.f32 %v3752_v37  ;;  %v10688_v52 = vpop.eup %10687  ;;  %v3758_v17 = vsub.f32 1.0, %v10686_v63  ;;  %v3778_v21 = vmul.f32 %v10686_v63, %v3768_v29  ;;  %v3770_v37 = vpop.permute.xlu0 %3769 }
 0xf7f   :  { %10699 = vtanh.f32 %v3751_v55  ;;  %v3757_v27 = vsub.f32 1.0, %v10688_v52  ;;  %v3777_v10 = vmul.f32 %v10688_v52, %v3766_v14 }
 0xf81   :  { %v10690_v49 = vpop.eup %10689 }
 0xf82   :  { %v3760_v47 = vsub.f32 1.0, %v10690_v49  ;;  %v3780_v0 = vmul.f32 %v10690_v49, %v3772_v8 }
 0xf84   :  { %v10692_v12 = vpop.eup %10691 }
 0xf85   :  { %v10694_v3 = vpop.eup %10693  ;;  %v3759_v41 = vsub.f32 1.0, %v10692_v12  ;;  %v3779_v28 = vmul.f32 %v10692_v12, %v3770_v37 }
 0xf86   :  { %v10696_v18 = vpop.eup %10695  ;;  %v3762_v15 = vmul.f32 %v10694_v3, %v3758_v17 }
 0xf87   :  { %v3761_v11 = vmul.f32 %v10696_v18, %v3757_v27 }
 0xf88   :  { %v10698_v35 = vpop.eup %10697  ;;  %v12347_v33 = vadd.f32 %v3778_v21, %v3762_v15 }
 0xf89   :  { %v10700_v25 = vpop.eup %10699  ;;  %v12349_v34 = vadd.f32 %v3777_v10, %v3761_v11  ;;  %v3764_v26 = vmul.f32 %v10698_v35, %v3760_v47 }
 0xf8a   :  { %v3763_v55 = vmul.f32 %v10700_v25, %v3759_v41  ;;  %3794 = vrot.lane.b32.xlu1 %v12347_v33, %s11101_s23 }
 0xf8b   :  { %v12352_v63 = vadd.f32 %v3780_v0, %v3764_v26  ;;  %3792 = vrot.lane.b32.xlu0 %v12349_v34, %s11101_s23 }
 0xf8c   :  { %v12355_v52 = vadd.f32 %v3779_v28, %v3763_v55 }
 0xf8e   :  { %3798 = vrot.lane.b32.xlu1 %v12352_v63, %s11101_s23 }
 0xf8f   :  { %3796 = vrot.lane.b32.xlu0 %v12355_v52, %s11101_s23 }
 0xffc   :  { %v3795_v29 = vpop.permute.xlu1 %3794 }
 0xffd   :  { %v3793_v14 = vpop.permute.xlu0 %3792 }
 0xffe   :  { %v10123_v17 = vpack.c.bf16 %v3795_v29, %v3793_v14  ;;  %9594 = vmatprep.mubr.msk.f32.mxu1 %vm1766_vm9, %v3793_v14 }
 0xfff   :  { %9595 = vmatmul.mubr.msk.f32.vlgmr.msra.gmra.mrb[22].mxu1 %vm1766_vm9, %v3795_v29 }
0x1000   :  { %v3799_v49 = vpop.permute.xlu1 %3798  ;;  %10124 = vmatprep.subr.bf16.mxu0 %v10123_v17 }
0x1001   :  { %10126 = vmatpush3.bf16.msra.mxu0 %v10123_v17  ;;  %v3797_v12 = vpop.permute.xlu0 %3796 }
0x1002   :  { %v10127_v3 = vpack.c.bf16 %v3799_v49, %v3797_v12  ;;  %9597 = vmatprep.mubr.msk.f32.mxu1 %vm1766_vm9, %v3797_v12 }
0x1003   :  { %9598 = vmatmul.mubr.msk.f32.gmra.mrb[24].mxu1 %vm1766_vm9, %v3799_v49 }
0x1004   :  { %10128 = vmatprep.subr.bf16.mxu0 %v10127_v3 }
0x1005   :  { %10130 = vmatpush3.bf16.msra.mxu0 %v10127_v3 }
0x1008   :  { %9609 = vmatmul.mubr.msk.f32.vlgmr.msra.gmra.mrb[66].mxu0 %vm13371_vm3, %v11659_v20 }
0x1009   :  { %9611 = vmatprep.mubr.msk.f32.mxu0 %vm13371_vm3, %v11661_v24 }
0x100c   :  { %9612 = vmatmul.mubr.msk.f32.gmra.mrb[68].mxu0 %vm13371_vm3, %v11663_v38 }
0x100d   :  { %9614 = vmatprep.mubr.msk.f32.mxu0 %vm13371_vm3, %v11666_v43 }
0x1010   :  { %9615 = vmatmul.mubr.msk.f32.gmra.mrb[70].mxu0 %vm13371_vm3, %v11685_v7 }
0x1011   :  { %9617 = vmatprep.mubr.msk.f32.mxu0 %vm13371_vm3, %v11691_v19 }
0x1014   :  { %9618 = vmatmul.mubr.msk.f32.gmra.mrb[72].mxu0 %vm13371_vm3, %v11697_v31 }
0x1015   :  { %9620 = vmatprep.mubr.msk.f32.mxu0 %vm13371_vm3, %v11707_v39 }
0x1018   :  { %9621 = vmatmul.mubr.msk.f32.gmra.mrb[74].mxu0 %vm13371_vm3, %v11717_v9 }
0x1019   :  { %9623 = vmatprep.mubr.msk.f32.mxu0 %vm13371_vm3, %v11719_v16 }
0x101c   :  { %9624 = vmatmul.mubr.msk.f32.gmra.mrb[76].mxu0 %vm13371_vm3, %v11725_v46 }
0x101d   :  { %9676 = vmatprep.mubr.msk.f32.mxu0 %vm13371_vm3, %v11657_v62 }
0x10db   :  { %v9610_v27 = vpop.f32.mrb[66].mxu0 }
0x10dc   :  { %v3976_v18 = vadd.f32 %v9610_v27, %v11735_v51  ;;  %v3970_v15 = vpop.f32.mrb[67].mxu0 }
0x10dd   :  { %v3971_v21 = vadd.f32 %v3970_v15, %v11729_v60 }
0x10de   :  { %4035 = vrot.lane.b32.xlu1 %v3976_v18, %s11102_s24 }
0x10df   :  { %v9613_v11 = vpop.f32.mrb[68].mxu0  ;;  %4033 = vrot.lane.b32.xlu0 %v3971_v21, %s11102_s24 }
0x10e0   :  { %v3986_v10 = vadd.f32 %v9613_v11, %v11731_v44  ;;  %v3980_v47 = vpop.f32.mrb[69].mxu0 }
0x10e1   :  { %v3981_v35 = vadd.f32 %v3980_v47, %v11737_v56 }
0x10e2   :  { %4039 = vrot.lane.b32.xlu1 %v3986_v10, %s11102_s24 }
0x10e3   :  { %v9616_v8 = vpop.f32.mrb[70].mxu0  ;;  %4037 = vrot.lane.b32.xlu0 %v3981_v35, %s11102_s24 }
0x10e4   :  { %v3996_v41 = vadd.f32 %v9616_v8, %v11751_v1  ;;  %v3990_v25 = vpop.f32.mrb[71].mxu0 }
0x10e5   :  { %v3991_v26 = vadd.f32 %v3990_v25, %v11733_v32 }
0x10e6   :  { %4079 = vrot.lane.b32.xlu1 %v3996_v41, %s11102_s24 }
0x10e7   :  { %v9619_v0 = vpop.f32.mrb[72].mxu0  ;;  %4077 = vrot.lane.b32.xlu0 %v3991_v26, %s11102_s24 }
0x10e8   :  { %v4006_v37 = vadd.f32 %v9619_v0, %v11743_v61  ;;  %v4000_v55 = vpop.f32.mrb[73].mxu0 }
0x10e9   :  { %v4001_v28 = vadd.f32 %v4000_v55, %v11771_v22 }
0x10ea   :  { %4083 = vrot.lane.b32.xlu1 %v4006_v37, %s11102_s24 }
0x10eb   :  { %v9622_v29 = vpop.f32.mrb[74].mxu0  ;;  %4081 = vrot.lane.b32.xlu0 %v4001_v28, %s11102_s24 }
0x10ec   :  { %v4016_v14 = vadd.f32 %v9622_v29, %v11761_v48  ;;  %v4010_v17 = vpop.f32.mrb[75].mxu0 }
0x10ed   :  { %v4011_v49 = vadd.f32 %v4010_v17, %v11785_v2 }
0x10ee   :  { %4123 = vrot.lane.b32.xlu1 %v4016_v14, %s11102_s24 }
0x10ef   :  { %v9625_v12 = vpop.f32.mrb[76].mxu0  ;;  %4121 = vrot.lane.b32.xlu0 %v4011_v49, %s11102_s24 }
0x10f0   :  { %v4026_v3 = vadd.f32 %v9625_v12, %v11789_v57  ;;  %v4020_v27 = vpop.f32.mrb[77].mxu0 }
0x10f1   :  { %v4021_v18 = vadd.f32 %v4020_v27, %v11783_v50 }
0x10f2   :  { %4127 = vrot.lane.b32.xlu1 %v4026_v3, %s11102_s24 }
0x10f3   :  { %4125 = vrot.lane.b32.xlu0 %v4021_v18, %s11102_s24 }
0x10f6   :  { %4155 = vrot.lane.b32.xlu1 %v12347_v33, %s11090_s3 }
0x10f7   :  { %4153 = vrot.lane.b32.xlu0 %v12349_v34, %s11090_s3 }
0x10fa   :  { %4159 = vrot.lane.b32.xlu1 %v12352_v63, %s11090_s3 }
0x10fb   :  { %4157 = vrot.lane.b32.xlu0 %v12355_v52, %s11090_s3 }
0x1150   :  { %v4036_v15 = vpop.permute.xlu1 %4035 }
0x1151   :  { %v4046_v21 = vadd.f32 %v4036_v15, %v11745_v5  ;;  %v4034_v11 = vpop.permute.xlu0 %4033 }
0x1152   :  { %v4045_v10 = vadd.f32 %v4034_v11, %v11748_v6 }
0x1153   :  { %v8594_v47 = vmul.f32 -1.442695, %v4046_v21 }
0x1154   :  { %v8593_v35 = vmul.f32 -1.442695, %v4045_v10  ;;  %v4040_v8 = vpop.permute.xlu1 %4039 }
0x1155   :  { %10701 = vpow2.f32 %v8594_v47  ;;  %v4048_v33 = vadd.f32 %v4040_v8, %v11755_v23  ;;  %v4038_v41 = vpop.permute.xlu0 %4037 }
0x1156   :  { %10703 = vpow2.f32 %v8593_v35  ;;  %v4047_v34 = vadd.f32 %v4038_v41, %v11758_v42 }
0x1157   :  { %v8596_v63 = vmul.f32 -1.442695, %v4048_v33 }
0x1158   :  { %v8595_v25 = vmul.f32 -1.442695, %v4047_v34  ;;  %v4080_v26 = vpop.permute.xlu1 %4079 }
0x1159   :  { %10705 = vpow2.f32 %v8596_v63  ;;  %v4090_v52 = vadd.f32 %v4080_v26, %v11765_v40  ;;  %v4078_v0 = vpop.permute.xlu0 %4077 }
0x115a   :  { %10707 = vpow2.f32 %v8595_v25  ;;  %v4089_v37 = vadd.f32 %v4078_v0, %v11768_v36 }
0x115b   :  { %v8598_v55 = vmul.f32 -1.442695, %v4090_v52 }
0x115c   :  { %v8597_v28 = vmul.f32 -1.442695, %v4089_v37  ;;  %v4084_v29 = vpop.permute.xlu1 %4083 }
0x115d   :  { %10709 = vpow2.f32 %v8598_v55  ;;  %v4092_v14 = vadd.f32 %v4084_v29, %v11775_v13  ;;  %v4082_v17 = vpop.permute.xlu0 %4081 }
0x115e   :  { %10711 = vpow2.f32 %v8597_v28  ;;  %v4091_v49 = vadd.f32 %v4082_v17, %v11778_v59 }
0x115f   :  { %v10702_v12 = vpop.eup %10701  ;;  %v8600_v3 = vmul.f32 -1.442695, %v4092_v14 }
0x1160   :  { %v10704_v27 = vpop.eup %10703  ;;  %v4062_v18 = vadd.f32 1.0, %v10702_v12  ;;  %v8599_v15 = vmul.f32 -1.442695, %v4091_v49  ;;  %v4124_v34 = vpop.permute.xlu1 %4123 }
0x1161   :  { %v4061_v21 = vadd.f32 1.0, %v10704_v27  ;;  %10713 = vpow2.f32 %v8600_v3  ;;  %v4122_v26 = vpop.permute.xlu0 %4121 }
0x1162   :  { %10715 = vrcp.f32 %v4062_v18 }
0x1163   :  { %v10706_v11 = vpop.eup %10705  ;;  %10717 = vrcp.f32 %v4061_v21 }
0x1164   :  { %v10708_v10 = vpop.eup %10707  ;;  %v4064_v47 = vadd.f32 1.0, %v10706_v11  ;;  %10719 = vpow2.f32 %v8599_v15  ;;  %v4128_v3 = vpop.permute.xlu1 %4127 }
0x1165   :  { %v4063_v35 = vadd.f32 1.0, %v10708_v10  ;;  %v4126_v15 = vpop.permute.xlu0 %4125 }
0x1166   :  { %10721 = vrcp.f32 %v4064_v47  ;;  %v8601_v47 = vsel %vm4173_vm11, 1.0, %v13398_v4 }
0x1167   :  { %v10710_v8 = vpop.eup %10709  ;;  %10723 = vrcp.f32 %v4063_v35  ;;  %9626 = vmatprep.subr.msk.mxu1 %vm1775_vm6, %v8601_v47 }
0x1168   :  { %v10712_v33 = vpop.eup %10711  ;;  %v4106_v41 = vadd.f32 1.0, %v10710_v8  ;;  %9627 = vmatpush3.msk.msra.mxu1 %vm1775_vm6, %v8601_v47 }
0x1169   :  { %v4105_v25 = vadd.f32 1.0, %v10712_v33  ;;  %v4156_v33 = vpop.permute.xlu1 %4155 }
0x116a   :  { %10725 = vrcp.f32 %v4106_v41 }
0x116b   :  { %v10714_v63 = vpop.eup %10713  ;;  %10727 = vrcp.f32 %v4105_v25 }
0x116c   :  { %v10716_v52 = vpop.eup %10715  ;;  %v4108_v0 = vadd.f32 1.0, %v10714_v63 }
0x116d   :  { %v10718_v37 = vpop.eup %10717  ;;  %v4134_v55 = vmul.f32 %v10716_v52, %v4124_v34  ;;  %v4154_v34 = vpop.permute.xlu0 %4153 }
0x116e   :  { %v10720_v28 = vpop.eup %10719  ;;  %v4133_v29 = vmul.f32 %v10718_v37, %v4122_v26  ;;  %10729 = vrcp.f32 %v4108_v0 }
0x116f   :  { %v4107_v14 = vadd.f32 1.0, %v10720_v28  ;;  %v4138_v17 = vadd.f32 %v4134_v55, %v11791_v54 }
0x1170   :  { %v10722_v49 = vpop.eup %10721  ;;  %v4137_v12 = vadd.f32 %v4133_v29, %v13394_v53 }
0x1171   :  { %v10724_v27 = vpop.eup %10723  ;;  %10731 = vrcp.f32 %v4107_v14  ;;  %v4136_v18 = vmul.f32 %v10722_v49, %v4128_v3 }
0x1172   :  { %10733 = vtanh.f32 %v4138_v17  ;;  %v4135_v21 = vmul.f32 %v10724_v27, %v4126_v15 }
0x1173   :  { %10735 = vtanh.f32 %v4137_v12  ;;  %v4140_v11 = vadd.f32 %v4136_v18, %v13395_v45  ;;  %v4160_v12 = vpop.permute.xlu1 %4159 }
0x1174   :  { %v4139_v10 = vadd.f32 %v4135_v21, %v13397_v58  ;;  %v10726_v35 = vpop.eup %10725 }
0x1175   :  { %10737 = vtanh.f32 %v4140_v11  ;;  %v10728_v8 = vpop.eup %10727  ;;  %v4146_v25 = vsub.f32 1.0, %v10726_v35  ;;  %v4166_v55 = vmul.f32 %v10726_v35, %v4156_v33  ;;  %v4158_v11 = vpop.permute.xlu0 %4157 }
0x1176   :  { %10739 = vtanh.f32 %v4139_v10  ;;  %v4145_v52 = vsub.f32 1.0, %v10728_v8  ;;  %v4165_v29 = vmul.f32 %v10728_v8, %v4154_v34 }
0x1178   :  { %v10730_v41 = vpop.eup %10729 }
0x1179   :  { %v4148_v14 = vsub.f32 1.0, %v10730_v41  ;;  %v4168_v21 = vmul.f32 %v10730_v41, %v4160_v12 }
0x117b   :  { %v10732_v63 = vpop.eup %10731 }
0x117c   :  { %v10734_v26 = vpop.eup %10733  ;;  %v4147_v3 = vsub.f32 1.0, %v10732_v63  ;;  %v4167_v47 = vmul.f32 %v10732_v63, %v4158_v11 }
0x117d   :  { %v10736_v0 = vpop.eup %10735  ;;  %v4150_v37 = vmul.f32 %v10734_v26, %v4146_v25 }
0x117e   :  { %v4149_v28 = vmul.f32 %v10736_v0, %v4145_v52 }
0x117f   :  { %v10738_v17 = vpop.eup %10737  ;;  %v12435_v49 = vadd.f32 %v4166_v55, %v4150_v37 }
0x1180   :  { %v10740_v27 = vpop.eup %10739  ;;  %v12437_v18 = vadd.f32 %v4165_v29, %v4149_v28  ;;  %v4152_v15 = vmul.f32 %v10738_v17, %v4148_v14 }
0x1181   :  { %v4151_v10 = vmul.f32 %v10740_v27, %v4147_v3  ;;  %4182 = vrot.lane.b32.xlu1 %v12435_v49, %s11103_s25 }
0x1182   :  { %v12440_v35 = vadd.f32 %v4168_v21, %v4152_v15  ;;  %4180 = vrot.lane.b32.xlu0 %v12437_v18, %s11103_s25 }
0x1183   :  { %v12443_v8 = vadd.f32 %v4167_v47, %v4151_v10 }
0x1185   :  { %4186 = vrot.lane.b32.xlu1 %v12440_v35, %s11103_s25 }
0x1186   :  { %4184 = vrot.lane.b32.xlu0 %v12443_v8, %s11103_s25 }
0x11f3   :  { %v4183_v33 = vpop.permute.xlu1 %4182 }
0x11f4   :  { %v4181_v34 = vpop.permute.xlu0 %4180 }
0x11f5   :  { %v10131_v25 = vpack.c.bf16 %v4183_v33, %v4181_v34  ;;  %9628 = vmatprep.mubr.msk.f32.mxu1 %vm1766_vm9, %v4181_v34 }
0x11f6   :  { %9629 = vmatmul.mubr.msk.f32.vlgmr.msra.gmra.mrb[22].mxu1 %vm1766_vm9, %v4183_v33 }
0x11f7   :  { %v4187_v41 = vpop.permute.xlu1 %4186  ;;  %10132 = vmatprep.subr.bf16.mxu1 %v10131_v25 }
0x11f8   :  { %v4185_v63 = vpop.permute.xlu0 %4184  ;;  %10134 = vmatpush3.bf16.msra.mxu1 %v10131_v25 }
0x11f9   :  { %v10135_v26 = vpack.c.bf16 %v4187_v41, %v4185_v63  ;;  %9631 = vmatprep.mubr.msk.f32.mxu1 %vm1766_vm9, %v4185_v63 }
0x11fa   :  { %9632 = vmatmul.mubr.msk.f32.gmra.mrb[24].mxu1 %vm1766_vm9, %v4187_v41 }
0x11fb   :  { %10136 = vmatprep.subr.bf16.mxu1 %v10135_v26  ;;  %9642 = vmatprep.mubr.msk.f32.mxu1 %vm13371_vm3, %v11657_v62 }
0x11fc   :  { %10138 = vmatpush3.bf16.msra.mxu1 %v10135_v26 }
0x11ff   :  { %9643 = vmatmul.mubr.msk.f32.vlgmr.msra.gmra.mrb[50].mxu1 %vm13371_vm3, %v11659_v20 }
0x1200   :  { %9645 = vmatprep.mubr.msk.f32.mxu1 %vm13371_vm3, %v11661_v24 }
0x1203   :  { %9646 = vmatmul.mubr.msk.f32.gmra.mrb[52].mxu1 %vm13371_vm3, %v11663_v38 }
0x1204   :  { %9648 = vmatprep.mubr.msk.f32.mxu1 %vm13371_vm3, %v11666_v43 }
0x1207   :  { %9649 = vmatmul.mubr.msk.f32.gmra.mrb[54].mxu1 %vm13371_vm3, %v11685_v7 }
0x1208   :  { %9651 = vmatprep.mubr.msk.f32.mxu1 %vm13371_vm3, %v11691_v19 }
0x120b   :  { %9652 = vmatmul.mubr.msk.f32.gmra.mrb[56].mxu1 %vm13371_vm3, %v11697_v31 }
0x120c   :  { %9654 = vmatprep.mubr.msk.f32.mxu1 %vm13371_vm3, %v11707_v39 }
0x120f   :  { %9655 = vmatmul.mubr.msk.f32.gmra.mrb[58].mxu1 %vm13371_vm3, %v11717_v9 }
0x1210   :  { %9657 = vmatprep.mubr.msk.f32.mxu1 %vm13371_vm3, %v11719_v16 }
0x1213   :  { %9658 = vmatmul.mubr.msk.f32.gmra.mrb[60].mxu1 %vm13371_vm3, %v11725_v46 }
0x12d2   :  { %v9644_v52 = vpop.f32.mrb[50].mxu1 }
0x12d3   :  { %v4364_v0 = vadd.f32 %v9644_v52, %v11735_v51  ;;  %v4358_v37 = vpop.f32.mrb[51].mxu1 }
0x12d4   :  { %v4359_v55 = vadd.f32 %v4358_v37, %v11729_v60 }
0x12d5   :  { %4423 = vrot.lane.b32.xlu1 %v4364_v0, %s11104_s26 }
0x12d6   :  { %v9647_v28 = vpop.f32.mrb[52].mxu1  ;;  %4421 = vrot.lane.b32.xlu0 %v4359_v55, %s11104_s26 }
0x12d7   :  { %v4374_v29 = vadd.f32 %v9647_v28, %v11731_v44  ;;  %v4368_v14 = vpop.f32.mrb[53].mxu1 }
0x12d8   :  { %v4369_v17 = vadd.f32 %v4368_v14, %v11737_v56 }
0x12d9   :  { %4427 = vrot.lane.b32.xlu1 %v4374_v29, %s11104_s26 }
0x12da   :  { %v9650_v12 = vpop.f32.mrb[54].mxu1  ;;  %4425 = vrot.lane.b32.xlu0 %v4369_v17, %s11104_s26 }
0x12db   :  { %v4384_v3 = vadd.f32 %v9650_v12, %v11751_v1  ;;  %v4378_v27 = vpop.f32.mrb[55].mxu1 }
0x12dc   :  { %v4379_v15 = vadd.f32 %v4378_v27, %v11733_v32 }
0x12dd   :  { %4467 = vrot.lane.b32.xlu1 %v4384_v3, %s11104_s26 }
0x12de   :  { %v9653_v21 = vpop.f32.mrb[56].mxu1  ;;  %4465 = vrot.lane.b32.xlu0 %v4379_v15, %s11104_s26 }
0x12df   :  { %v4394_v11 = vadd.f32 %v9653_v21, %v11743_v61  ;;  %v4388_v10 = vpop.f32.mrb[57].mxu1 }
0x12e0   :  { %v4389_v47 = vadd.f32 %v4388_v10, %v11771_v22 }
0x12e1   :  { %4471 = vrot.lane.b32.xlu1 %v4394_v11, %s11104_s26 }
0x12e2   :  { %v9656_v33 = vpop.f32.mrb[58].mxu1  ;;  %4469 = vrot.lane.b32.xlu0 %v4389_v47, %s11104_s26 }
0x12e3   :  { %v4404_v34 = vadd.f32 %v9656_v33, %v11761_v48  ;;  %v4398_v25 = vpop.f32.mrb[59].mxu1 }
0x12e4   :  { %v4399_v41 = vadd.f32 %v4398_v25, %v11785_v2 }
0x12e5   :  { %4511 = vrot.lane.b32.xlu1 %v4404_v34, %s11104_s26 }
0x12e6   :  { %v9659_v63 = vpop.f32.mrb[60].mxu1  ;;  %4509 = vrot.lane.b32.xlu0 %v4399_v41, %s11104_s26 }
0x12e7   :  { %v4414_v26 = vadd.f32 %v9659_v63, %v11789_v57  ;;  %v4408_v52 = vpop.f32.mrb[61].mxu1 }
0x12e8   :  { %v4409_v0 = vadd.f32 %v4408_v52, %v11783_v50 }
0x12e9   :  { %4515 = vrot.lane.b32.xlu1 %v4414_v26, %s11104_s26 }
0x12ea   :  { %4513 = vrot.lane.b32.xlu0 %v4409_v0, %s11104_s26 }
0x12ed   :  { %4543 = vrot.lane.b32.xlu1 %v12435_v49, %s11090_s3 }
0x12ee   :  { %4541 = vrot.lane.b32.xlu0 %v12437_v18, %s11090_s3 }
0x12f1   :  { %4547 = vrot.lane.b32.xlu1 %v12440_v35, %s11090_s3 }
0x12f2   :  { %4545 = vrot.lane.b32.xlu0 %v12443_v8, %s11090_s3 }
0x1347   :  { %v4424_v37 = vpop.permute.xlu1 %4423 }
0x1348   :  { %v4434_v55 = vadd.f32 %v4424_v37, %v11745_v5  ;;  %v4422_v28 = vpop.permute.xlu0 %4421 }
0x1349   :  { %v4433_v29 = vadd.f32 %v4422_v28, %v11748_v6 }
0x134a   :  { %v8620_v14 = vmul.f32 -1.442695, %v4434_v55 }
0x134b   :  { %v8619_v17 = vmul.f32 -1.442695, %v4433_v29  ;;  %v4428_v12 = vpop.permute.xlu1 %4427 }
0x134c   :  { %10741 = vpow2.f32 %v8620_v14  ;;  %v4436_v49 = vadd.f32 %v4428_v12, %v11755_v23  ;;  %v4426_v3 = vpop.permute.xlu0 %4425 }
0x134d   :  { %10743 = vpow2.f32 %v8619_v17  ;;  %v4435_v18 = vadd.f32 %v4426_v3, %v11758_v42 }
0x134e   :  { %v8622_v35 = vmul.f32 -1.442695, %v4436_v49 }
0x134f   :  { %v8621_v27 = vmul.f32 -1.442695, %v4435_v18  ;;  %v4468_v15 = vpop.permute.xlu1 %4467 }
0x1350   :  { %10745 = vpow2.f32 %v8622_v35  ;;  %v4478_v8 = vadd.f32 %v4468_v15, %v11765_v40  ;;  %v4466_v21 = vpop.permute.xlu0 %4465 }
0x1351   :  { %10747 = vpow2.f32 %v8621_v27  ;;  %v4477_v11 = vadd.f32 %v4466_v21, %v11768_v36 }
0x1352   :  { %v8624_v10 = vmul.f32 -1.442695, %v4478_v8 }
0x1353   :  { %v8623_v47 = vmul.f32 -1.442695, %v4477_v11  ;;  %v4472_v33 = vpop.permute.xlu1 %4471 }
0x1354   :  { %10749 = vpow2.f32 %v8624_v10  ;;  %v4480_v34 = vadd.f32 %v4472_v33, %v11775_v13  ;;  %v4470_v25 = vpop.permute.xlu0 %4469 }
0x1355   :  { %10751 = vpow2.f32 %v8623_v47  ;;  %v4479_v41 = vadd.f32 %v4470_v25, %v11778_v59 }
0x1356   :  { %v10742_v63 = vpop.eup %10741  ;;  %v8626_v26 = vmul.f32 -1.442695, %v4480_v34 }
0x1357   :  { %v10744_v52 = vpop.eup %10743  ;;  %v4450_v0 = vadd.f32 1.0, %v10742_v63  ;;  %v8625_v37 = vmul.f32 -1.442695, %v4479_v41  ;;  %v4512_v18 = vpop.permute.xlu1 %4511 }
0x1358   :  { %v4449_v55 = vadd.f32 1.0, %v10744_v52  ;;  %10753 = vpow2.f32 %v8626_v26  ;;  %v4510_v15 = vpop.permute.xlu0 %4509 }
0x1359   :  { %10755 = vrcp.f32 %v4450_v0 }
0x135a   :  { %v10746_v28 = vpop.eup %10745  ;;  %10757 = vrcp.f32 %v4449_v55 }
0x135b   :  { %v10748_v29 = vpop.eup %10747  ;;  %v4452_v14 = vadd.f32 1.0, %v10746_v28  ;;  %10759 = vpow2.f32 %v8625_v37  ;;  %v4516_v26 = vpop.permute.xlu1 %4515 }
0x135c   :  { %v4451_v17 = vadd.f32 1.0, %v10748_v29  ;;  %v4514_v37 = vpop.permute.xlu0 %4513 }
0x135d   :  { %10761 = vrcp.f32 %v4452_v14  ;;  %v8627_v14 = vsel %vm4561_vm12, 1.0, %v13398_v4 }
0x135e   :  { %v10750_v12 = vpop.eup %10749  ;;  %10763 = vrcp.f32 %v4451_v17  ;;  %9660 = vmatprep.subr.msk.mxu1 %vm1775_vm6, %v8627_v14 }
0x135f   :  { %v10752_v49 = vpop.eup %10751  ;;  %v4494_v3 = vadd.f32 1.0, %v10750_v12  ;;  %9661 = vmatpush3.msk.msra.mxu1 %vm1775_vm6, %v8627_v14 }
0x1360   :  { %v4493_v27 = vadd.f32 1.0, %v10752_v49  ;;  %v4544_v49 = vpop.permute.xlu1 %4543 }
0x1361   :  { %10765 = vrcp.f32 %v4494_v3 }
0x1362   :  { %v10754_v35 = vpop.eup %10753  ;;  %10767 = vrcp.f32 %v4493_v27 }
0x1363   :  { %v10756_v8 = vpop.eup %10755  ;;  %v4496_v21 = vadd.f32 1.0, %v10754_v35 }
0x1364   :  { %v10758_v11 = vpop.eup %10757  ;;  %v4522_v10 = vmul.f32 %v10756_v8, %v4512_v18  ;;  %v4542_v18 = vpop.permute.xlu0 %4541 }
0x1365   :  { %v10760_v47 = vpop.eup %10759  ;;  %v4521_v33 = vmul.f32 %v10758_v11, %v4510_v15  ;;  %10769 = vrcp.f32 %v4496_v21 }
0x1366   :  { %v4495_v34 = vadd.f32 1.0, %v10760_v47  ;;  %v4526_v25 = vadd.f32 %v4522_v10, %v11791_v54 }
0x1367   :  { %v10762_v41 = vpop.eup %10761  ;;  %v4525_v63 = vadd.f32 %v4521_v33, %v13394_v53 }
0x1368   :  { %v10764_v52 = vpop.eup %10763  ;;  %10771 = vrcp.f32 %v4495_v34  ;;  %v4524_v0 = vmul.f32 %v10762_v41, %v4516_v26 }
0x1369   :  { %10773 = vtanh.f32 %v4526_v25  ;;  %v4523_v55 = vmul.f32 %v10764_v52, %v4514_v37 }
0x136a   :  { %10775 = vtanh.f32 %v4525_v63  ;;  %v4528_v28 = vadd.f32 %v4524_v0, %v13395_v45  ;;  %v4548_v63 = vpop.permute.xlu1 %4547 }
0x136b   :  { %v4527_v29 = vadd.f32 %v4523_v55, %v13397_v58  ;;  %v10766_v17 = vpop.eup %10765 }
0x136c   :  { %10777 = vtanh.f32 %v4528_v28  ;;  %v10768_v12 = vpop.eup %10767  ;;  %v4534_v27 = vsub.f32 1.0, %v10766_v17  ;;  %v4554_v10 = vmul.f32 %v10766_v17, %v4544_v49  ;;  %v4546_v28 = vpop.permute.xlu0 %4545 }
0x136d   :  { %10779 = vtanh.f32 %v4527_v29  ;;  %v4533_v8 = vsub.f32 1.0, %v10768_v12  ;;  %v4553_v33 = vmul.f32 %v10768_v12, %v4542_v18 }
0x136f   :  { %v10770_v3 = vpop.eup %10769 }
0x1370   :  { %v4536_v34 = vsub.f32 1.0, %v10770_v3  ;;  %v4556_v55 = vmul.f32 %v10770_v3, %v4548_v63 }
0x1372   :  { %v10772_v35 = vpop.eup %10771 }
0x1373   :  { %v10774_v15 = vpop.eup %10773  ;;  %v4535_v26 = vsub.f32 1.0, %v10772_v35  ;;  %v4555_v14 = vmul.f32 %v10772_v35, %v4546_v28 }
0x1374   :  { %v10776_v21 = vpop.eup %10775  ;;  %v4538_v11 = vmul.f32 %v10774_v15, %v4534_v27 }
0x1375   :  { %v4537_v47 = vmul.f32 %v10776_v21, %v4533_v8 }
0x1376   :  { %v10778_v25 = vpop.eup %10777  ;;  %v12523_v41 = vadd.f32 %v4554_v10, %v4538_v11 }
0x1377   :  { %v10780_v52 = vpop.eup %10779  ;;  %v12525_v0 = vadd.f32 %v4553_v33, %v4537_v47  ;;  %v4540_v37 = vmul.f32 %v10778_v25, %v4536_v34 }
0x1378   :  { %v4539_v29 = vmul.f32 %v10780_v52, %v4535_v26  ;;  %4570 = vrot.lane.b32.xlu1 %v12523_v41, %s11087_s16 }
0x1379   :  { %v12529_v17 = vadd.f32 %v4556_v55, %v4540_v37  ;;  %4568 = vrot.lane.b32.xlu0 %v12525_v0, %s11087_s16 }
0x137a   :  { %v12533_v12 = vadd.f32 %v4555_v14, %v4539_v29 }
0x137c   :  { %4574 = vrot.lane.b32.xlu1 %v12529_v17, %s11087_s16 }
0x137d   :  { %4572 = vrot.lane.b32.xlu0 %v12533_v12, %s11087_s16  ;;  %s11105_s16 = smov 18  }
0x13ea   :  { %v4571_v49 = vpop.permute.xlu1 %4570 }
0x13eb   :  { %v4569_v3 = vpop.permute.xlu0 %4568 }
0x13ec   :  { %v10139_v18 = vpack.c.bf16 %v4571_v49, %v4569_v3  ;;  %9662 = vmatprep.mubr.msk.f32.mxu1 %vm1766_vm9, %v4569_v3 }
0x13ed   :  { %9663 = vmatmul.mubr.msk.f32.vlgmr.msra.gmra.mrb[22].mxu1 %vm1766_vm9, %v4571_v49 }
0x13ee   :  { %v4575_v35 = vpop.permute.xlu1 %4574  ;;  %10140 = vmatprep.subr.bf16.mxu0 %v10139_v18 }
0x13ef   :  { %10142 = vmatpush3.bf16.msra.mxu0 %v10139_v18  ;;  %v4573_v27 = vpop.permute.xlu0 %4572 }
0x13f0   :  { %v10143_v15 = vpack.c.bf16 %v4575_v35, %v4573_v27  ;;  %9665 = vmatprep.mubr.msk.f32.mxu1 %vm1766_vm9, %v4573_v27 }
0x13f1   :  { %9666 = vmatmul.mubr.msk.f32.gmra.mrb[24].mxu1 %vm1766_vm9, %v4575_v35 }
0x13f2   :  { %10144 = vmatprep.subr.bf16.mxu0 %v10143_v15 }
0x13f3   :  { %10146 = vmatpush3.bf16.msra.mxu0 %v10143_v15 }
0x13f6   :  { %9677 = vmatmul.mubr.msk.f32.vlgmr.msra.gmra.mrb[78].mxu0 %vm13371_vm3, %v11659_v20 }
0x13f7   :  { %9679 = vmatprep.mubr.msk.f32.mxu0 %vm13371_vm3, %v11661_v24 }
0x13fa   :  { %9680 = vmatmul.mubr.msk.f32.gmra.mrb[80].mxu0 %vm13371_vm3, %v11663_v38 }
0x13fb   :  { %9682 = vmatprep.mubr.msk.f32.mxu0 %vm13371_vm3, %v11666_v43 }
0x13fe   :  { %9683 = vmatmul.mubr.msk.f32.gmra.mrb[82].mxu0 %vm13371_vm3, %v11685_v7 }
0x13ff   :  { %9685 = vmatprep.mubr.msk.f32.mxu0 %vm13371_vm3, %v11691_v19 }
0x1402   :  { %9686 = vmatmul.mubr.msk.f32.gmra.mrb[84].mxu0 %vm13371_vm3, %v11697_v31 }
0x1403   :  { %9688 = vmatprep.mubr.msk.f32.mxu0 %vm13371_vm3, %v11707_v39 }
0x1406   :  { %9689 = vmatmul.mubr.msk.f32.gmra.mrb[86].mxu0 %vm13371_vm3, %v11717_v9 }
0x1407   :  { %9691 = vmatprep.mubr.msk.f32.mxu0 %vm13371_vm3, %v11719_v16 }
0x140a   :  { %9692 = vmatmul.mubr.msk.f32.gmra.mrb[88].mxu0 %vm13371_vm3, %v11725_v46 }
0x140b   :  { %9710 = vmatprep.mubr.msk.f32.mxu0 %vm13371_vm3, %v11657_v62 }
0x14c9   :  { %v9678_v8 = vpop.f32.mrb[78].mxu0 }
0x14ca   :  { %v4752_v21 = vadd.f32 %v9678_v8, %v11735_v51  ;;  %v4746_v11 = vpop.f32.mrb[79].mxu0 }
0x14cb   :  { %v4747_v10 = vadd.f32 %v4746_v11, %v11729_v60 }
0x14cc   :  { %4811 = vrot.lane.b32.xlu1 %v4752_v21, %s11105_s16 }
0x14cd   :  { %v9681_v47 = vpop.f32.mrb[80].mxu0  ;;  %4809 = vrot.lane.b32.xlu0 %v4747_v10, %s11105_s16 }
0x14ce   :  { %v4762_v33 = vadd.f32 %v9681_v47, %v11731_v44  ;;  %v4756_v34 = vpop.f32.mrb[81].mxu0 }
0x14cf   :  { %v4757_v25 = vadd.f32 %v4756_v34, %v11737_v56 }
0x14d0   :  { %4815 = vrot.lane.b32.xlu1 %v4762_v33, %s11105_s16 }
0x14d1   :  { %v9684_v63 = vpop.f32.mrb[82].mxu0  ;;  %4813 = vrot.lane.b32.xlu0 %v4757_v25, %s11105_s16 }
0x14d2   :  { %v4772_v26 = vadd.f32 %v9684_v63, %v11751_v1  ;;  %v4766_v52 = vpop.f32.mrb[83].mxu0 }
0x14d3   :  { %v4767_v37 = vadd.f32 %v4766_v52, %v11733_v32 }
0x14d4   :  { %4855 = vrot.lane.b32.xlu1 %v4772_v26, %s11105_s16 }
0x14d5   :  { %v9687_v55 = vpop.f32.mrb[84].mxu0  ;;  %4853 = vrot.lane.b32.xlu0 %v4767_v37, %s11105_s16 }
0x14d6   :  { %v4782_v28 = vadd.f32 %v9687_v55, %v11743_v61  ;;  %v4776_v29 = vpop.f32.mrb[85].mxu0 }
0x14d7   :  { %v4777_v14 = vadd.f32 %v4776_v29, %v11771_v22 }
0x14d8   :  { %4859 = vrot.lane.b32.xlu1 %v4782_v28, %s11105_s16 }
0x14d9   :  { %v9690_v49 = vpop.f32.mrb[86].mxu0  ;;  %4857 = vrot.lane.b32.xlu0 %v4777_v14, %s11105_s16 }
0x14da   :  { %v4792_v3 = vadd.f32 %v9690_v49, %v11761_v48  ;;  %v4786_v18 = vpop.f32.mrb[87].mxu0 }
0x14db   :  { %v4787_v35 = vadd.f32 %v4786_v18, %v11785_v2 }
0x14dc   :  { %4899 = vrot.lane.b32.xlu1 %v4792_v3, %s11105_s16 }
0x14dd   :  { %v9693_v27 = vpop.f32.mrb[88].mxu0  ;;  %4897 = vrot.lane.b32.xlu0 %v4787_v35, %s11105_s16 }
0x14de   :  { %v4802_v15 = vadd.f32 %v9693_v27, %v11789_v57  ;;  %v4796_v8 = vpop.f32.mrb[89].mxu0 }
0x14df   :  { %v4797_v21 = vadd.f32 %v4796_v8, %v11783_v50 }
0x14e0   :  { %4903 = vrot.lane.b32.xlu1 %v4802_v15, %s11105_s16 }
0x14e1   :  { %4901 = vrot.lane.b32.xlu0 %v4797_v21, %s11105_s16 }
0x14e4   :  { %4931 = vrot.lane.b32.xlu1 %v12523_v41, %s11090_s3 }
0x14e5   :  { %4929 = vrot.lane.b32.xlu0 %v12525_v0, %s11090_s3 }
0x14e8   :  { %4935 = vrot.lane.b32.xlu1 %v12529_v17, %s11090_s3 }
0x14e9   :  { %4933 = vrot.lane.b32.xlu0 %v12533_v12, %s11090_s3 }
0x153e   :  { %v4812_v11 = vpop.permute.xlu1 %4811 }
0x153f   :  { %v4822_v10 = vadd.f32 %v4812_v11, %v11745_v5  ;;  %v4810_v47 = vpop.permute.xlu0 %4809 }
0x1540   :  { %v4821_v33 = vadd.f32 %v4810_v47, %v11748_v6 }
0x1541   :  { %v8646_v34 = vmul.f32 -1.442695, %v4822_v10 }
0x1542   :  { %v8645_v25 = vmul.f32 -1.442695, %v4821_v33  ;;  %v4816_v63 = vpop.permute.xlu1 %4815 }
0x1543   :  { %10781 = vpow2.f32 %v8646_v34  ;;  %v4824_v41 = vadd.f32 %v4816_v63, %v11755_v23  ;;  %v4814_v26 = vpop.permute.xlu0 %4813 }
0x1544   :  { %10783 = vpow2.f32 %v8645_v25  ;;  %v4823_v0 = vadd.f32 %v4814_v26, %v11758_v42 }
0x1545   :  { %v8648_v17 = vmul.f32 -1.442695, %v4824_v41 }
0x1546   :  { %v8647_v52 = vmul.f32 -1.442695, %v4823_v0  ;;  %v4856_v37 = vpop.permute.xlu1 %4855 }
0x1547   :  { %10785 = vpow2.f32 %v8648_v17  ;;  %v4866_v12 = vadd.f32 %v4856_v37, %v11765_v40  ;;  %v4854_v55 = vpop.permute.xlu0 %4853 }
0x1548   :  { %10787 = vpow2.f32 %v8647_v52  ;;  %v4865_v28 = vadd.f32 %v4854_v55, %v11768_v36 }
0x1549   :  { %v8650_v29 = vmul.f32 -1.442695, %v4866_v12 }
0x154a   :  { %v8649_v14 = vmul.f32 -1.442695, %v4865_v28  ;;  %v4860_v49 = vpop.permute.xlu1 %4859 }
0x154b   :  { %10789 = vpow2.f32 %v8650_v29  ;;  %v4868_v3 = vadd.f32 %v4860_v49, %v11775_v13  ;;  %v4858_v18 = vpop.permute.xlu0 %4857 }
0x154c   :  { %10791 = vpow2.f32 %v8649_v14  ;;  %v4867_v35 = vadd.f32 %v4858_v18, %v11778_v59 }
0x154d   :  { %v10782_v27 = vpop.eup %10781  ;;  %v8652_v15 = vmul.f32 -1.442695, %v4868_v3 }
0x154e   :  { %v10784_v8 = vpop.eup %10783  ;;  %v4838_v21 = vadd.f32 1.0, %v10782_v27  ;;  %v8651_v11 = vmul.f32 -1.442695, %v4867_v35  ;;  %v4900_v0 = vpop.permute.xlu1 %4899 }
0x154f   :  { %v4837_v10 = vadd.f32 1.0, %v10784_v8  ;;  %10793 = vpow2.f32 %v8652_v15  ;;  %v4898_v37 = vpop.permute.xlu0 %4897 }
0x1550   :  { %10795 = vrcp.f32 %v4838_v21 }
0x1551   :  { %v10786_v47 = vpop.eup %10785  ;;  %10797 = vrcp.f32 %v4837_v10 }
0x1552   :  { %v10788_v33 = vpop.eup %10787  ;;  %v4840_v34 = vadd.f32 1.0, %v10786_v47  ;;  %10799 = vpow2.f32 %v8651_v11  ;;  %v4904_v15 = vpop.permute.xlu1 %4903 }
0x1553   :  { %v4839_v25 = vadd.f32 1.0, %v10788_v33  ;;  %v4902_v11 = vpop.permute.xlu0 %4901 }
0x1554   :  { %10801 = vrcp.f32 %v4840_v34  ;;  %v8653_v34 = vsel %vm4949_vm14, 1.0, %v13398_v4 }
0x1555   :  { %v10790_v63 = vpop.eup %10789  ;;  %10803 = vrcp.f32 %v4839_v25  ;;  %9694 = vmatprep.subr.msk.mxu1 %vm1775_vm6, %v8653_v34 }
0x1556   :  { %v10792_v41 = vpop.eup %10791  ;;  %v4882_v26 = vadd.f32 1.0, %v10790_v63  ;;  %9695 = vmatpush3.msk.msra.mxu1 %vm1775_vm6, %v8653_v34 }
0x1557   :  { %v4881_v52 = vadd.f32 1.0, %v10792_v41  ;;  %v4932_v41 = vpop.permute.xlu1 %4931 }
0x1558   :  { %10805 = vrcp.f32 %v4882_v26 }
0x1559   :  { %v10794_v17 = vpop.eup %10793  ;;  %10807 = vrcp.f32 %v4881_v52 }
0x155a   :  { %v10796_v12 = vpop.eup %10795  ;;  %v4884_v55 = vadd.f32 1.0, %v10794_v17 }
0x155b   :  { %v10798_v28 = vpop.eup %10797  ;;  %v4910_v29 = vmul.f32 %v10796_v12, %v4900_v0  ;;  %v4930_v0 = vpop.permute.xlu0 %4929 }
0x155c   :  { %v10800_v14 = vpop.eup %10799  ;;  %v4909_v49 = vmul.f32 %v10798_v28, %v4898_v37  ;;  %10809 = vrcp.f32 %v4884_v55 }
0x155d   :  { %v4883_v3 = vadd.f32 1.0, %v10800_v14  ;;  %v4914_v18 = vadd.f32 %v4910_v29, %v11791_v54 }
0x155e   :  { %v10802_v35 = vpop.eup %10801  ;;  %v4913_v27 = vadd.f32 %v4909_v49, %v13394_v53 }
0x155f   :  { %v10804_v8 = vpop.eup %10803  ;;  %10811 = vrcp.f32 %v4883_v3  ;;  %v4912_v21 = vmul.f32 %v10802_v35, %v4904_v15 }
0x1560   :  { %10813 = vtanh.f32 %v4914_v18  ;;  %v4911_v10 = vmul.f32 %v10804_v8, %v4902_v11 }
0x1561   :  { %10815 = vtanh.f32 %v4913_v27  ;;  %v4916_v47 = vadd.f32 %v4912_v21, %v13395_v45  ;;  %v4936_v27 = vpop.permute.xlu1 %4935 }
0x1562   :  { %v4915_v33 = vadd.f32 %v4911_v10, %v13397_v58  ;;  %v10806_v25 = vpop.eup %10805 }
0x1563   :  { %10817 = vtanh.f32 %v4916_v47  ;;  %v10808_v63 = vpop.eup %10807  ;;  %v4922_v52 = vsub.f32 1.0, %v10806_v25  ;;  %v4942_v29 = vmul.f32 %v10806_v25, %v4932_v41  ;;  %v4934_v47 = vpop.permute.xlu0 %4933 }
0x1564   :  { %10819 = vtanh.f32 %v4915_v33  ;;  %v4921_v12 = vsub.f32 1.0, %v10808_v63  ;;  %v4941_v49 = vmul.f32 %v10808_v63, %v4930_v0 }
0x1566   :  { %v10810_v26 = vpop.eup %10809 }
0x1567   :  { %v4924_v3 = vsub.f32 1.0, %v10810_v26  ;;  %v4944_v10 = vmul.f32 %v10810_v26, %v4936_v27 }
0x1569   :  { %v10812_v17 = vpop.eup %10811 }
0x156a   :  { %v10814_v37 = vpop.eup %10813  ;;  %v4923_v15 = vsub.f32 1.0, %v10812_v17  ;;  %v4943_v34 = vmul.f32 %v10812_v17, %v4934_v47 }
0x156b   :  { %v10816_v55 = vpop.eup %10815  ;;  %v4926_v28 = vmul.f32 %v10814_v37, %v4922_v52 }
0x156c   :  { %v4925_v14 = vmul.f32 %v10816_v55, %v4921_v12 }
0x156d   :  { %v10818_v18 = vpop.eup %10817  ;;  %v12615_v35 = vadd.f32 %v4942_v29, %v4926_v28 }
0x156e   :  { %v10820_v8 = vpop.eup %10819  ;;  %v12617_v21 = vadd.f32 %v4941_v49, %v4925_v14  ;;  %v4928_v11 = vmul.f32 %v10818_v18, %v4924_v3 }
0x156f   :  { %v4927_v33 = vmul.f32 %v10820_v8, %v4923_v15  ;;  %4958 = vrot.lane.b32.xlu1 %v12615_v35, %s11106_s27 }
0x1570   :  { %v12620_v25 = vadd.f32 %v4944_v10, %v4928_v11  ;;  %4956 = vrot.lane.b32.xlu0 %v12617_v21, %s11106_s27 }
0x1571   :  { %v12623_v63 = vadd.f32 %v4943_v34, %v4927_v33 }
0x1573   :  { %4962 = vrot.lane.b32.xlu1 %v12620_v25, %s11106_s27 }
0x1574   :  { %4960 = vrot.lane.b32.xlu0 %v12623_v63, %s11106_s27 }
0x15e1   :  { %v4959_v41 = vpop.permute.xlu1 %4958 }
0x15e2   :  { %v4957_v0 = vpop.permute.xlu0 %4956 }
0x15e3   :  { %v10147_v52 = vpack.c.bf16 %v4959_v41, %v4957_v0  ;;  %9696 = vmatprep.mubr.msk.f32.mxu1 %vm1766_vm9, %v4957_v0 }
0x15e4   :  { %9697 = vmatmul.mubr.msk.f32.vlgmr.msra.gmra.mrb[22].mxu1 %vm1766_vm9, %v4959_v41 }
0x15e5   :  { %v4963_v26 = vpop.permute.xlu1 %4962  ;;  %10148 = vmatprep.subr.bf16.mxu0 %v10147_v52 }
0x15e6   :  { %10150 = vmatpush3.bf16.msra.mxu0 %v10147_v52  ;;  %v4961_v17 = vpop.permute.xlu0 %4960 }
0x15e7   :  { %v10151_v37 = vpack.c.bf16 %v4963_v26, %v4961_v17  ;;  %9699 = vmatprep.mubr.msk.f32.mxu1 %vm1766_vm9, %v4961_v17 }
0x15e8   :  { %9700 = vmatmul.mubr.msk.f32.gmra.mrb[24].mxu1 %vm1766_vm9, %v4963_v26 }
0x15e9   :  { %10152 = vmatprep.subr.bf16.mxu0 %v10151_v37 }
0x15ea   :  { %10154 = vmatpush3.bf16.msra.mxu0 %v10151_v37 }
0x15ed   :  { %9711 = vmatmul.mubr.msk.f32.vlgmr.msra.gmra.mrb[90].mxu0 %vm13371_vm3, %v11659_v20 }
0x15ee   :  { %9713 = vmatprep.mubr.msk.f32.mxu0 %vm13371_vm3, %v11661_v24 }
0x15f1   :  { %9714 = vmatmul.mubr.msk.f32.gmra.mrb[92].mxu0 %vm13371_vm3, %v11663_v38 }
0x15f2   :  { %9716 = vmatprep.mubr.msk.f32.mxu0 %vm13371_vm3, %v11666_v43 }
0x15f5   :  { %9717 = vmatmul.mubr.msk.f32.gmra.mrb[94].mxu0 %vm13371_vm3, %v11685_v7 }
0x15f6   :  { %9719 = vmatprep.mubr.msk.f32.mxu0 %vm13371_vm3, %v11691_v19 }
0x15f9   :  { %9720 = vmatmul.mubr.msk.f32.gmra.mrb[96].mxu0 %vm13371_vm3, %v11697_v31 }
0x15fa   :  { %9722 = vmatprep.mubr.msk.f32.mxu0 %vm13371_vm3, %v11707_v39 }
0x15fd   :  { %9723 = vmatmul.mubr.msk.f32.gmra.mrb[98].mxu0 %vm13371_vm3, %v11717_v9 }
0x15fe   :  { %9725 = vmatprep.mubr.msk.f32.mxu0 %vm13371_vm3, %v11719_v16 }
0x1601   :  { %9726 = vmatmul.mubr.msk.f32.gmra.mrb[100].mxu0 %vm13371_vm3, %v11725_v46 }
0x1602   :  { %9778 = vmatprep.mubr.msk.f32.mxu0 %vm13371_vm3, %v11657_v62 }
0x16c0   :  { %v9712_v12 = vpop.f32.mrb[90].mxu0 }
0x16c1   :  { %v5140_v55 = vadd.f32 %v9712_v12, %v11735_v51  ;;  %v5134_v28 = vpop.f32.mrb[91].mxu0 }
0x16c2   :  { %v5135_v29 = vadd.f32 %v5134_v28, %v11729_v60 }
0x16c3   :  { %5199 = vrot.lane.b32.xlu1 %v5140_v55, %s11107_s28 }
0x16c4   :  { %v9715_v14 = vpop.f32.mrb[92].mxu0  ;;  %5197 = vrot.lane.b32.xlu0 %v5135_v29, %s11107_s28 }
0x16c5   :  { %v5150_v49 = vadd.f32 %v9715_v14, %v11731_v44  ;;  %v5144_v3 = vpop.f32.mrb[93].mxu0 }
0x16c6   :  { %v5145_v18 = vadd.f32 %v5144_v3, %v11737_v56 }
0x16c7   :  { %5203 = vrot.lane.b32.xlu1 %v5150_v49, %s11107_s28 }
0x16c8   :  { %v9718_v27 = vpop.f32.mrb[94].mxu0  ;;  %5201 = vrot.lane.b32.xlu0 %v5145_v18, %s11107_s28 }
0x16c9   :  { %v5160_v15 = vadd.f32 %v9718_v27, %v11751_v1  ;;  %v5154_v8 = vpop.f32.mrb[95].mxu0 }
0x16ca   :  { %v5155_v11 = vadd.f32 %v5154_v8, %v11733_v32 }
0x16cb   :  { %5243 = vrot.lane.b32.xlu1 %v5160_v15, %s11107_s28 }
0x16cc   :  { %v9721_v10 = vpop.f32.mrb[96].mxu0  ;;  %5241 = vrot.lane.b32.xlu0 %v5155_v11, %s11107_s28 }
0x16cd   :  { %v5170_v47 = vadd.f32 %v9721_v10, %v11743_v61  ;;  %v5164_v33 = vpop.f32.mrb[97].mxu0 }
0x16ce   :  { %v5165_v34 = vadd.f32 %v5164_v33, %v11771_v22 }
0x16cf   :  { %5247 = vrot.lane.b32.xlu1 %v5170_v47, %s11107_s28 }
0x16d0   :  { %v9724_v41 = vpop.f32.mrb[98].mxu0  ;;  %5245 = vrot.lane.b32.xlu0 %v5165_v34, %s11107_s28 }
0x16d1   :  { %v5180_v0 = vadd.f32 %v9724_v41, %v11761_v48  ;;  %v5174_v52 = vpop.f32.mrb[99].mxu0 }
0x16d2   :  { %v5175_v26 = vadd.f32 %v5174_v52, %v11785_v2 }
0x16d3   :  { %5287 = vrot.lane.b32.xlu1 %v5180_v0, %s11107_s28 }
0x16d4   :  { %v9727_v17 = vpop.f32.mrb[100].mxu0  ;;  %5285 = vrot.lane.b32.xlu0 %v5175_v26, %s11107_s28 }
0x16d5   :  { %v5190_v37 = vadd.f32 %v9727_v17, %v11789_v57  ;;  %v5184_v12 = vpop.f32.mrb[101].mxu0 }
0x16d6   :  { %v5185_v55 = vadd.f32 %v5184_v12, %v11783_v50 }
0x16d7   :  { %5291 = vrot.lane.b32.xlu1 %v5190_v37, %s11107_s28 }
0x16d8   :  { %5289 = vrot.lane.b32.xlu0 %v5185_v55, %s11107_s28 }
0x16db   :  { %5319 = vrot.lane.b32.xlu1 %v12615_v35, %s11090_s3 }
0x16dc   :  { %5317 = vrot.lane.b32.xlu0 %v12617_v21, %s11090_s3 }
0x16df   :  { %5323 = vrot.lane.b32.xlu1 %v12620_v25, %s11090_s3 }
0x16e0   :  { %5321 = vrot.lane.b32.xlu0 %v12623_v63, %s11090_s3 }
0x1735   :  { %v5200_v28 = vpop.permute.xlu1 %5199 }
0x1736   :  { %v5210_v29 = vadd.f32 %v5200_v28, %v11745_v5  ;;  %v5198_v14 = vpop.permute.xlu0 %5197 }
0x1737   :  { %v5209_v49 = vadd.f32 %v5198_v14, %v11748_v6 }
0x1738   :  { %v8672_v3 = vmul.f32 -1.442695, %v5210_v29 }
0x1739   :  { %v8671_v18 = vmul.f32 -1.442695, %v5209_v49  ;;  %v5204_v27 = vpop.permute.xlu1 %5203 }
0x173a   :  { %10821 = vpow2.f32 %v8672_v3  ;;  %v5212_v35 = vadd.f32 %v5204_v27, %v11755_v23  ;;  %v5202_v15 = vpop.permute.xlu0 %5201 }
0x173b   :  { %10823 = vpow2.f32 %v8671_v18  ;;  %v5211_v21 = vadd.f32 %v5202_v15, %v11758_v42 }
0x173c   :  { %v8674_v25 = vmul.f32 -1.442695, %v5212_v35 }
0x173d   :  { %v8673_v8 = vmul.f32 -1.442695, %v5211_v21  ;;  %v5244_v11 = vpop.permute.xlu1 %5243 }
0x173e   :  { %10825 = vpow2.f32 %v8674_v25  ;;  %v5254_v63 = vadd.f32 %v5244_v11, %v11765_v40  ;;  %v5242_v10 = vpop.permute.xlu0 %5241 }
0x173f   :  { %10827 = vpow2.f32 %v8673_v8  ;;  %v5253_v47 = vadd.f32 %v5242_v10, %v11768_v36 }
0x1740   :  { %v8676_v33 = vmul.f32 -1.442695, %v5254_v63 }
0x1741   :  { %v8675_v34 = vmul.f32 -1.442695, %v5253_v47  ;;  %v5248_v41 = vpop.permute.xlu1 %5247 }
0x1742   :  { %10829 = vpow2.f32 %v8676_v33  ;;  %v5256_v0 = vadd.f32 %v5248_v41, %v11775_v13  ;;  %v5246_v52 = vpop.permute.xlu0 %5245 }
0x1743   :  { %10831 = vpow2.f32 %v8675_v34  ;;  %v5255_v26 = vadd.f32 %v5246_v52, %v11778_v59 }
0x1744   :  { %v10822_v17 = vpop.eup %10821  ;;  %v8678_v37 = vmul.f32 -1.442695, %v5256_v0 }
0x1745   :  { %v10824_v12 = vpop.eup %10823  ;;  %v5226_v55 = vadd.f32 1.0, %v10822_v17  ;;  %v8677_v28 = vmul.f32 -1.442695, %v5255_v26  ;;  %v5288_v21 = vpop.permute.xlu1 %5287 }
0x1746   :  { %v5225_v29 = vadd.f32 1.0, %v10824_v12  ;;  %10833 = vpow2.f32 %v8678_v37  ;;  %v5286_v11 = vpop.permute.xlu0 %5285 }
0x1747   :  { %10835 = vrcp.f32 %v5226_v55 }
0x1748   :  { %v10826_v14 = vpop.eup %10825  ;;  %10837 = vrcp.f32 %v5225_v29 }
0x1749   :  { %v10828_v49 = vpop.eup %10827  ;;  %v5228_v3 = vadd.f32 1.0, %v10826_v14  ;;  %10839 = vpow2.f32 %v8677_v28  ;;  %v5292_v37 = vpop.permute.xlu1 %5291 }
0x174a   :  { %v5227_v18 = vadd.f32 1.0, %v10828_v49  ;;  %v5290_v28 = vpop.permute.xlu0 %5289 }
0x174b   :  { %10841 = vrcp.f32 %v5228_v3  ;;  %v8679_v3 = vsel %vm5337_vm15, 1.0, %v13398_v4 }
0x174c   :  { %v10830_v27 = vpop.eup %10829  ;;  %10843 = vrcp.f32 %v5227_v18  ;;  %9728 = vmatprep.subr.msk.mxu1 %vm1775_vm6, %v8679_v3 }
0x174d   :  { %v10832_v35 = vpop.eup %10831  ;;  %v5270_v15 = vadd.f32 1.0, %v10830_v27  ;;  %9729 = vmatpush3.msk.msra.mxu1 %vm1775_vm6, %v8679_v3 }
0x174e   :  { %v5269_v8 = vadd.f32 1.0, %v10832_v35  ;;  %v5320_v35 = vpop.permute.xlu1 %5319 }
0x174f   :  { %10845 = vrcp.f32 %v5270_v15 }
0x1750   :  { %v10834_v25 = vpop.eup %10833  ;;  %10847 = vrcp.f32 %v5269_v8 }
0x1751   :  { %v10836_v63 = vpop.eup %10835  ;;  %v5272_v10 = vadd.f32 1.0, %v10834_v25 }
0x1752   :  { %v10838_v47 = vpop.eup %10837  ;;  %v5298_v33 = vmul.f32 %v10836_v63, %v5288_v21  ;;  %v5318_v21 = vpop.permute.xlu0 %5317 }
0x1753   :  { %v10840_v34 = vpop.eup %10839  ;;  %v5297_v41 = vmul.f32 %v10838_v47, %v5286_v11  ;;  %10849 = vrcp.f32 %v5272_v10 }
0x1754   :  { %v5271_v0 = vadd.f32 1.0, %v10840_v34  ;;  %v5302_v52 = vadd.f32 %v5298_v33, %v11791_v54 }
0x1755   :  { %v10842_v26 = vpop.eup %10841  ;;  %v5301_v17 = vadd.f32 %v5297_v41, %v13394_v53 }
0x1756   :  { %v10844_v12 = vpop.eup %10843  ;;  %10851 = vrcp.f32 %v5271_v0  ;;  %v5300_v55 = vmul.f32 %v10842_v26, %v5292_v37 }
0x1757   :  { %10853 = vtanh.f32 %v5302_v52  ;;  %v5299_v29 = vmul.f32 %v10844_v12, %v5290_v28 }
0x1758   :  { %10855 = vtanh.f32 %v5301_v17  ;;  %v5304_v14 = vadd.f32 %v5300_v55, %v13395_v45  ;;  %v5324_v17 = vpop.permute.xlu1 %5323 }
0x1759   :  { %v5303_v49 = vadd.f32 %v5299_v29, %v13397_v58  ;;  %v10846_v18 = vpop.eup %10845 }
0x175a   :  { %10857 = vtanh.f32 %v5304_v14  ;;  %v10848_v27 = vpop.eup %10847  ;;  %v5310_v8 = vsub.f32 1.0, %v10846_v18  ;;  %v5330_v33 = vmul.f32 %v10846_v18, %v5320_v35  ;;  %v5322_v14 = vpop.permute.xlu0 %5321 }
0x175b   :  { %10859 = vtanh.f32 %v5303_v49  ;;  %v5309_v63 = vsub.f32 1.0, %v10848_v27  ;;  %v5329_v41 = vmul.f32 %v10848_v27, %v5318_v21 }
0x175d   :  { %v10850_v15 = vpop.eup %10849 }
0x175e   :  { %v5312_v0 = vsub.f32 1.0, %v10850_v15  ;;  %v5332_v29 = vmul.f32 %v10850_v15, %v5324_v17 }
0x1760   :  { %v10852_v25 = vpop.eup %10851 }
0x1761   :  { %v10854_v11 = vpop.eup %10853  ;;  %v5311_v37 = vsub.f32 1.0, %v10852_v25  ;;  %v5331_v3 = vmul.f32 %v10852_v25, %v5322_v14 }
0x1762   :  { %v10856_v10 = vpop.eup %10855  ;;  %v5314_v47 = vmul.f32 %v10854_v11, %v5310_v8 }
0x1763   :  { %v5313_v34 = vmul.f32 %v10856_v10, %v5309_v63 }
0x1764   :  { %v10858_v52 = vpop.eup %10857  ;;  %v12703_v26 = vadd.f32 %v5330_v33, %v5314_v47 }
0x1765   :  { %v10860_v12 = vpop.eup %10859  ;;  %v12705_v55 = vadd.f32 %v5329_v41, %v5313_v34  ;;  %v5316_v28 = vmul.f32 %v10858_v52, %v5312_v0 }
0x1766   :  { %v5315_v49 = vmul.f32 %v10860_v12, %v5311_v37  ;;  %5346 = vrot.lane.b32.xlu1 %v12703_v26, %s11108_s29 }
0x1767   :  { %v12708_v18 = vadd.f32 %v5332_v29, %v5316_v28  ;;  %5344 = vrot.lane.b32.xlu0 %v12705_v55, %s11108_s29 }
0x1768   :  { %v12711_v27 = vadd.f32 %v5331_v3, %v5315_v49 }
0x176a   :  { %5350 = vrot.lane.b32.xlu1 %v12708_v18, %s11108_s29 }
0x176b   :  { %5348 = vrot.lane.b32.xlu0 %v12711_v27, %s11108_s29 }
0x17d8   :  { %v5347_v35 = vpop.permute.xlu1 %5346 }
0x17d9   :  { %v5345_v21 = vpop.permute.xlu0 %5344 }
0x17da   :  { %v10155_v8 = vpack.c.bf16 %v5347_v35, %v5345_v21  ;;  %9730 = vmatprep.mubr.msk.f32.mxu1 %vm1766_vm9, %v5345_v21 }
0x17db   :  { %9731 = vmatmul.mubr.msk.f32.vlgmr.msra.gmra.mrb[22].mxu1 %vm1766_vm9, %v5347_v35 }
0x17dc   :  { %v5351_v15 = vpop.permute.xlu1 %5350  ;;  %10156 = vmatprep.subr.bf16.mxu1 %v10155_v8 }
0x17dd   :  { %v5349_v25 = vpop.permute.xlu0 %5348  ;;  %10158 = vmatpush3.bf16.msra.mxu1 %v10155_v8 }
0x17de   :  { %v10159_v11 = vpack.c.bf16 %v5351_v15, %v5349_v25  ;;  %9733 = vmatprep.mubr.msk.f32.mxu1 %vm1766_vm9, %v5349_v25 }
0x17df   :  { %9734 = vmatmul.mubr.msk.f32.gmra.mrb[24].mxu1 %vm1766_vm9, %v5351_v15 }
0x17e0   :  { %10160 = vmatprep.subr.bf16.mxu1 %v10159_v11  ;;  %9744 = vmatprep.mubr.msk.f32.mxu1 %vm13371_vm3, %v11657_v62 }
0x17e1   :  { %10162 = vmatpush3.bf16.msra.mxu1 %v10159_v11 }
0x17e4   :  { %9745 = vmatmul.mubr.msk.f32.vlgmr.msra.gmra.mrb[62].mxu1 %vm13371_vm3, %v11659_v20 }
0x17e5   :  { %9747 = vmatprep.mubr.msk.f32.mxu1 %vm13371_vm3, %v11661_v24 }
0x17e8   :  { %9748 = vmatmul.mubr.msk.f32.gmra.mrb[64].mxu1 %vm13371_vm3, %v11663_v38 }
0x17e9   :  { %9750 = vmatprep.mubr.msk.f32.mxu1 %vm13371_vm3, %v11666_v43 }
0x17ec   :  { %9751 = vmatmul.mubr.msk.f32.gmra.mrb[66].mxu1 %vm13371_vm3, %v11685_v7 }
0x17ed   :  { %9753 = vmatprep.mubr.msk.f32.mxu1 %vm13371_vm3, %v11691_v19 }
0x17f0   :  { %9754 = vmatmul.mubr.msk.f32.gmra.mrb[68].mxu1 %vm13371_vm3, %v11697_v31 }
0x17f1   :  { %9756 = vmatprep.mubr.msk.f32.mxu1 %vm13371_vm3, %v11707_v39 }
0x17f4   :  { %9757 = vmatmul.mubr.msk.f32.gmra.mrb[70].mxu1 %vm13371_vm3, %v11717_v9 }
0x17f5   :  { %9759 = vmatprep.mubr.msk.f32.mxu1 %vm13371_vm3, %v11719_v16 }
0x17f8   :  { %9760 = vmatmul.mubr.msk.f32.gmra.mrb[72].mxu1 %vm13371_vm3, %v11725_v46 }
0x18b7   :  { %v9746_v63 = vpop.f32.mrb[62].mxu1 }
0x18b8   :  { %v5528_v10 = vadd.f32 %v9746_v63, %v11735_v51  ;;  %v5522_v47 = vpop.f32.mrb[63].mxu1 }
0x18b9   :  { %v5523_v33 = vadd.f32 %v5522_v47, %v11729_v60 }
0x18ba   :  { %5587 = vrot.lane.b32.xlu1 %v5528_v10, %s11109_s30 }
0x18bb   :  { %v9749_v34 = vpop.f32.mrb[64].mxu1  ;;  %5585 = vrot.lane.b32.xlu0 %v5523_v33, %s11109_s30 }
0x18bc   :  { %v5538_v41 = vadd.f32 %v9749_v34, %v11731_v44  ;;  %v5532_v0 = vpop.f32.mrb[65].mxu1 }
0x18bd   :  { %v5533_v52 = vadd.f32 %v5532_v0, %v11737_v56 }
0x18be   :  { %5591 = vrot.lane.b32.xlu1 %v5538_v41, %s11109_s30 }
0x18bf   :  { %v9752_v17 = vpop.f32.mrb[66].mxu1  ;;  %5589 = vrot.lane.b32.xlu0 %v5533_v52, %s11109_s30 }
0x18c0   :  { %v5548_v37 = vadd.f32 %v9752_v17, %v11751_v1  ;;  %v5542_v12 = vpop.f32.mrb[67].mxu1 }
0x18c1   :  { %v5543_v28 = vadd.f32 %v5542_v12, %v11733_v32 }
0x18c2   :  { %5631 = vrot.lane.b32.xlu1 %v5548_v37, %s11109_s30 }
0x18c3   :  { %v9755_v29 = vpop.f32.mrb[68].mxu1  ;;  %5629 = vrot.lane.b32.xlu0 %v5543_v28, %s11109_s30 }
0x18c4   :  { %v5558_v14 = vadd.f32 %v9755_v29, %v11743_v61  ;;  %v5552_v49 = vpop.f32.mrb[69].mxu1 }
0x18c5   :  { %v5553_v3 = vadd.f32 %v5552_v49, %v11771_v22 }
0x18c6   :  { %5635 = vrot.lane.b32.xlu1 %v5558_v14, %s11109_s30 }
0x18c7   :  { %v9758_v35 = vpop.f32.mrb[70].mxu1  ;;  %5633 = vrot.lane.b32.xlu0 %v5553_v3, %s11109_s30 }
0x18c8   :  { %v5568_v21 = vadd.f32 %v9758_v35, %v11761_v48  ;;  %v5562_v8 = vpop.f32.mrb[71].mxu1 }
0x18c9   :  { %v5563_v15 = vadd.f32 %v5562_v8, %v11785_v2 }
0x18ca   :  { %5675 = vrot.lane.b32.xlu1 %v5568_v21, %s11109_s30 }
0x18cb   :  { %v9761_v25 = vpop.f32.mrb[72].mxu1  ;;  %5673 = vrot.lane.b32.xlu0 %v5563_v15, %s11109_s30 }
0x18cc   :  { %v5578_v11 = vadd.f32 %v9761_v25, %v11789_v57  ;;  %v5572_v63 = vpop.f32.mrb[73].mxu1 }
0x18cd   :  { %v5573_v10 = vadd.f32 %v5572_v63, %v11783_v50 }
0x18ce   :  { %5679 = vrot.lane.b32.xlu1 %v5578_v11, %s11109_s30 }
0x18cf   :  { %5677 = vrot.lane.b32.xlu0 %v5573_v10, %s11109_s30 }
0x18d2   :  { %5707 = vrot.lane.b32.xlu1 %v12703_v26, %s11090_s3 }
0x18d3   :  { %5705 = vrot.lane.b32.xlu0 %v12705_v55, %s11090_s3 }
0x18d6   :  { %5711 = vrot.lane.b32.xlu1 %v12708_v18, %s11090_s3 }
0x18d7   :  { %5709 = vrot.lane.b32.xlu0 %v12711_v27, %s11090_s3 }
0x192c   :  { %v5588_v47 = vpop.permute.xlu1 %5587 }
0x192d   :  { %v5598_v33 = vadd.f32 %v5588_v47, %v11745_v5  ;;  %v5586_v34 = vpop.permute.xlu0 %5585 }
0x192e   :  { %v5597_v41 = vadd.f32 %v5586_v34, %v11748_v6 }
0x192f   :  { %v8698_v0 = vmul.f32 -1.442695, %v5598_v33 }
0x1930   :  { %v8697_v52 = vmul.f32 -1.442695, %v5597_v41  ;;  %v5592_v17 = vpop.permute.xlu1 %5591 }
0x1931   :  { %10861 = vpow2.f32 %v8698_v0  ;;  %v5600_v26 = vadd.f32 %v5592_v17, %v11755_v23  ;;  %v5590_v37 = vpop.permute.xlu0 %5589 }
0x1932   :  { %10863 = vpow2.f32 %v8697_v52  ;;  %v5599_v55 = vadd.f32 %v5590_v37, %v11758_v42 }
0x1933   :  { %v8700_v18 = vmul.f32 -1.442695, %v5600_v26 }
0x1934   :  { %v8699_v12 = vmul.f32 -1.442695, %v5599_v55  ;;  %v5632_v28 = vpop.permute.xlu1 %5631 }
0x1935   :  { %10865 = vpow2.f32 %v8700_v18  ;;  %v5642_v27 = vadd.f32 %v5632_v28, %v11765_v40  ;;  %v5630_v29 = vpop.permute.xlu0 %5629 }
0x1936   :  { %10867 = vpow2.f32 %v8699_v12  ;;  %v5641_v14 = vadd.f32 %v5630_v29, %v11768_v36 }
0x1937   :  { %v8702_v49 = vmul.f32 -1.442695, %v5642_v27 }
0x1938   :  { %v8701_v3 = vmul.f32 -1.442695, %v5641_v14  ;;  %v5636_v35 = vpop.permute.xlu1 %5635 }
0x1939   :  { %10869 = vpow2.f32 %v8702_v49  ;;  %v5644_v21 = vadd.f32 %v5636_v35, %v11775_v13  ;;  %v5634_v8 = vpop.permute.xlu0 %5633 }
0x193a   :  { %10871 = vpow2.f32 %v8701_v3  ;;  %v5643_v15 = vadd.f32 %v5634_v8, %v11778_v59 }
0x193b   :  { %v10862_v25 = vpop.eup %10861  ;;  %v8704_v11 = vmul.f32 -1.442695, %v5644_v21 }
0x193c   :  { %v10864_v63 = vpop.eup %10863  ;;  %v5614_v10 = vadd.f32 1.0, %v10862_v25  ;;  %v8703_v47 = vmul.f32 -1.442695, %v5643_v15  ;;  %v5676_v55 = vpop.permute.xlu1 %5675 }
0x193d   :  { %v5613_v33 = vadd.f32 1.0, %v10864_v63  ;;  %10873 = vpow2.f32 %v8704_v11  ;;  %v5674_v28 = vpop.permute.xlu0 %5673 }
0x193e   :  { %10875 = vrcp.f32 %v5614_v10 }
0x193f   :  { %v10866_v34 = vpop.eup %10865  ;;  %10877 = vrcp.f32 %v5613_v33 }
0x1940   :  { %v10868_v41 = vpop.eup %10867  ;;  %v5616_v0 = vadd.f32 1.0, %v10866_v34  ;;  %10879 = vpow2.f32 %v8703_v47  ;;  %v5680_v11 = vpop.permute.xlu1 %5679 }
0x1941   :  { %v5615_v52 = vadd.f32 1.0, %v10868_v41  ;;  %v5678_v47 = vpop.permute.xlu0 %5677 }
0x1942   :  { %10881 = vrcp.f32 %v5616_v0  ;;  %v8705_v0 = vsel %vm5725_vm1, 1.0, %v13398_v4 }
0x1943   :  { %v10870_v17 = vpop.eup %10869  ;;  %10883 = vrcp.f32 %v5615_v52  ;;  %9762 = vmatprep.subr.msk.mxu1 %vm1775_vm6, %v8705_v0 }
0x1944   :  { %v10872_v26 = vpop.eup %10871  ;;  %v5658_v37 = vadd.f32 1.0, %v10870_v17  ;;  %9763 = vmatpush3.msk.msra.mxu1 %vm1775_vm6, %v8705_v0 }
0x1945   :  { %v5657_v12 = vadd.f32 1.0, %v10872_v26  ;;  %v5708_v26 = vpop.permute.xlu1 %5707 }
0x1946   :  { %10885 = vrcp.f32 %v5658_v37 }
0x1947   :  { %v10874_v18 = vpop.eup %10873  ;;  %10887 = vrcp.f32 %v5657_v12 }
0x1948   :  { %v10876_v27 = vpop.eup %10875  ;;  %v5660_v29 = vadd.f32 1.0, %v10874_v18 }
0x1949   :  { %v10878_v14 = vpop.eup %10877  ;;  %v5686_v49 = vmul.f32 %v10876_v27, %v5676_v55  ;;  %v5706_v55 = vpop.permute.xlu0 %5705 }
0x194a   :  { %v10880_v3 = vpop.eup %10879  ;;  %v5685_v35 = vmul.f32 %v10878_v14, %v5674_v28  ;;  %10889 = vrcp.f32 %v5660_v29 }
0x194b   :  { %v5659_v21 = vadd.f32 1.0, %v10880_v3  ;;  %v5690_v8 = vadd.f32 %v5686_v49, %v11791_v54 }
0x194c   :  { %v10882_v15 = vpop.eup %10881  ;;  %v5689_v25 = vadd.f32 %v5685_v35, %v13394_v53 }
0x194d   :  { %v10884_v63 = vpop.eup %10883  ;;  %10891 = vrcp.f32 %v5659_v21  ;;  %v5688_v10 = vmul.f32 %v10882_v15, %v5680_v11 }
0x194e   :  { %10893 = vtanh.f32 %v5690_v8  ;;  %v5687_v33 = vmul.f32 %v10884_v63, %v5678_v47 }
0x194f   :  { %10895 = vtanh.f32 %v5689_v25  ;;  %v5692_v34 = vadd.f32 %v5688_v10, %v13395_v45  ;;  %v5712_v25 = vpop.permute.xlu1 %5711 }
0x1950   :  { %v5691_v41 = vadd.f32 %v5687_v33, %v13397_v58  ;;  %v10886_v52 = vpop.eup %10885 }
0x1951   :  { %10897 = vtanh.f32 %v5692_v34  ;;  %v10888_v17 = vpop.eup %10887  ;;  %v5698_v12 = vsub.f32 1.0, %v10886_v52  ;;  %v5718_v49 = vmul.f32 %v10886_v52, %v5708_v26  ;;  %v5710_v34 = vpop.permute.xlu0 %5709 }
0x1952   :  { %10899 = vtanh.f32 %v5691_v41  ;;  %v5697_v27 = vsub.f32 1.0, %v10888_v17  ;;  %v5717_v35 = vmul.f32 %v10888_v17, %v5706_v55 }
0x1954   :  { %v10890_v37 = vpop.eup %10889 }
0x1955   :  { %v5700_v21 = vsub.f32 1.0, %v10890_v37  ;;  %v5720_v33 = vmul.f32 %v10890_v37, %v5712_v25 }
0x1957   :  { %v10892_v18 = vpop.eup %10891 }
0x1958   :  { %v10894_v28 = vpop.eup %10893  ;;  %v5699_v11 = vsub.f32 1.0, %v10892_v18  ;;  %v5719_v0 = vmul.f32 %v10892_v18, %v5710_v34 }
0x1959   :  { %v10896_v29 = vpop.eup %10895  ;;  %v5702_v14 = vmul.f32 %v10894_v28, %v5698_v12 }
0x195a   :  { %v5701_v3 = vmul.f32 %v10896_v29, %v5697_v27 }
0x195b   :  { %v10898_v8 = vpop.eup %10897  ;;  %v12791_v15 = vadd.f32 %v5718_v49, %v5702_v14 }
0x195c   :  { %v10900_v63 = vpop.eup %10899  ;;  %v12793_v10 = vadd.f32 %v5717_v35, %v5701_v3  ;;  %v5704_v47 = vmul.f32 %v10898_v8, %v5700_v21 }
0x195d   :  { %v5703_v41 = vmul.f32 %v10900_v63, %v5699_v11  ;;  %5734 = vrot.lane.b32.xlu1 %v12791_v15, %s11110_s6 }
0x195e   :  { %v12796_v52 = vadd.f32 %v5720_v33, %v5704_v47  ;;  %5732 = vrot.lane.b32.xlu0 %v12793_v10, %s11110_s6 }
0x195f   :  { %v12799_v17 = vadd.f32 %v5719_v0, %v5703_v41 }
0x1961   :  { %5738 = vrot.lane.b32.xlu1 %v12796_v52, %s11110_s6 }
0x1962   :  { %5736 = vrot.lane.b32.xlu0 %v12799_v17, %s11110_s6 }
0x19cf   :  { %v5735_v26 = vpop.permute.xlu1 %5734 }
0x19d0   :  { %v5733_v55 = vpop.permute.xlu0 %5732 }
0x19d1   :  { %v10163_v12 = vpack.c.bf16 %v5735_v26, %v5733_v55  ;;  %9764 = vmatprep.mubr.msk.f32.mxu1 %vm1766_vm9, %v5733_v55 }
0x19d2   :  { %9765 = vmatmul.mubr.msk.f32.vlgmr.msra.gmra.mrb[22].mxu1 %vm1766_vm9, %v5735_v26 }
0x19d3   :  { %v5739_v37 = vpop.permute.xlu1 %5738  ;;  %10164 = vmatprep.subr.bf16.mxu0 %v10163_v12 }
0x19d4   :  { %10166 = vmatpush3.bf16.msra.mxu0 %v10163_v12  ;;  %v5737_v18 = vpop.permute.xlu0 %5736 }
0x19d5   :  { %v10167_v28 = vpack.c.bf16 %v5739_v37, %v5737_v18  ;;  %9767 = vmatprep.mubr.msk.f32.mxu1 %vm1766_vm9, %v5737_v18 }
0x19d6   :  { %9768 = vmatmul.mubr.msk.f32.gmra.mrb[24].mxu1 %vm1766_vm9, %v5739_v37 }
0x19d7   :  { %10168 = vmatprep.subr.bf16.mxu0 %v10167_v28 }
0x19d8   :  { %10170 = vmatpush3.bf16.msra.mxu0 %v10167_v28 }
0x19db   :  { %9779 = vmatmul.mubr.msk.f32.vlgmr.msra.gmra.mrb[102].mxu0 %vm13371_vm3, %v11659_v20 }
0x19dc   :  { %9781 = vmatprep.mubr.msk.f32.mxu0 %vm13371_vm3, %v11661_v24 }
0x19df   :  { %9782 = vmatmul.mubr.msk.f32.gmra.mrb[104].mxu0 %vm13371_vm3, %v11663_v38 }
0x19e0   :  { %9784 = vmatprep.mubr.msk.f32.mxu0 %vm13371_vm3, %v11666_v43 }
0x19e3   :  { %9785 = vmatmul.mubr.msk.f32.gmra.mrb[106].mxu0 %vm13371_vm3, %v11685_v7 }
0x19e4   :  { %9787 = vmatprep.mubr.msk.f32.mxu0 %vm13371_vm3, %v11691_v19 }
0x19e7   :  { %9788 = vmatmul.mubr.msk.f32.gmra.mrb[108].mxu0 %vm13371_vm3, %v11697_v31 }
0x19e8   :  { %9790 = vmatprep.mubr.msk.f32.mxu0 %vm13371_vm3, %v11707_v39 }
0x19eb   :  { %9791 = vmatmul.mubr.msk.f32.gmra.mrb[110].mxu0 %vm13371_vm3, %v11717_v9 }
0x19ec   :  { %9793 = vmatprep.mubr.msk.f32.mxu0 %vm13371_vm3, %v11719_v16 }
0x19ef   :  { %9794 = vmatmul.mubr.msk.f32.gmra.mrb[112].mxu0 %vm13371_vm3, %v11725_v46 }
0x19f0   :  { %9812 = vmatprep.mubr.msk.f32.mxu0 %vm13371_vm3, %v11657_v62 }
0x1aae   :  { %v9780_v27 = vpop.f32.mrb[102].mxu0 }
0x1aaf   :  { %v5916_v29 = vadd.f32 %v9780_v27, %v11735_v51  ;;  %v5910_v14 = vpop.f32.mrb[103].mxu0 }
0x1ab0   :  { %v5911_v49 = vadd.f32 %v5910_v14, %v11729_v60 }
0x1ab1   :  { %5975 = vrot.lane.b32.xlu1 %v5916_v29, %s11111_s7 }
0x1ab2   :  { %v9783_v3 = vpop.f32.mrb[104].mxu0  ;;  %5973 = vrot.lane.b32.xlu0 %v5911_v49, %s11111_s7 }
0x1ab3   :  { %v5926_v35 = vadd.f32 %v9783_v3, %v11731_v44  ;;  %v5920_v21 = vpop.f32.mrb[105].mxu0 }
0x1ab4   :  { %v5921_v8 = vadd.f32 %v5920_v21, %v11737_v56 }
0x1ab5   :  { %5979 = vrot.lane.b32.xlu1 %v5926_v35, %s11111_s7 }
0x1ab6   :  { %v9786_v25 = vpop.f32.mrb[106].mxu0  ;;  %5977 = vrot.lane.b32.xlu0 %v5921_v8, %s11111_s7 }
0x1ab7   :  { %v5936_v11 = vadd.f32 %v9786_v25, %v11751_v1  ;;  %v5930_v63 = vpop.f32.mrb[107].mxu0 }
0x1ab8   :  { %v5931_v47 = vadd.f32 %v5930_v63, %v11733_v32 }
0x1ab9   :  { %6019 = vrot.lane.b32.xlu1 %v5936_v11, %s11111_s7 }
0x1aba   :  { %v9789_v33 = vpop.f32.mrb[108].mxu0  ;;  %6017 = vrot.lane.b32.xlu0 %v5931_v47, %s11111_s7 }
0x1abb   :  { %v5946_v34 = vadd.f32 %v9789_v33, %v11743_v61  ;;  %v5940_v41 = vpop.f32.mrb[109].mxu0 }
0x1abc   :  { %v5941_v0 = vadd.f32 %v5940_v41, %v11771_v22 }
0x1abd   :  { %6023 = vrot.lane.b32.xlu1 %v5946_v34, %s11111_s7 }
0x1abe   :  { %v9792_v26 = vpop.f32.mrb[110].mxu0  ;;  %6021 = vrot.lane.b32.xlu0 %v5941_v0, %s11111_s7 }
0x1abf   :  { %v5956_v55 = vadd.f32 %v9792_v26, %v11761_v48  ;;  %v5950_v12 = vpop.f32.mrb[111].mxu0 }
0x1ac0   :  { %v5951_v37 = vadd.f32 %v5950_v12, %v11785_v2 }
0x1ac1   :  { %6063 = vrot.lane.b32.xlu1 %v5956_v55, %s11111_s7 }
0x1ac2   :  { %v9795_v18 = vpop.f32.mrb[112].mxu0  ;;  %6061 = vrot.lane.b32.xlu0 %v5951_v37, %s11111_s7 }
0x1ac3   :  { %v5966_v28 = vadd.f32 %v9795_v18, %v11789_v57  ;;  %v5960_v27 = vpop.f32.mrb[113].mxu0 }
0x1ac4   :  { %v5961_v29 = vadd.f32 %v5960_v27, %v11783_v50 }
0x1ac5   :  { %6067 = vrot.lane.b32.xlu1 %v5966_v28, %s11111_s7 }
0x1ac6   :  { %6065 = vrot.lane.b32.xlu0 %v5961_v29, %s11111_s7 }
0x1ac9   :  { %6095 = vrot.lane.b32.xlu1 %v12791_v15, %s11090_s3 }
0x1aca   :  { %6093 = vrot.lane.b32.xlu0 %v12793_v10, %s11090_s3 }
0x1acd   :  { %6099 = vrot.lane.b32.xlu1 %v12796_v52, %s11090_s3 }
0x1ace   :  { %6097 = vrot.lane.b32.xlu0 %v12799_v17, %s11090_s3 }
0x1b23   :  { %v5976_v14 = vpop.permute.xlu1 %5975 }
0x1b24   :  { %v5986_v49 = vadd.f32 %v5976_v14, %v11745_v5  ;;  %v5974_v3 = vpop.permute.xlu0 %5973 }
0x1b25   :  { %v5985_v35 = vadd.f32 %v5974_v3, %v11748_v6 }
0x1b26   :  { %v8724_v21 = vmul.f32 -1.442695, %v5986_v49 }
0x1b27   :  { %v8723_v8 = vmul.f32 -1.442695, %v5985_v35  ;;  %v5980_v25 = vpop.permute.xlu1 %5979 }
0x1b28   :  { %10901 = vpow2.f32 %v8724_v21  ;;  %v5988_v15 = vadd.f32 %v5980_v25, %v11755_v23  ;;  %v5978_v11 = vpop.permute.xlu0 %5977 }
0x1b29   :  { %10903 = vpow2.f32 %v8723_v8  ;;  %v5987_v10 = vadd.f32 %v5978_v11, %v11758_v42 }
0x1b2a   :  { %v8726_v52 = vmul.f32 -1.442695, %v5988_v15 }
0x1b2b   :  { %v8725_v63 = vmul.f32 -1.442695, %v5987_v10  ;;  %v6020_v47 = vpop.permute.xlu1 %6019 }
0x1b2c   :  { %10905 = vpow2.f32 %v8726_v52  ;;  %v6030_v17 = vadd.f32 %v6020_v47, %v11765_v40  ;;  %v6018_v33 = vpop.permute.xlu0 %6017 }
0x1b2d   :  { %10907 = vpow2.f32 %v8725_v63  ;;  %v6029_v34 = vadd.f32 %v6018_v33, %v11768_v36 }
0x1b2e   :  { %v8728_v41 = vmul.f32 -1.442695, %v6030_v17 }
0x1b2f   :  { %v8727_v0 = vmul.f32 -1.442695, %v6029_v34  ;;  %v6024_v26 = vpop.permute.xlu1 %6023 }
0x1b30   :  { %10909 = vpow2.f32 %v8728_v41  ;;  %v6032_v55 = vadd.f32 %v6024_v26, %v11775_v13  ;;  %v6022_v12 = vpop.permute.xlu0 %6021 }
0x1b31   :  { %10911 = vpow2.f32 %v8727_v0  ;;  %v6031_v37 = vadd.f32 %v6022_v12, %v11778_v59 }
0x1b32   :  { %v10902_v18 = vpop.eup %10901  ;;  %v8730_v28 = vmul.f32 -1.442695, %v6032_v55 }
0x1b33   :  { %v10904_v27 = vpop.eup %10903  ;;  %v6002_v29 = vadd.f32 1.0, %v10902_v18  ;;  %v8729_v14 = vmul.f32 -1.442695, %v6031_v37  ;;  %v6064_v10 = vpop.permute.xlu1 %6063 }
0x1b34   :  { %v6001_v49 = vadd.f32 1.0, %v10904_v27  ;;  %10913 = vpow2.f32 %v8730_v28  ;;  %v6062_v47 = vpop.permute.xlu0 %6061 }
0x1b35   :  { %10915 = vrcp.f32 %v6002_v29 }
0x1b36   :  { %v10906_v3 = vpop.eup %10905  ;;  %10917 = vrcp.f32 %v6001_v49 }
0x1b37   :  { %v10908_v35 = vpop.eup %10907  ;;  %v6004_v21 = vadd.f32 1.0, %v10906_v3  ;;  %10919 = vpow2.f32 %v8729_v14  ;;  %v6068_v28 = vpop.permute.xlu1 %6067 }
0x1b38   :  { %v6003_v8 = vadd.f32 1.0, %v10908_v35  ;;  %v6066_v14 = vpop.permute.xlu0 %6065 }
0x1b39   :  { %10921 = vrcp.f32 %v6004_v21  ;;  %v8731_v21 = vsel %vm6113_vm2, 1.0, %v13398_v4 }
0x1b3a   :  { %v10910_v25 = vpop.eup %10909  ;;  %10923 = vrcp.f32 %v6003_v8  ;;  %9796 = vmatprep.subr.msk.mxu1 %vm1775_vm6, %v8731_v21 }
0x1b3b   :  { %v10912_v15 = vpop.eup %10911  ;;  %v6046_v11 = vadd.f32 1.0, %v10910_v25  ;;  %9797 = vmatpush3.msk.msra.mxu1 %vm1775_vm6, %v8731_v21 }
0x1b3c   :  { %v6045_v63 = vadd.f32 1.0, %v10912_v15  ;;  %v6096_v15 = vpop.permute.xlu1 %6095 }
0x1b3d   :  { %10925 = vrcp.f32 %v6046_v11 }
0x1b3e   :  { %v10914_v52 = vpop.eup %10913  ;;  %10927 = vrcp.f32 %v6045_v63 }
0x1b3f   :  { %v10916_v17 = vpop.eup %10915  ;;  %v6048_v33 = vadd.f32 1.0, %v10914_v52 }
0x1b40   :  { %v10918_v34 = vpop.eup %10917  ;;  %v6074_v41 = vmul.f32 %v10916_v17, %v6064_v10  ;;  %v6094_v10 = vpop.permute.xlu0 %6093 }
0x1b41   :  { %v10920_v0 = vpop.eup %10919  ;;  %v6073_v26 = vmul.f32 %v10918_v34, %v6062_v47  ;;  %10929 = vrcp.f32 %v6048_v33 }
0x1b42   :  { %v6047_v55 = vadd.f32 1.0, %v10920_v0  ;;  %v6078_v12 = vadd.f32 %v6074_v41, %v11791_v54 }
0x1b43   :  { %v10922_v37 = vpop.eup %10921  ;;  %v6077_v18 = vadd.f32 %v6073_v26, %v13394_v53 }
0x1b44   :  { %v10924_v27 = vpop.eup %10923  ;;  %10931 = vrcp.f32 %v6047_v55  ;;  %v6076_v29 = vmul.f32 %v10922_v37, %v6068_v28 }
0x1b45   :  { %10933 = vtanh.f32 %v6078_v12  ;;  %v6075_v49 = vmul.f32 %v10924_v27, %v6066_v14 }
0x1b46   :  { %10935 = vtanh.f32 %v6077_v18  ;;  %v6080_v3 = vadd.f32 %v6076_v29, %v13395_v45  ;;  %v6100_v18 = vpop.permute.xlu1 %6099 }
0x1b47   :  { %v6079_v35 = vadd.f32 %v6075_v49, %v13397_v58  ;;  %v10926_v8 = vpop.eup %10925 }
0x1b48   :  { %10937 = vtanh.f32 %v6080_v3  ;;  %v10928_v25 = vpop.eup %10927  ;;  %v6086_v63 = vsub.f32 1.0, %v10926_v8  ;;  %v6106_v41 = vmul.f32 %v10926_v8, %v6096_v15  ;;  %v6098_v3 = vpop.permute.xlu0 %6097 }
0x1b49   :  { %10939 = vtanh.f32 %v6079_v35  ;;  %v6085_v17 = vsub.f32 1.0, %v10928_v25  ;;  %v6105_v26 = vmul.f32 %v10928_v25, %v6094_v10 }
0x1b4b   :  { %v10930_v11 = vpop.eup %10929 }
0x1b4c   :  { %v6088_v55 = vsub.f32 1.0, %v10930_v11  ;;  %v6108_v49 = vmul.f32 %v10930_v11, %v6100_v18 }
0x1b4e   :  { %v10932_v52 = vpop.eup %10931 }
0x1b4f   :  { %v10934_v47 = vpop.eup %10933  ;;  %v6087_v28 = vsub.f32 1.0, %v10932_v52  ;;  %v6107_v21 = vmul.f32 %v10932_v52, %v6098_v3 }
0x1b50   :  { %v10936_v33 = vpop.eup %10935  ;;  %v6090_v34 = vmul.f32 %v10934_v47, %v6086_v63 }
0x1b51   :  { %v6089_v0 = vmul.f32 %v10936_v33, %v6085_v17 }
0x1b52   :  { %v10938_v12 = vpop.eup %10937  ;;  %v12879_v37 = vadd.f32 %v6106_v41, %v6090_v34 }
0x1b53   :  { %v10940_v27 = vpop.eup %10939  ;;  %v12881_v29 = vadd.f32 %v6105_v26, %v6089_v0  ;;  %v6092_v14 = vmul.f32 %v10938_v12, %v6088_v55 }
0x1b54   :  { %v6091_v35 = vmul.f32 %v10940_v27, %v6087_v28  ;;  %6122 = vrot.lane.b32.xlu1 %v12879_v37, %s11112_s8 }
0x1b55   :  { %v12884_v8 = vadd.f32 %v6108_v49, %v6092_v14  ;;  %6120 = vrot.lane.b32.xlu0 %v12881_v29, %s11112_s8 }
0x1b56   :  { %v12887_v25 = vadd.f32 %v6107_v21, %v6091_v35 }
0x1b58   :  { %6126 = vrot.lane.b32.xlu1 %v12884_v8, %s11112_s8 }
0x1b59   :  { %6124 = vrot.lane.b32.xlu0 %v12887_v25, %s11112_s8 }
0x1bc6   :  { %v6123_v15 = vpop.permute.xlu1 %6122 }
0x1bc7   :  { %v6121_v10 = vpop.permute.xlu0 %6120 }
0x1bc8   :  { %v10171_v63 = vpack.c.bf16 %v6123_v15, %v6121_v10  ;;  %9798 = vmatprep.mubr.msk.f32.mxu1 %vm1766_vm9, %v6121_v10 }
0x1bc9   :  { %9799 = vmatmul.mubr.msk.f32.vlgmr.msra.gmra.mrb[22].mxu1 %vm1766_vm9, %v6123_v15 }
0x1bca   :  { %v6127_v11 = vpop.permute.xlu1 %6126  ;;  %10172 = vmatprep.subr.bf16.mxu0 %v10171_v63 }
0x1bcb   :  { %10174 = vmatpush3.bf16.msra.mxu0 %v10171_v63  ;;  %v6125_v52 = vpop.permute.xlu0 %6124 }
0x1bcc   :  { %v10175_v47 = vpack.c.bf16 %v6127_v11, %v6125_v52  ;;  %9801 = vmatprep.mubr.msk.f32.mxu1 %vm1766_vm9, %v6125_v52 }
0x1bcd   :  { %9802 = vmatmul.mubr.msk.f32.gmra.mrb[24].mxu1 %vm1766_vm9, %v6127_v11 }
0x1bce   :  { %10176 = vmatprep.subr.bf16.mxu0 %v10175_v47 }
0x1bcf   :  { %10178 = vmatpush3.bf16.msra.mxu0 %v10175_v47 }
0x1bd2   :  { %9813 = vmatmul.mubr.msk.f32.vlgmr.msra.gmra.mrb[114].mxu0 %vm13371_vm3, %v11659_v20 }
0x1bd3   :  { %9815 = vmatprep.mubr.msk.f32.mxu0 %vm13371_vm3, %v11661_v24 }
0x1bd6   :  { %9816 = vmatmul.mubr.msk.f32.gmra.mrb[116].mxu0 %vm13371_vm3, %v11663_v38 }
0x1bd7   :  { %9818 = vmatprep.mubr.msk.f32.mxu0 %vm13371_vm3, %v11666_v43 }
0x1bda   :  { %9819 = vmatmul.mubr.msk.f32.gmra.mrb[118].mxu0 %vm13371_vm3, %v11685_v7 }
0x1bdb   :  { %9821 = vmatprep.mubr.msk.f32.mxu0 %vm13371_vm3, %v11691_v19 }
0x1bde   :  { %9822 = vmatmul.mubr.msk.f32.gmra.mrb[120].mxu0 %vm13371_vm3, %v11697_v31 }
0x1bdf   :  { %9824 = vmatprep.mubr.msk.f32.mxu0 %vm13371_vm3, %v11707_v39 }
0x1be2   :  { %9825 = vmatmul.mubr.msk.f32.gmra.mrb[122].mxu0 %vm13371_vm3, %v11717_v9 }
0x1be3   :  { %9827 = vmatprep.mubr.msk.f32.mxu0 %vm13371_vm3, %v11719_v16 }
0x1be6   :  { %9828 = vmatmul.mubr.msk.f32.gmra.mrb[124].mxu0 %vm13371_vm3, %v11725_v46 }
0x1be7   :  { %9880 = vmatprep.mubr.msk.f32.mxu0 %vm13371_vm3, %v11657_v62 }
0x1ca5   :  { %v9814_v17 = vpop.f32.mrb[114].mxu0 }
0x1ca6   :  { %v6304_v33 = vadd.f32 %v9814_v17, %v11735_v51  ;;  %v6298_v34 = vpop.f32.mrb[115].mxu0 }
0x1ca7   :  { %v6299_v41 = vadd.f32 %v6298_v34, %v11729_v60 }
0x1ca8   :  { %6363 = vrot.lane.b32.xlu1 %v6304_v33, %s11113_s9 }
0x1ca9   :  { %v9817_v0 = vpop.f32.mrb[116].mxu0  ;;  %6361 = vrot.lane.b32.xlu0 %v6299_v41, %s11113_s9 }
0x1caa   :  { %v6314_v26 = vadd.f32 %v9817_v0, %v11731_v44  ;;  %v6308_v55 = vpop.f32.mrb[117].mxu0 }
0x1cab   :  { %v6309_v12 = vadd.f32 %v6308_v55, %v11737_v56 }
0x1cac   :  { %6367 = vrot.lane.b32.xlu1 %v6314_v26, %s11113_s9 }
0x1cad   :  { %v9820_v18 = vpop.f32.mrb[118].mxu0  ;;  %6365 = vrot.lane.b32.xlu0 %v6309_v12, %s11113_s9 }
0x1cae   :  { %v6324_v28 = vadd.f32 %v9820_v18, %v11751_v1  ;;  %v6318_v27 = vpop.f32.mrb[119].mxu0 }
0x1caf   :  { %v6319_v14 = vadd.f32 %v6318_v27, %v11733_v32 }
0x1cb0   :  { %6407 = vrot.lane.b32.xlu1 %v6324_v28, %s11113_s9 }
0x1cb1   :  { %v9823_v49 = vpop.f32.mrb[120].mxu0  ;;  %6405 = vrot.lane.b32.xlu0 %v6319_v14, %s11113_s9 }
0x1cb2   :  { %v6334_v3 = vadd.f32 %v9823_v49, %v11743_v61  ;;  %v6328_v35 = vpop.f32.mrb[121].mxu0 }
0x1cb3   :  { %v6329_v21 = vadd.f32 %v6328_v35, %v11771_v22 }
0x1cb4   :  { %6411 = vrot.lane.b32.xlu1 %v6334_v3, %s11113_s9 }
0x1cb5   :  { %v9826_v15 = vpop.f32.mrb[122].mxu0  ;;  %6409 = vrot.lane.b32.xlu0 %v6329_v21, %s11113_s9 }
0x1cb6   :  { %v6344_v10 = vadd.f32 %v9826_v15, %v11761_v48  ;;  %v6338_v63 = vpop.f32.mrb[123].mxu0 }
0x1cb7   :  { %v6339_v11 = vadd.f32 %v6338_v63, %v11785_v2 }
0x1cb8   :  { %6451 = vrot.lane.b32.xlu1 %v6344_v10, %s11113_s9 }
0x1cb9   :  { %v9829_v52 = vpop.f32.mrb[124].mxu0  ;;  %6449 = vrot.lane.b32.xlu0 %v6339_v11, %s11113_s9 }
0x1cba   :  { %v6354_v47 = vadd.f32 %v9829_v52, %v11789_v57  ;;  %v6348_v17 = vpop.f32.mrb[125].mxu0 }
0x1cbb   :  { %v6349_v33 = vadd.f32 %v6348_v17, %v11783_v50 }
0x1cbc   :  { %6455 = vrot.lane.b32.xlu1 %v6354_v47, %s11113_s9 }
0x1cbd   :  { %6453 = vrot.lane.b32.xlu0 %v6349_v33, %s11113_s9 }
0x1cc0   :  { %6483 = vrot.lane.b32.xlu1 %v12879_v37, %s11090_s3 }
0x1cc1   :  { %6481 = vrot.lane.b32.xlu0 %v12881_v29, %s11090_s3 }
0x1cc4   :  { %6487 = vrot.lane.b32.xlu1 %v12884_v8, %s11090_s3 }
0x1cc5   :  { %6485 = vrot.lane.b32.xlu0 %v12887_v25, %s11090_s3 }
0x1d1a   :  { %v6364_v34 = vpop.permute.xlu1 %6363 }
0x1d1b   :  { %v6374_v41 = vadd.f32 %v6364_v34, %v11745_v5  ;;  %v6362_v0 = vpop.permute.xlu0 %6361 }
0x1d1c   :  { %v6373_v26 = vadd.f32 %v6362_v0, %v11748_v6 }
0x1d1d   :  { %v8750_v55 = vmul.f32 -1.442695, %v6374_v41 }
0x1d1e   :  { %v8749_v12 = vmul.f32 -1.442695, %v6373_v26  ;;  %v6368_v18 = vpop.permute.xlu1 %6367 }
0x1d1f   :  { %10941 = vpow2.f32 %v8750_v55  ;;  %v6376_v37 = vadd.f32 %v6368_v18, %v11755_v23  ;;  %v6366_v28 = vpop.permute.xlu0 %6365 }
0x1d20   :  { %10943 = vpow2.f32 %v8749_v12  ;;  %v6375_v29 = vadd.f32 %v6366_v28, %v11758_v42 }
0x1d21   :  { %v8752_v8 = vmul.f32 -1.442695, %v6376_v37 }
0x1d22   :  { %v8751_v27 = vmul.f32 -1.442695, %v6375_v29  ;;  %v6408_v14 = vpop.permute.xlu1 %6407 }
0x1d23   :  { %10945 = vpow2.f32 %v8752_v8  ;;  %v6418_v25 = vadd.f32 %v6408_v14, %v11765_v40  ;;  %v6406_v49 = vpop.permute.xlu0 %6405 }
0x1d24   :  { %10947 = vpow2.f32 %v8751_v27  ;;  %v6417_v3 = vadd.f32 %v6406_v49, %v11768_v36 }
0x1d25   :  { %v8754_v35 = vmul.f32 -1.442695, %v6418_v25 }
0x1d26   :  { %v8753_v21 = vmul.f32 -1.442695, %v6417_v3  ;;  %v6412_v15 = vpop.permute.xlu1 %6411 }
0x1d27   :  { %10949 = vpow2.f32 %v8754_v35  ;;  %v6420_v10 = vadd.f32 %v6412_v15, %v11775_v13  ;;  %v6410_v63 = vpop.permute.xlu0 %6409 }
0x1d28   :  { %10951 = vpow2.f32 %v8753_v21  ;;  %v6419_v11 = vadd.f32 %v6410_v63, %v11778_v59 }
0x1d29   :  { %v10942_v52 = vpop.eup %10941  ;;  %v8756_v47 = vmul.f32 -1.442695, %v6420_v10 }
0x1d2a   :  { %v10944_v17 = vpop.eup %10943  ;;  %v6390_v33 = vadd.f32 1.0, %v10942_v52  ;;  %v8755_v34 = vmul.f32 -1.442695, %v6419_v11  ;;  %v6452_v29 = vpop.permute.xlu1 %6451 }
0x1d2b   :  { %v6389_v41 = vadd.f32 1.0, %v10944_v17  ;;  %10953 = vpow2.f32 %v8756_v47  ;;  %v6450_v14 = vpop.permute.xlu0 %6449 }
0x1d2c   :  { %10955 = vrcp.f32 %v6390_v33 }
0x1d2d   :  { %v10946_v0 = vpop.eup %10945  ;;  %10957 = vrcp.f32 %v6389_v41 }
0x1d2e   :  { %v10948_v26 = vpop.eup %10947  ;;  %v6392_v55 = vadd.f32 1.0, %v10946_v0  ;;  %10959 = vpow2.f32 %v8755_v34  ;;  %v6456_v47 = vpop.permute.xlu1 %6455 }
0x1d2f   :  { %v6391_v12 = vadd.f32 1.0, %v10948_v26  ;;  %v6454_v34 = vpop.permute.xlu0 %6453 }
0x1d30   :  { %10961 = vrcp.f32 %v6392_v55  ;;  %v8757_v55 = vsel %vm6501_vm4, 1.0, %v13398_v4  ;;  %vm7691_vm4 = vcmask 392192  }
0x1d31   :  { %v10950_v18 = vpop.eup %10949  ;;  %10963 = vrcp.f32 %v6391_v12  ;;  %9830 = vmatprep.subr.msk.mxu1 %vm1775_vm6, %v8757_v55 }
0x1d32   :  { %v10952_v37 = vpop.eup %10951  ;;  %v6434_v28 = vadd.f32 1.0, %v10950_v18  ;;  %9831 = vmatpush3.msk.msra.mxu1 %vm1775_vm6, %v8757_v55 }
0x1d33   :  { %v6433_v27 = vadd.f32 1.0, %v10952_v37  ;;  %v6484_v37 = vpop.permute.xlu1 %6483 }
0x1d34   :  { %10965 = vrcp.f32 %v6434_v28 }
0x1d35   :  { %v10954_v8 = vpop.eup %10953  ;;  %10967 = vrcp.f32 %v6433_v27 }
0x1d36   :  { %v10956_v25 = vpop.eup %10955  ;;  %v6436_v49 = vadd.f32 1.0, %v10954_v8 }
0x1d37   :  { %v10958_v3 = vpop.eup %10957  ;;  %v6462_v35 = vmul.f32 %v10956_v25, %v6452_v29  ;;  %v6482_v29 = vpop.permute.xlu0 %6481 }
0x1d38   :  { %v10960_v21 = vpop.eup %10959  ;;  %v6461_v15 = vmul.f32 %v10958_v3, %v6450_v14  ;;  %10969 = vrcp.f32 %v6436_v49 }
0x1d39   :  { %v6435_v10 = vadd.f32 1.0, %v10960_v21  ;;  %v6466_v63 = vadd.f32 %v6462_v35, %v11791_v54 }
0x1d3a   :  { %v10962_v11 = vpop.eup %10961  ;;  %v6465_v52 = vadd.f32 %v6461_v15, %v13394_v53 }
0x1d3b   :  { %v10964_v17 = vpop.eup %10963  ;;  %10971 = vrcp.f32 %v6435_v10  ;;  %v6464_v33 = vmul.f32 %v10962_v11, %v6456_v47 }
0x1d3c   :  { %10973 = vtanh.f32 %v6466_v63  ;;  %v6463_v41 = vmul.f32 %v10964_v17, %v6454_v34 }
0x1d3d   :  { %10975 = vtanh.f32 %v6465_v52  ;;  %v6468_v0 = vadd.f32 %v6464_v33, %v13395_v45  ;;  %v6488_v52 = vpop.permute.xlu1 %6487 }
0x1d3e   :  { %v6467_v26 = vadd.f32 %v6463_v41, %v13397_v58  ;;  %v10966_v12 = vpop.eup %10965 }
0x1d3f   :  { %10977 = vtanh.f32 %v6468_v0  ;;  %v10968_v18 = vpop.eup %10967  ;;  %v6474_v27 = vsub.f32 1.0, %v10966_v12  ;;  %v6494_v35 = vmul.f32 %v10966_v12, %v6484_v37  ;;  %v6486_v0 = vpop.permute.xlu0 %6485 }
0x1d40   :  { %10979 = vtanh.f32 %v6467_v26  ;;  %v6473_v25 = vsub.f32 1.0, %v10968_v18  ;;  %v6493_v15 = vmul.f32 %v10968_v18, %v6482_v29 }
0x1d42   :  { %v10970_v28 = vpop.eup %10969 }
0x1d43   :  { %v6476_v10 = vsub.f32 1.0, %v10970_v28  ;;  %v6496_v41 = vmul.f32 %v10970_v28, %v6488_v52 }
0x1d45   :  { %v10972_v8 = vpop.eup %10971 }
0x1d46   :  { %v10974_v14 = vpop.eup %10973  ;;  %v6475_v47 = vsub.f32 1.0, %v10972_v8  ;;  %v6495_v55 = vmul.f32 %v10972_v8, %v6486_v0 }
0x1d47   :  { %v10976_v49 = vpop.eup %10975  ;;  %v6478_v3 = vmul.f32 %v10974_v14, %v6474_v27 }
0x1d48   :  { %v6477_v21 = vmul.f32 %v10976_v49, %v6473_v25 }
0x1d49   :  { %v10978_v63 = vpop.eup %10977  ;;  %v12967_v11 = vadd.f32 %v6494_v35, %v6478_v3 }
0x1d4a   :  { %v10980_v17 = vpop.eup %10979  ;;  %v12969_v33 = vadd.f32 %v6493_v15, %v6477_v21  ;;  %v6480_v34 = vmul.f32 %v10978_v63, %v6476_v10 }
0x1d4b   :  { %v6479_v26 = vmul.f32 %v10980_v17, %v6475_v47  ;;  %6510 = vrot.lane.b32.xlu1 %v12967_v11, %s11114_s10 }
0x1d4c   :  { %v12972_v12 = vadd.f32 %v6496_v41, %v6480_v34  ;;  %6508 = vrot.lane.b32.xlu0 %v12969_v33, %s11114_s10 }
0x1d4d   :  { %v12975_v18 = vadd.f32 %v6495_v55, %v6479_v26 }
0x1d4f   :  { %6514 = vrot.lane.b32.xlu1 %v12972_v12, %s11114_s10 }
0x1d50   :  { %6512 = vrot.lane.b32.xlu0 %v12975_v18, %s11114_s10 }
0x1dbd   :  { %v6511_v37 = vpop.permute.xlu1 %6510 }
0x1dbe   :  { %v6509_v29 = vpop.permute.xlu0 %6508 }
0x1dbf   :  { %v10179_v27 = vpack.c.bf16 %v6511_v37, %v6509_v29  ;;  %9832 = vmatprep.mubr.msk.f32.mxu1 %vm1766_vm9, %v6509_v29 }
0x1dc0   :  { %9833 = vmatmul.mubr.msk.f32.vlgmr.msra.gmra.mrb[22].mxu1 %vm1766_vm9, %v6511_v37 }
0x1dc1   :  { %v6515_v28 = vpop.permute.xlu1 %6514  ;;  %10180 = vmatprep.subr.bf16.mxu1 %v10179_v27 }
0x1dc2   :  { %v6513_v8 = vpop.permute.xlu0 %6512  ;;  %10182 = vmatpush3.bf16.msra.mxu1 %v10179_v27 }
0x1dc3   :  { %v10183_v14 = vpack.c.bf16 %v6515_v28, %v6513_v8  ;;  %9835 = vmatprep.mubr.msk.f32.mxu1 %vm1766_vm9, %v6513_v8 }
0x1dc4   :  { %9836 = vmatmul.mubr.msk.f32.gmra.mrb[24].mxu1 %vm1766_vm9, %v6515_v28 }
0x1dc5   :  { %10184 = vmatprep.subr.bf16.mxu1 %v10183_v14  ;;  %9846 = vmatprep.mubr.msk.f32.mxu1 %vm13371_vm3, %v11657_v62 }
0x1dc6   :  { %10186 = vmatpush3.bf16.msra.mxu1 %v10183_v14 }
0x1dc9   :  { %9847 = vmatmul.mubr.msk.f32.vlgmr.msra.gmra.mrb[74].mxu1 %vm13371_vm3, %v11659_v20 }
0x1dca   :  { %9849 = vmatprep.mubr.msk.f32.mxu1 %vm13371_vm3, %v11661_v24 }
0x1dcd   :  { %9850 = vmatmul.mubr.msk.f32.gmra.mrb[76].mxu1 %vm13371_vm3, %v11663_v38 }
0x1dce   :  { %9852 = vmatprep.mubr.msk.f32.mxu1 %vm13371_vm3, %v11666_v43 }
0x1dd1   :  { %9853 = vmatmul.mubr.msk.f32.gmra.mrb[78].mxu1 %vm13371_vm3, %v11685_v7 }
0x1dd2   :  { %9855 = vmatprep.mubr.msk.f32.mxu1 %vm13371_vm3, %v11691_v19 }
0x1dd5   :  { %9856 = vmatmul.mubr.msk.f32.gmra.mrb[80].mxu1 %vm13371_vm3, %v11697_v31 }
0x1dd6   :  { %9858 = vmatprep.mubr.msk.f32.mxu1 %vm13371_vm3, %v11707_v39 }
0x1dd9   :  { %9859 = vmatmul.mubr.msk.f32.gmra.mrb[82].mxu1 %vm13371_vm3, %v11717_v9 }
0x1dda   :  { %9861 = vmatprep.mubr.msk.f32.mxu1 %vm13371_vm3, %v11719_v16 }
0x1ddd   :  { %9862 = vmatmul.mubr.msk.f32.gmra.mrb[84].mxu1 %vm13371_vm3, %v11725_v46 }
0x1e9c   :  { %v9848_v62 = vpop.f32.mrb[74].mxu1 }
0x1e9d   :  { %v6692_v25 = vadd.f32 %v9848_v62, %v11735_v51  ;;  %v6686_v49 = vpop.f32.mrb[75].mxu1 }
0x1e9e   :  { %v6687_v3 = vadd.f32 %v6686_v49, %v11729_v60 }
0x1e9f   :  { %6751 = vrot.lane.b32.xlu1 %v6692_v25, %s11115_s11 }
0x1ea0   :  { %v9851_v35 = vpop.f32.mrb[76].mxu1  ;;  %6749 = vrot.lane.b32.xlu0 %v6687_v3, %s11115_s11 }
0x1ea1   :  { %v6702_v21 = vadd.f32 %v9851_v35, %v11731_v44  ;;  %v6696_v15 = vpop.f32.mrb[77].mxu1 }
0x1ea2   :  { %v6697_v10 = vadd.f32 %v6696_v15, %v11737_v56 }
0x1ea3   :  { %6755 = vrot.lane.b32.xlu1 %v6702_v21, %s11115_s11 }
0x1ea4   :  { %v9854_v63 = vpop.f32.mrb[78].mxu1  ;;  %6753 = vrot.lane.b32.xlu0 %v6697_v10, %s11115_s11 }
0x1ea5   :  { %v6712_v52 = vadd.f32 %v9854_v63, %v11751_v1  ;;  %v6706_v47 = vpop.f32.mrb[79].mxu1 }
0x1ea6   :  { %v6707_v17 = vadd.f32 %v6706_v47, %v11733_v32 }
0x1ea7   :  { %6795 = vrot.lane.b32.xlu1 %v6712_v52, %s11115_s11 }
0x1ea8   :  { %v9857_v34 = vpop.f32.mrb[80].mxu1  ;;  %6793 = vrot.lane.b32.xlu0 %v6707_v17, %s11115_s11 }
0x1ea9   :  { %v6722_v41 = vadd.f32 %v9857_v34, %v11743_v61  ;;  %v6716_v0 = vpop.f32.mrb[81].mxu1 }
0x1eaa   :  { %v6717_v26 = vadd.f32 %v6716_v0, %v11771_v22 }
0x1eab   :  { %6799 = vrot.lane.b32.xlu1 %v6722_v41, %s11115_s11 }
0x1eac   :  { %v9860_v55 = vpop.f32.mrb[82].mxu1  ;;  %6797 = vrot.lane.b32.xlu0 %v6717_v26, %s11115_s11 }
0x1ead   :  { %v6732_v37 = vadd.f32 %v9860_v55, %v11761_v48  ;;  %v6726_v29 = vpop.f32.mrb[83].mxu1 }
0x1eae   :  { %v6727_v27 = vadd.f32 %v6726_v29, %v11785_v2 }
0x1eaf   :  { %6839 = vrot.lane.b32.xlu1 %v6732_v37, %s11115_s11 }
0x1eb0   :  { %v9863_v28 = vpop.f32.mrb[84].mxu1  ;;  %6837 = vrot.lane.b32.xlu0 %v6727_v27, %s11115_s11 }
0x1eb1   :  { %v6742_v8 = vadd.f32 %v9863_v28, %v11789_v57  ;;  %v6736_v14 = vpop.f32.mrb[85].mxu1 }
0x1eb2   :  { %v6737_v62 = vadd.f32 %v6736_v14, %v11783_v50 }
0x1eb3   :  { %6843 = vrot.lane.b32.xlu1 %v6742_v8, %s11115_s11 }
0x1eb4   :  { %6841 = vrot.lane.b32.xlu0 %v6737_v62, %s11115_s11 }
0x1eb7   :  { %6871 = vrot.lane.b32.xlu1 %v12967_v11, %s11090_s3 }
0x1eb8   :  { %6869 = vrot.lane.b32.xlu0 %v12969_v33, %s11090_s3 }
0x1ebb   :  { %6875 = vrot.lane.b32.xlu1 %v12972_v12, %s11090_s3 }
0x1ebc   :  { %6873 = vrot.lane.b32.xlu0 %v12975_v18, %s11090_s3 }
0x1f11   :  { %v6752_v25 = vpop.permute.xlu1 %6751 }
0x1f12   :  { %v6762_v49 = vadd.f32 %v6752_v25, %v11745_v5  ;;  %v6750_v3 = vpop.permute.xlu0 %6749 }
0x1f13   :  { %v6761_v35 = vadd.f32 %v6750_v3, %v11748_v6 }
0x1f14   :  { %v8776_v21 = vmul.f32 -1.442695, %v6762_v49 }
0x1f15   :  { %v8775_v15 = vmul.f32 -1.442695, %v6761_v35  ;;  %v6756_v10 = vpop.permute.xlu1 %6755 }
0x1f16   :  { %10981 = vpow2.f32 %v8776_v21  ;;  %v6764_v11 = vadd.f32 %v6756_v10, %v11755_v23  ;;  %v6754_v63 = vpop.permute.xlu0 %6753 }
0x1f17   :  { %10983 = vpow2.f32 %v8775_v15  ;;  %v6763_v33 = vadd.f32 %v6754_v63, %v11758_v42 }
0x1f18   :  { %v8778_v12 = vmul.f32 -1.442695, %v6764_v11 }
0x1f19   :  { %v8777_v52 = vmul.f32 -1.442695, %v6763_v33  ;;  %v6796_v47 = vpop.permute.xlu1 %6795 }
0x1f1a   :  { %10985 = vpow2.f32 %v8778_v12  ;;  %v6806_v18 = vadd.f32 %v6796_v47, %v11765_v40  ;;  %v6794_v17 = vpop.permute.xlu0 %6793 }
0x1f1b   :  { %10987 = vpow2.f32 %v8777_v52  ;;  %v6805_v34 = vadd.f32 %v6794_v17, %v11768_v36 }
0x1f1c   :  { %v8780_v41 = vmul.f32 -1.442695, %v6806_v18 }
0x1f1d   :  { %v8779_v0 = vmul.f32 -1.442695, %v6805_v34  ;;  %v6800_v26 = vpop.permute.xlu1 %6799 }
0x1f1e   :  { %10989 = vpow2.f32 %v8780_v41  ;;  %v6808_v55 = vadd.f32 %v6800_v26, %v11775_v13  ;;  %v6798_v37 = vpop.permute.xlu0 %6797 }
0x1f1f   :  { %10991 = vpow2.f32 %v8779_v0  ;;  %v6807_v29 = vadd.f32 %v6798_v37, %v11778_v59 }
0x1f20   :  { %v10982_v27 = vpop.eup %10981  ;;  %v8782_v28 = vmul.f32 -1.442695, %v6808_v55 }
0x1f21   :  { %v10984_v8 = vpop.eup %10983  ;;  %v6778_v14 = vadd.f32 1.0, %v10982_v27  ;;  %v8781_v62 = vmul.f32 -1.442695, %v6807_v29  ;;  %v6840_v63 = vpop.permute.xlu1 %6839 }
0x1f22   :  { %v6777_v25 = vadd.f32 1.0, %v10984_v8  ;;  %10993 = vpow2.f32 %v8782_v28  ;;  %v6838_v52 = vpop.permute.xlu0 %6837 }
0x1f23   :  { %10995 = vrcp.f32 %v6778_v14 }
0x1f24   :  { %v10986_v49 = vpop.eup %10985  ;;  %10997 = vrcp.f32 %v6777_v25 }
0x1f25   :  { %v10988_v3 = vpop.eup %10987  ;;  %v6780_v35 = vadd.f32 1.0, %v10986_v49  ;;  %10999 = vpow2.f32 %v8781_v62  ;;  %v6844_v27 = vpop.permute.xlu1 %6843 }
0x1f26   :  { %v6779_v21 = vadd.f32 1.0, %v10988_v3  ;;  %v6842_v14 = vpop.permute.xlu0 %6841  ;;  %v8783_v3 = vsel %vm6889_vm5, 1.0, %v13398_v4 }
0x1f27   :  { %11001 = vrcp.f32 %v6780_v35  ;;  %9864 = vmatprep.subr.msk.mxu1 %vm1775_vm6, %v8783_v3 }
0x1f28   :  { %v10990_v15 = vpop.eup %10989  ;;  %11003 = vrcp.f32 %v6779_v21  ;;  %9865 = vmatpush3.msk.msra.mxu1 %vm1775_vm6, %v8783_v3 }
0x1f29   :  { %v10992_v10 = vpop.eup %10991  ;;  %v6822_v11 = vadd.f32 1.0, %v10990_v15  ;;  %v6872_v15 = vpop.permute.xlu1 %6871 }
0x1f2a   :  { %v6821_v12 = vadd.f32 1.0, %v10992_v10 }
0x1f2b   :  { %11005 = vrcp.f32 %v6822_v11  ;;  %v6870_v11 = vpop.permute.xlu0 %6869 }
0x1f2c   :  { %v10994_v33 = vpop.eup %10993  ;;  %11007 = vrcp.f32 %v6821_v12 }
0x1f2d   :  { %v10996_v47 = vpop.eup %10995  ;;  %v6824_v18 = vadd.f32 1.0, %v10994_v33 }
0x1f2e   :  { %v10998_v17 = vpop.eup %10997  ;;  %v6850_v34 = vmul.f32 %v10996_v47, %v6840_v63 }
0x1f2f   :  { %v11000_v41 = vpop.eup %10999  ;;  %v6849_v0 = vmul.f32 %v10998_v17, %v6838_v52  ;;  %11009 = vrcp.f32 %v6824_v18 }
0x1f30   :  { %v6823_v26 = vadd.f32 1.0, %v11000_v41  ;;  %v6854_v55 = vadd.f32 %v6850_v34, %v11791_v54 }
0x1f31   :  { %v11002_v37 = vpop.eup %11001  ;;  %v6853_v29 = vadd.f32 %v6849_v0, %v13394_v53 }
0x1f32   :  { %v11004_v28 = vpop.eup %11003  ;;  %11011 = vrcp.f32 %v6823_v26  ;;  %v6852_v8 = vmul.f32 %v11002_v37, %v6844_v27  ;;  %v6876_v37 = vpop.permute.xlu1 %6875 }
0x1f33   :  { %11013 = vtanh.f32 %v6854_v55  ;;  %v6851_v62 = vmul.f32 %v11004_v28, %v6842_v14 }
0x1f34   :  { %11015 = vtanh.f32 %v6853_v29  ;;  %v6856_v25 = vadd.f32 %v6852_v8, %v13395_v45 }
0x1f35   :  { %v6855_v49 = vadd.f32 %v6851_v62, %v13397_v58  ;;  %v11006_v35 = vpop.eup %11005  ;;  %v6874_v62 = vpop.permute.xlu0 %6873 }
0x1f36   :  { %11017 = vtanh.f32 %v6856_v25  ;;  %v11008_v21 = vpop.eup %11007  ;;  %v6862_v33 = vsub.f32 1.0, %v11006_v35  ;;  %v6882_v17 = vmul.f32 %v11006_v35, %v6872_v15 }
0x1f37   :  { %11019 = vtanh.f32 %v6855_v49  ;;  %v6861_v52 = vsub.f32 1.0, %v11008_v21  ;;  %v6881_v41 = vmul.f32 %v11008_v21, %v6870_v11 }
0x1f39   :  { %v11010_v10 = vpop.eup %11009 }
0x1f3a   :  { %v6864_v0 = vsub.f32 1.0, %v11010_v10  ;;  %v6884_v14 = vmul.f32 %v11010_v10, %v6876_v37 }
0x1f3c   :  { %v11012_v63 = vpop.eup %11011 }
0x1f3d   :  { %v11014_v12 = vpop.eup %11013  ;;  %v6863_v29 = vsub.f32 1.0, %v11012_v63  ;;  %v6883_v49 = vmul.f32 %v11012_v63, %v6874_v62 }
0x1f3e   :  { %v11016_v47 = vpop.eup %11015  ;;  %v6866_v18 = vmul.f32 %v11014_v12, %v6862_v33 }
0x1f3f   :  { %v6865_v34 = vmul.f32 %v11016_v47, %v6861_v52 }
0x1f40   :  { %v11018_v26 = vpop.eup %11017  ;;  %v13055_v55 = vadd.f32 %v6882_v17, %v6866_v18 }
0x1f41   :  { %v11020_v27 = vpop.eup %11019  ;;  %v13057_v28 = vadd.f32 %v6881_v41, %v6865_v34  ;;  %v6868_v8 = vmul.f32 %v11018_v26, %v6864_v0 }
0x1f42   :  { %v6867_v25 = vmul.f32 %v11020_v27, %v6863_v29  ;;  %6898 = vrot.lane.b32.xlu1 %v13055_v55, %s11116_s12 }
0x1f43   :  { %v13060_v3 = vadd.f32 %v6884_v14, %v6868_v8  ;;  %6896 = vrot.lane.b32.xlu0 %v13057_v28, %s11116_s12 }
0x1f44   :  { %v13063_v35 = vadd.f32 %v6883_v49, %v6867_v25 }
0x1f46   :  { %6902 = vrot.lane.b32.xlu1 %v13060_v3, %s11116_s12 }
0x1f47   :  { %6900 = vrot.lane.b32.xlu0 %v13063_v35, %s11116_s12 }
0x1fb4   :  { %v6899_v21 = vpop.permute.xlu1 %6898 }
0x1fb5   :  { %v6897_v15 = vpop.permute.xlu0 %6896 }
0x1fb6   :  { %v10187_v11 = vpack.c.bf16 %v6899_v21, %v6897_v15  ;;  %9866 = vmatprep.mubr.msk.f32.mxu1 %vm1766_vm9, %v6897_v15 }
0x1fb7   :  { %9867 = vmatmul.mubr.msk.f32.vlgmr.msra.gmra.mrb[22].mxu1 %vm1766_vm9, %v6899_v21 }
0x1fb8   :  { %v6903_v10 = vpop.permute.xlu1 %6902  ;;  %10188 = vmatprep.subr.bf16.mxu0 %v10187_v11 }
0x1fb9   :  { %10190 = vmatpush3.bf16.msra.mxu0 %v10187_v11  ;;  %v6901_v63 = vpop.permute.xlu0 %6900 }
0x1fba   :  { %v10191_v33 = vpack.c.bf16 %v6903_v10, %v6901_v63  ;;  %9869 = vmatprep.mubr.msk.f32.mxu1 %vm1766_vm9, %v6901_v63 }
0x1fbb   :  { %9870 = vmatmul.mubr.msk.f32.gmra.mrb[24].mxu1 %vm1766_vm9, %v6903_v10 }
0x1fbc   :  { %10192 = vmatprep.subr.bf16.mxu0 %v10191_v33 }
0x1fbd   :  { %10194 = vmatpush3.bf16.msra.mxu0 %v10191_v33 }
0x1fc0   :  { %9881 = vmatmul.mubr.msk.f32.vlgmr.msra.gmra.mrb[126].mxu0 %vm13371_vm3, %v11659_v20 }
0x1fc1   :  { %9883 = vmatprep.mubr.msk.f32.mxu0 %vm13371_vm3, %v11661_v24 }
0x1fc4   :  { %9884 = vmatmul.mubr.msk.f32.gmra.mrb[128].mxu0 %vm13371_vm3, %v11663_v38 }
0x1fc5   :  { %9886 = vmatprep.mubr.msk.f32.mxu0 %vm13371_vm3, %v11666_v43 }
0x1fc8   :  { %9887 = vmatmul.mubr.msk.f32.gmra.mrb[130].mxu0 %vm13371_vm3, %v11685_v7 }
0x1fc9   :  { %9889 = vmatprep.mubr.msk.f32.mxu0 %vm13371_vm3, %v11691_v19 }
0x1fcc   :  { %9890 = vmatmul.mubr.msk.f32.gmra.mrb[132].mxu0 %vm13371_vm3, %v11697_v31 }
0x1fcd   :  { %9892 = vmatprep.mubr.msk.f32.mxu0 %vm13371_vm3, %v11707_v39 }
0x1fd0   :  { %9893 = vmatmul.mubr.msk.f32.gmra.mrb[134].mxu0 %vm13371_vm3, %v11717_v9 }
0x1fd1   :  { %9895 = vmatprep.mubr.msk.f32.mxu0 %vm13371_vm3, %v11719_v16 }
0x1fd4   :  { %9896 = vmatmul.mubr.msk.f32.gmra.mrb[136].mxu0 %vm13371_vm3, %v11725_v46 }
0x2093   :  { %v9882_v20 = vpop.f32.mrb[126].mxu0 }
0x2094   :  { %v7080_v24 = vadd.f32 %v9882_v20, %v11735_v51  ;;  %v7074_v38 = vpop.f32.mrb[127].mxu0 }
0x2095   :  { %v7075_v43 = vadd.f32 %v7074_v38, %v11729_v60 }
0x2096   :  { %7139 = vrot.lane.b32.xlu1 %v7080_v24, %s11117_s13 }
0x2097   :  { %v9885_v7 = vpop.f32.mrb[128].mxu0  ;;  %7137 = vrot.lane.b32.xlu0 %v7075_v43, %s11117_s13 }
0x2098   :  { %v7090_v19 = vadd.f32 %v9885_v7, %v11731_v44  ;;  %v7084_v31 = vpop.f32.mrb[129].mxu0 }
0x2099   :  { %v7085_v39 = vadd.f32 %v7084_v31, %v11737_v56 }
0x209a   :  { %7143 = vrot.lane.b32.xlu1 %v7090_v19, %s11117_s13 }
0x209b   :  { %v9888_v9 = vpop.f32.mrb[130].mxu0  ;;  %7141 = vrot.lane.b32.xlu0 %v7085_v39, %s11117_s13 }
0x209c   :  { %v7100_v16 = vadd.f32 %v9888_v9, %v11751_v1  ;;  %v7094_v46 = vpop.f32.mrb[131].mxu0 }
0x209d   :  { %v7095_v60 = vadd.f32 %v7094_v46, %v11733_v32 }
0x209e   :  { %7183 = vrot.lane.b32.xlu1 %v7100_v16, %s11117_s13 }
0x209f   :  { %v9891_v51 = vpop.f32.mrb[132].mxu0  ;;  %7181 = vrot.lane.b32.xlu0 %v7095_v60, %s11117_s13 }
0x20a0   :  { %v7110_v44 = vadd.f32 %v9891_v51, %v11743_v61  ;;  %v7104_v12 = vpop.f32.mrb[133].mxu0 }
0x20a1   :  { %v7105_v56 = vadd.f32 %v7104_v12, %v11771_v22 }
0x20a2   :  { %7187 = vrot.lane.b32.xlu1 %v7110_v44, %s11117_s13 }
0x20a3   :  { %v9894_v52 = vpop.f32.mrb[134].mxu0  ;;  %7185 = vrot.lane.b32.xlu0 %v7105_v56, %s11117_s13 }
0x20a4   :  { %v7120_v1 = vadd.f32 %v9894_v52, %v11761_v48  ;;  %v7114_v47 = vpop.f32.mrb[135].mxu0 }
0x20a5   :  { %v7115_v32 = vadd.f32 %v7114_v47, %v11785_v2 }
0x20a6   :  { %7227 = vrot.lane.b32.xlu1 %v7120_v1, %s11117_s13 }
0x20a7   :  { %v9897_v18 = vpop.f32.mrb[136].mxu0  ;;  %7225 = vrot.lane.b32.xlu0 %v7115_v32, %s11117_s13 }
0x20a8   :  { %v7130_v61 = vadd.f32 %v9897_v18, %v11789_v57  ;;  %v7124_v17 = vpop.f32.mrb[137].mxu0 }
0x20a9   :  { %v7125_v22 = vadd.f32 %v7124_v17, %v11783_v50 }
0x20aa   :  { %7231 = vrot.lane.b32.xlu1 %v7130_v61, %s11117_s13 }
0x20ab   :  { %7229 = vrot.lane.b32.xlu0 %v7125_v22, %s11117_s13 }
0x20ae   :  { %7259 = vrot.lane.b32.xlu1 %v13055_v55, %s11090_s3 }
0x20af   :  { %7257 = vrot.lane.b32.xlu0 %v13057_v28, %s11090_s3 }
0x20b2   :  { %7263 = vrot.lane.b32.xlu1 %v13060_v3, %s11090_s3 }
0x20b3   :  { %7261 = vrot.lane.b32.xlu0 %v13063_v35, %s11090_s3  ;;  %s11118_s3 = smov 98  }
0x2108   :  { %v7140_v57 = vpop.permute.xlu1 %7139 }
0x2109   :  { %v7150_v48 = vadd.f32 %v7140_v57, %v11745_v5  ;;  %v7138_v50 = vpop.permute.xlu0 %7137 }
0x210a   :  { %v7149_v2 = vadd.f32 %v7138_v50, %v11748_v6 }
0x210b   :  { %v8802_v34 = vmul.f32 -1.442695, %v7150_v48 }
0x210c   :  { %v8801_v41 = vmul.f32 -1.442695, %v7149_v2  ;;  %v7144_v0 = vpop.permute.xlu1 %7143 }
0x210d   :  { %11021 = vpow2.f32 %v8802_v34  ;;  %v7152_v26 = vadd.f32 %v7144_v0, %v11755_v23  ;;  %v7142_v55 = vpop.permute.xlu0 %7141 }
0x210e   :  { %11023 = vpow2.f32 %v8801_v41  ;;  %v7151_v37 = vadd.f32 %v7142_v55, %v11758_v42 }
0x210f   :  { %v8804_v29 = vmul.f32 -1.442695, %v7152_v26 }
0x2110   :  { %v8803_v27 = vmul.f32 -1.442695, %v7151_v37  ;;  %v7184_v28 = vpop.permute.xlu1 %7183 }
0x2111   :  { %11025 = vpow2.f32 %v8804_v29  ;;  %v7194_v8 = vadd.f32 %v7184_v28, %v11765_v40  ;;  %v7182_v5 = vpop.permute.xlu0 %7181 }
0x2112   :  { %11027 = vpow2.f32 %v8803_v27  ;;  %v7193_v6 = vadd.f32 %v7182_v5, %v11768_v36 }
0x2113   :  { %v8806_v14 = vmul.f32 -1.442695, %v7194_v8 }
0x2114   :  { %v8805_v62 = vmul.f32 -1.442695, %v7193_v6  ;;  %v7188_v25 = vpop.permute.xlu1 %7187 }
0x2115   :  { %11029 = vpow2.f32 %v8806_v14  ;;  %v7196_v23 = vadd.f32 %v7188_v25, %v11775_v13  ;;  %v7186_v49 = vpop.permute.xlu0 %7185 }
0x2116   :  { %11031 = vpow2.f32 %v8805_v62  ;;  %v7195_v42 = vadd.f32 %v7186_v49, %v11778_v59 }
0x2117   :  { %v11022_v3 = vpop.eup %11021  ;;  %v8808_v35 = vmul.f32 -1.442695, %v7196_v23 }
0x2118   :  { %v11024_v21 = vpop.eup %11023  ;;  %v7166_v15 = vadd.f32 1.0, %v11022_v3  ;;  %v8807_v11 = vmul.f32 -1.442695, %v7195_v42  ;;  %v7228_v59 = vpop.permute.xlu1 %7227 }
0x2119   :  { %v7165_v40 = vadd.f32 1.0, %v11024_v21  ;;  %11033 = vpow2.f32 %v8808_v35  ;;  %v7226_v7 = vpop.permute.xlu0 %7225 }
0x211a   :  { %11035 = vrcp.f32 %v7166_v15 }
0x211b   :  { %v11026_v10 = vpop.eup %11025  ;;  %11037 = vrcp.f32 %v7165_v40  ;;  %v11119_v40 = vmov 6  }
0x211c   :  { %v11028_v36 = vpop.eup %11027  ;;  %v7168_v63 = vadd.f32 1.0, %v11026_v10  ;;  %11039 = vpow2.f32 %v8807_v11  ;;  %v7232_v56 = vpop.permute.xlu1 %7231  ;;  %v13148_v11 = vld [vmem:[%s13340_s4] sm:$0xff]  ;;  %10410 = vset.pattern.permute.xlu0 %v11119_v40  ;;  %10411 = vset.pattern.permute.xlu1 %v11119_v40 }
0x211d   :  { %v7167_v33 = vadd.f32 1.0, %v11028_v36  ;;  %v7230_v47 = vpop.permute.xlu0 %7229  ;;  %9914 = vmatprep.mubr.msk.f32.mxu0 %vm13371_vm3, %v13148_v11  ;;  %v13155_v10 = vld [vmem:[%s13337_s2] sm:$0xff]  ;;  %v13161_v36 = vld [vmem:[%s13337_s2 + $0x8] sm:$0xff]  ;;  %s11121_s2 = smov 96  }
0x211e   :  { %11041 = vrcp.f32 %v7168_v63 }
0x211f   :  { %v11030_v13 = vpop.eup %11029  ;;  %11043 = vrcp.f32 %v7167_v33 }
0x2120   :  { %v11032_v20 = vpop.eup %11031  ;;  %v7210_v24 = vadd.f32 1.0, %v11030_v13  ;;  %v7260_v22 = vpop.permute.xlu1 %7259 }
0x2121   :  { %v7209_v43 = vadd.f32 1.0, %v11032_v20  ;;  %v7258_v48 = vpop.permute.xlu0 %7257 }
0x2122   :  { %11045 = vrcp.f32 %v7210_v24 }
0x2123   :  { %v11034_v38 = vpop.eup %11033  ;;  %11047 = vrcp.f32 %v7209_v43  ;;  %v13399_v43 = vld [vmem:[#allocation3_spill] sm:$0xff] }
0x2124   :  { %v11036_v19 = vpop.eup %11035  ;;  %v7212_v31 = vadd.f32 1.0, %v11034_v38  ;;  %v7264_v27 = vpop.permute.xlu1 %7263  ;;  %v13167_v38 = vld [vmem:[%s13340_s4 + $0x8] sm:$0xff]  ;;  %s11124_s4 = smov 48  }
0x2125   :  { %v11038_v39 = vpop.eup %11037  ;;  %v7238_v9 = vmul.f32 %v11036_v19, %v7228_v59  ;;  %v7262_v62 = vpop.permute.xlu0 %7261 }
0x2126   :  { %v11040_v16 = vpop.eup %11039  ;;  %v7237_v46 = vmul.f32 %v11038_v39, %v7226_v7  ;;  %11049 = vrcp.f32 %v7212_v31  ;;  %v13400_v7 = vld [vmem:[#allocation2_spill] sm:$0xff]  ;;  %v13401_v31 = vld [vmem:[#allocation4_spill] sm:$0xff] }
0x2127   :  { %v7211_v60 = vadd.f32 1.0, %v11040_v16  ;;  %v7242_v51 = vadd.f32 %v7238_v9, %v11791_v54  ;;  %v8809_v54 = vsel %vm7277_vm7, 1.0, %v13398_v4  ;;  %v7495_v19 = vsub.s32 %v13400_v7, %v13399_v43  ;;  %v13402_v9 = vld [vmem:[#allocation5_spill] sm:$0xff] }
0x2128   :  { %v11042_v44 = vpop.eup %11041  ;;  %v7241_v12 = vadd.f32 %v7237_v46, %v13394_v53  ;;  %9898 = vmatprep.subr.msk.mxu1 %vm1775_vm6, %v8809_v54  ;;  %v7496_v39 = vsub.s32 %v13401_v31, %v13399_v43  ;;  %v7497_v16 = vsub.s32 %v13402_v9, %v13399_v43  ;;  %v13403_v46 = vld [vmem:[#allocation6_spill] sm:$0xff] }
0x2129   :  { %v11044_v52 = vpop.eup %11043  ;;  %11051 = vrcp.f32 %v7211_v60  ;;  %v7240_v1 = vmul.f32 %v11042_v44, %v7232_v56  ;;  %9899 = vmatpush3.msk.msra.mxu1 %vm1775_vm6, %v8809_v54  ;;  %v7498_v60 = vsub.s32 %v13403_v46, %v13399_v43  ;;  %vm7499_vm6 = vcmp.eq.s32.totalorder %v7495_v19, 4294967294 }
0x212a   :  { %11053 = vtanh.f32 %v7242_v51  ;;  %v7239_v32 = vmul.f32 %v11044_v52, %v7230_v47  ;;  %vm7501_vm8 = vcmp.eq.s32.totalorder %v7497_v16, 4294967294  ;;  %vm7511_vm0 = vcmp.eq.s32.totalorder %v7495_v19, 2 }
0x212b   :  { %11055 = vtanh.f32 %v7241_v12  ;;  %v7244_v18 = vadd.f32 %v7240_v1, %v13395_v45  ;;  %vm7502_vm13 = vcmp.eq.s32.totalorder %v7498_v60, 4294967294  ;;  %vm7512_vm11 = vcmp.eq.s32.totalorder %v7496_v39, 2 }
0x212c   :  { %v7243_v61 = vadd.f32 %v7239_v32, %v13397_v58  ;;  %v11046_v53 = vpop.eup %11045  ;;  %v11120_v44 = vmov 1.0|1.0   ;;  %vm13186_vm12 = vmpackc.low %vm7502_vm13, %vm7501_vm8  ;;  %vm7513_vm15 = vcmp.eq.s32.totalorder %v7497_v16, 2  ;;  %vm7514_vm1 = vcmp.eq.s32.totalorder %v7498_v60, 2 }
0x212d   :  { %11057 = vtanh.f32 %v7244_v18  ;;  %v11048_v17 = vpop.eup %11047  ;;  %v7250_v2 = vsub.f32 1.0, %v11046_v53  ;;  %v7270_v58 = vmul.f32 %v11046_v53, %v7260_v22  ;;  %vm13193_vm14 = vmpackc.low %vm7512_vm11, %vm7511_vm0  ;;  %v8052_v51 = vmul.u32 16, %v13401_v31 }
0x212e   :  { %11059 = vtanh.f32 %v7243_v61  ;;  %v7249_v34 = vsub.f32 1.0, %v11048_v17  ;;  %v7269_v26 = vmul.f32 %v11048_v17, %v7258_v48  ;;  %10212 = vmatprep.subr.msk.bf16.mxu1 %vm13193_vm14, %v11120_v44  ;;  %vm13206_vm2 = vmpackc.low %vm7514_vm1, %vm7513_vm15  ;;  %v8050_v12 = vadd.s32 384, %v13399_v43 }
0x212f   :  { %v8053_v31 = vmul.u32 16, %v13402_v9 }
0x2130   :  { %v11050_v57 = vpop.eup %11049 }
0x2131   :  { %v7252_v55 = vsub.f32 1.0, %v11050_v57  ;;  %v7272_v14 = vmul.f32 %v11050_v57, %v7264_v27 }
0x2133   :  { %v11052_v50 = vpop.eup %11051 }
0x2134   :  { %v11054_v45 = vpop.eup %11053  ;;  %v7251_v28 = vsub.f32 1.0, %v11052_v50  ;;  %v7271_v23 = vmul.f32 %v11052_v50, %v7262_v62 }
0x2135   :  { %v11056_v30 = vpop.eup %11055  ;;  %v7254_v41 = vmul.f32 %v11054_v45, %v7250_v2 }
0x2136   :  { %v7253_v0 = vmul.f32 %v11056_v30, %v7249_v34  ;;  %v11122_v30 = vmov 7  }
0x2137   :  { %v11058_v37 = vpop.eup %11057  ;;  %v7274_v29 = vadd.f32 %v7270_v58, %v7254_v41  ;;  %v11123_v41 = vmov 9  }
0x2138   :  { %v11060_v8 = vpop.eup %11059  ;;  %v7273_v5 = vadd.f32 %v7269_v26, %v7253_v0  ;;  %v7256_v6 = vmul.f32 %v11058_v37, %v7252_v55 }
0x2139   :  { %v7255_v25 = vmul.f32 %v11060_v8, %v7251_v28  ;;  %7286 = vrot.lane.b32.xlu1 %v7274_v29, %s11118_s3 }
0x213a   :  { %v7276_v49 = vadd.f32 %v7272_v14, %v7256_v6  ;;  %7284 = vrot.lane.b32.xlu0 %v7273_v5, %s11118_s3 }
0x213b   :  { %v7275_v42 = vadd.f32 %v7271_v23, %v7255_v25 }
0x213d   :  { %7290 = vrot.lane.b32.xlu1 %v7276_v49, %s11118_s3 }
0x213e   :  { %7288 = vrot.lane.b32.xlu0 %v7275_v42, %s11118_s3 }
0x2141   :  { %7399 = vperm.xlu1 %10411, %v13161_v36  }
0x2142   :  { %7395 = vperm.xlu0 %10410, %v13155_v10  }
0x2145   :  { %7687 = vrot.lane.b32.xlu1 %v13148_v11, %s11121_s2 }
0x2146   :  { %7689 = vrot.lane.b32.xlu0 %v13167_v38, %s11121_s2  ;;  %10412 = vset.pattern.permute.xlu1 %v11122_v30 }
0x2147   :  { %10413 = vset.pattern.permute.xlu0 %v11122_v30 }
0x2149   :  { %7680 = vperm.xlu1 %10412, %v13155_v10  }
0x214a   :  { %7684 = vperm.xlu0 %10413, %v13161_v36  }
0x214d   :  { %10414 = vset.pattern.permute.xlu1 %v11123_v41 }
0x214e   :  { %7776 = vperm.xlu1 %10414, %v13155_v10   ;;  %7951 = vrot.lane.b32.xlu0 %v13148_v11, %s11124_s4 }
0x2152   :  { %7780 = vperm.xlu1 %10414, %v13161_v36  }
0x2156   :  { %7953 = vrot.lane.b32.xlu1 %v13167_v38, %s11124_s4 }
0x21ab   :  { %v7287_v3 = vpop.permute.xlu1 %7286 }
0x21ac   :  { %v7285_v35 = vpop.permute.xlu0 %7284 }
0x21ad   :  { %9900 = vmatprep.mubr.msk.f32.mxu1 %vm1766_vm9, %v7285_v35 }
0x21ae   :  { %9901 = vmatmul.mubr.msk.f32.vlgmr.msra.gmra.mrb[22].mxu1 %vm1766_vm9, %v7287_v3 }
0x21af   :  { %v7291_v15 = vpop.permute.xlu1 %7290  ;;  %10214 = vmatpush3.bf16.msk.msra.mxu1 %vm13193_vm14, %v11120_v44 }
0x21b0   :  { %v7289_v21 = vpop.permute.xlu0 %7288  ;;  %10216 = vmatprep.subr.msk.bf16.mxu1 %vm13206_vm2, %v11120_v44 }
0x21b1   :  { %9903 = vmatprep.mubr.msk.f32.mxu1 %vm1766_vm9, %v7289_v21 }
0x21b2   :  { %9904 = vmatmul.mubr.msk.f32.gmra.mrb[24].mxu1 %vm1766_vm9, %v7291_v15  ;;  %vm7500_vm9 = vcmp.eq.s32.totalorder %v7496_v39, 4294967294 }
0x21b3   :  { %vm13179_vm10 = vmpackc.low %vm7500_vm9, %vm7499_vm6  ;;  %10218 = vmatpush3.bf16.msk.msra.mxu1 %vm13206_vm2, %v11120_v44 }
0x21b4   :  { %10232 = vmatprep.subr.msk.bf16.mxu1 %vm13179_vm10, %v11120_v44 }
0x21c0   :  { %v7400_v1 = vpop.permute.xlu1 %7399 }
0x21c1   :  { %v7396_v47 = vpop.permute.xlu0 %7395 }
0x21c4   :  { %v7688_v34 = vpop.permute.xlu1 %7687 }
0x21c5   :  { %v7690_v28 = vpop.permute.xlu0 %7689 }
0x21c8   :  { %v7681_v8 = vpop.permute.xlu1 %7680 }
0x21c9   :  { %v7685_v6 = vpop.permute.xlu0 %7684 }
0x21cd   :  { %v7777_v5 = vpop.permute.xlu1 %7776 }
0x21d1   :  { %v7781_v3 = vpop.permute.xlu1 %7780 }
0x21d5   :  { %v7954_v60 = vpop.permute.xlu1 %7953 }
0x2281   :  { %v9902_v63 = vpop.f32.mrb[22].mxu1 }
0x2282   :  { %v7369_v33 = vpop.f32.mrb[23].mxu1 }
0x2283   :  { %v10195_v13 = vpack.c.bf16 %v9902_v63, %v7369_v33 }
0x2285   :  { %v9905_v20 = vpop.f32.mrb[24].mxu1  ;;  %10196 = vmatprep.subr.bf16.mxu0 %v10195_v13 }
0x2286   :  { %v7379_v24 = vpop.f32.mrb[25].mxu1  ;;  %10198 = vmatpush3.bf16.msra.mxu0 %v10195_v13  ;;  %v7952_v13 = vpop.permute.xlu0 %7951 }
0x2287   :  { %v10199_v59 = vpack.c.bf16 %v9905_v20, %v7379_v24  ;;  %v11125_v20 = vmov 8  }
0x2288   :  { %10416 = vset.pattern.permute.xlu1 %v11125_v20  ;;  %10415 = vset.pattern.permute.xlu0 %v11125_v20 }
0x2289   :  { %10200 = vmatprep.subr.bf16.mxu0 %v10199_v59  ;;  %7948 = vperm.xlu1 %10416, %v13161_v36   ;;  %v8048_v36 = vadd.s32 128, %v13399_v43 }
0x228a   :  { %10202 = vmatpush3.bf16.msra.mxu0 %v10199_v59  ;;  %7944 = vperm.xlu0 %10415, %v13155_v10   ;;  %v8051_v10 = vmul.u32 16, %v13400_v7  ;;  %v8059_v7 = vsub.s32 %v13399_v43, %v8052_v51 }
0x228b   :  { %10204 = vmatprep.subr.msk.bf16.mxu0 %vm13179_vm10, %v11120_v44  ;;  %v8060_v52 = vsub.s32 %v8048_v36, %v8052_v51 }
0x228c   :  { %v8056_v56 = vsub.s32 %v8048_v36, %v8051_v10 }
0x228d   :  { %9915 = vmatmul.mubr.msk.f32.vlgmr.msra.gmra.mrb[138].mxu0 %vm13371_vm3, %v13167_v38  ;;  %vm8076_vm7 = vcmp.ge.s32.totalorder %v8060_v52, 0  ;;  %vm8092_vm9 = vcmp.lt.s32.totalorder %v8060_v52, 16 }
0x228e   :  { %10206 = vmatpush3.bf16.msk.msra.mxu0 %vm13179_vm10, %v11120_v44  ;;  %vm8072_vm5 = vcmp.ge.s32.totalorder %v8056_v56, 0  ;;  %vm8088_vm6 = vcmp.lt.s32.totalorder %v8056_v56, 16  ;;  %vm8108_vm0 = vmand %vm8076_vm7, %vm8092_vm9 }
0x228f   :  { %10208 = vmatprep.subr.msk.bf16.mxu0 %vm13186_vm12, %v11120_v44  ;;  %vm8104_vm8 = vmand %vm8072_vm5, %vm8088_vm6  ;;  %vm8075_vm5 = vcmp.ge.s32.totalorder %v8059_v7, 0  ;;  %vm8091_vm6 = vcmp.lt.s32.totalorder %v8059_v7, 16 }
0x2292   :  { %10210 = vmatpush3.bf16.msk.msra.mxu0 %vm13186_vm12, %v11120_v44 }
0x2309   :  { %v7945_v30 = vpop.permute.xlu0 %7944 }
0x2360   :  { %v9916_v32 = vpop.f32.mrb[138].mxu0 }
0x2361   :  { %v7474_v18 = vpop.f32.mrb[139].mxu0  ;;  %v7480_v61 = vadd.f32 %v9916_v32, %v7400_v1  ;;  %v8058_v1 = vsub.s32 %v8050_v12, %v8051_v10  ;;  %v8055_v32 = vsub.s32 %v13399_v43, %v8051_v10 }
0x2362   :  { %v7475_v54 = vadd.f32 %v7474_v18, %v7396_v47  ;;  %v8062_v47 = vsub.s32 %v8050_v12, %v8052_v51  ;;  %v8049_v18 = vadd.s32 256, %v13399_v43 }
0x2363   :  { %v8818_v53 = vmul.f32 -1.442695, %v7480_v61  ;;  %vm8090_vm13 = vcmp.lt.s32.totalorder %v8058_v1, 16  ;;  %vm8071_vm1 = vcmp.ge.s32.totalorder %v8055_v32, 0 }
0x2364   :  { %v8817_v17 = vmul.f32 -1.442695, %v7475_v54  ;;  %vm8078_vm11 = vcmp.ge.s32.totalorder %v8062_v47, 0  ;;  %v8057_v61 = vsub.s32 %v8049_v18, %v8051_v10  ;;  %v8054_v54 = vmul.u32 16, %v13403_v46 }
0x2365   :  { %11061 = vpow2.f32 %v8818_v53  ;;  %v8061_v53 = vsub.s32 %v8049_v18, %v8052_v51  ;;  %v8066_v46 = vsub.s32 %v8050_v12, %v8053_v31 }
0x2366   :  { %11063 = vpow2.f32 %v8817_v17  ;;  %v8064_v17 = vsub.s32 %v8048_v36, %v8053_v31  ;;  %vm8073_vm9 = vcmp.ge.s32.totalorder %v8057_v61, 0  ;;  %v8068_v9 = vsub.s32 %v8048_v36, %v8054_v54 }
0x236f   :  { %v11062_v22 = vpop.eup %11061 }
0x2370   :  { %v11064_v57 = vpop.eup %11063  ;;  %v7490_v48 = vadd.f32 1.0, %v11062_v22  ;;  %v8070_v22 = vsub.s32 %v8050_v12, %v8054_v54 }
0x2371   :  { %v7489_v50 = vadd.f32 1.0, %v11064_v57  ;;  %v8063_v57 = vsub.s32 %v13399_v43, %v8053_v31 }
0x2373   :  { %11065 = vrcp.f32 %v7489_v50  ;;  %v8065_v50 = vsub.s32 %v8049_v18, %v8053_v31 }
0x2374   :  { %11067 = vrcp.f32 %v7490_v48  ;;  %v8067_v48 = vsub.s32 %v13399_v43, %v8054_v54  ;;  %v7949_v43 = vpop.permute.xlu1 %7948 }
0x237d   :  { %v13224_v2 = vpop.eup %11065 }
0x237e   :  { %v13226_v45 = vpop.eup %11067  ;;  %9925 = vmatprep.mubr.msk.f32.mxu0 %vm13371_vm3, %v13224_v2  ;;  %9936 = vmatprep.mubr.msk.f32.mxu1 %vm13371_vm3, %v13224_v2 }
0x237f   :  { %9926 = vmatmul.mubr.msk.f32.vlgmr.msra.gmra.mrb[140].mxu0 %vm13371_vm3, %v13226_v45  ;;  %9937 = vmatmul.mubr.msk.f32.vlgmr.msra.gmra.mrb[86].mxu1 %vm13371_vm3, %v13226_v45  ;;  %v10223_v27 = vpack.c.bf16 %v13226_v45, %v13224_v2 }
0x2380   :  { %10234 = vmatpush3.bf16.msk.msra.mxu1 %vm13179_vm10, %v11120_v44  ;;  %9951 = vmatprep.mubr.msk.f32.mxu0 %vm7691_vm4, %v7688_v34  ;;  %vm8074_vm10 = vcmp.ge.s32.totalorder %v8058_v1, 0  ;;  %v8069_v34 = vsub.s32 %v8049_v18, %v8054_v54 }
0x2381   :  { %10236 = vmatprep.subr.msk.bf16.mxu1 %vm13186_vm12, %v11120_v44  ;;  %vm8106_vm15 = vmand %vm8074_vm10, %vm8090_vm13  ;;  %vm8093_vm10 = vcmp.lt.s32.totalorder %v8061_v53, 16 }
0x2384   :  { %10238 = vmatpush3.bf16.msk.msra.mxu1 %vm13186_vm12, %v11120_v44  ;;  %vm8094_vm12 = vcmp.lt.s32.totalorder %v8062_v47, 16 }
0x2385   :  { %10240 = vmatprep.subr.msk.bf16.mxu1 %vm13193_vm14, %v11120_v44 }
0x2452   :  { %v9927_v58 = vpop.f32.mrb[140].mxu0  ;;  %v9938_v0 = vpop.f32.mrb[86].mxu1 }
0x2453   :  { %v7595_v26 = vpop.f32.mrb[141].mxu0  ;;  %v7670_v55 = vpop.f32.mrb[87].mxu1 }
0x2454   :  { %v10219_v37 = vpack.c.bf16 %v9927_v58, %v7595_v26  ;;  %v10227_v29 = vpack.c.bf16 %v9938_v0, %v7670_v55 }
0x2456   :  { %10220 = vmatprep.subr.bf16.mxu0 %v10219_v37 }
0x2457   :  { %10222 = vmatpush3.bf16.msra.mxu0 %v10219_v37 }
0x2458   :  { %10224 = vmatprep.subr.bf16.mxu0 %v10223_v27 }
0x245b   :  { %10226 = vmatpush3.bf16.msra.mxu0 %v10223_v27 }
0x245c   :  { %10228 = vmatprep.subr.bf16.mxu0 %v10227_v29 }
0x245f   :  { %10230 = vmatpush3.bf16.msra.mxu0 %v10227_v29 }
0x2462   :  { %9952 = vmatmul.mubr.msk.f32.vlgmr.msra.gmra.mrb[142].mxu0 %vm7691_vm4, %v7690_v28 }
0x2463   :  { %9988 = vmatprep.mubr.msk.f32.mxu0 %vm7691_vm4, %v7952_v13  ;;  %v13421_v13 = vld [vmem:[#allocation14_spill] sm:$0xff] }
0x2535   :  { %v9953_v14 = vpop.f32.mrb[142].mxu0 }
0x2536   :  { %v7762_v62 = vpop.f32.mrb[143].mxu0  ;;  %v7768_v25 = vadd.f32 %v9953_v14, %v7685_v6 }
0x2537   :  { %v7763_v23 = vadd.f32 %v7762_v62, %v7681_v8 }
0x2538   :  { %v7774_v49 = vmin.f32 %v7768_v25, 0.0  ;;  %v7772_v35 = vmax.f32 %v7768_v25, 0.0 }
0x2539   :  { %v7773_v42 = vmin.f32 %v7763_v23, 0.0  ;;  %v7771_v15 = vmax.f32 %v7763_v23, 0.0  ;;  %v13416_v23 = vld [vmem:[#allocation9_spill] sm:$0xff] }
0x253a   :  { %v7784_v21 = vmul.f32 %v7781_v3, %v7774_v49 }
0x253b   :  { %v7783_v40 = vmul.f32 %v7777_v5, %v7773_v42 }
0x253c   :  { %v7786_v63 = vadd.f32 %v7784_v21, %v7772_v35  ;;  %v13418_v21 = vld [vmem:[#allocation7_spill] sm:$0xff] }
0x253d   :  { %v7785_v33 = vadd.f32 %v7783_v40, %v7771_v15  ;;  %v13419_v40 = vld [vmem:[#allocation8_spill] sm:$0xff] }
0x253f   :  { %9962 = vmatprep.mubr.msk.f32.mxu1 %vm13371_vm3, %v7785_v33  ;;  %v10251_v11 = vpack.c.bf16 %v7786_v63, %v7785_v33 }
0x2540   :  { %9963 = vmatmul.mubr.msk.f32.vlgmr.msra.gmra.mrb[88].mxu1 %vm13371_vm3, %v7786_v63 }
0x2541   :  { %10242 = vmatpush3.bf16.msk.msra.mxu1 %vm13193_vm14, %v11120_v44  ;;  %9973 = vmatprep.mubr.msk.f32.mxu1 %vm13371_vm3, %v7785_v33  ;;  %vm10259_vm14 = vmpackc.low %vm8108_vm0, %vm8104_vm8  ;;  %vm8089_vm0 = vcmp.lt.s32.totalorder %v8057_v61, 16  ;;  %v13420_v33 = vld [vmem:[#allocation13_spill] sm:$0xff] }
0x2542   :  { %10244 = vmatprep.subr.msk.bf16.mxu1 %vm13206_vm2, %v11120_v44  ;;  %vm8107_vm8 = vmand %vm8075_vm5, %vm8091_vm6  ;;  %vm8082_vm6 = vcmp.ge.s32.totalorder %v8066_v46, 0 }
0x2545   :  { %10246 = vmatpush3.bf16.msk.msra.mxu1 %vm13206_vm2, %v11120_v44  ;;  %vm8087_vm2 = vcmp.lt.s32.totalorder %v8055_v32, 16 }
0x2546   :  { %10260 = vmatprep.subr.msk.bf16.mxu1 %vm10259_vm14, %v11120_v44  ;;  %vm8103_vm7 = vmand %vm8071_vm1, %vm8087_vm2  ;;  %vm8077_vm14 = vcmp.ge.s32.totalorder %v8061_v53, 0  ;;  %vm8100_vm1 = vcmp.lt.s32.totalorder %v8068_v9, 16 }
0x2547   :  { %vm10261_vm13 = vmpackc.low %vm8107_vm8, %vm8103_vm7  ;;  %vm8098_vm7 = vcmp.lt.s32.totalorder %v8066_v46, 16 }
0x2548   :  { %9974 = vmatmul.mubr.msk.f32.vlgmr.msra.gmra.mrb[90].mxu1 %vm13371_vm3, %v7786_v63 }
0x2549   :  { %8205 = vmatprep.mubr.f32.mxu1 %v13398_v4  ;;  %10262 = vmatpush1.bf16.msk.msra.mxu1 %vm10261_vm13, %v11120_v44  ;;  %vm8086_vm13 = vcmp.ge.s32.totalorder %v8070_v22, 0 }
0x2613   :  { %v9964_v24 = vpop.f32.mrb[88].mxu1 }
0x2614   :  { %v7859_v59 = vpop.f32.mrb[89].mxu1 }
0x2615   :  { %v10247_v38 = vpack.c.bf16 %v9964_v24, %v7859_v59 }
0x2617   :  { %10248 = vmatprep.subr.bf16.mxu0 %v10247_v38 }
0x2618   :  { %10250 = vmatpush3.bf16.msra.mxu0 %v10247_v38  ;;  %v13422_v38 = vld [vmem:[#allocation11_spill] sm:$0xff] }
0x2619   :  { %10252 = vmatprep.subr.bf16.mxu0 %v10251_v11 }
0x261b   :  { %v9975_v19 = vpop.f32.mrb[90].mxu1 }
0x261c   :  { %v7934_v39 = vpop.f32.mrb[91].mxu1  ;;  %10254 = vmatpush3.bf16.msra.mxu0 %v10251_v11 }
0x261d   :  { %v10255_v16 = vpack.c.bf16 %v9975_v19, %v7934_v39  ;;  %v13423_v39 = vld [vmem:[#allocation12_spill] sm:$0xff] }
0x261f   :  { %10256 = vmatprep.subr.bf16.mxu0 %v10255_v16 }
0x2620   :  { %10258 = vmatpush3.bf16.msra.mxu0 %v10255_v16 }
0x2623   :  { %9989 = vmatmul.mubr.msk.f32.vlgmr.msra.gmra.mrb[144].mxu0 %vm7691_vm4, %v7954_v60  ;;  %vm8110_vm4 = vmand %vm8078_vm11, %vm8094_vm12  ;;  %vm8080_vm12 = vcmp.ge.s32.totalorder %v8064_v17, 0 }
0x2624   :  { %8282 = vmatprep.mubr.f32.mxu0 %v13398_v4  ;;  %vm10267_vm3 = vmpackc.low %vm8110_vm4, %vm8106_vm15  ;;  %vm8096_vm4 = vcmp.lt.s32.totalorder %v8064_v17, 16 }
0x2625   :  { %10268 = vmatprep.subr.msk.bf16.mxu0 %vm10267_vm3, %v11120_v44  ;;  %vm8105_vm11 = vmand %vm8073_vm9, %vm8089_vm0  ;;  %vm8084_vm3 = vcmp.ge.s32.totalorder %v8068_v9, 0  ;;  %vm8102_vm0 = vcmp.lt.s32.totalorder %v8070_v22, 16 }
0x2626   :  { %vm8109_vm15 = vmand %vm8077_vm14, %vm8093_vm10  ;;  %vm8079_vm10 = vcmp.ge.s32.totalorder %v8063_v57, 0 }
0x2627   :  { %vm10269_vm2 = vmpackc.low %vm8109_vm15, %vm8105_vm11  ;;  %vm8095_vm11 = vcmp.lt.s32.totalorder %v8063_v57, 16 }
0x2628   :  { %10270 = vmatpush1.bf16.msk.msra.mxu0 %vm10269_vm2, %v11120_v44  ;;  %vm8112_vm5 = vmand %vm8080_vm12, %vm8096_vm4  ;;  %vm8083_vm2 = vcmp.ge.s32.totalorder %v8067_v48, 0  ;;  %vm8099_vm4 = vcmp.lt.s32.totalorder %v8067_v48, 16 }
0x2629   :  { %vm8116_vm8 = vmand %vm8084_vm3, %vm8100_vm1  ;;  %vm8081_vm3 = vcmp.ge.s32.totalorder %v8065_v50, 0 }
0x262a   :  { %vm10263_vm9 = vmpackc.low %vm8116_vm8, %vm8112_vm5  ;;  %vm8097_vm5 = vcmp.lt.s32.totalorder %v8065_v50, 16 }
0x262b   :  { %10264 = vmatprep.subr.msk.bf16.mxu1 %vm10263_vm9, %v11120_v44  ;;  %vm8114_vm14 = vmand %vm8082_vm6, %vm8098_vm7  ;;  %vm8085_vm9 = vcmp.ge.s32.totalorder %v8069_v34, 0  ;;  %vm8101_vm6 = vcmp.lt.s32.totalorder %v8069_v34, 16 }
0x262c   :  { %vm8118_vm15 = vmand %vm8086_vm13, %vm8102_vm0 }
0x262d   :  { %vm10271_vm12 = vmpackc.low %vm8118_vm15, %vm8114_vm14 }
0x262e   :  { %10272 = vmatprep.subr.msk.bf16.mxu0 %vm10271_vm12, %v11120_v44  ;;  %vm8111_vm1 = vmand %vm8079_vm10, %vm8095_vm11  ;;  %vm13412_vm10 = vcmask 261120  }
0x262f   :  { %vm8115_vm8 = vmand %vm8083_vm2, %vm8099_vm4 }
0x2630   :  { %vm10265_vm7 = vmpackc.low %vm8115_vm8, %vm8111_vm1 }
0x2631   :  { %10266 = vmatpush1.bf16.msk.msra.mxu1 %vm10265_vm7, %v11120_v44  ;;  %vm8113_vm0 = vmand %vm8081_vm3, %vm8097_vm5 }
0x2632   :  { %vm8117_vm13 = vmand %vm8085_vm9, %vm8101_vm6 }
0x2633   :  { %vm10273_vm14 = vmpackc.low %vm8117_vm13, %vm8113_vm0 }
0x2634   :  { %10274 = vmatpush1.bf16.msk.msra.mxu0 %vm10273_vm14, %v11120_v44  ;;  %vm13413_vm11 = vmmov %vm13412_vm10 }
0x2635   :  { %vm13414_vm15 = vmmov %vm13412_vm10 }
0x2636   :  { %vm13415_vm2 = vmmov %vm13412_vm10 }
0x26f6   :  { %v9990_v41 = vpop.f32.mrb[144].mxu0 }
0x26f7   :  { %v8031_v58 = vadd.f32 %v9990_v41, %v7949_v43  ;;  %v8025_v0 = vpop.f32.mrb[145].mxu0 }
0x26f8   :  { %v8026_v26 = vadd.f32 %v8025_v0, %v7945_v30 }
0x26f9   :  { %v8856_v55 = vmul.f32 -1.442695, %v8031_v58 }
0x26fa   :  { %v8855_v37 = vmul.f32 -1.442695, %v8026_v26 }
0x26fb   :  { %11069 = vpow2.f32 %v8856_v55 }
0x26fc   :  { %11071 = vpow2.f32 %v8855_v37 }
0x2705   :  { %v11070_v29 = vpop.eup %11069 }
0x2706   :  { %v11072_v27 = vpop.eup %11071  ;;  %v8041_v28 = vadd.f32 1.0, %v11070_v29 }
0x2707   :  { %v8040_v8 = vadd.f32 1.0, %v11072_v27 }
0x2709   :  { %11073 = vrcp.f32 %v8040_v8 }
0x270a   :  { %11075 = vrcp.f32 %v8041_v28 }
0x2713   :  { %v11074_v5 = vpop.eup %11073 }
0x2714   :  { %v8046_v6 = vmul.f32 %v11074_v5, %v13224_v2  ;;  %v11076_v44 = vpop.eup %11075  ;;  %v13417_v2 = vld [vmem:[#allocation10_spill] sm:$0xff] }
0x2715   :  { %v8047_v14 = vmul.f32 %v11076_v44, %v13226_v45 }
0x2716   :  { %8865 = vmatmul.mubr.msk.f32.vlgmr.msra.gmra.mrb[92].mxu1 %vm13412_vm10, %v8046_v6  ;;  %8875 = vmatmul.mubr.msk.f32.vlgmr.msra.gmra.mrb[146].mxu0 %vm13413_vm11, %v8046_v6 }
0x2717   :  { %8211 = vmatprep.mubr.f32.mxu1 %v13398_v4  ;;  %8288 = vmatprep.mubr.f32.mxu0 %v13398_v4 }
0x271a   :  { %8866 = vmatmul.mubr.msk.f32.gmra.mrb[94].mxu1 %vm13414_vm15, %v8047_v14  ;;  %8876 = vmatmul.mubr.msk.f32.gmra.mrb[148].mxu0 %vm13415_vm2, %v8047_v14 }
0x27e9   :  { %v8207_v62 = vpop.f32.mrb[92].mxu1  ;;  %v8284_v25 = vpop.f32.mrb[146].mxu0 }
0x27ea   :  { %v8295_v49 = vmul.f32 %v8207_v62, %v13416_v23  ;;  %v8297_v42 = vmul.f32 %v8284_v25, %v13417_v2  ;;  %v8209_v3 = vpop.f32.mrb[93].mxu1  ;;  %v8286_v35 = vpop.f32.mrb[147].mxu0 }
0x27eb   :  { %v8296_v15 = vmul.f32 %v8209_v3, %v13418_v21  ;;  %v8298_v63 = vmul.f32 %v8286_v35, %v13419_v40 }
0x27ec   :  { %8303 = vst [vmem:[%s13341_s5] sm:$0xff] %v8295_v49  ;;  %8305 = vst [vmem:[%s13341_s5 + $0x10] sm:$0xff] %v8297_v42 }
0x27ed   :  { %8304 = vst [vmem:[%s13341_s5 + $0x8] sm:$0xff] %v8296_v15  ;;  %8306 = vst [vmem:[%s13341_s5 + $0x18] sm:$0xff] %v8298_v63  ;;  %v8213_v4 = vpop.f32.mrb[94].mxu1  ;;  %v8290_v45 = vpop.f32.mrb[148].mxu0 }
0x27ee   :  { %v8299_v11 = vmul.f32 %v8213_v4, %v13420_v33  ;;  %v8301_v20 = vmul.f32 %v8290_v45, %v13421_v13  ;;  %v8215_v24 = vpop.f32.mrb[95].mxu1  ;;  %v8292_v59 = vpop.f32.mrb[149].mxu0 }
0x27ef   :  { %v8300_v19 = vmul.f32 %v8215_v24, %v13422_v38  ;;  %v8302_v16 = vmul.f32 %v8292_v59, %v13423_v39 }
0x27f0   :  { %8307 = vst [vmem:[%s13341_s5 + $0x20] sm:$0xff] %v8299_v11  ;;  %8309 = vst [vmem:[%s13341_s5 + $0x30] sm:$0xff] %v8301_v20 }
0x27f1   :  { %8308 = vst [vmem:[%s13341_s5 + $0x28] sm:$0xff] %v8300_v19  ;;  %8310 = vst [vmem:[%s13341_s5 + $0x38] sm:$0xff] %v8302_v16 }

</bundles_post_ra>
